<compile_context>
chip_gen: v7x
topology: tpu7x:2x2x1
jax: 0.10.0
libtpu: 0.0.40
codegen_flags: <defaults>
</compile_context>

<pallas_src>
import jax
import jax.numpy as jnp
from jax.experimental import pallas as pl
from jax.experimental.pallas import tpu as pltpu


def _make_sfsc_kernel(nf, d, field_index, num_linear):
    """Build the SFSC kernel for static (num_fields+1, emb dim, field_index, #layers)."""

    def kernel(*refs):
        x_ref, yt_ref = refs[0], refs[1]
        s_ref, r_ref, g_ref, mask_ref, a_ref, ia_ref = refs[2:8]
        w_refs = refs[8:-1]
        out_ref = refs[-1]

        x2 = x_ref[...]                                        # (TB, NF*D) f32, lane-dense
        y_emb = x2[:, (nf - 1) * d:nf * d]                     # (TB, D)   x[:, -1, :]
        t_emb = x2[:, field_index * d:(field_index + 1) * d]   # (TB, D)

        # ---- masked attention over the NF fields -------------------------------
        # Per-field dot products done on the MXU with a constant block-diagonal
        # selection matrix S; fields {field_index, nf-1} get -1e30 so their exp
        # underflows to exactly 0 (equivalent to excluding them, as in PyTorch).
        t_tiled = jnp.concatenate([t_emb] * nf, axis=1)        # (TB, NF*D)
        scores = jnp.dot(x2 * t_tiled, s_ref[...],
                         preferred_element_type=jnp.float32)   # (TB, NF)
        scores = scores * (1.0 / (float(d) ** 0.5)) + mask_ref[...]
        scores = scores - jnp.max(scores, axis=1, keepdims=True)
        e = jnp.exp(scores)
        attn = e / jnp.sum(e, axis=1, keepdims=True)           # (TB, NF); masked -> 0.0
        attn_x = jnp.dot(attn, r_ref[...],
                         preferred_element_type=jnp.float32)   # (TB, NF*D) expand on MXU
        x_att = jnp.dot(attn_x * x2, g_ref[...],
                        preferred_element_type=jnp.float32)    # (TB, D) group-sum on MXU

        # ---- MLP (single fused first-layer dot over the 3D concat) -------------
        h = jnp.concatenate([y_emb, t_emb, x_att], axis=1)     # (TB, 3D) (one lane tile)
        for li in range(num_linear):
            w = w_refs[2 * li][...]
            b = w_refs[2 * li + 1][...]
            h = jnp.dot(h, w, preferred_element_type=jnp.float32) + b
            if li != num_linear - 1:
                h = jnp.maximum(h, 0.0)                        # ReLU

        # ---- shape-weight softmax + ensemble tail, lane=batch layout -----------
        ht = jnp.transpose(h)                                  # (48, TB), one XLU transpose
        ht = ht - jnp.max(ht, axis=0, keepdims=True)
        eh = jnp.exp(ht)
        sw = eh / jnp.sum(eh, axis=0, keepdims=True)           # (48, TB)

        yt = yt_ref[...]                                       # (1, TB)
        a = a_ref[...]                                         # (16, 1) constant
        inv_log1p_a = ia_ref[...]                              # (16, 1) constant

        sig_y = jax.nn.sigmoid(yt)                             # (1, TB)
        log_sig_y = jax.nn.log_sigmoid(yt)                     # (1, TB)

        # Sequential multiply-accumulate: only one (16, TB) family live at a time.
        acc = jnp.exp(a * log_sig_y) * sw[0:16, :]             # sigmoid(y) ** a
        acc = acc + jax.nn.sigmoid(a * yt) * sw[16:32, :]      # sigmoid(a * y)
        acc = acc + (jnp.log1p(sig_y * a) * inv_log1p_a) * sw[32:48, :]

        out_ref[...] = jnp.sum(acc, axis=0, keepdims=True).astype(jnp.float32)

    return kernel


def _pick_tile(b, tb):
    """Lane-aligned batch tile: big tiles, <=1 padded tile, >=4 tiles for v7x."""
    tb = max(128, (tb // 128) * 128)
    tb = min(tb, pl.cdiv(b, 128) * 128)        # never pad beyond one tile
    quarter = (b // (4 * 128)) * 128           # tile that yields ~4 tiles
    if quarter >= 512:                         # only shrink if tiles stay >= 512 rows
        tb = min(tb, quarter)
    return tb


def sfsc_forward(x, y, weights, biases, field_index, tb=1024):
    """Pallas wrapper.

    x: (B, NF, D) f32 (last field is the label embedding), y: (B, 1) raw logits,
    weights[i]: (h_i, h_{i+1}), biases[i]: (h_{i+1},).
    """
    B, nf, D = x.shape
    nfd = nf * D
    num_linear = len(weights)
    if not (0 <= field_index < nf - 1):
        raise ValueError("field_index must address a feature field, not the label embedding")
    if weights[0].shape[0] != 3 * D:
        raise ValueError("first linear layer must take the 3*D concatenated embedding")
    if weights[-1].shape[1] != 48:
        raise ValueError("last linear layer must output 48 = 3 * 16 ensemble weights")

    tb = _pick_tile(B, tb)
    num_tiles = pl.cdiv(B, tb)
    b_pad = num_tiles * tb

    # Lane-dense 2D repack of x; y pre-transposed to (1, B) lane=batch.
    x2 = x.reshape(B, nfd).astype(jnp.float32)
    yT = y.astype(jnp.float32).reshape(1, B)
    if b_pad != B:
        x2 = jnp.pad(x2, ((0, b_pad - B), (0, 0)))
        yT = jnp.pad(yT, ((0, 0), (0, b_pad - B)))

    # Constant selection matrices for the per-field MXU reductions.
    col_field = jnp.arange(nfd, dtype=jnp.int32) // D          # field id per column
    col_dim = jnp.arange(nfd, dtype=jnp.int32) % D             # emb dim per column
    S = (col_field[:, None] == jnp.arange(nf)[None, :]).astype(jnp.float32)   # (NFD, NF)
    R = jnp.transpose(S)                                                        # (NF, NFD)
    G = (col_dim[:, None] == jnp.arange(D)[None, :]).astype(jnp.float32)       # (NFD, D)

    fidx = jnp.arange(nf, dtype=jnp.int32)
    mask_row = jnp.where((fidx == field_index) | (fidx == nf - 1),
                         jnp.float32(-1e30), jnp.float32(0.0)).reshape(1, nf)

    a_col = (jnp.arange(5, 21, dtype=jnp.float32) / 10.0).reshape(16, 1)        # (16, 1)
    ia_col = (1.0 / jnp.log1p(a_col)).astype(jnp.float32)                       # (16, 1)

    args = [x2, yT, S, R, G, mask_row, a_col, ia_col]
    for w, b in zip(weights, biases):
        args.append(w.astype(jnp.float32))
        args.append(b.reshape(1, -1).astype(jnp.float32))

    # x / y tiles stream through VMEM (double-buffered); everything else uses a
    # constant index_map so it is DMA'd once and stays resident across the grid.
    in_specs = [
        pl.BlockSpec((tb, nfd), lambda i: (i, 0)),
        pl.BlockSpec((1, tb), lambda i: (0, i)),
    ]
    in_specs += [pl.BlockSpec(a.shape, lambda i: (0, 0)) for a in args[2:]]

    out = pl.pallas_call(
        _make_sfsc_kernel(nf, D, field_index, num_linear),
        out_shape=jax.ShapeDtypeStruct((1, b_pad), jnp.float32),
        grid=(num_tiles,),
        in_specs=in_specs,
        out_specs=pl.BlockSpec((1, tb), lambda i: (0, i)),
        compiler_params=pltpu.CompilerParams(
            dimension_semantics=("parallel",),      # batch tiles shard across v7x's 2 TCs
            vmem_limit_bytes=32 * 1024 * 1024,      # per-tile footprint is a few MiB at most
        ),
    )(*args)

    return out.reshape(b_pad, 1)[:B]


def sfsc_reference(x, y, weights, biases, field_index):
    """Pure-JAX reference mirroring the PyTorch forward."""
    nf = x.shape[1]
    D = x.shape[2]
    y_emb = x[:, -1, :]
    t_emb = x[:, field_index, :]
    other = [i for i in range(nf - 1) if i != field_index]
    x_emb = jnp.stack([x[:, i, :] for i in other], axis=1)
    scores = jnp.sum(x_emb * t_emb[:, None, :], axis=-1, keepdims=True) / (D ** 0.5)
    attn = jax.nn.softmax(scores, axis=1)
    x_att = jnp.sum(attn * x_emb, axis=1)
    h = jnp.concatenate([y_emb, t_emb, x_att], axis=1)
    for i, (w, b) in enumerate(zip(weights, biases)):
        h = h @ w + b
        if i != len(weights) - 1:
            h = jax.nn.relu(h)
    sw = jax.nn.softmax(h, axis=1)
    a = jnp.arange(5, 21, dtype=jnp.float32) / 10.0
    sig = jax.nn.sigmoid(y)
    ens = jnp.concatenate(
        [jnp.power(sig, a), jax.nn.sigmoid(y * a), jnp.log1p(sig * a) / jnp.log1p(a)],
        axis=1,
    )
    return jnp.sum(ens * sw, axis=1, keepdims=True).astype(jnp.float32)


if __name__ == "__main__":
    key = jax.random.PRNGKey(0)
    B, NF, D = 500, 5, 32            # 4 feature fields + 1 label-embedding field
    field_index = 1
    hidden_layers = [3 * D, 64, 48]  # last layer must be 48 = 3 * 16 ensemble fns

    num_linear = len(hidden_layers) - 1
    keys = jax.random.split(key, 2 + 2 * num_linear)
    kx, ky, wkeys = keys[0], keys[1], keys[2:]

    x = jax.random.normal(kx, (B, NF, D), dtype=jnp.float32)
    y = jax.random.normal(ky, (B, 1), dtype=jnp.float32)

    weights, biases = [], []
    for li, (h0, h1) in enumerate(zip(hidden_layers[:-1], hidden_layers[1:])):
        bound = 1.0 / (h0 ** 0.5)    # PyTorch nn.Linear default init range
        weights.append(
            jax.random.uniform(wkeys[2 * li], (h0, h1), jnp.float32, -bound, bound)
        )
        biases.append(
            jax.random.uniform(wkeys[2 * li + 1], (h1,), jnp.float32, -bound, bound)
        )

    out = sfsc_forward(x, y, weights, biases, field_index, tb=1024)
    jax.block_until_ready(out)

    ref = sfsc_reference(x, y, weights, biases, field_index)
    assert out.shape == (B, 1) and out.dtype == jnp.float32
    assert bool(jnp.allclose(out, ref, atol=5e-5, rtol=5e-5)), "mismatch vs reference"
    print("KERNEL_OK")
</pallas_src>

<mosaic_0001>
module attributes {stable_mosaic.version = 11 : i64} {
  func.func @kernel(%arg0: i32, %arg1: memref<512x160xf32, #tpu.memory_space<vmem>>, %arg2: memref<1x512xf32, #tpu.memory_space<vmem>>, %arg3: memref<160x5xf32, #tpu.memory_space<vmem>>, %arg4: memref<5x160xf32, #tpu.memory_space<vmem>>, %arg5: memref<160x32xf32, #tpu.memory_space<vmem>>, %arg6: memref<1x5xf32, #tpu.memory_space<vmem>>, %arg7: memref<16x1xf32, #tpu.memory_space<vmem>>, %arg8: memref<16x1xf32, #tpu.memory_space<vmem>>, %arg9: memref<96x64xf32, #tpu.memory_space<vmem>>, %arg10: memref<1x64xf32, #tpu.memory_space<vmem>>, %arg11: memref<64x48xf32, #tpu.memory_space<vmem>>, %arg12: memref<1x48xf32, #tpu.memory_space<vmem>>, %arg13: memref<1x512xf32, #tpu.memory_space<vmem>>) attributes {dimension_semantics = [#tpu.dimension_semantics<parallel>], iteration_bounds = array<i64: 1>, scalar_prefetch = 0 : i64, scratch_operands = 0 : i64, tpu.core_type = #tpu.core_type<tc>, window_params = [{transform_indices = @transform_0, window_bounds = array<i64: 512, 160>}, {transform_indices = @transform_1, window_bounds = array<i64: 1, 512>}, {pipeline_mode = #tpu.pipeline_mode<synchronous>, transform_indices = @transform_2, window_bounds = array<i64: 160, 5>}, {pipeline_mode = #tpu.pipeline_mode<synchronous>, transform_indices = @transform_3, window_bounds = array<i64: 5, 160>}, {pipeline_mode = #tpu.pipeline_mode<synchronous>, transform_indices = @transform_4, window_bounds = array<i64: 160, 32>}, {pipeline_mode = #tpu.pipeline_mode<synchronous>, transform_indices = @transform_5, window_bounds = array<i64: 1, 5>}, {pipeline_mode = #tpu.pipeline_mode<synchronous>, transform_indices = @transform_6, window_bounds = array<i64: 16, 1>}, {pipeline_mode = #tpu.pipeline_mode<synchronous>, transform_indices = @transform_7, window_bounds = array<i64: 16, 1>}, {pipeline_mode = #tpu.pipeline_mode<synchronous>, transform_indices = @transform_8, window_bounds = array<i64: 96, 64>}, {pipeline_mode = #tpu.pipeline_mode<synchronous>, transform_indices = @transform_9, window_bounds = array<i64: 1, 64>}, {pipeline_mode = #tpu.pipeline_mode<synchronous>, transform_indices = @transform_10, window_bounds = array<i64: 64, 48>}, {pipeline_mode = #tpu.pipeline_mode<synchronous>, transform_indices = @transform_11, window_bounds = array<i64: 1, 48>}, {transform_indices = @transform_12, window_bounds = array<i64: 1, 512>}]} {
    %c0 = arith.constant 0 : index
    %c0_0 = arith.constant 0 : index
    %0 = vector.load %arg1[%c0, %c0_0] : memref<512x160xf32, #tpu.memory_space<vmem>>, vector<512x160xf32>
    %1 = vector.extract_strided_slice %0 {offsets = [0, 128], sizes = [512, 32], strides = [1, 1]} : vector<512x160xf32> to vector<512x32xf32>
    %2 = vector.extract_strided_slice %0 {offsets = [0, 32], sizes = [512, 32], strides = [1, 1]} : vector<512x160xf32> to vector<512x32xf32>
    %3 = tpu.concatenate %2, %2, %2, %2, %2 in 1 : vector<512x32xf32>, vector<512x32xf32>, vector<512x32xf32>, vector<512x32xf32>, vector<512x32xf32> -> vector<512x160xf32>
    %4 = arith.mulf %0, %3 : vector<512x160xf32>
    %c0_1 = arith.constant 0 : index
    %c0_2 = arith.constant 0 : index
    %5 = vector.load %arg3[%c0_1, %c0_2] : memref<160x5xf32, #tpu.memory_space<vmem>>, vector<160x5xf32>
    %cst = arith.constant dense<0.000000e+00> : vector<512x5xf32>
    %6 = tpu.matmul %4, %5, %cst {dimension_numbers = #tpu.dot_dimension_numbers<[1], [0], [0], [1], [0, 0, 1, 1], [], []>} : vector<512x160xf32>, vector<160x5xf32>, vector<512x5xf32> -> vector<512x5xf32>
    %cst_3 = arith.constant 0.176776692 : f32
    %7 = vector.broadcast %cst_3 : f32 to vector<512x5xf32>
    %8 = arith.mulf %6, %7 : vector<512x5xf32>
    %c0_4 = arith.constant 0 : index
    %c0_5 = arith.constant 0 : index
    %9 = vector.load %arg6[%c0_4, %c0_5] : memref<1x5xf32, #tpu.memory_space<vmem>>, vector<1x5xf32>
    %10 = vector.broadcast %9 : vector<1x5xf32> to vector<512x5xf32>
    %11 = arith.addf %8, %10 : vector<512x5xf32>
    %cst_6 = arith.constant dense<0xFF800000> : vector<512xf32>
    %12 = vector.multi_reduction <maximumf>, %11, %cst_6 [1] : vector<512x5xf32> to vector<512xf32>
    %13 = vector.shape_cast %12 : vector<512xf32> to vector<512x1xf32>
    %14 = vector.broadcast %13 : vector<512x1xf32> to vector<512x5xf32>
    %15 = arith.subf %11, %14 : vector<512x5xf32>
    %16 = math.exp %15 : vector<512x5xf32>
    %cst_7 = arith.constant dense<0.000000e+00> : vector<512xf32>
    %17 = vector.multi_reduction <add>, %16, %cst_7 [1] : vector<512x5xf32> to vector<512xf32>
    %18 = vector.shape_cast %17 : vector<512xf32> to vector<512x1xf32>
    %19 = vector.broadcast %18 : vector<512x1xf32> to vector<512x5xf32>
    %20 = arith.divf %16, %19 : vector<512x5xf32>
    %c0_8 = arith.constant 0 : index
    %c0_9 = arith.constant 0 : index
    %21 = vector.load %arg4[%c0_8, %c0_9] : memref<5x160xf32, #tpu.memory_space<vmem>>, vector<5x160xf32>
    %cst_10 = arith.constant dense<0.000000e+00> : vector<512x160xf32>
    %22 = tpu.matmul %20, %21, %cst_10 {dimension_numbers = #tpu.dot_dimension_numbers<[1], [0], [0], [1], [0, 0, 1, 1], [], []>} : vector<512x5xf32>, vector<5x160xf32>, vector<512x160xf32> -> vector<512x160xf32>
    %23 = arith.mulf %22, %0 : vector<512x160xf32>
    %c0_11 = arith.constant 0 : index
    %c0_12 = arith.constant 0 : index
    %24 = vector.load %arg5[%c0_11, %c0_12] : memref<160x32xf32, #tpu.memory_space<vmem>>, vector<160x32xf32>
    %cst_13 = arith.constant dense<0.000000e+00> : vector<512x32xf32>
    %25 = tpu.matmul %23, %24, %cst_13 {dimension_numbers = #tpu.dot_dimension_numbers<[1], [0], [0], [1], [0, 0, 1, 1], [], []>} : vector<512x160xf32>, vector<160x32xf32>, vector<512x32xf32> -> vector<512x32xf32>
    %26 = tpu.concatenate %1, %2, %25 in 1 : vector<512x32xf32>, vector<512x32xf32>, vector<512x32xf32> -> vector<512x96xf32>
    %c0_14 = arith.constant 0 : index
    %c0_15 = arith.constant 0 : index
    %27 = vector.load %arg9[%c0_14, %c0_15] : memref<96x64xf32, #tpu.memory_space<vmem>>, vector<96x64xf32>
    %c0_16 = arith.constant 0 : index
    %c0_17 = arith.constant 0 : index
    %28 = vector.load %arg10[%c0_16, %c0_17] : memref<1x64xf32, #tpu.memory_space<vmem>>, vector<1x64xf32>
    %cst_18 = arith.constant dense<0.000000e+00> : vector<512x64xf32>
    %29 = tpu.matmul %26, %27, %cst_18 {dimension_numbers = #tpu.dot_dimension_numbers<[1], [0], [0], [1], [0, 0, 1, 1], [], []>} : vector<512x96xf32>, vector<96x64xf32>, vector<512x64xf32> -> vector<512x64xf32>
    %30 = vector.broadcast %28 : vector<1x64xf32> to vector<512x64xf32>
    %31 = arith.addf %29, %30 : vector<512x64xf32>
    %cst_19 = arith.constant 0.000000e+00 : f32
    %32 = vector.broadcast %cst_19 : f32 to vector<512x64xf32>
    %33 = arith.maximumf %31, %32 : vector<512x64xf32>
    %c0_20 = arith.constant 0 : index
    %c0_21 = arith.constant 0 : index
    %34 = vector.load %arg11[%c0_20, %c0_21] : memref<64x48xf32, #tpu.memory_space<vmem>>, vector<64x48xf32>
    %c0_22 = arith.constant 0 : index
    %c0_23 = arith.constant 0 : index
    %35 = vector.load %arg12[%c0_22, %c0_23] : memref<1x48xf32, #tpu.memory_space<vmem>>, vector<1x48xf32>
    %cst_24 = arith.constant dense<0.000000e+00> : vector<512x48xf32>
    %36 = tpu.matmul %33, %34, %cst_24 {dimension_numbers = #tpu.dot_dimension_numbers<[1], [0], [0], [1], [0, 0, 1, 1], [], []>} : vector<512x64xf32>, vector<64x48xf32>, vector<512x48xf32> -> vector<512x48xf32>
    %37 = vector.broadcast %35 : vector<1x48xf32> to vector<512x48xf32>
    %38 = arith.addf %36, %37 : vector<512x48xf32>
    %39 = tpu.transpose %38, [1, 0] : vector<512x48xf32> -> vector<48x512xf32>
    %cst_25 = arith.constant dense<0xFF800000> : vector<512xf32>
    %40 = vector.multi_reduction <maximumf>, %39, %cst_25 [0] : vector<48x512xf32> to vector<512xf32>
    %41 = vector.shape_cast %40 : vector<512xf32> to vector<1x512xf32>
    %42 = vector.broadcast %41 : vector<1x512xf32> to vector<48x512xf32>
    %43 = arith.subf %39, %42 : vector<48x512xf32>
    %44 = math.exp %43 : vector<48x512xf32>
    %cst_26 = arith.constant dense<0.000000e+00> : vector<512xf32>
    %45 = vector.multi_reduction <add>, %44, %cst_26 [0] : vector<48x512xf32> to vector<512xf32>
    %46 = vector.shape_cast %45 : vector<512xf32> to vector<1x512xf32>
    %47 = vector.broadcast %46 : vector<1x512xf32> to vector<48x512xf32>
    %48 = arith.divf %44, %47 : vector<48x512xf32>
    %c0_27 = arith.constant 0 : index
    %c0_28 = arith.constant 0 : index
    %49 = vector.load %arg2[%c0_27, %c0_28] : memref<1x512xf32, #tpu.memory_space<vmem>>, vector<1x512xf32>
    %c0_29 = arith.constant 0 : index
    %c0_30 = arith.constant 0 : index
    %50 = vector.load %arg7[%c0_29, %c0_30] : memref<16x1xf32, #tpu.memory_space<vmem>>, vector<16x1xf32>
    %c0_31 = arith.constant 0 : index
    %c0_32 = arith.constant 0 : index
    %51 = vector.load %arg8[%c0_31, %c0_32] : memref<16x1xf32, #tpu.memory_space<vmem>>, vector<16x1xf32>
    %52 = arith.negf %49 : vector<1x512xf32>
    %53 = math.exp %52 : vector<1x512xf32>
    %cst_33 = arith.constant 1.000000e+00 : f32
    %54 = vector.broadcast %cst_33 : f32 to vector<1x512xf32>
    %55 = arith.addf %54, %53 : vector<1x512xf32>
    %56 = arith.divf %54, %55 : vector<1x512xf32>
    %cst_34 = arith.constant 0.000000e+00 : f32
    %57 = vector.broadcast %cst_34 : f32 to vector<1x512xf32>
    %58 = arith.subf %57, %49 : vector<1x512xf32>
    %cst_35 = arith.constant 0.000000e+00 : f32
    %59 = vector.broadcast %cst_35 : f32 to vector<1x512xf32>
    %60 = arith.maximumf %58, %59 : vector<1x512xf32>
    %61 = vector.broadcast %cst_35 : f32 to vector<1x512xf32>
    %62 = arith.subf %58, %61 : vector<1x512xf32>
    %63 = arith.cmpf one, %62, %62 : vector<1x512xf32>
    %64 = vector.broadcast %cst_35 : f32 to vector<1x512xf32>
    %65 = arith.addf %58, %64 : vector<1x512xf32>
    %66 = math.absf %62 : vector<1x512xf32>
    %cst_36 = arith.constant 0.000000e+00 : f32
    %67 = vector.broadcast %cst_36 : f32 to vector<1x512xf32>
    %68 = arith.subf %67, %66 : vector<1x512xf32>
    %69 = math.exp %68 : vector<1x512xf32>
    %70 = math.log1p %69 : vector<1x512xf32>
    %71 = arith.addf %60, %70 : vector<1x512xf32>
    %72 = arith.select %63, %65, %71 : vector<1x512xi1>, vector<1x512xf32>
    %cst_37 = arith.constant 0.000000e+00 : f32
    %73 = vector.broadcast %cst_37 : f32 to vector<1x512xf32>
    %74 = arith.subf %73, %72 : vector<1x512xf32>
    %75 = vector.broadcast %50 : vector<16x1xf32> to vector<16x512xf32>
    %76 = vector.broadcast %74 : vector<1x512xf32> to vector<16x512xf32>
    %77 = arith.mulf %75, %76 : vector<16x512xf32>
    %78 = math.exp %77 : vector<16x512xf32>
    %79 = vector.extract_strided_slice %48 {offsets = [0, 0], sizes = [16, 512], strides = [1, 1]} : vector<48x512xf32> to vector<16x512xf32>
    %80 = arith.mulf %78, %79 : vector<16x512xf32>
    %81 = vector.broadcast %50 : vector<16x1xf32> to vector<16x512xf32>
    %82 = vector.broadcast %49 : vector<1x512xf32> to vector<16x512xf32>
    %83 = arith.mulf %81, %82 : vector<16x512xf32>
    %84 = arith.negf %83 : vector<16x512xf32>
    %85 = math.exp %84 : vector<16x512xf32>
    %cst_38 = arith.constant 1.000000e+00 : f32
    %86 = vector.broadcast %cst_38 : f32 to vector<16x512xf32>
    %87 = arith.addf %86, %85 : vector<16x512xf32>
    %88 = arith.divf %86, %87 : vector<16x512xf32>
    %89 = vector.extract_strided_slice %48 {offsets = [16, 0], sizes = [16, 512], strides = [1, 1]} : vector<48x512xf32> to vector<16x512xf32>
    %90 = arith.mulf %88, %89 : vector<16x512xf32>
    %91 = arith.addf %80, %90 : vector<16x512xf32>
    %92 = vector.broadcast %56 : vector<1x512xf32> to vector<16x512xf32>
    %93 = vector.broadcast %50 : vector<16x1xf32> to vector<16x512xf32>
    %94 = arith.mulf %92, %93 : vector<16x512xf32>
    %95 = math.log1p %94 : vector<16x512xf32>
    %96 = vector.broadcast %51 : vector<16x1xf32> to vector<16x512xf32>
    %97 = arith.mulf %95, %96 : vector<16x512xf32>
    %98 = vector.extract_strided_slice %48 {offsets = [32, 0], sizes = [16, 512], strides = [1, 1]} : vector<48x512xf32> to vector<16x512xf32>
    %99 = arith.mulf %97, %98 : vector<16x512xf32>
    %100 = arith.addf %91, %99 : vector<16x512xf32>
    %cst_39 = arith.constant dense<0.000000e+00> : vector<512xf32>
    %101 = vector.multi_reduction <add>, %100, %cst_39 [0] : vector<16x512xf32> to vector<512xf32>
    %102 = vector.shape_cast %101 : vector<512xf32> to vector<1x512xf32>
    %c0_40 = arith.constant 0 : index
    %c0_41 = arith.constant 0 : index
    %103 = vector.load %arg13[%c0_40, %c0_41] : memref<1x512xf32, #tpu.memory_space<vmem>>, vector<1x512xf32>
    tpu.vector_store %arg13[%c0_40, %c0_41], %102 {strides = array<i32>} : memref<1x512xf32, #tpu.memory_space<vmem>>, vector<1x512xf32>,
    return
  }
  func.func @transform_0(%arg0: i32) -> (i32, i32) {
    %c0_i32 = arith.constant 0 : i32
    %c0_i32_0 = arith.constant 0 : i32
    return %arg0, %c0_i32 : i32, i32
  }
  func.func @transform_1(%arg0: i32) -> (i32, i32) {
    %c0_i32 = arith.constant 0 : i32
    %c0_i32_0 = arith.constant 0 : i32
    return %c0_i32, %arg0 : i32, i32
  }
  func.func @transform_2(%arg0: i32) -> (i32, i32) {
    %c0_i32 = arith.constant 0 : i32
    %c0_i32_0 = arith.constant 0 : i32
    %c0_i32_1 = arith.constant 0 : i32
    return %c0_i32, %c0_i32_0 : i32, i32
  }
  func.func @transform_3(%arg0: i32) -> (i32, i32) {
    %c0_i32 = arith.constant 0 : i32
    %c0_i32_0 = arith.constant 0 : i32
    %c0_i32_1 = arith.constant 0 : i32
    return %c0_i32, %c0_i32_0 : i32, i32
  }
  func.func @transform_4(%arg0: i32) -> (i32, i32) {
    %c0_i32 = arith.constant 0 : i32
    %c0_i32_0 = arith.constant 0 : i32
    %c0_i32_1 = arith.constant 0 : i32
    return %c0_i32, %c0_i32_0 : i32, i32
  }
  func.func @transform_5(%arg0: i32) -> (i32, i32) {
    %c0_i32 = arith.constant 0 : i32
    %c0_i32_0 = arith.constant 0 : i32
    %c0_i32_1 = arith.constant 0 : i32
    return %c0_i32, %c0_i32_0 : i32, i32
  }
  func.func @transform_6(%arg0: i32) -> (i32, i32) {
    %c0_i32 = arith.constant 0 : i32
    %c0_i32_0 = arith.constant 0 : i32
    %c0_i32_1 = arith.constant 0 : i32
    return %c0_i32, %c0_i32_0 : i32, i32
  }
  func.func @transform_7(%arg0: i32) -> (i32, i32) {
    %c0_i32 = arith.constant 0 : i32
    %c0_i32_0 = arith.constant 0 : i32
    %c0_i32_1 = arith.constant 0 : i32
    return %c0_i32, %c0_i32_0 : i32, i32
  }
  func.func @transform_8(%arg0: i32) -> (i32, i32) {
    %c0_i32 = arith.constant 0 : i32
    %c0_i32_0 = arith.constant 0 : i32
    %c0_i32_1 = arith.constant 0 : i32
    return %c0_i32, %c0_i32_0 : i32, i32
  }
  func.func @transform_9(%arg0: i32) -> (i32, i32) {
    %c0_i32 = arith.constant 0 : i32
    %c0_i32_0 = arith.constant 0 : i32
    %c0_i32_1 = arith.constant 0 : i32
    return %c0_i32, %c0_i32_0 : i32, i32
  }
  func.func @transform_10(%arg0: i32) -> (i32, i32) {
    %c0_i32 = arith.constant 0 : i32
    %c0_i32_0 = arith.constant 0 : i32
    %c0_i32_1 = arith.constant 0 : i32
    return %c0_i32, %c0_i32_0 : i32, i32
  }
  func.func @transform_11(%arg0: i32) -> (i32, i32) {
    %c0_i32 = arith.constant 0 : i32
    %c0_i32_0 = arith.constant 0 : i32
    %c0_i32_1 = arith.constant 0 : i32
    return %c0_i32, %c0_i32_0 : i32, i32
  }
  func.func @transform_12(%arg0: i32) -> (i32, i32) {
    %c0_i32 = arith.constant 0 : i32
    %c0_i32_0 = arith.constant 0 : i32
    return %c0_i32, %arg0 : i32, i32
  }
}

</mosaic_0001>

<bundles_post_ra>
// kernel: tpu_custom_call.1
= control target key start
LH: loop header
LB: loop body
LE: loop exit
PB: predicated region body
PF: predicated region fallthrough
CT: control target
= control target key end

     0   :  { %s7680_s23 = smov 64   ;;  %s7681_s24 = smov 96   ;;  %v12426_v2 = vmov 0.0|0.0   ;;  %s12413_s0 = inlined_call_operand.vmem [shape: f32[512,160], index: 0, kind: input, shape index: {}]   ;;  %s12414_s1 = inlined_call_operand.vmem [shape: f32[1,512], index: 1, kind: input, shape index: {}]   ;;  %s12415_s2 = inlined_call_operand.vmem [shape: f32[160,5], index: 2, kind: input, shape index: {}]   ;;  %s12416_s3 = inlined_call_operand.vmem [shape: f32[5,160], index: 3, kind: input, shape index: {}]   ;;  %s12417_s4 = inlined_call_operand.vmem [shape: f32[160,32], index: 4, kind: input, shape index: {}]   ;;  %s12418_s5 = inlined_call_operand.vmem [shape: f32[1,5], index: 5, kind: input, shape index: {}]   ;;  %s12419_s6 = inlined_call_operand.vmem [shape: f32[16,1], index: 6, kind: input, shape index: {}]   ;;  %s12420_s7 = inlined_call_operand.vmem [shape: f32[16,1], index: 7, kind: input, shape index: {}]   ;;  %s12421_s8 = inlined_call_operand.vmem [shape: f32[96,64], index: 8, kind: input, shape index: {}]   ;;  %s12422_s9 = inlined_call_operand.vmem [shape: f32[1,64], index: 9, kind: input, shape index: {}]   ;;  %s12423_s10 = inlined_call_operand.vmem [shape: f32[64,48], index: 10, kind: input, shape index: {}]   ;;  %s12424_s11 = inlined_call_operand.vmem [shape: f32[1,48], index: 11, kind: input, shape index: {}]   ;;  %s12425_s12 = inlined_call_operand.hbm [shape: f32[1,512], index: 12, kind: output, shape index: {}]  }
   0x1   :  { %v7756_v0 = vld [vmem:[%s12413_s0] sm:$0xff]  ;;  %v7765_v1 = vld [vmem:[%s12413_s0 + $0x10] sm:$0xff]  ;;  %7009 = vmatprep.subr.bf16.mxu0 %v12426_v2  ;;  %s7683_s27 = smov 32   ;;  %v1134_v4 = vld [vmem:[%s12415_s2 + $0x8] sm:$0xff] }
   0x2   :  { %618 = vrot.lane.b32.xlu1 %v7756_v0, %s7680_s23  ;;  %234 = vrot.lane.b32.xlu0 %v7756_v0, %s7681_s24  ;;  %v1133_v3 = vld [vmem:[%s12415_s2] sm:$0xff]  ;;  %v1135_v6 = vld [vmem:[%s12415_s2 + $0x10] sm:$0xff] }
   0x3   :  { %v7010_v5 = vpack.c.bf16 %v1134_v4, %v1133_v3  ;;  %v1136_v7 = vld [vmem:[%s12415_s2 + $0x18] sm:$0xff]  ;;  %v1137_v9 = vld [vmem:[%s12415_s2 + $0x20] sm:$0xff]  ;;  %v1138_v10 = vld [vmem:[%s12415_s2 + $0x28] sm:$0xff] }
   0x4   :  { %v7013_v8 = vpack.c.bf16 %v1136_v7, %v1135_v6  ;;  %v7797_v11 = vld [vmem:[%s12413_s0 + $0x20] sm:$0xff]  ;;  %v7016_v12 = vpack.c.bf16 %v1138_v10, %v1137_v9  ;;  %v1139_v13 = vld [vmem:[%s12415_s2 + $0x30] sm:$0xff]  ;;  %v1140_v14 = vld [vmem:[%s12415_s2 + $0x38] sm:$0xff] }
   0x5   :  { %7011 = vmatpush1.bf16.msra.mxu0 %v7010_v5  ;;  %v7813_v15 = vld [vmem:[%s12413_s0 + $0x30] sm:$0xff]  ;;  %v7019_v16 = vpack.c.bf16 %v1140_v14, %v1139_v13  ;;  %v1141_v17 = vld [vmem:[%s12415_s2 + $0x40] sm:$0xff]  ;;  %v1142_v18 = vld [vmem:[%s12415_s2 + $0x48] sm:$0xff] }
   0x6   :  { %236 = vrot.lane.b32.xlu1 %v7765_v1, %s7681_s24  ;;  %426 = vrot.lane.b32.xlu0 %v7756_v0, %s7683_s27 }
   0x7   :  { %7012 = vmatprep.subr.bf16.mxu0 %v12426_v2 }
   0x9   :  { %7014 = vmatpush1.bf16.msra.mxu0 %v7013_v8 }
   0xa   :  { %620 = vrot.lane.b32.xlu1 %v7765_v1, %s7680_s23  ;;  %428 = vrot.lane.b32.xlu0 %v7765_v1, %s7683_s27 }
   0xb   :  { %7015 = vmatprep.subr.bf16.mxu0 %v12426_v2 }
   0xd   :  { %7017 = vmatpush1.bf16.msra.mxu0 %v7016_v12 }
   0xe   :  { %430 = vrot.lane.b32.xlu1 %v7797_v11, %s7683_s27  ;;  %238 = vrot.lane.b32.xlu0 %v7797_v11, %s7681_s24 }
   0xf   :  { %7018 = vmatprep.subr.bf16.mxu0 %v12426_v2 }
  0x12   :  { %240 = vrot.lane.b32.xlu1 %v7813_v15, %s7681_s24  ;;  %622 = vrot.lane.b32.xlu0 %v7797_v11, %s7680_s23 }
  0x13   :  { %17 = vsyncpa [#allocation3], 0  ;;  %7020 = vmatpush1.bf16.msra.mxu0 %v7019_v16  ;;  %v7022_v19 = vpack.c.bf16 %v1142_v18, %v1141_v17  ;;  %v1143_v20 = vld [vmem:[%s12415_s2 + $0x50] sm:$0xff]  ;;  %v1144_v21 = vld [vmem:[%s12415_s2 + $0x58] sm:$0xff]  ;;  %vm810_vm0 = vcmask 261120   ;;  %vm875_vm1 = vcmask 523264  }
  0x14   :  { %v7840_v22 = vld [vmem:[%s12413_s0 + $0x40] sm:$0xff]  ;;  %7021 = vmatprep.subr.bf16.mxu0 %v12426_v2  ;;  %v7025_v23 = vpack.c.bf16 %v1144_v21, %v1143_v20  ;;  %v1146_v25 = vld [vmem:[%s12415_s2 + $0x68] sm:$0xff]  ;;  %v7856_v26 = vld [vmem:[%s12413_s0 + $0x50] sm:$0xff]  ;;  %vm940_vm2 = vcmask 785408   ;;  %vm1865_vm3 = vcmask 39936   ;;  %vm2764_vm4 = vcmask 1044480  }
  0x15   :  { %v1145_v24 = vld [vmem:[%s12415_s2 + $0x60] sm:$0xff]  ;;  %v1147_v28 = vld [vmem:[%s12415_s2 + $0x70] sm:$0xff]  ;;  %v1148_v29 = vld [vmem:[%s12415_s2 + $0x78] sm:$0xff] }
  0x16   :  { %624 = vrot.lane.b32.xlu1 %v7813_v15, %s7680_s23  ;;  %432 = vrot.lane.b32.xlu0 %v7813_v15, %s7683_s27  ;;  %v7028_v27 = vpack.c.bf16 %v1146_v25, %v1145_v24  ;;  %v7031_v30 = vpack.c.bf16 %v1148_v29, %v1147_v28  ;;  %v1149_v31 = vld [vmem:[%s12415_s2 + $0x80] sm:$0xff]  ;;  %v1150_v32 = vld [vmem:[%s12415_s2 + $0x88] sm:$0xff] }
  0x17   :  { %7023 = vmatpush1.bf16.msra.mxu0 %v7022_v19  ;;  %v7883_v33 = vld [vmem:[%s12413_s0 + $0x60] sm:$0xff]  ;;  %v7034_v34 = vpack.c.bf16 %v1150_v32, %v1149_v31  ;;  %v1151_v35 = vld [vmem:[%s12415_s2 + $0x90] sm:$0xff]  ;;  %v1152_v36 = vld [vmem:[%s12415_s2 + $0x98] sm:$0xff] }
  0x18   :  { %7024 = vmatprep.subr.bf16.mxu0 %v12426_v2  ;;  %v7899_v37 = vld [vmem:[%s12413_s0 + $0x70] sm:$0xff]  ;;  %v7037_v38 = vpack.c.bf16 %v1152_v36, %v1151_v35  ;;  %v7914_v39 = vld [vmem:[%s12413_s0 + $0x80] sm:$0xff]  ;;  %v43_v51 = vld [vmem:[%s12413_s0 + $0x8] sm:$0xff] }
  0x19   :  { %v7923_v40 = vld [vmem:[%s12413_s0 + $0x90] sm:$0xff]  ;;  %v7936_v41 = vld [vmem:[%s12413_s0 + $0xa0] sm:$0xff]  ;;  %v45_v61 = vld [vmem:[%s12413_s0 + $0x18] sm:$0xff] }
  0x1a   :  { %434 = vrot.lane.b32.xlu1 %v7840_v22, %s7683_s27  ;;  %242 = vrot.lane.b32.xlu0 %v7840_v22, %s7681_s24  ;;  %v7945_v42 = vld [vmem:[%s12413_s0 + $0xb0] sm:$0xff]  ;;  %v7958_v43 = vld [vmem:[%s12413_s0 + $0xc0] sm:$0xff] }
  0x1b   :  { %7026 = vmatpush1.bf16.msra.mxu0 %v7025_v23  ;;  %v7967_v44 = vld [vmem:[%s12413_s0 + $0xd0] sm:$0xff]  ;;  %v7980_v45 = vld [vmem:[%s12413_s0 + $0xe0] sm:$0xff]  ;;  %v49_v16 = vld [vmem:[%s12413_s0 + $0x38] sm:$0xff] }
  0x1c   :  { %7027 = vmatprep.subr.bf16.mxu0 %v12426_v2  ;;  %v7989_v46 = vld [vmem:[%s12413_s0 + $0xf0] sm:$0xff]  ;;  %v8002_v47 = vld [vmem:[%s12413_s0 + $0x100] sm:$0xff] }
  0x1d   :  { %v8011_v48 = vld [vmem:[%s12413_s0 + $0x110] sm:$0xff]  ;;  %v8024_v49 = vld [vmem:[%s12413_s0 + $0x120] sm:$0xff] }
  0x1e   :  { %244 = vrot.lane.b32.xlu1 %v7856_v26, %s7681_s24  ;;  %626 = vrot.lane.b32.xlu0 %v7840_v22, %s7680_s23  ;;  %v8033_v50 = vld [vmem:[%s12413_s0 + $0x130] sm:$0xff]  ;;  %v8050_v55 = vld [vmem:[%s12413_s0 + $0x140] sm:$0xff] }
  0x1f   :  { %7029 = vmatpush1.bf16.msra.mxu0 %v7028_v27  ;;  %v8067_v63 = vld [vmem:[%s12413_s0 + $0x150] sm:$0xff] }
  0x20   :  { %7030 = vmatprep.subr.bf16.mxu0 %v12426_v2  ;;  %v8107_v24 = vld [vmem:[%s12413_s0 + $0x170] sm:$0xff] }
  0x22   :  { %628 = vrot.lane.b32.xlu1 %v7856_v26, %s7680_s23  ;;  %436 = vrot.lane.b32.xlu0 %v7856_v26, %s7683_s27 }
  0x23   :  { %7032 = vmatpush1.bf16.msra.mxu0 %v7031_v30  ;;  %v51_v30 = vld [vmem:[%s12413_s0 + $0x48] sm:$0xff] }
  0x24   :  { %7033 = vmatprep.subr.bf16.mxu0 %v12426_v2 }
  0x26   :  { %438 = vrot.lane.b32.xlu1 %v7883_v33, %s7683_s27  ;;  %246 = vrot.lane.b32.xlu0 %v7883_v33, %s7681_s24 }
  0x27   :  { %7035 = vmatpush1.bf16.msra.mxu0 %v7034_v34 }
  0x28   :  { %7036 = vmatprep.subr.bf16.mxu0 %v12426_v2 }
  0x2a   :  { %248 = vrot.lane.b32.xlu1 %v7899_v37, %s7681_s24  ;;  %630 = vrot.lane.b32.xlu0 %v7883_v33, %s7680_s23 }
  0x2b   :  { %7038 = vmatpush1.bf16.msra.mxu0 %v7037_v38  ;;  %v53_v38 = vld [vmem:[%s12413_s0 + $0x58] sm:$0xff] }
  0x2e   :  { %632 = vrot.lane.b32.xlu1 %v7899_v37, %s7680_s23  ;;  %440 = vrot.lane.b32.xlu0 %v7899_v37, %s7683_s27 }
  0x32   :  { %442 = vrot.lane.b32.xlu1 %v7914_v39, %s7683_s27  ;;  %250 = vrot.lane.b32.xlu0 %v7914_v39, %s7681_s24 }
  0x36   :  { %252 = vrot.lane.b32.xlu1 %v7923_v40, %s7681_s24  ;;  %634 = vrot.lane.b32.xlu0 %v7914_v39, %s7680_s23 }
  0x3a   :  { %636 = vrot.lane.b32.xlu1 %v7923_v40, %s7680_s23  ;;  %444 = vrot.lane.b32.xlu0 %v7923_v40, %s7683_s27 }
  0x3e   :  { %446 = vrot.lane.b32.xlu1 %v7936_v41, %s7683_s27  ;;  %254 = vrot.lane.b32.xlu0 %v7936_v41, %s7681_s24 }
  0x42   :  { %256 = vrot.lane.b32.xlu1 %v7945_v42, %s7681_s24  ;;  %638 = vrot.lane.b32.xlu0 %v7936_v41, %s7680_s23 }
  0x46   :  { %640 = vrot.lane.b32.xlu1 %v7945_v42, %s7680_s23  ;;  %448 = vrot.lane.b32.xlu0 %v7945_v42, %s7683_s27 }
  0x4a   :  { %450 = vrot.lane.b32.xlu1 %v7958_v43, %s7683_s27  ;;  %258 = vrot.lane.b32.xlu0 %v7958_v43, %s7681_s24 }
  0x4e   :  { %260 = vrot.lane.b32.xlu1 %v7967_v44, %s7681_s24  ;;  %642 = vrot.lane.b32.xlu0 %v7958_v43, %s7680_s23 }
  0x52   :  { %644 = vrot.lane.b32.xlu1 %v7967_v44, %s7680_s23  ;;  %452 = vrot.lane.b32.xlu0 %v7967_v44, %s7683_s27 }
  0x56   :  { %454 = vrot.lane.b32.xlu1 %v7980_v45, %s7683_s27  ;;  %262 = vrot.lane.b32.xlu0 %v7980_v45, %s7681_s24 }
  0x5a   :  { %264 = vrot.lane.b32.xlu1 %v7989_v46, %s7681_s24  ;;  %646 = vrot.lane.b32.xlu0 %v7980_v45, %s7680_s23 }
  0x5e   :  { %648 = vrot.lane.b32.xlu1 %v7989_v46, %s7680_s23  ;;  %456 = vrot.lane.b32.xlu0 %v7989_v46, %s7683_s27 }
  0x62   :  { %458 = vrot.lane.b32.xlu1 %v8002_v47, %s7683_s27  ;;  %266 = vrot.lane.b32.xlu0 %v8002_v47, %s7681_s24 }
  0x66   :  { %268 = vrot.lane.b32.xlu1 %v8011_v48, %s7681_s24  ;;  %650 = vrot.lane.b32.xlu0 %v8002_v47, %s7680_s23 }
  0x6a   :  { %652 = vrot.lane.b32.xlu1 %v8011_v48, %s7680_s23  ;;  %460 = vrot.lane.b32.xlu0 %v8011_v48, %s7683_s27 }
  0x6e   :  { %462 = vrot.lane.b32.xlu1 %v8024_v49, %s7683_s27  ;;  %270 = vrot.lane.b32.xlu0 %v8024_v49, %s7681_s24 }
  0x72   :  { %272 = vrot.lane.b32.xlu1 %v8033_v50, %s7681_s24  ;;  %654 = vrot.lane.b32.xlu0 %v8024_v49, %s7680_s23 }
  0x74   :  { %v235_v52 = vpop.permute.xlu0 %234  ;;  %v619_v53 = vpop.permute.xlu1 %618 }
  0x75   :  { %v1006_v54 = vmul.f32 %v235_v52, %v43_v51  ;;  %v811_v56 = vsel %vm810_vm0, %v235_v52, %v7756_v0 }
  0x76   :  { %656 = vrot.lane.b32.xlu1 %v8033_v50, %s7680_s23  ;;  %464 = vrot.lane.b32.xlu0 %v8033_v50, %s7683_s27 }
  0x77   :  { %6295 = vmatprep.mubr.msk.f32.mxu0 %vm810_vm0, %v1006_v54 }
  0x78   :  { %v427_v57 = vpop.permute.xlu0 %426  ;;  %v237_v58 = vpop.permute.xlu1 %236 }
  0x79   :  { %v876_v59 = vsel %vm875_vm1, %v811_v56, %v427_v57  ;;  %v812_v3 = vsel %vm810_vm0, %v237_v58, %v7765_v1  ;;  %v1008_v6 = vmul.f32 %v237_v58, %v45_v61  ;;  %v8147_v58 = vld [vmem:[%s12413_s0 + $0x190] sm:$0xff] }
  0x7a   :  { %v941_v60 = vsel %vm940_vm2, %v876_v59, %v619_v53  ;;  %466 = vrot.lane.b32.xlu1 %v8050_v55, %s7683_s27  ;;  %274 = vrot.lane.b32.xlu0 %v8050_v55, %s7681_s24 }
  0x7b   :  { %v1005_v62 = vmul.f32 %v941_v60, %v7756_v0  ;;  %v47_v0 = vld [vmem:[%s12413_s0 + $0x28] sm:$0xff] }
  0x7c   :  { %v429_v4 = vpop.permute.xlu0 %428  ;;  %v621_v5 = vpop.permute.xlu1 %620 }
  0x7d   :  { %v877_v7 = vsel %vm875_vm1, %v812_v3, %v429_v4  ;;  %1410 = vmatmul.mubr.f32.vlgmr.msra.gmra.mrb[0].mxu0 %v1005_v62  ;;  %v55_v3 = vld [vmem:[%s12413_s0 + $0x68] sm:$0xff] }
  0x7e   :  { %v942_v8 = vsel %vm940_vm2, %v877_v7, %v621_v5  ;;  %276 = vrot.lane.b32.xlu1 %v8067_v63, %s7681_s24  ;;  %658 = vrot.lane.b32.xlu0 %v8050_v55, %s7680_s23 }
  0x7f   :  { %v1007_v9 = vmul.f32 %v942_v8, %v7765_v1  ;;  %6296 = vmatprep.mubr.msk.f32.mxu0 %vm810_vm0, %v1008_v6  ;;  %v8095_v1 = vld [vmem:[%s12413_s0 + $0x160] sm:$0xff] }
  0x80   :  { %v239_v10 = vpop.permute.xlu0 %238  ;;  %v431_v12 = vpop.permute.xlu1 %430 }
  0x81   :  { %v813_v13 = vsel %vm810_vm0, %v239_v10, %v7797_v11  ;;  %v1010_v14 = vmul.f32 %v239_v10, %v47_v0  ;;  %1415 = vmatmul.mubr.f32.gmra.mrb[2].mxu0 %v1007_v9  ;;  %v57_v0 = vld [vmem:[%s12413_s0 + $0x78] sm:$0xff] }
  0x82   :  { %660 = vrot.lane.b32.xlu1 %v8067_v63, %s7680_s23  ;;  %468 = vrot.lane.b32.xlu0 %v8067_v63, %s7683_s27  ;;  %v878_v17 = vsel %vm875_vm1, %v813_v13, %v431_v12 }
  0x83   :  { %6297 = vmatprep.mubr.msk.f32.mxu0 %vm810_vm0, %v1010_v14 }
  0x84   :  { %v623_v18 = vpop.permute.xlu0 %622  ;;  %v241_v19 = vpop.permute.xlu1 %240 }
  0x85   :  { %v943_v20 = vsel %vm940_vm2, %v878_v17, %v623_v18  ;;  %v1012_v21 = vmul.f32 %v241_v19, %v49_v16  ;;  %v814_v25 = vsel %vm810_vm0, %v241_v19, %v7813_v15  ;;  %v8187_v17 = vld [vmem:[%s12413_s0 + $0x1b0] sm:$0xff] }
  0x86   :  { %v1009_v23 = vmul.f32 %v943_v20, %v7797_v11  ;;  %470 = vrot.lane.b32.xlu1 %v8095_v1, %s7683_s27  ;;  %278 = vrot.lane.b32.xlu0 %v8095_v1, %s7681_s24 }
  0x88   :  { %1420 = vmatmul.mubr.f32.gmra.mrb[4].mxu0 %v1009_v23  ;;  %v433_v27 = vpop.permute.xlu0 %432  ;;  %v625_v28 = vpop.permute.xlu1 %624  ;;  %v59_v23 = vld [vmem:[%s12413_s0 + $0x88] sm:$0xff] }
  0x89   :  { %v879_v29 = vsel %vm875_vm1, %v814_v25, %v433_v27  ;;  %6298 = vmatprep.mubr.msk.f32.mxu0 %vm810_vm0, %v1012_v21 }
  0x8a   :  { %v944_v11 = vsel %vm940_vm2, %v879_v29, %v625_v28  ;;  %280 = vrot.lane.b32.xlu1 %v8107_v24, %s7681_s24  ;;  %662 = vrot.lane.b32.xlu0 %v8095_v1, %s7680_s23 }
  0x8b   :  { %v1011_v31 = vmul.f32 %v944_v11, %v7813_v15  ;;  %v8135_v15 = vld [vmem:[%s12413_s0 + $0x180] sm:$0xff] }
  0x8c   :  { %v243_v32 = vpop.permute.xlu0 %242  ;;  %v435_v34 = vpop.permute.xlu1 %434 }
  0x8d   :  { %v815_v35 = vsel %vm810_vm0, %v243_v32, %v7840_v22  ;;  %v1014_v36 = vmul.f32 %v243_v32, %v51_v30  ;;  %1425 = vmatmul.mubr.f32.gmra.mrb[6].mxu0 %v1011_v31  ;;  %v61_v30 = vld [vmem:[%s12413_s0 + $0x98] sm:$0xff] }
  0x8e   :  { %664 = vrot.lane.b32.xlu1 %v8107_v24, %s7680_s23  ;;  %472 = vrot.lane.b32.xlu0 %v8107_v24, %s7683_s27  ;;  %v880_v51 = vsel %vm875_vm1, %v815_v35, %v435_v34 }
  0x8f   :  { %6299 = vmatprep.mubr.msk.f32.mxu0 %vm810_vm0, %v1014_v36 }
  0x90   :  { %v627_v52 = vpop.permute.xlu0 %626  ;;  %v245_v53 = vpop.permute.xlu1 %244 }
  0x91   :  { %v945_v54 = vsel %vm940_vm2, %v880_v51, %v627_v52  ;;  %v1016_v56 = vmul.f32 %v245_v53, %v53_v38  ;;  %v816_v59 = vsel %vm810_vm0, %v245_v53, %v7856_v26  ;;  %v8227_v51 = vld [vmem:[%s12413_s0 + $0x1d0] sm:$0xff] }
  0x92   :  { %v1013_v57 = vmul.f32 %v945_v54, %v7840_v22  ;;  %474 = vrot.lane.b32.xlu1 %v8135_v15, %s7683_s27  ;;  %282 = vrot.lane.b32.xlu0 %v8135_v15, %s7681_s24 }
  0x94   :  { %1430 = vmatmul.mubr.f32.gmra.mrb[8].mxu0 %v1013_v57  ;;  %v437_v60 = vpop.permute.xlu0 %436  ;;  %v629_v61 = vpop.permute.xlu1 %628  ;;  %v63_v57 = vld [vmem:[%s12413_s0 + $0xa8] sm:$0xff] }
  0x95   :  { %v881_v62 = vsel %vm875_vm1, %v816_v59, %v437_v60  ;;  %6300 = vmatprep.mubr.msk.f32.mxu0 %vm810_vm0, %v1016_v56 }
  0x96   :  { %v946_v22 = vsel %vm940_vm2, %v881_v62, %v629_v61  ;;  %284 = vrot.lane.b32.xlu1 %v8147_v58, %s7681_s24  ;;  %666 = vrot.lane.b32.xlu0 %v8135_v15, %s7680_s23 }
  0x97   :  { %v1015_v4 = vmul.f32 %v946_v22, %v7856_v26  ;;  %v8175_v26 = vld [vmem:[%s12413_s0 + $0x1a0] sm:$0xff] }
  0x98   :  { %v247_v5 = vpop.permute.xlu0 %246  ;;  %v439_v6 = vpop.permute.xlu1 %438 }
  0x99   :  { %v817_v7 = vsel %vm810_vm0, %v247_v5, %v7883_v33  ;;  %v1018_v8 = vmul.f32 %v247_v5, %v55_v3  ;;  %1435 = vmatmul.mubr.f32.gmra.mrb[10].mxu0 %v1015_v4  ;;  %v65_v3 = vld [vmem:[%s12413_s0 + $0xb8] sm:$0xff] }
  0x9a   :  { %668 = vrot.lane.b32.xlu1 %v8147_v58, %s7680_s23  ;;  %476 = vrot.lane.b32.xlu0 %v8147_v58, %s7683_s27  ;;  %v882_v9 = vsel %vm875_vm1, %v817_v7, %v439_v6 }
  0x9b   :  { %6301 = vmatprep.mubr.msk.f32.mxu0 %vm810_vm0, %v1018_v8 }
  0x9c   :  { %v631_v10 = vpop.permute.xlu0 %630  ;;  %v249_v12 = vpop.permute.xlu1 %248 }
  0x9d   :  { %v947_v13 = vsel %vm940_vm2, %v882_v9, %v631_v10  ;;  %v1020_v14 = vmul.f32 %v249_v12, %v57_v0  ;;  %v818_v18 = vsel %vm810_vm0, %v249_v12, %v7899_v37  ;;  %v8267_v9 = vld [vmem:[%s12413_s0 + $0x1f0] sm:$0xff] }
  0x9e   :  { %v1017_v16 = vmul.f32 %v947_v13, %v7883_v33  ;;  %478 = vrot.lane.b32.xlu1 %v8175_v26, %s7683_s27  ;;  %286 = vrot.lane.b32.xlu0 %v8175_v26, %s7681_s24 }
  0xa0   :  { %1440 = vmatmul.mubr.f32.gmra.mrb[12].mxu0 %v1017_v16  ;;  %v441_v19 = vpop.permute.xlu0 %440  ;;  %v633_v20 = vpop.permute.xlu1 %632  ;;  %v67_v16 = vld [vmem:[%s12413_s0 + $0xc8] sm:$0xff] }
  0xa1   :  { %v883_v21 = vsel %vm875_vm1, %v818_v18, %v441_v19  ;;  %6302 = vmatprep.mubr.msk.f32.mxu0 %vm810_vm0, %v1020_v14 }
  0xa2   :  { %v948_v33 = vsel %vm940_vm2, %v883_v21, %v633_v20  ;;  %288 = vrot.lane.b32.xlu1 %v8187_v17, %s7681_s24  ;;  %670 = vrot.lane.b32.xlu0 %v8175_v26, %s7680_s23 }
  0xa3   :  { %v1019_v25 = vmul.f32 %v948_v33, %v7899_v37  ;;  %v8215_v37 = vld [vmem:[%s12413_s0 + $0x1c0] sm:$0xff] }
  0xa4   :  { %v251_v27 = vpop.permute.xlu0 %250  ;;  %v443_v28 = vpop.permute.xlu1 %442 }
  0xa5   :  { %v819_v29 = vsel %vm810_vm0, %v251_v27, %v7914_v39  ;;  %v1022_v11 = vmul.f32 %v251_v27, %v59_v23  ;;  %1445 = vmatmul.mubr.f32.gmra.mrb[14].mxu0 %v1019_v25  ;;  %v69_v23 = vld [vmem:[%s12413_s0 + $0xd8] sm:$0xff] }
  0xa6   :  { %672 = vrot.lane.b32.xlu1 %v8187_v17, %s7680_s23  ;;  %480 = vrot.lane.b32.xlu0 %v8187_v17, %s7683_s27  ;;  %v884_v31 = vsel %vm875_vm1, %v819_v29, %v443_v28 }
  0xa7   :  { %6303 = vmatprep.mubr.msk.f32.mxu0 %vm810_vm0, %v1022_v11 }
  0xa8   :  { %v635_v32 = vpop.permute.xlu0 %634  ;;  %v253_v34 = vpop.permute.xlu1 %252 }
  0xa9   :  { %v949_v35 = vsel %vm940_vm2, %v884_v31, %v635_v32  ;;  %v1024_v36 = vmul.f32 %v253_v34, %v61_v30  ;;  %v820_v52 = vsel %vm810_vm0, %v253_v34, %v7923_v40  ;;  %v8307_v31 = vld [vmem:[%s12413_s0 + $0x210] sm:$0xff] }
  0xaa   :  { %v1021_v38 = vmul.f32 %v949_v35, %v7914_v39  ;;  %482 = vrot.lane.b32.xlu1 %v8215_v37, %s7683_s27  ;;  %290 = vrot.lane.b32.xlu0 %v8215_v37, %s7681_s24 }
  0xac   :  { %1450 = vmatmul.mubr.f32.gmra.mrb[16].mxu0 %v1021_v38  ;;  %v445_v53 = vpop.permute.xlu0 %444  ;;  %v637_v54 = vpop.permute.xlu1 %636  ;;  %v71_v38 = vld [vmem:[%s12413_s0 + $0xe8] sm:$0xff] }
  0xad   :  { %v885_v56 = vsel %vm875_vm1, %v820_v52, %v445_v53  ;;  %6304 = vmatprep.mubr.msk.f32.mxu0 %vm810_vm0, %v1024_v36 }
  0xae   :  { %v950_v39 = vsel %vm940_vm2, %v885_v56, %v637_v54  ;;  %292 = vrot.lane.b32.xlu1 %v8227_v51, %s7681_s24  ;;  %674 = vrot.lane.b32.xlu0 %v8215_v37, %s7680_s23 }
  0xaf   :  { %v1023_v59 = vmul.f32 %v950_v39, %v7923_v40  ;;  %v8255_v40 = vld [vmem:[%s12413_s0 + $0x1e0] sm:$0xff] }
  0xb0   :  { %v255_v60 = vpop.permute.xlu0 %254  ;;  %v447_v61 = vpop.permute.xlu1 %446 }
  0xb1   :  { %v821_v62 = vsel %vm810_vm0, %v255_v60, %v7936_v41  ;;  %v1026_v22 = vmul.f32 %v255_v60, %v63_v57  ;;  %1455 = vmatmul.mubr.f32.gmra.mrb[18].mxu0 %v1023_v59  ;;  %v73_v57 = vld [vmem:[%s12413_s0 + $0xf8] sm:$0xff] }
  0xb2   :  { %676 = vrot.lane.b32.xlu1 %v8227_v51, %s7680_s23  ;;  %484 = vrot.lane.b32.xlu0 %v8227_v51, %s7683_s27  ;;  %v886_v4 = vsel %vm875_vm1, %v821_v62, %v447_v61 }
  0xb3   :  { %6305 = vmatprep.mubr.msk.f32.mxu0 %vm810_vm0, %v1026_v22 }
  0xb4   :  { %v639_v5 = vpop.permute.xlu0 %638  ;;  %v257_v6 = vpop.permute.xlu1 %256 }
  0xb5   :  { %v951_v7 = vsel %vm940_vm2, %v886_v4, %v639_v5  ;;  %v1028_v8 = vmul.f32 %v257_v6, %v65_v3  ;;  %v822_v10 = vsel %vm810_vm0, %v257_v6, %v7945_v42  ;;  %v8347_v4 = vld [vmem:[%s12413_s0 + $0x230] sm:$0xff] }
  0xb6   :  { %v1025_v0 = vmul.f32 %v951_v7, %v7936_v41  ;;  %486 = vrot.lane.b32.xlu1 %v8255_v40, %s7683_s27  ;;  %294 = vrot.lane.b32.xlu0 %v8255_v40, %s7681_s24 }
  0xb8   :  { %1460 = vmatmul.mubr.f32.gmra.mrb[20].mxu0 %v1025_v0  ;;  %v449_v12 = vpop.permute.xlu0 %448  ;;  %v641_v13 = vpop.permute.xlu1 %640  ;;  %v75_v0 = vld [vmem:[%s12413_s0 + $0x108] sm:$0xff] }
  0xb9   :  { %v887_v14 = vsel %vm875_vm1, %v822_v10, %v449_v12  ;;  %6306 = vmatprep.mubr.msk.f32.mxu0 %vm810_vm0, %v1028_v8 }
  0xba   :  { %v952_v41 = vsel %vm940_vm2, %v887_v14, %v641_v13  ;;  %296 = vrot.lane.b32.xlu1 %v8267_v9, %s7681_s24  ;;  %678 = vrot.lane.b32.xlu0 %v8255_v40, %s7680_s23 }
  0xbb   :  { %v1027_v18 = vmul.f32 %v952_v41, %v7945_v42  ;;  %v8295_v42 = vld [vmem:[%s12413_s0 + $0x200] sm:$0xff] }
  0xbc   :  { %v259_v19 = vpop.permute.xlu0 %258  ;;  %v451_v20 = vpop.permute.xlu1 %450 }
  0xbd   :  { %v823_v21 = vsel %vm810_vm0, %v259_v19, %v7958_v43  ;;  %v1030_v33 = vmul.f32 %v259_v19, %v67_v16  ;;  %1465 = vmatmul.mubr.f32.gmra.mrb[22].mxu0 %v1027_v18  ;;  %v77_v16 = vld [vmem:[%s12413_s0 + $0x118] sm:$0xff] }
  0xbe   :  { %680 = vrot.lane.b32.xlu1 %v8267_v9, %s7680_s23  ;;  %488 = vrot.lane.b32.xlu0 %v8267_v9, %s7683_s27  ;;  %v888_v25 = vsel %vm875_vm1, %v823_v21, %v451_v20 }
  0xbf   :  { %6307 = vmatprep.mubr.msk.f32.mxu0 %vm810_vm0, %v1030_v33 }
  0xc0   :  { %v643_v27 = vpop.permute.xlu0 %642  ;;  %v261_v28 = vpop.permute.xlu1 %260 }
  0xc1   :  { %v953_v29 = vsel %vm940_vm2, %v888_v25, %v643_v27  ;;  %v1032_v11 = vmul.f32 %v261_v28, %v69_v23  ;;  %v824_v32 = vsel %vm810_vm0, %v261_v28, %v7967_v44  ;;  %v8387_v25 = vld [vmem:[%s12413_s0 + $0x250] sm:$0xff] }
  0xc2   :  { %v1029_v30 = vmul.f32 %v953_v29, %v7958_v43  ;;  %490 = vrot.lane.b32.xlu1 %v8295_v42, %s7683_s27  ;;  %298 = vrot.lane.b32.xlu0 %v8295_v42, %s7681_s24 }
  0xc4   :  { %1470 = vmatmul.mubr.f32.gmra.mrb[24].mxu0 %v1029_v30  ;;  %v453_v34 = vpop.permute.xlu0 %452  ;;  %v645_v35 = vpop.permute.xlu1 %644  ;;  %v79_v30 = vld [vmem:[%s12413_s0 + $0x128] sm:$0xff] }
  0xc5   :  { %v889_v36 = vsel %vm875_vm1, %v824_v32, %v453_v34  ;;  %6308 = vmatprep.mubr.msk.f32.mxu0 %vm810_vm0, %v1032_v11 }
  0xc6   :  { %v954_v43 = vsel %vm940_vm2, %v889_v36, %v645_v35  ;;  %300 = vrot.lane.b32.xlu1 %v8307_v31, %s7681_s24  ;;  %682 = vrot.lane.b32.xlu0 %v8295_v42, %s7680_s23 }
  0xc7   :  { %v1031_v52 = vmul.f32 %v954_v43, %v7967_v44  ;;  %v8335_v44 = vld [vmem:[%s12413_s0 + $0x220] sm:$0xff] }
  0xc8   :  { %v263_v53 = vpop.permute.xlu0 %262  ;;  %v455_v54 = vpop.permute.xlu1 %454 }
  0xc9   :  { %v825_v56 = vsel %vm810_vm0, %v263_v53, %v7980_v45  ;;  %v1034_v39 = vmul.f32 %v263_v53, %v71_v38  ;;  %1475 = vmatmul.mubr.f32.gmra.mrb[26].mxu0 %v1031_v52  ;;  %v81_v38 = vld [vmem:[%s12413_s0 + $0x138] sm:$0xff] }
  0xca   :  { %684 = vrot.lane.b32.xlu1 %v8307_v31, %s7680_s23  ;;  %492 = vrot.lane.b32.xlu0 %v8307_v31, %s7683_s27  ;;  %v890_v59 = vsel %vm875_vm1, %v825_v56, %v455_v54 }
  0xcb   :  { %6309 = vmatprep.mubr.msk.f32.mxu0 %vm810_vm0, %v1034_v39 }
  0xcc   :  { %v647_v60 = vpop.permute.xlu0 %646  ;;  %v265_v61 = vpop.permute.xlu1 %264 }
  0xcd   :  { %v955_v62 = vsel %vm940_vm2, %v890_v59, %v647_v60  ;;  %v1036_v22 = vmul.f32 %v265_v61, %v73_v57  ;;  %v826_v5 = vsel %vm810_vm0, %v265_v61, %v7989_v46  ;;  %v8427_v59 = vld [vmem:[%s12413_s0 + $0x270] sm:$0xff] }
  0xce   :  { %v1033_v3 = vmul.f32 %v955_v62, %v7980_v45  ;;  %494 = vrot.lane.b32.xlu1 %v8335_v44, %s7683_s27  ;;  %302 = vrot.lane.b32.xlu0 %v8335_v44, %s7681_s24 }
  0xd0   :  { %1480 = vmatmul.mubr.f32.gmra.mrb[28].mxu0 %v1033_v3  ;;  %v457_v6 = vpop.permute.xlu0 %456  ;;  %v649_v7 = vpop.permute.xlu1 %648  ;;  %v83_v3 = vld [vmem:[%s12413_s0 + $0x148] sm:$0xff] }
  0xd1   :  { %v891_v8 = vsel %vm875_vm1, %v826_v5, %v457_v6  ;;  %6310 = vmatprep.mubr.msk.f32.mxu0 %vm810_vm0, %v1036_v22 }
  0xd2   :  { %v956_v45 = vsel %vm940_vm2, %v891_v8, %v649_v7  ;;  %304 = vrot.lane.b32.xlu1 %v8347_v4, %s7681_s24  ;;  %686 = vrot.lane.b32.xlu0 %v8335_v44, %s7680_s23 }
  0xd3   :  { %v1035_v10 = vmul.f32 %v956_v45, %v7989_v46  ;;  %v8375_v46 = vld [vmem:[%s12413_s0 + $0x240] sm:$0xff] }
  0xd4   :  { %v267_v12 = vpop.permute.xlu0 %266  ;;  %v459_v13 = vpop.permute.xlu1 %458 }
  0xd5   :  { %v827_v14 = vsel %vm810_vm0, %v267_v12, %v8002_v47  ;;  %v1038_v41 = vmul.f32 %v267_v12, %v75_v0  ;;  %1485 = vmatmul.mubr.f32.gmra.mrb[30].mxu0 %v1035_v10  ;;  %v85_v0 = vld [vmem:[%s12413_s0 + $0x158] sm:$0xff] }
  0xd6   :  { %688 = vrot.lane.b32.xlu1 %v8347_v4, %s7680_s23  ;;  %496 = vrot.lane.b32.xlu0 %v8347_v4, %s7683_s27  ;;  %v892_v18 = vsel %vm875_vm1, %v827_v14, %v459_v13 }
  0xd7   :  { %6311 = vmatprep.mubr.msk.f32.mxu0 %vm810_vm0, %v1038_v41 }
  0xd8   :  { %v651_v19 = vpop.permute.xlu0 %650  ;;  %v269_v20 = vpop.permute.xlu1 %268 }
  0xd9   :  { %v957_v21 = vsel %vm940_vm2, %v892_v18, %v651_v19  ;;  %v1040_v33 = vmul.f32 %v269_v20, %v77_v16  ;;  %v828_v27 = vsel %vm810_vm0, %v269_v20, %v8011_v48  ;;  %v8467_v18 = vld [vmem:[%s12413_s0 + $0x290] sm:$0xff] }
  0xda   :  { %v1037_v23 = vmul.f32 %v957_v21, %v8002_v47  ;;  %498 = vrot.lane.b32.xlu1 %v8375_v46, %s7683_s27  ;;  %306 = vrot.lane.b32.xlu0 %v8375_v46, %s7681_s24 }
  0xdc   :  { %1490 = vmatmul.mubr.f32.gmra.mrb[32].mxu0 %v1037_v23  ;;  %v461_v28 = vpop.permute.xlu0 %460  ;;  %v653_v29 = vpop.permute.xlu1 %652  ;;  %v87_v23 = vld [vmem:[%s12413_s0 + $0x168] sm:$0xff] }
  0xdd   :  { %v893_v11 = vsel %vm875_vm1, %v828_v27, %v461_v28  ;;  %6312 = vmatprep.mubr.msk.f32.mxu0 %vm810_vm0, %v1040_v33 }
  0xde   :  { %v958_v47 = vsel %vm940_vm2, %v893_v11, %v653_v29  ;;  %308 = vrot.lane.b32.xlu1 %v8387_v25, %s7681_s24  ;;  %690 = vrot.lane.b32.xlu0 %v8375_v46, %s7680_s23 }
  0xdf   :  { %v1039_v32 = vmul.f32 %v958_v47, %v8011_v48  ;;  %v8415_v48 = vld [vmem:[%s12413_s0 + $0x260] sm:$0xff] }
  0xe0   :  { %v271_v34 = vpop.permute.xlu0 %270  ;;  %v463_v35 = vpop.permute.xlu1 %462 }
  0xe1   :  { %v829_v36 = vsel %vm810_vm0, %v271_v34, %v8024_v49  ;;  %v1042_v43 = vmul.f32 %v271_v34, %v79_v30  ;;  %1495 = vmatmul.mubr.f32.gmra.mrb[34].mxu0 %v1039_v32  ;;  %v89_v30 = vld [vmem:[%s12413_s0 + $0x178] sm:$0xff] }
  0xe2   :  { %692 = vrot.lane.b32.xlu1 %v8387_v25, %s7680_s23  ;;  %500 = vrot.lane.b32.xlu0 %v8387_v25, %s7683_s27  ;;  %v894_v52 = vsel %vm875_vm1, %v829_v36, %v463_v35 }
  0xe3   :  { %6313 = vmatprep.mubr.msk.f32.mxu0 %vm810_vm0, %v1042_v43 }
  0xe4   :  { %v655_v53 = vpop.permute.xlu0 %654  ;;  %v273_v54 = vpop.permute.xlu1 %272 }
  0xe5   :  { %v959_v56 = vsel %vm940_vm2, %v894_v52, %v655_v53  ;;  %v1044_v39 = vmul.f32 %v273_v54, %v81_v38  ;;  %v830_v60 = vsel %vm810_vm0, %v273_v54, %v8033_v50  ;;  %v8507_v52 = vld [vmem:[%s12413_s0 + $0x2b0] sm:$0xff] }
  0xe6   :  { %v1041_v57 = vmul.f32 %v959_v56, %v8024_v49  ;;  %502 = vrot.lane.b32.xlu1 %v8415_v48, %s7683_s27  ;;  %310 = vrot.lane.b32.xlu0 %v8415_v48, %s7681_s24 }
  0xe8   :  { %1500 = vmatmul.mubr.f32.gmra.mrb[36].mxu0 %v1041_v57  ;;  %v465_v61 = vpop.permute.xlu0 %464  ;;  %v657_v62 = vpop.permute.xlu1 %656  ;;  %v91_v57 = vld [vmem:[%s12413_s0 + $0x188] sm:$0xff] }
  0xe9   :  { %v895_v22 = vsel %vm875_vm1, %v830_v60, %v465_v61  ;;  %6314 = vmatprep.mubr.msk.f32.mxu0 %vm810_vm0, %v1044_v39 }
  0xea   :  { %v960_v49 = vsel %vm940_vm2, %v895_v22, %v657_v62  ;;  %312 = vrot.lane.b32.xlu1 %v8427_v59, %s7681_s24  ;;  %694 = vrot.lane.b32.xlu0 %v8415_v48, %s7680_s23 }
  0xeb   :  { %v1043_v5 = vmul.f32 %v960_v49, %v8033_v50  ;;  %v8455_v50 = vld [vmem:[%s12413_s0 + $0x280] sm:$0xff] }
  0xec   :  { %v275_v6 = vpop.permute.xlu0 %274  ;;  %v467_v7 = vpop.permute.xlu1 %466 }
  0xed   :  { %v831_v8 = vsel %vm810_vm0, %v275_v6, %v8050_v55  ;;  %v1046_v45 = vmul.f32 %v275_v6, %v83_v3  ;;  %1505 = vmatmul.mubr.f32.gmra.mrb[38].mxu0 %v1043_v5  ;;  %v93_v3 = vld [vmem:[%s12413_s0 + $0x198] sm:$0xff] }
  0xee   :  { %696 = vrot.lane.b32.xlu1 %v8427_v59, %s7680_s23  ;;  %504 = vrot.lane.b32.xlu0 %v8427_v59, %s7683_s27  ;;  %v896_v10 = vsel %vm875_vm1, %v831_v8, %v467_v7 }
  0xef   :  { %6315 = vmatprep.mubr.msk.f32.mxu0 %vm810_vm0, %v1046_v45 }
  0xf0   :  { %v659_v12 = vpop.permute.xlu0 %658  ;;  %v277_v13 = vpop.permute.xlu1 %276 }
  0xf1   :  { %v961_v14 = vsel %vm940_vm2, %v896_v10, %v659_v12  ;;  %v1048_v41 = vmul.f32 %v277_v13, %v85_v0  ;;  %v832_v19 = vsel %vm810_vm0, %v277_v13, %v8067_v63  ;;  %v8547_v10 = vld [vmem:[%s12413_s0 + $0x2d0] sm:$0xff] }
  0xf2   :  { %v1045_v16 = vmul.f32 %v961_v14, %v8050_v55  ;;  %506 = vrot.lane.b32.xlu1 %v8455_v50, %s7683_s27  ;;  %314 = vrot.lane.b32.xlu0 %v8455_v50, %s7681_s24 }
  0xf4   :  { %1510 = vmatmul.mubr.f32.gmra.mrb[40].mxu0 %v1045_v16  ;;  %v469_v20 = vpop.permute.xlu0 %468  ;;  %v661_v21 = vpop.permute.xlu1 %660  ;;  %v95_v16 = vld [vmem:[%s12413_s0 + $0x1a8] sm:$0xff] }
  0xf5   :  { %v897_v33 = vsel %vm875_vm1, %v832_v19, %v469_v20  ;;  %6316 = vmatprep.mubr.msk.f32.mxu0 %vm810_vm0, %v1048_v41 }
  0xf6   :  { %v962_v55 = vsel %vm940_vm2, %v897_v33, %v661_v21  ;;  %316 = vrot.lane.b32.xlu1 %v8467_v18, %s7681_s24  ;;  %698 = vrot.lane.b32.xlu0 %v8455_v50, %s7680_s23 }
  0xf7   :  { %v1047_v27 = vmul.f32 %v962_v55, %v8067_v63  ;;  %v8495_v63 = vld [vmem:[%s12413_s0 + $0x2a0] sm:$0xff] }
  0xf8   :  { %v279_v28 = vpop.permute.xlu0 %278  ;;  %v471_v29 = vpop.permute.xlu1 %470 }
  0xf9   :  { %v833_v11 = vsel %vm810_vm0, %v279_v28, %v8095_v1  ;;  %v1050_v47 = vmul.f32 %v279_v28, %v87_v23  ;;  %1515 = vmatmul.mubr.f32.gmra.mrb[42].mxu0 %v1047_v27  ;;  %v97_v23 = vld [vmem:[%s12413_s0 + $0x1b8] sm:$0xff] }
  0xfa   :  { %700 = vrot.lane.b32.xlu1 %v8467_v18, %s7680_s23  ;;  %508 = vrot.lane.b32.xlu0 %v8467_v18, %s7683_s27  ;;  %v898_v32 = vsel %vm875_vm1, %v833_v11, %v471_v29 }
  0xfb   :  { %6317 = vmatprep.mubr.msk.f32.mxu0 %vm810_vm0, %v1050_v47 }
  0xfc   :  { %v663_v34 = vpop.permute.xlu0 %662  ;;  %v281_v35 = vpop.permute.xlu1 %280 }
  0xfd   :  { %v963_v36 = vsel %vm940_vm2, %v898_v32, %v663_v34  ;;  %v1052_v43 = vmul.f32 %v281_v35, %v89_v30  ;;  %v834_v53 = vsel %vm810_vm0, %v281_v35, %v8107_v24  ;;  %v8587_v32 = vld [vmem:[%s12413_s0 + $0x2f0] sm:$0xff] }
  0xfe   :  { %v1049_v38 = vmul.f32 %v963_v36, %v8095_v1  ;;  %510 = vrot.lane.b32.xlu1 %v8495_v63, %s7683_s27  ;;  %318 = vrot.lane.b32.xlu0 %v8495_v63, %s7681_s24 }
 0x100   :  { %1520 = vmatmul.mubr.f32.gmra.mrb[44].mxu0 %v1049_v38  ;;  %v473_v54 = vpop.permute.xlu0 %472  ;;  %v665_v56 = vpop.permute.xlu1 %664  ;;  %v99_v38 = vld [vmem:[%s12413_s0 + $0x1c8] sm:$0xff] }
 0x101   :  { %v899_v39 = vsel %vm875_vm1, %v834_v53, %v473_v54  ;;  %6318 = vmatprep.mubr.msk.f32.mxu0 %vm810_vm0, %v1052_v43 }
 0x102   :  { %v964_v1 = vsel %vm940_vm2, %v899_v39, %v665_v56  ;;  %320 = vrot.lane.b32.xlu1 %v8507_v52, %s7681_s24  ;;  %702 = vrot.lane.b32.xlu0 %v8495_v63, %s7680_s23 }
 0x103   :  { %v1051_v60 = vmul.f32 %v964_v1, %v8107_v24  ;;  %v8535_v24 = vld [vmem:[%s12413_s0 + $0x2c0] sm:$0xff] }
 0x104   :  { %v283_v61 = vpop.permute.xlu0 %282  ;;  %v475_v62 = vpop.permute.xlu1 %474 }
 0x105   :  { %v835_v22 = vsel %vm810_vm0, %v283_v61, %v8135_v15  ;;  %v1054_v49 = vmul.f32 %v283_v61, %v91_v57  ;;  %1525 = vmatmul.mubr.f32.gmra.mrb[46].mxu0 %v1051_v60  ;;  %v101_v57 = vld [vmem:[%s12413_s0 + $0x1d8] sm:$0xff] }
 0x106   :  { %704 = vrot.lane.b32.xlu1 %v8507_v52, %s7680_s23  ;;  %512 = vrot.lane.b32.xlu0 %v8507_v52, %s7683_s27  ;;  %v900_v5 = vsel %vm875_vm1, %v835_v22, %v475_v62 }
 0x107   :  { %6319 = vmatprep.mubr.msk.f32.mxu0 %vm810_vm0, %v1054_v49 }
 0x108   :  { %v667_v6 = vpop.permute.xlu0 %666  ;;  %v285_v7 = vpop.permute.xlu1 %284 }
 0x109   :  { %v965_v8 = vsel %vm940_vm2, %v900_v5, %v667_v6  ;;  %v1056_v45 = vmul.f32 %v285_v7, %v93_v3  ;;  %v836_v12 = vsel %vm810_vm0, %v285_v7, %v8147_v58  ;;  %v8627_v5 = vld [vmem:[%s12413_s0 + $0x310] sm:$0xff] }
 0x10a   :  { %v1053_v0 = vmul.f32 %v965_v8, %v8135_v15  ;;  %514 = vrot.lane.b32.xlu1 %v8535_v24, %s7683_s27  ;;  %322 = vrot.lane.b32.xlu0 %v8535_v24, %s7681_s24 }
 0x10c   :  { %1530 = vmatmul.mubr.f32.gmra.mrb[48].mxu0 %v1053_v0  ;;  %v477_v13 = vpop.permute.xlu0 %476  ;;  %v669_v14 = vpop.permute.xlu1 %668  ;;  %v103_v0 = vld [vmem:[%s12413_s0 + $0x1e8] sm:$0xff] }
 0x10d   :  { %v901_v41 = vsel %vm875_vm1, %v836_v12, %v477_v13  ;;  %6320 = vmatprep.mubr.msk.f32.mxu0 %vm810_vm0, %v1056_v45 }
 0x10e   :  { %v966_v15 = vsel %vm940_vm2, %v901_v41, %v669_v14  ;;  %324 = vrot.lane.b32.xlu1 %v8547_v10, %s7681_s24  ;;  %706 = vrot.lane.b32.xlu0 %v8535_v24, %s7680_s23 }
 0x10f   :  { %v1055_v19 = vmul.f32 %v966_v15, %v8147_v58  ;;  %v8575_v58 = vld [vmem:[%s12413_s0 + $0x2e0] sm:$0xff] }
 0x110   :  { %v287_v20 = vpop.permute.xlu0 %286  ;;  %v479_v21 = vpop.permute.xlu1 %478 }
 0x111   :  { %v837_v33 = vsel %vm810_vm0, %v287_v20, %v8175_v26  ;;  %v1058_v55 = vmul.f32 %v287_v20, %v95_v16  ;;  %1535 = vmatmul.mubr.f32.gmra.mrb[50].mxu0 %v1055_v19  ;;  %v105_v16 = vld [vmem:[%s12413_s0 + $0x1f8] sm:$0xff] }
 0x112   :  { %708 = vrot.lane.b32.xlu1 %v8547_v10, %s7680_s23  ;;  %516 = vrot.lane.b32.xlu0 %v8547_v10, %s7683_s27  ;;  %v902_v27 = vsel %vm875_vm1, %v837_v33, %v479_v21 }
 0x113   :  { %6321 = vmatprep.mubr.msk.f32.mxu0 %vm810_vm0, %v1058_v55 }
 0x114   :  { %v671_v28 = vpop.permute.xlu0 %670  ;;  %v289_v29 = vpop.permute.xlu1 %288 }
 0x115   :  { %v967_v11 = vsel %vm940_vm2, %v902_v27, %v671_v28  ;;  %v1060_v47 = vmul.f32 %v289_v29, %v97_v23  ;;  %v838_v34 = vsel %vm810_vm0, %v289_v29, %v8187_v17  ;;  %v8667_v27 = vld [vmem:[%s12413_s0 + $0x330] sm:$0xff] }
 0x116   :  { %v1057_v30 = vmul.f32 %v967_v11, %v8175_v26  ;;  %518 = vrot.lane.b32.xlu1 %v8575_v58, %s7683_s27  ;;  %326 = vrot.lane.b32.xlu0 %v8575_v58, %s7681_s24 }
 0x118   :  { %1540 = vmatmul.mubr.f32.gmra.mrb[52].mxu0 %v1057_v30  ;;  %v481_v35 = vpop.permute.xlu0 %480  ;;  %v673_v36 = vpop.permute.xlu1 %672  ;;  %v107_v30 = vld [vmem:[%s12413_s0 + $0x208] sm:$0xff] }
 0x119   :  { %v903_v43 = vsel %vm875_vm1, %v838_v34, %v481_v35  ;;  %6322 = vmatprep.mubr.msk.f32.mxu0 %vm810_vm0, %v1060_v47 }
 0x11a   :  { %v968_v26 = vsel %vm940_vm2, %v903_v43, %v673_v36  ;;  %328 = vrot.lane.b32.xlu1 %v8587_v32, %s7681_s24  ;;  %710 = vrot.lane.b32.xlu0 %v8575_v58, %s7680_s23 }
 0x11b   :  { %v1059_v53 = vmul.f32 %v968_v26, %v8187_v17  ;;  %v8615_v17 = vld [vmem:[%s12413_s0 + $0x300] sm:$0xff] }
 0x11c   :  { %v291_v54 = vpop.permute.xlu0 %290  ;;  %v483_v56 = vpop.permute.xlu1 %482 }
 0x11d   :  { %v839_v39 = vsel %vm810_vm0, %v291_v54, %v8215_v37  ;;  %v1062_v1 = vmul.f32 %v291_v54, %v99_v38  ;;  %1545 = vmatmul.mubr.f32.gmra.mrb[54].mxu0 %v1059_v53  ;;  %v109_v38 = vld [vmem:[%s12413_s0 + $0x218] sm:$0xff] }
 0x11e   :  { %712 = vrot.lane.b32.xlu1 %v8587_v32, %s7680_s23  ;;  %520 = vrot.lane.b32.xlu0 %v8587_v32, %s7683_s27  ;;  %v904_v60 = vsel %vm875_vm1, %v839_v39, %v483_v56 }
 0x11f   :  { %6323 = vmatprep.mubr.msk.f32.mxu0 %vm810_vm0, %v1062_v1 }
 0x120   :  { %v675_v61 = vpop.permute.xlu0 %674  ;;  %v293_v62 = vpop.permute.xlu1 %292 }
 0x121   :  { %v969_v22 = vsel %vm940_vm2, %v904_v60, %v675_v61  ;;  %v1064_v49 = vmul.f32 %v293_v62, %v101_v57  ;;  %v840_v6 = vsel %vm810_vm0, %v293_v62, %v8227_v51  ;;  %v8707_v60 = vld [vmem:[%s12413_s0 + $0x350] sm:$0xff] }
 0x122   :  { %v1061_v3 = vmul.f32 %v969_v22, %v8215_v37  ;;  %522 = vrot.lane.b32.xlu1 %v8615_v17, %s7683_s27  ;;  %330 = vrot.lane.b32.xlu0 %v8615_v17, %s7681_s24 }
 0x124   :  { %1550 = vmatmul.mubr.f32.gmra.mrb[56].mxu0 %v1061_v3  ;;  %v485_v7 = vpop.permute.xlu0 %484  ;;  %v677_v8 = vpop.permute.xlu1 %676  ;;  %v111_v3 = vld [vmem:[%s12413_s0 + $0x228] sm:$0xff] }
 0x125   :  { %v905_v45 = vsel %vm875_vm1, %v840_v6, %v485_v7  ;;  %6324 = vmatprep.mubr.msk.f32.mxu0 %vm810_vm0, %v1064_v49 }
 0x126   :  { %v970_v37 = vsel %vm940_vm2, %v905_v45, %v677_v8  ;;  %332 = vrot.lane.b32.xlu1 %v8627_v5, %s7681_s24  ;;  %714 = vrot.lane.b32.xlu0 %v8615_v17, %s7680_s23 }
 0x127   :  { %v1063_v12 = vmul.f32 %v970_v37, %v8227_v51  ;;  %v8655_v51 = vld [vmem:[%s12413_s0 + $0x320] sm:$0xff] }
 0x128   :  { %v295_v13 = vpop.permute.xlu0 %294  ;;  %v487_v14 = vpop.permute.xlu1 %486 }
 0x129   :  { %v841_v41 = vsel %vm810_vm0, %v295_v13, %v8255_v40  ;;  %v1066_v15 = vmul.f32 %v295_v13, %v103_v0  ;;  %1555 = vmatmul.mubr.f32.gmra.mrb[58].mxu0 %v1063_v12  ;;  %v113_v0 = vld [vmem:[%s12413_s0 + $0x238] sm:$0xff] }
 0x12a   :  { %716 = vrot.lane.b32.xlu1 %v8627_v5, %s7680_s23  ;;  %524 = vrot.lane.b32.xlu0 %v8627_v5, %s7683_s27  ;;  %v906_v19 = vsel %vm875_vm1, %v841_v41, %v487_v14 }
 0x12b   :  { %6325 = vmatprep.mubr.msk.f32.mxu0 %vm810_vm0, %v1066_v15 }
 0x12c   :  { %v679_v20 = vpop.permute.xlu0 %678  ;;  %v297_v21 = vpop.permute.xlu1 %296 }
 0x12d   :  { %v971_v33 = vsel %vm940_vm2, %v906_v19, %v679_v20  ;;  %v1068_v55 = vmul.f32 %v297_v21, %v105_v16  ;;  %v842_v28 = vsel %vm810_vm0, %v297_v21, %v8267_v9  ;;  %v8747_v19 = vld [vmem:[%s12413_s0 + $0x370] sm:$0xff] }
 0x12e   :  { %v1065_v23 = vmul.f32 %v971_v33, %v8255_v40  ;;  %526 = vrot.lane.b32.xlu1 %v8655_v51, %s7683_s27  ;;  %334 = vrot.lane.b32.xlu0 %v8655_v51, %s7681_s24 }
 0x130   :  { %1560 = vmatmul.mubr.f32.gmra.mrb[60].mxu0 %v1065_v23  ;;  %v489_v29 = vpop.permute.xlu0 %488  ;;  %v681_v11 = vpop.permute.xlu1 %680  ;;  %v115_v23 = vld [vmem:[%s12413_s0 + $0x248] sm:$0xff] }
 0x131   :  { %v907_v47 = vsel %vm875_vm1, %v842_v28, %v489_v29  ;;  %6326 = vmatprep.mubr.msk.f32.mxu0 %vm810_vm0, %v1068_v55 }
 0x132   :  { %v972_v40 = vsel %vm940_vm2, %v907_v47, %v681_v11  ;;  %336 = vrot.lane.b32.xlu1 %v8667_v27, %s7681_s24  ;;  %718 = vrot.lane.b32.xlu0 %v8655_v51, %s7680_s23 }
 0x133   :  { %v1067_v34 = vmul.f32 %v972_v40, %v8267_v9  ;;  %v8695_v9 = vld [vmem:[%s12413_s0 + $0x340] sm:$0xff] }
 0x134   :  { %v299_v35 = vpop.permute.xlu0 %298  ;;  %v491_v36 = vpop.permute.xlu1 %490 }
 0x135   :  { %v843_v43 = vsel %vm810_vm0, %v299_v35, %v8295_v42  ;;  %v1070_v26 = vmul.f32 %v299_v35, %v107_v30  ;;  %1565 = vmatmul.mubr.f32.gmra.mrb[62].mxu0 %v1067_v34  ;;  %v117_v30 = vld [vmem:[%s12413_s0 + $0x258] sm:$0xff] }
 0x136   :  { %720 = vrot.lane.b32.xlu1 %v8667_v27, %s7680_s23  ;;  %528 = vrot.lane.b32.xlu0 %v8667_v27, %s7683_s27  ;;  %v908_v53 = vsel %vm875_vm1, %v843_v43, %v491_v36 }
 0x137   :  { %6327 = vmatprep.mubr.msk.f32.mxu0 %vm810_vm0, %v1070_v26 }
 0x138   :  { %v683_v54 = vpop.permute.xlu0 %682  ;;  %v301_v56 = vpop.permute.xlu1 %300 }
 0x139   :  { %v973_v39 = vsel %vm940_vm2, %v908_v53, %v683_v54  ;;  %v1072_v1 = vmul.f32 %v301_v56, %v109_v38  ;;  %v844_v61 = vsel %vm810_vm0, %v301_v56, %v8307_v31  ;;  %v8789_v56 = vld [vmem:[%s12413_s0 + $0x390] sm:$0xff] }
 0x13a   :  { %v1069_v57 = vmul.f32 %v973_v39, %v8295_v42  ;;  %530 = vrot.lane.b32.xlu1 %v8695_v9, %s7683_s27  ;;  %338 = vrot.lane.b32.xlu0 %v8695_v9, %s7681_s24 }
 0x13c   :  { %1570 = vmatmul.mubr.f32.gmra.mrb[64].mxu0 %v1069_v57  ;;  %v493_v62 = vpop.permute.xlu0 %492  ;;  %v685_v22 = vpop.permute.xlu1 %684 }
 0x13d   :  { %v909_v49 = vsel %vm875_vm1, %v844_v61, %v493_v62  ;;  %6328 = vmatprep.mubr.msk.f32.mxu0 %vm810_vm0, %v1072_v1 }
 0x13e   :  { %v974_v42 = vsel %vm940_vm2, %v909_v49, %v685_v22  ;;  %340 = vrot.lane.b32.xlu1 %v8707_v60, %s7681_s24  ;;  %722 = vrot.lane.b32.xlu0 %v8695_v9, %s7680_s23  ;;  %v119_v49 = vld [vmem:[%s12413_s0 + $0x268] sm:$0xff] }
 0x13f   :  { %v1071_v6 = vmul.f32 %v974_v42, %v8307_v31  ;;  %v8735_v31 = vld [vmem:[%s12413_s0 + $0x360] sm:$0xff] }
 0x140   :  { %v303_v7 = vpop.permute.xlu0 %302  ;;  %v495_v8 = vpop.permute.xlu1 %494 }
 0x141   :  { %v845_v45 = vsel %vm810_vm0, %v303_v7, %v8335_v44  ;;  %v1074_v37 = vmul.f32 %v303_v7, %v111_v3  ;;  %1575 = vmatmul.mubr.f32.gmra.mrb[66].mxu0 %v1071_v6 }
 0x142   :  { %724 = vrot.lane.b32.xlu1 %v8707_v60, %s7680_s23  ;;  %532 = vrot.lane.b32.xlu0 %v8707_v60, %s7683_s27  ;;  %v910_v12 = vsel %vm875_vm1, %v845_v45, %v495_v8 }
 0x143   :  { %6329 = vmatprep.mubr.msk.f32.mxu0 %vm810_vm0, %v1074_v37  ;;  %v8821_v37 = vld [vmem:[%s12413_s0 + $0x3a0] sm:$0xff] }
 0x144   :  { %v687_v13 = vpop.permute.xlu0 %686  ;;  %v305_v14 = vpop.permute.xlu1 %304 }
 0x145   :  { %v975_v41 = vsel %vm940_vm2, %v910_v12, %v687_v13  ;;  %v1076_v15 = vmul.f32 %v305_v14, %v113_v0  ;;  %v846_v20 = vsel %vm810_vm0, %v305_v14, %v8347_v4 }
 0x146   :  { %v1073_v16 = vmul.f32 %v975_v41, %v8335_v44  ;;  %534 = vrot.lane.b32.xlu1 %v8735_v31, %s7683_s27  ;;  %342 = vrot.lane.b32.xlu0 %v8735_v31, %s7681_s24 }
 0x148   :  { %1580 = vmatmul.mubr.f32.gmra.mrb[68].mxu0 %v1073_v16  ;;  %v497_v21 = vpop.permute.xlu0 %496  ;;  %v689_v33 = vpop.permute.xlu1 %688 }
 0x149   :  { %v911_v55 = vsel %vm875_vm1, %v846_v20, %v497_v21  ;;  %6330 = vmatprep.mubr.msk.f32.mxu0 %vm810_vm0, %v1076_v15  ;;  %v8833_v20 = vld [vmem:[%s12413_s0 + $0x3b0] sm:$0xff] }
 0x14a   :  { %v976_v44 = vsel %vm940_vm2, %v911_v55, %v689_v33  ;;  %344 = vrot.lane.b32.xlu1 %v8747_v19, %s7681_s24  ;;  %726 = vrot.lane.b32.xlu0 %v8735_v31, %s7680_s23 }
 0x14b   :  { %v1075_v28 = vmul.f32 %v976_v44, %v8347_v4  ;;  %v8775_v4 = vld [vmem:[%s12413_s0 + $0x380] sm:$0xff] }
 0x14c   :  { %v307_v29 = vpop.permute.xlu0 %306  ;;  %v499_v11 = vpop.permute.xlu1 %498 }
 0x14d   :  { %v847_v47 = vsel %vm810_vm0, %v307_v29, %v8375_v46  ;;  %v1078_v40 = vmul.f32 %v307_v29, %v115_v23  ;;  %1585 = vmatmul.mubr.f32.gmra.mrb[70].mxu0 %v1075_v28  ;;  %v123_v29 = vld [vmem:[%s12413_s0 + $0x288] sm:$0xff] }
 0x14e   :  { %728 = vrot.lane.b32.xlu1 %v8747_v19, %s7680_s23  ;;  %536 = vrot.lane.b32.xlu0 %v8747_v19, %s7683_s27  ;;  %v912_v34 = vsel %vm875_vm1, %v847_v47, %v499_v11 }
 0x14f   :  { %6331 = vmatprep.mubr.msk.f32.mxu0 %vm810_vm0, %v1078_v40 }
 0x150   :  { %v8778_v35 = vpop.f32.mrb[0].mxu0  ;;  %v691_v36 = vpop.permute.xlu0 %690 }
 0x151   :  { %v977_v43 = vsel %vm940_vm2, %v912_v34, %v691_v36  ;;  %v309_v26 = vpop.permute.xlu1 %308  ;;  %v1413_v38 = vpop.f32.mrb[1].mxu0 }
 0x152   :  { %v1077_v53 = vmul.f32 %v977_v43, %v8375_v46  ;;  %v1080_v54 = vmul.f32 %v309_v26, %v117_v30  ;;  %538 = vrot.lane.b32.xlu1 %v8775_v4, %s7683_s27  ;;  %346 = vrot.lane.b32.xlu0 %v8775_v4, %s7681_s24  ;;  %v848_v39 = vsel %vm810_vm0, %v309_v26, %v8387_v25  ;;  %v8865_v43 = vld [vmem:[%s12413_s0 + $0x3c0] sm:$0xff] }
 0x154   :  { %v8793_v1 = vpop.f32.mrb[2].mxu0  ;;  %1590 = vmatmul.mubr.f32.gmra.mrb[72].mxu0 %v1077_v53  ;;  %v501_v57 = vpop.permute.xlu0 %500 }
 0x155   :  { %v913_v46 = vsel %vm875_vm1, %v848_v39, %v501_v57  ;;  %v693_v61 = vpop.permute.xlu1 %692  ;;  %v1418_v62 = vpop.f32.mrb[3].mxu0  ;;  %6332 = vmatprep.mubr.msk.f32.mxu0 %vm810_vm0, %v1080_v54 }
 0x156   :  { %v978_v22 = vsel %vm940_vm2, %v913_v46, %v693_v61  ;;  %348 = vrot.lane.b32.xlu1 %v8789_v56, %s7681_s24  ;;  %730 = vrot.lane.b32.xlu0 %v8775_v4, %s7680_s23  ;;  %v8877_v61 = vld [vmem:[%s12413_s0 + $0x3d0] sm:$0xff] }
 0x157   :  { %v1079_v42 = vmul.f32 %v978_v22, %v8387_v25  ;;  %v121_v25 = vld [vmem:[%s12413_s0 + $0x278] sm:$0xff] }
 0x158   :  { %v311_v3 = vpop.permute.xlu0 %310 }
 0x159   :  { %v849_v6 = vsel %vm810_vm0, %v311_v3, %v8415_v48  ;;  %v1082_v7 = vmul.f32 %v311_v3, %v119_v49  ;;  %v503_v8 = vpop.permute.xlu1 %502  ;;  %1595 = vmatmul.mubr.f32.gmra.mrb[74].mxu0 %v1079_v42 }
 0x15a   :  { %732 = vrot.lane.b32.xlu1 %v8789_v56, %s7680_s23  ;;  %540 = vrot.lane.b32.xlu0 %v8789_v56, %s7683_s27  ;;  %v914_v0 = vsel %vm875_vm1, %v849_v6, %v503_v8 }
 0x15b   :  { %v8812_v45 = vpop.f32.mrb[4].mxu0  ;;  %6333 = vmatprep.mubr.msk.f32.mxu0 %vm810_vm0, %v1082_v7  ;;  %v127_v7 = vld [vmem:[%s12413_s0 + $0x2a8] sm:$0xff] }
 0x15c   :  { %v1423_v12 = vpop.f32.mrb[5].mxu0  ;;  %v695_v13 = vpop.permute.xlu0 %694 }
 0x15d   :  { %v979_v14 = vsel %vm940_vm2, %v914_v0, %v695_v13  ;;  %v313_v41 = vpop.permute.xlu1 %312 }
 0x15e   :  { %v1081_v15 = vmul.f32 %v979_v14, %v8415_v48  ;;  %v1084_v16 = vmul.f32 %v313_v41, %v121_v25  ;;  %542 = vrot.lane.b32.xlu1 %v8821_v37, %s7683_s27  ;;  %350 = vrot.lane.b32.xlu0 %v8821_v37, %s7681_s24  ;;  %v850_v21 = vsel %vm810_vm0, %v313_v41, %v8427_v59  ;;  %v8909_v41 = vld [vmem:[%s12413_s0 + $0x3e0] sm:$0xff] }
 0x160   :  { %v8837_v33 = vpop.f32.mrb[6].mxu0  ;;  %1600 = vmatmul.mubr.f32.gmra.mrb[76].mxu0 %v1081_v15  ;;  %v505_v55 = vpop.permute.xlu0 %504 }
 0x161   :  { %v915_v48 = vsel %vm875_vm1, %v850_v21, %v505_v55  ;;  %v697_v44 = vpop.permute.xlu1 %696  ;;  %v1428_v23 = vpop.f32.mrb[7].mxu0  ;;  %6334 = vmatprep.mubr.msk.f32.mxu0 %vm810_vm0, %v1084_v16 }
 0x162   :  { %v980_v28 = vsel %vm940_vm2, %v915_v48, %v697_v44  ;;  %352 = vrot.lane.b32.xlu1 %v8833_v20, %s7681_s24  ;;  %734 = vrot.lane.b32.xlu0 %v8821_v37, %s7680_s23 }
 0x163   :  { %v1083_v11 = vmul.f32 %v980_v28, %v8427_v59  ;;  %v125_v59 = vld [vmem:[%s12413_s0 + $0x298] sm:$0xff]  ;;  %v8921_v28 = vld [vmem:[%s12413_s0 + $0x3f0] sm:$0xff] }
 0x164   :  { %v315_v47 = vpop.permute.xlu0 %314 }
 0x165   :  { %v851_v40 = vsel %vm810_vm0, %v315_v47, %v8455_v50  ;;  %v1086_v30 = vmul.f32 %v315_v47, %v123_v29  ;;  %v507_v34 = vpop.permute.xlu1 %506  ;;  %1605 = vmatmul.mubr.f32.gmra.mrb[78].mxu0 %v1083_v11 }
 0x166   :  { %736 = vrot.lane.b32.xlu1 %v8833_v20, %s7680_s23  ;;  %544 = vrot.lane.b32.xlu0 %v8833_v20, %s7683_s27  ;;  %v916_v26 = vsel %vm875_vm1, %v851_v40, %v507_v34 }
 0x167   :  { %v8856_v36 = vpop.f32.mrb[8].mxu0  ;;  %6335 = vmatprep.mubr.msk.f32.mxu0 %vm810_vm0, %v1086_v30 }
 0x168   :  { %v1433_v38 = vpop.f32.mrb[9].mxu0  ;;  %v699_v53 = vpop.permute.xlu0 %698 }
 0x169   :  { %v981_v54 = vsel %vm940_vm2, %v916_v26, %v699_v53  ;;  %v317_v39 = vpop.permute.xlu1 %316 }
 0x16a   :  { %v1085_v57 = vmul.f32 %v981_v54, %v8455_v50  ;;  %v1088_v46 = vmul.f32 %v317_v39, %v125_v59  ;;  %546 = vrot.lane.b32.xlu1 %v8865_v43, %s7683_s27  ;;  %354 = vrot.lane.b32.xlu0 %v8865_v43, %s7681_s24  ;;  %v852_v62 = vsel %vm810_vm0, %v317_v39, %v8467_v18  ;;  %v131_v59 = vld [vmem:[%s12413_s0 + $0x2c8] sm:$0xff] }
 0x16c   :  { %v8881_v22 = vpop.f32.mrb[10].mxu0  ;;  %1610 = vmatmul.mubr.f32.gmra.mrb[80].mxu0 %v1085_v57  ;;  %v509_v49 = vpop.permute.xlu0 %508 }
 0x16d   :  { %v917_v50 = vsel %vm875_vm1, %v852_v62, %v509_v49  ;;  %v701_v42 = vpop.permute.xlu1 %700  ;;  %v1438_v3 = vpop.f32.mrb[11].mxu0  ;;  %6336 = vmatprep.mubr.msk.f32.mxu0 %vm810_vm0, %v1088_v46 }
 0x16e   :  { %v982_v6 = vsel %vm940_vm2, %v917_v50, %v701_v42  ;;  %356 = vrot.lane.b32.xlu1 %v8877_v61, %s7681_s24  ;;  %738 = vrot.lane.b32.xlu0 %v8865_v43, %s7680_s23 }
 0x16f   :  { %v1087_v8 = vmul.f32 %v982_v6, %v8467_v18  ;;  %v129_v18 = vld [vmem:[%s12413_s0 + $0x2b8] sm:$0xff] }
 0x170   :  { %v319_v25 = vpop.permute.xlu0 %318 }
 0x171   :  { %v853_v0 = vsel %vm810_vm0, %v319_v25, %v8495_v63  ;;  %v1090_v12 = vmul.f32 %v319_v25, %v127_v7  ;;  %v511_v13 = vpop.permute.xlu1 %510  ;;  %1615 = vmatmul.mubr.f32.gmra.mrb[82].mxu0 %v1087_v8 }
 0x172   :  { %740 = vrot.lane.b32.xlu1 %v8877_v61, %s7680_s23  ;;  %548 = vrot.lane.b32.xlu0 %v8877_v61, %s7683_s27  ;;  %v918_v15 = vsel %vm875_vm1, %v853_v0, %v511_v13 }
 0x173   :  { %v8900_v14 = vpop.f32.mrb[12].mxu0  ;;  %6337 = vmatprep.mubr.msk.f32.mxu0 %vm810_vm0, %v1090_v12 }
 0x174   :  { %v1443_v16 = vpop.f32.mrb[13].mxu0  ;;  %v703_v21 = vpop.permute.xlu0 %702 }
 0x175   :  { %v983_v55 = vsel %vm940_vm2, %v918_v15, %v703_v21  ;;  %v321_v48 = vpop.permute.xlu1 %320 }
 0x176   :  { %v1089_v44 = vmul.f32 %v983_v55, %v8495_v63  ;;  %v1092_v23 = vmul.f32 %v321_v48, %v129_v18  ;;  %550 = vrot.lane.b32.xlu1 %v8909_v41, %s7683_s27  ;;  %358 = vrot.lane.b32.xlu0 %v8909_v41, %s7681_s24  ;;  %v854_v29 = vsel %vm810_vm0, %v321_v48, %v8507_v52 }
 0x178   :  { %v8925_v11 = vpop.f32.mrb[14].mxu0  ;;  %1620 = vmatmul.mubr.f32.gmra.mrb[84].mxu0 %v1089_v44  ;;  %v513_v47 = vpop.permute.xlu0 %512 }
 0x179   :  { %v919_v63 = vsel %vm875_vm1, %v854_v29, %v513_v47  ;;  %v705_v40 = vpop.permute.xlu1 %704  ;;  %v1448_v30 = vpop.f32.mrb[15].mxu0  ;;  %6338 = vmatprep.mubr.msk.f32.mxu0 %vm810_vm0, %v1092_v23  ;;  %v137_v23 = vld [vmem:[%s12413_s0 + $0x2f8] sm:$0xff] }
 0x17a   :  { %v984_v34 = vsel %vm940_vm2, %v919_v63, %v705_v40  ;;  %360 = vrot.lane.b32.xlu1 %v8921_v28, %s7681_s24  ;;  %742 = vrot.lane.b32.xlu0 %v8909_v41, %s7680_s23 }
 0x17b   :  { %v1091_v26 = vmul.f32 %v984_v34, %v8507_v52  ;;  %v133_v52 = vld [vmem:[%s12413_s0 + $0x2d8] sm:$0xff] }
 0x17c   :  { %v323_v38 = vpop.permute.xlu0 %322 }
 0x17d   :  { %v855_v53 = vsel %vm810_vm0, %v323_v38, %v8535_v24  ;;  %v1094_v54 = vmul.f32 %v323_v38, %v131_v59  ;;  %v515_v39 = vpop.permute.xlu1 %514  ;;  %1625 = vmatmul.mubr.f32.gmra.mrb[86].mxu0 %v1091_v26 }
 0x17e   :  { %744 = vrot.lane.b32.xlu1 %v8921_v28, %s7680_s23  ;;  %552 = vrot.lane.b32.xlu0 %v8921_v28, %s7683_s27  ;;  %v920_v46 = vsel %vm875_vm1, %v855_v53, %v515_v39 }
 0x17f   :  { %v8944_v57 = vpop.f32.mrb[16].mxu0  ;;  %6339 = vmatprep.mubr.msk.f32.mxu0 %vm810_vm0, %v1094_v54 }
 0x180   :  { %v1453_v62 = vpop.f32.mrb[17].mxu0  ;;  %v707_v49 = vpop.permute.xlu0 %706 }
 0x181   :  { %v985_v50 = vsel %vm940_vm2, %v920_v46, %v707_v49  ;;  %v325_v42 = vpop.permute.xlu1 %324  ;;  %v1730_v49 = vmul.f32 0.17677669, %v8778_v35  ;;  %v1731_v35 = vmul.f32 0.17677669, %v8793_v1 }
 0x182   :  { %v1093_v3 = vmul.f32 %v985_v50, %v8535_v24  ;;  %v1096_v6 = vmul.f32 %v325_v42, %v133_v52  ;;  %v856_v7 = vsel %vm810_vm0, %v325_v42, %v8547_v10  ;;  %v135_v24 = vld [vmem:[%s12413_s0 + $0x2e8] sm:$0xff] }
 0x184   :  { %v8955_v8 = vpop.f32.mrb[18].mxu0  ;;  %1630 = vmatmul.mubr.f32.gmra.mrb[88].mxu0 %v1093_v3  ;;  %v517_v25 = vpop.permute.xlu0 %516 }
 0x185   :  { %v921_v0 = vsel %vm875_vm1, %v856_v7, %v517_v25  ;;  %v709_v12 = vpop.permute.xlu1 %708  ;;  %v1458_v13 = vpop.f32.mrb[19].mxu0  ;;  %6340 = vmatprep.mubr.msk.f32.mxu0 %vm810_vm0, %v1096_v6  ;;  %v8992_v6 = vld [vmem:[%s12418_s5] ss:$0 sm:$0xff]  ;;  %v1732_v25 = vmul.f32 0.17677669, %v8812_v45 }
 0x186   :  { %v986_v18 = vsel %vm940_vm2, %v921_v0, %v709_v12  ;;  %v1733_v45 = vmul.f32 0.17677669, %v8837_v33 }
 0x187   :  { %v1095_v15 = vmul.f32 %v986_v18, %v8547_v10  ;;  %v9004_v18 = vadd.f32 %v8992_v6, %v1730_v49  ;;  %v9012_v1 = vadd.f32 %v8992_v6, %v1732_v25  ;;  %v145_v49 = vld [vmem:[%s12413_s0 + $0x338] sm:$0xff] }
 0x188   :  { %v327_v16 = vpop.permute.xlu0 %326 }
 0x189   :  { %v857_v21 = vsel %vm810_vm0, %v327_v16, %v8575_v58  ;;  %v1098_v55 = vmul.f32 %v327_v16, %v135_v24  ;;  %v519_v48 = vpop.permute.xlu1 %518  ;;  %1635 = vmatmul.mubr.f32.gmra.mrb[90].mxu0 %v1095_v15 }
 0x18a   :  { %v922_v29 = vsel %vm875_vm1, %v857_v21, %v519_v48 }
 0x18b   :  { %v8966_v44 = vpop.f32.mrb[20].mxu0  ;;  %6341 = vmatprep.mubr.msk.f32.mxu0 %vm810_vm0, %v1098_v55  ;;  %v9009_v55 = vadd.f32 %v8992_v6, %v1731_v35 }
 0x18c   :  { %v1463_v47 = vpop.f32.mrb[21].mxu0  ;;  %v711_v63 = vpop.permute.xlu0 %710 }
 0x18d   :  { %v987_v10 = vsel %vm940_vm2, %v922_v29, %v711_v63  ;;  %v329_v40 = vpop.permute.xlu1 %328  ;;  %v1734_v47 = vmul.f32 0.17677669, %v8856_v36  ;;  %v9030_v36 = vadd.f32 %v8992_v6, %v1733_v45 }
 0x18e   :  { %v1097_v30 = vmul.f32 %v987_v10, %v8575_v58  ;;  %v1100_v34 = vmul.f32 %v329_v40, %v137_v23  ;;  %v858_v59 = vsel %vm810_vm0, %v329_v40, %v8587_v32  ;;  %v139_v58 = vld [vmem:[%s12413_s0 + $0x308] sm:$0xff]  ;;  %v1866_v40 = vsel %vm1865_vm3, %v9004_v18, -inf }
 0x18f   :  { %v1875_v25 = vsel %vm1865_vm3, %v9030_v36, -inf }
 0x190   :  { %v8977_v26 = vpop.f32.mrb[22].mxu0  ;;  %1640 = vmatmul.mubr.f32.gmra.mrb[92].mxu0 %v1097_v30  ;;  %v521_v38 = vpop.permute.xlu0 %520  ;;  %v143_v30 = vld [vmem:[%s12413_s0 + $0x328] sm:$0xff] }
 0x191   :  { %v923_v53 = vsel %vm875_vm1, %v858_v59, %v521_v38  ;;  %v713_v54 = vpop.permute.xlu1 %712  ;;  %v1468_v39 = vpop.f32.mrb[23].mxu0  ;;  %6342 = vmatprep.mubr.msk.f32.mxu0 %vm810_vm0, %v1100_v34  ;;  %v1872_v38 = vsel %vm1865_vm3, %v9012_v1, -inf }
 0x192   :  { %v988_v52 = vsel %vm940_vm2, %v923_v53, %v713_v54  ;;  %v1869_v53 = vsel %vm1865_vm3, %v9009_v55, -inf  ;;  %v9037_v54 = vadd.f32 %v8992_v6, %v1734_v47  ;;  %v1735_v39 = vmul.f32 0.17677669, %v8881_v22 }
 0x193   :  { %v1099_v46 = vmul.f32 %v988_v52, %v8587_v32  ;;  %v141_v32 = vld [vmem:[%s12413_s0 + $0x318] sm:$0xff]  ;;  %v1737_v22 = vmul.f32 0.17677669, %v8925_v11  ;;  %v1738_v11 = vmul.f32 0.17677669, %v8944_v57 }
 0x194   :  { %v331_v62 = vpop.permute.xlu0 %330 }
 0x195   :  { %v859_v50 = vsel %vm810_vm0, %v331_v62, %v8615_v17  ;;  %v1102_v42 = vmul.f32 %v331_v62, %v139_v58  ;;  %v523_v3 = vpop.permute.xlu1 %522  ;;  %1645 = vmatmul.mubr.f32.gmra.mrb[94].mxu0 %v1099_v46  ;;  %v1736_v46 = vmul.f32 0.17677669, %v8900_v14 }
 0x196   :  { %v924_v0 = vsel %vm875_vm1, %v859_v50, %v523_v3 }
 0x197   :  { %v8994_v7 = vpop.f32.mrb[24].mxu0  ;;  %6343 = vmatprep.mubr.msk.f32.mxu0 %vm810_vm0, %v1102_v42 }
 0x198   :  { %v1473_v12 = vpop.f32.mrb[25].mxu0  ;;  %v715_v13 = vpop.permute.xlu0 %714 }
 0x199   :  { %v989_v24 = vsel %vm940_vm2, %v924_v0, %v715_v13  ;;  %v333_v15 = vpop.permute.xlu1 %332  ;;  %v1878_v0 = vsel %vm1865_vm3, %v9037_v54, -inf  ;;  %v9060_v12 = vadd.f32 %v8992_v6, %v1736_v46 }
 0x19a   :  { %v1101_v16 = vmul.f32 %v989_v24, %v8615_v17  ;;  %v1104_v21 = vmul.f32 %v333_v15, %v141_v32  ;;  %v860_v48 = vsel %vm810_vm0, %v333_v15, %v8627_v5  ;;  %v9052_v32 = vadd.f32 %v8992_v6, %v1735_v39 }
 0x19b   :  { %v9065_v15 = vadd.f32 %v8992_v6, %v1737_v22 }
 0x19c   :  { %v9017_v23 = vpop.f32.mrb[26].mxu0  ;;  %1650 = vmatmul.mubr.f32.gmra.mrb[96].mxu0 %v1101_v16  ;;  %v525_v29 = vpop.permute.xlu0 %524  ;;  %v1739_v16 = vmul.f32 0.17677669, %v8955_v8 }
 0x19d   :  { %v925_v17 = vsel %vm875_vm1, %v860_v48, %v525_v29  ;;  %v717_v63 = vpop.permute.xlu1 %716  ;;  %v1478_v10 = vpop.f32.mrb[27].mxu0  ;;  %6344 = vmatprep.mubr.msk.f32.mxu0 %vm810_vm0, %v1104_v21  ;;  %1867 = vmax.xlane.f32.xlu0 %v1866_v40  ;;  %v1740_v29 = vmul.f32 0.17677669, %v8966_v44  ;;  %v147_v44 = vld [vmem:[%s12413_s0 + $0x348] sm:$0xff]  ;;  %v1743_v46 = vmul.f32 0.17677669, %v9017_v23 }
 0x19e   :  { %v990_v33 = vsel %vm940_vm2, %v925_v17, %v717_v63  ;;  %v1881_v17 = vsel %vm1865_vm3, %v9052_v32, -inf  ;;  %v9076_v63 = vadd.f32 %v8992_v6, %v1738_v11  ;;  %v1884_v10 = vsel %vm1865_vm3, %v9060_v12, -inf }
 0x19f   :  { %v1103_v34 = vmul.f32 %v990_v33, %v8627_v5  ;;  %v9086_v33 = vadd.f32 %v8992_v6, %v1739_v16 }
 0x1a0   :  { %v335_v59 = vpop.permute.xlu0 %334 }
 0x1a1   :  { %v861_v52 = vsel %vm810_vm0, %v335_v59, %v8655_v51  ;;  %v1106_v58 = vmul.f32 %v335_v59, %v143_v30  ;;  %v527_v5 = vpop.permute.xlu1 %526  ;;  %1655 = vmatmul.mubr.f32.gmra.mrb[98].mxu0 %v1103_v34  ;;  %1873 = vmax.xlane.f32.xlu0 %v1872_v38  ;;  %v1887_v34 = vsel %vm1865_vm3, %v9065_v15, -inf  ;;  %v9091_v59 = vadd.f32 %v8992_v6, %v1740_v29 }
 0x1a2   :  { %1870 = vmax.xlane.f32.xlu1 %v1869_v53  ;;  %v926_v50 = vsel %vm875_vm1, %v861_v52, %v527_v5  ;;  %v1741_v38 = vmul.f32 0.17677669, %v8977_v26  ;;  %v149_v26 = vld [vmem:[%s12413_s0 + $0x358] sm:$0xff] }
 0x1a3   :  { %v9043_v62 = vpop.f32.mrb[28].mxu0  ;;  %6345 = vmatprep.mubr.msk.f32.mxu0 %vm810_vm0, %v1106_v58  ;;  %v1890_v58 = vsel %vm1865_vm3, %v9076_v63, -inf }
 0x1a4   :  { %v1483_v42 = vpop.f32.mrb[29].mxu0  ;;  %v719_v3 = vpop.permute.xlu0 %718  ;;  %v1744_v23 = vmul.f32 0.17677669, %v9043_v62 }
 0x1a5   :  { %v991_v14 = vsel %vm940_vm2, %v926_v50, %v719_v3  ;;  %v337_v35 = vpop.permute.xlu1 %336  ;;  %1876 = vmax.xlane.f32.xlu0 %v1875_v25 }
 0x1a6   :  { %v1105_v13 = vmul.f32 %v991_v14, %v8655_v51  ;;  %v1108_v24 = vmul.f32 %v337_v35, %v145_v49  ;;  %1879 = vmax.xlane.f32.xlu1 %v1878_v0  ;;  %v862_v21 = vsel %vm810_vm0, %v337_v35, %v8667_v27  ;;  %v1893_v14 = vsel %vm1865_vm3, %v9086_v33, -inf }
 0x1a7   :  { %v1896_v35 = vsel %vm1865_vm3, %v9091_v59, -inf  ;;  %v9128_v62 = vadd.f32 %v8992_v6, %v1744_v23 }
 0x1a8   :  { %v1486_v45 = vpop.f32.mrb[30].mxu0  ;;  %1660 = vmatmul.mubr.f32.gmra.mrb[100].mxu0 %v1105_v13  ;;  %v529_v48 = vpop.permute.xlu0 %528  ;;  %v9119_v13 = vadd.f32 %v8992_v6, %v1743_v46 }
 0x1a9   :  { %v927_v57 = vsel %vm875_vm1, %v862_v21, %v529_v48  ;;  %v721_v47 = vpop.permute.xlu1 %720  ;;  %v1488_v51 = vpop.f32.mrb[31].mxu0  ;;  %6346 = vmatprep.mubr.msk.f32.mxu0 %vm810_vm0, %v1108_v24  ;;  %1882 = vmax.xlane.f32.xlu0 %v1881_v17  ;;  %v1745_v48 = vmul.f32 0.17677669, %v1486_v45  ;;  %v151_v45 = vld [vmem:[%s12413_s0 + $0x368] sm:$0xff] }
 0x1aa   :  { %v992_v8 = vsel %vm940_vm2, %v927_v57, %v721_v47  ;;  %1885 = vmax.xlane.f32.xlu1 %v1884_v10 }
 0x1ab   :  { %v1107_v40 = vmul.f32 %v992_v8, %v8667_v27  ;;  %v1742_v27 = vmul.f32 0.17677669, %v8994_v7  ;;  %v9106_v7 = vadd.f32 %v8992_v6, %v1741_v38 }
 0x1ac   :  { %v339_v30 = vpop.permute.xlu0 %338 }
 0x1ad   :  { %v863_v53 = vsel %vm810_vm0, %v339_v30, %v8695_v9  ;;  %v1110_v39 = vmul.f32 %v339_v30, %v147_v44  ;;  %v531_v52 = vpop.permute.xlu1 %530  ;;  %1665 = vmatmul.mubr.f32.gmra.mrb[102].mxu0 %v1107_v40  ;;  %1888 = vmax.xlane.f32.xlu0 %v1887_v34  ;;  %v9114_v25 = vadd.f32 %v8992_v6, %v1742_v27  ;;  %v1905_v40 = vsel %vm1865_vm3, %v9119_v13, -inf }
 0x1ae   :  { %1891 = vmax.xlane.f32.xlu1 %v1890_v58  ;;  %v928_v49 = vsel %vm875_vm1, %v863_v53, %v531_v52  ;;  %v9140_v30 = vadd.f32 %v8992_v6, %v1745_v48  ;;  %v153_v58 = vld [vmem:[%s12413_s0 + $0x378] sm:$0xff] }
 0x1af   :  { %v1491_v5 = vpop.f32.mrb[32].mxu0  ;;  %6347 = vmatprep.mubr.msk.f32.mxu0 %vm810_vm0, %v1110_v39  ;;  %v1902_v8 = vsel %vm1865_vm3, %v9114_v25, -inf }
 0x1b0   :  { %v1493_v22 = vpop.f32.mrb[33].mxu0  ;;  %v723_v50 = vpop.permute.xlu0 %722  ;;  %v1746_v51 = vmul.f32 0.17677669, %v1491_v5 }
 0x1b1   :  { %v993_v42 = vsel %vm940_vm2, %v928_v49, %v723_v50  ;;  %v341_v3 = vpop.permute.xlu1 %340  ;;  %1894 = vmax.xlane.f32.xlu0 %v1893_v14 }
 0x1b2   :  { %v1109_v0 = vmul.f32 %v993_v42, %v8695_v9  ;;  %v1112_v11 = vmul.f32 %v341_v3, %v149_v26  ;;  %1897 = vmax.xlane.f32.xlu1 %v1896_v35  ;;  %v864_v24 = vsel %vm810_vm0, %v341_v3, %v8707_v60  ;;  %v1899_v9 = vsel %vm1865_vm3, %v9106_v7, -inf }
 0x1b3   :  { %v9145_v52 = vadd.f32 %v8992_v6, %v1746_v51  ;;  %v1911_v3 = vsel %vm1865_vm3, %v9140_v30, -inf  ;;  %v155_v51 = vld [vmem:[%s12413_s0 + $0x388] sm:$0xff] }
 0x1b4   :  { %v1496_v16 = vpop.f32.mrb[34].mxu0  ;;  %1670 = vmatmul.mubr.f32.gmra.mrb[104].mxu0 %v1109_v0  ;;  %v533_v21 = vpop.permute.xlu0 %532 }
 0x1b5   :  { %v929_v29 = vsel %vm875_vm1, %v864_v24, %v533_v21  ;;  %v725_v57 = vpop.permute.xlu1 %724  ;;  %v1498_v47 = vpop.f32.mrb[35].mxu0  ;;  %6348 = vmatprep.mubr.msk.f32.mxu0 %vm810_vm0, %v1112_v11  ;;  %1900 = vmax.xlane.f32.xlu0 %v1899_v9  ;;  %v1747_v34 = vmul.f32 0.17677669, %v1496_v16  ;;  %v1914_v0 = vsel %vm1865_vm3, %v9145_v52, -inf }
 0x1b6   :  { %v994_v17 = vsel %vm940_vm2, %v929_v29, %v725_v57  ;;  %1903 = vmax.xlane.f32.xlu1 %v1902_v8 }
 0x1b7   :  { %v1111_v10 = vmul.f32 %v994_v17, %v8707_v60  ;;  %v1908_v60 = vsel %vm1865_vm3, %v9128_v62, -inf  ;;  %v9155_v22 = vadd.f32 %v8992_v6, %v1747_v34 }
 0x1b8   :  { %v343_v44 = vpop.permute.xlu0 %342 }
 0x1b9   :  { %v865_v38 = vsel %vm810_vm0, %v343_v44, %v8735_v31  ;;  %v1114_v53 = vmul.f32 %v343_v44, %v151_v45  ;;  %v535_v39 = vpop.permute.xlu1 %534  ;;  %1675 = vmatmul.mubr.f32.gmra.mrb[106].mxu0 %v1111_v10  ;;  %1906 = vmax.xlane.f32.xlu0 %v1905_v40  ;;  %v1917_v47 = vsel %vm1865_vm3, %v9155_v22, -inf }
 0x1ba   :  { %1909 = vmax.xlane.f32.xlu1 %v1908_v60  ;;  %v930_v5 = vsel %vm875_vm1, %v865_v38, %v535_v39 }
 0x1bb   :  { %v1501_v27 = vpop.f32.mrb[36].mxu0  ;;  %6349 = vmatprep.mubr.msk.f32.mxu0 %vm810_vm0, %v1114_v53  ;;  %v157_v53 = vld [vmem:[%s12413_s0 + $0x398] sm:$0xff] }
 0x1bc   :  { %v1748_v26 = vmul.f32 0.17677669, %v1501_v27  ;;  %v1503_v46 = vpop.f32.mrb[37].mxu0  ;;  %v727_v49 = vpop.permute.xlu0 %726 }
 0x1bd   :  { %v995_v50 = vsel %vm940_vm2, %v930_v5, %v727_v49  ;;  %v345_v42 = vpop.permute.xlu1 %344  ;;  %1912 = vmax.xlane.f32.xlu0 %v1911_v3 }
 0x1be   :  { %v9161_v14 = vadd.f32 %v8992_v6, %v1748_v26  ;;  %v1113_v35 = vmul.f32 %v995_v50, %v8735_v31  ;;  %v1116_v23 = vmul.f32 %v345_v42, %v153_v58  ;;  %1915 = vmax.xlane.f32.xlu1 %v1914_v0  ;;  %v866_v11 = vsel %vm810_vm0, %v345_v42, %v8747_v19 }
 0x1c0   :  { %v1506_v24 = vpop.f32.mrb[38].mxu0  ;;  %1680 = vmatmul.mubr.f32.gmra.mrb[108].mxu0 %v1113_v35  ;;  %v537_v16 = vpop.permute.xlu0 %536  ;;  %v1920_v21 = vsel %vm1865_vm3, %v9161_v14, -inf }
 0x1c1   :  { %v1749_v48 = vmul.f32 0.17677669, %v1506_v24  ;;  %v931_v29 = vsel %vm875_vm1, %v866_v11, %v537_v16  ;;  %v729_v57 = vpop.permute.xlu1 %728  ;;  %v1508_v31 = vpop.f32.mrb[39].mxu0  ;;  %6350 = vmatprep.mubr.msk.f32.mxu0 %vm810_vm0, %v1116_v23  ;;  %1918 = vmax.xlane.f32.xlu0 %v1917_v47 }
 0x1c2   :  { %v996_v9 = vsel %vm940_vm2, %v931_v29, %v729_v57  ;;  %1921 = vmax.xlane.f32.xlu1 %v1920_v21 }
 0x1c3   :  { %v9179_v17 = vadd.f32 %v8992_v6, %v1749_v48  ;;  %v1115_v8 = vmul.f32 %v996_v9, %v8747_v19  ;;  %v159_v48 = vld [vmem:[%s12413_s0 + $0x3a8] sm:$0xff] }
 0x1c4   :  { %v347_v45 = vpop.permute.xlu0 %346 }
 0x1c5   :  { %v867_v10 = vsel %vm810_vm0, %v347_v45, %v8775_v4  ;;  %v1118_v44 = vmul.f32 %v347_v45, %v155_v51  ;;  %v539_v40 = vpop.permute.xlu1 %538  ;;  %1685 = vmatmul.mubr.f32.gmra.mrb[110].mxu0 %v1115_v8  ;;  %v1923_v34 = vsel %vm1865_vm3, %v9179_v17, -inf }
 0x1c6   :  { %1924 = vmax.xlane.f32.xlu0 %v1923_v34  ;;  %v932_v19 = vsel %vm875_vm1, %v867_v10, %v539_v40 }
 0x1c7   :  { %v1511_v38 = vpop.f32.mrb[40].mxu0  ;;  %6351 = vmatprep.mubr.msk.f32.mxu0 %vm810_vm0, %v1118_v44 }
 0x1c8   :  { %v1750_v39 = vmul.f32 0.17677669, %v1511_v38  ;;  %v1513_v60 = vpop.f32.mrb[41].mxu0  ;;  %v731_v27 = vpop.permute.xlu0 %730 }
 0x1c9   :  { %v997_v58 = vsel %vm940_vm2, %v932_v19, %v731_v27  ;;  %v349_v5 = vpop.permute.xlu1 %348 }
 0x1ca   :  { %v9193_v26 = vadd.f32 %v8992_v6, %v1750_v39  ;;  %v1117_v46 = vmul.f32 %v997_v58, %v8775_v4  ;;  %v1120_v49 = vmul.f32 %v349_v5, %v157_v53  ;;  %v868_v50 = vsel %vm810_vm0, %v349_v5, %v8789_v56 }
 0x1cc   :  { %v1516_v42 = vpop.f32.mrb[42].mxu0  ;;  %1690 = vmatmul.mubr.f32.gmra.mrb[112].mxu0 %v1117_v46  ;;  %v541_v3 = vpop.permute.xlu0 %540  ;;  %v1926_v35 = vsel %vm1865_vm3, %v9193_v26, -inf }
 0x1cd   :  { %v1751_v23 = vmul.f32 0.17677669, %v1516_v42  ;;  %v933_v0 = vsel %vm875_vm1, %v868_v50, %v541_v3  ;;  %v733_v11 = vpop.permute.xlu1 %732  ;;  %1927 = vmax.xlane.f32.xlu1 %v1926_v35  ;;  %v1518_v24 = vpop.f32.mrb[43].mxu0  ;;  %6352 = vmatprep.mubr.msk.f32.mxu0 %vm810_vm0, %v1120_v49  ;;  %v163_v3 = vld [vmem:[%s12413_s0 + $0x3c8] sm:$0xff] }
 0x1ce   :  { %v998_v4 = vsel %vm940_vm2, %v933_v0, %v733_v11 }
 0x1cf   :  { %v9204_v16 = vadd.f32 %v8992_v6, %v1751_v23  ;;  %v1119_v21 = vmul.f32 %v998_v4, %v8789_v56  ;;  %v161_v56 = vld [vmem:[%s12413_s0 + $0x3b8] sm:$0xff] }
 0x1d0   :  { %v351_v29 = vpop.permute.xlu0 %350 }
 0x1d1   :  { %v543_v57 = vpop.permute.xlu1 %542  ;;  %1695 = vmatmul.mubr.f32.gmra.mrb[114].mxu0 %v1119_v21  ;;  %v1929_v31 = vsel %vm1865_vm3, %v9204_v16, -inf  ;;  %v869_v47 = vsel %vm810_vm0, %v351_v29, %v8821_v37  ;;  %v1122_v9 = vmul.f32 %v351_v29, %v159_v48  ;;  %v165_v48 = vld [vmem:[%s12413_s0 + $0x3d8] sm:$0xff] }
 0x1d2   :  { %1930 = vmax.xlane.f32.xlu0 %v1929_v31  ;;  %v934_v10 = vsel %vm875_vm1, %v869_v47, %v543_v57 }
 0x1d3   :  { %v1521_v51 = vpop.f32.mrb[44].mxu0  ;;  %6353 = vmatprep.mubr.msk.f32.mxu0 %vm810_vm0, %v1122_v9 }
 0x1d4   :  { %v1752_v8 = vmul.f32 0.17677669, %v1521_v51  ;;  %v1523_v45 = vpop.f32.mrb[45].mxu0  ;;  %v735_v44 = vpop.permute.xlu0 %734 }
 0x1d5   :  { %v353_v40 = vpop.permute.xlu1 %352  ;;  %v999_v38 = vsel %vm940_vm2, %v934_v10, %v735_v44 }
 0x1d6   :  { %v9220_v34 = vadd.f32 %v8992_v6, %v1752_v8  ;;  %v1124_v53 = vmul.f32 %v353_v40, %v161_v56  ;;  %v1121_v19 = vmul.f32 %v999_v38, %v8821_v37  ;;  %v870_v27 = vsel %vm810_vm0, %v353_v40, %v8833_v20 }
 0x1d8   :  { %v1526_v39 = vpop.f32.mrb[46].mxu0  ;;  %v1932_v60 = vsel %vm1865_vm3, %v9220_v34, -inf  ;;  %1700 = vmatmul.mubr.f32.gmra.mrb[116].mxu0 %v1121_v19  ;;  %v545_v5 = vpop.permute.xlu0 %544 }
 0x1d9   :  { %v1753_v58 = vmul.f32 0.17677669, %v1526_v39  ;;  %v737_v46 = vpop.permute.xlu1 %736  ;;  %1933 = vmax.xlane.f32.xlu1 %v1932_v60  ;;  %v935_v49 = vsel %vm875_vm1, %v870_v27, %v545_v5  ;;  %v1528_v50 = vpop.f32.mrb[47].mxu0  ;;  %6354 = vmatprep.mubr.msk.f32.mxu0 %vm810_vm0, %v1124_v53  ;;  %v167_v27 = vld [vmem:[%s12413_s0 + $0x3e8] sm:$0xff] }
 0x1da   :  { %v1000_v37 = vsel %vm940_vm2, %v935_v49, %v737_v46 }
 0x1db   :  { %v9231_v42 = vadd.f32 %v8992_v6, %v1753_v58  ;;  %v1123_v35 = vmul.f32 %v1000_v37, %v8833_v20 }
 0x1dc   :  { %v355_v23 = vpop.permute.xlu0 %354 }
 0x1dd   :  { %v547_v0 = vpop.permute.xlu1 %546  ;;  %v1935_v11 = vsel %vm1865_vm3, %v9231_v42, -inf  ;;  %v871_v24 = vsel %vm810_vm0, %v355_v23, %v8865_v43  ;;  %v1126_v4 = vmul.f32 %v355_v23, %v163_v3  ;;  %1705 = vmatmul.mubr.f32.gmra.mrb[118].mxu0 %v1123_v35  ;;  %v169_v35 = vld [vmem:[%s12413_s0 + $0x3f8] sm:$0xff] }
 0x1de   :  { %1936 = vmax.xlane.f32.xlu1 %v1935_v11  ;;  %v936_v57 = vsel %vm875_vm1, %v871_v24, %v547_v0 }
 0x1df   :  { %v1531_v21 = vpop.f32.mrb[48].mxu0  ;;  %6355 = vmatprep.mubr.msk.f32.mxu0 %vm810_vm0, %v1126_v4 }
 0x1e0   :  { %v1754_v29 = vmul.f32 0.17677669, %v1531_v21  ;;  %v1533_v20 = vpop.f32.mrb[49].mxu0  ;;  %v739_v31 = vpop.permute.xlu0 %738 }
 0x1e1   :  { %v357_v47 = vpop.permute.xlu1 %356  ;;  %v1001_v51 = vsel %vm940_vm2, %v936_v57, %v739_v31 }
 0x1e2   :  { %v9248_v9 = vadd.f32 %v8992_v6, %v1754_v29  ;;  %v1128_v56 = vmul.f32 %v357_v47, %v165_v48  ;;  %v1125_v8 = vmul.f32 %v1001_v51, %v8865_v43  ;;  %v872_v44 = vsel %vm810_vm0, %v357_v47, %v8877_v61 }
 0x1e4   :  { %v1536_v45 = vpop.f32.mrb[50].mxu0  ;;  %v1938_v10 = vsel %vm1865_vm3, %v9248_v9, -inf  ;;  %1710 = vmatmul.mubr.f32.gmra.mrb[120].mxu0 %v1125_v8  ;;  %v549_v38 = vpop.permute.xlu0 %548 }
 0x1e5   :  { %v1755_v40 = vmul.f32 0.17677669, %v1536_v45  ;;  %v741_v53 = vpop.permute.xlu1 %740  ;;  %1939 = vmax.xlane.f32.xlu1 %v1938_v10  ;;  %v937_v19 = vsel %vm875_vm1, %v872_v44, %v549_v38  ;;  %v1538_v39 = vpop.f32.mrb[51].mxu0  ;;  %6356 = vmatprep.mubr.msk.f32.mxu0 %vm810_vm0, %v1128_v56 }
 0x1e6   :  { %v1002_v43 = vsel %vm940_vm2, %v937_v19, %v741_v53 }
 0x1e7   :  { %v9259_v60 = vadd.f32 %v8992_v6, %v1755_v40  ;;  %v1127_v58 = vmul.f32 %v1002_v43, %v8877_v61 }
 0x1e8   :  { %v359_v5 = vpop.permute.xlu0 %358 }
 0x1e9   :  { %v551_v46 = vpop.permute.xlu1 %550  ;;  %v1941_v49 = vsel %vm1865_vm3, %v9259_v60, -inf  ;;  %v873_v50 = vsel %vm810_vm0, %v359_v5, %v8909_v41  ;;  %v1130_v37 = vmul.f32 %v359_v5, %v167_v27  ;;  %1715 = vmatmul.mubr.f32.gmra.mrb[122].mxu0 %v1127_v58 }
 0x1ea   :  { %1942 = vmax.xlane.f32.xlu1 %v1941_v49  ;;  %v938_v0 = vsel %vm875_vm1, %v873_v50, %v551_v46 }
 0x1eb   :  { %v1541_v3 = vpop.f32.mrb[52].mxu0  ;;  %6357 = vmatprep.mubr.msk.f32.mxu0 %vm810_vm0, %v1130_v37 }
 0x1ec   :  { %v1756_v23 = vmul.f32 0.17677669, %v1541_v3  ;;  %v1543_v61 = vpop.f32.mrb[53].mxu0  ;;  %v743_v11 = vpop.permute.xlu0 %742 }
 0x1ed   :  { %v361_v24 = vpop.permute.xlu1 %360  ;;  %v1003_v21 = vsel %vm940_vm2, %v938_v0, %v743_v11 }
 0x1ee   :  { %v9276_v4 = vadd.f32 %v8992_v6, %v1756_v23  ;;  %v1132_v48 = vmul.f32 %v361_v24, %v169_v35  ;;  %v1129_v29 = vmul.f32 %v1003_v21, %v8909_v41  ;;  %v874_v31 = vsel %vm810_vm0, %v361_v24, %v8921_v28 }
 0x1f0   :  { %v1546_v20 = vpop.f32.mrb[54].mxu0  ;;  %v1944_v57 = vsel %vm1865_vm3, %v9276_v4, -inf  ;;  %1720 = vmatmul.mubr.f32.gmra.mrb[124].mxu0 %v1129_v29  ;;  %v553_v51 = vpop.permute.xlu0 %552 }
 0x1f1   :  { %v1757_v47 = vmul.f32 0.17677669, %v1546_v20  ;;  %v745_v56 = vpop.permute.xlu1 %744  ;;  %1945 = vmax.xlane.f32.xlu1 %v1944_v57  ;;  %v939_v8 = vsel %vm875_vm1, %v874_v31, %v553_v51  ;;  %v1548_v45 = vpop.f32.mrb[55].mxu0  ;;  %6358 = vmatprep.mubr.msk.f32.mxu0 %vm810_vm0, %v1132_v48 }
 0x1f2   :  { %v1004_v41 = vsel %vm940_vm2, %v939_v8, %v745_v56 }
 0x1f3   :  { %v9287_v10 = vadd.f32 %v8992_v6, %v1757_v47  ;;  %v1131_v44 = vmul.f32 %v1004_v41, %v8921_v28 }
 0x1f5   :  { %v1947_v40 = vsel %vm1865_vm3, %v9287_v10, -inf  ;;  %1725 = vmatmul.mubr.f32.gmra.mrb[126].mxu0 %v1131_v44 }
 0x1f6   :  { %1948 = vmax.xlane.f32.xlu1 %v1947_v40 }
 0x1f7   :  { %v1551_v38 = vpop.f32.mrb[56].mxu0 }
 0x1f8   :  { %v1758_v53 = vmul.f32 0.17677669, %v1551_v38  ;;  %v1553_v19 = vpop.f32.mrb[57].mxu0 }
 0x1fa   :  { %v9294_v39 = vadd.f32 %v8992_v6, %v1758_v53 }
 0x1fc   :  { %v1556_v43 = vpop.f32.mrb[58].mxu0  ;;  %v1950_v27 = vsel %vm1865_vm3, %v9294_v39, -inf }
 0x1fd   :  { %v1759_v58 = vmul.f32 0.17677669, %v1556_v43  ;;  %1951 = vmax.xlane.f32.xlu1 %v1950_v27  ;;  %v1558_v5 = vpop.f32.mrb[59].mxu0 }
 0x1ff   :  { %v9299_v28 = vadd.f32 %v8992_v6, %v1759_v58 }
 0x201   :  { %v1953_v46 = vsel %vm1865_vm3, %v9299_v28, -inf }
 0x202   :  { %1954 = vmax.xlane.f32.xlu1 %v1953_v46 }
 0x203   :  { %v1561_v49 = vpop.f32.mrb[60].mxu0 }
 0x204   :  { %v1760_v50 = vmul.f32 0.17677669, %v1561_v49  ;;  %v1563_v37 = vpop.f32.mrb[61].mxu0 }
 0x206   :  { %v9304_v3 = vadd.f32 %v8992_v6, %v1760_v50 }
 0x208   :  { %v1566_v35 = vpop.f32.mrb[62].mxu0  ;;  %v1956_v23 = vsel %vm1865_vm3, %v9304_v3, -inf }
 0x209   :  { %v1761_v61 = vmul.f32 0.17677669, %v1566_v35  ;;  %1957 = vmax.xlane.f32.xlu1 %v1956_v23  ;;  %v1568_v0 = vpop.f32.mrb[63].mxu0 }
 0x20b   :  { %v9309_v11 = vadd.f32 %v8992_v6, %v1761_v61 }
 0x20d   :  { %v1959_v24 = vsel %vm1865_vm3, %v9309_v11, -inf }
 0x20e   :  { %1960 = vmax.xlane.f32.xlu1 %v1959_v24 }
 0x20f   :  { %v1571_v21 = vpop.f32.mrb[64].mxu0 }
 0x210   :  { %v1762_v48 = vmul.f32 0.17677669, %v1571_v21  ;;  %v1573_v29 = vpop.f32.mrb[65].mxu0 }
 0x212   :  { %v9314_v20 = vadd.f32 %v8992_v6, %v1762_v48 }
 0x214   :  { %v1576_v57 = vpop.f32.mrb[66].mxu0  ;;  %v1962_v31 = vsel %vm1865_vm3, %v9314_v20, -inf }
 0x215   :  { %v1763_v47 = vmul.f32 0.17677669, %v1576_v57  ;;  %1963 = vmax.xlane.f32.xlu1 %v1962_v31  ;;  %v1578_v51 = vpop.f32.mrb[67].mxu0 }
 0x217   :  { %v9319_v56 = vadd.f32 %v8992_v6, %v1763_v47 }
 0x219   :  { %v1965_v8 = vsel %vm1865_vm3, %v9319_v56, -inf }
 0x21a   :  { %1966 = vmax.xlane.f32.xlu1 %v1965_v8 }
 0x21b   :  { %v1581_v45 = vpop.f32.mrb[68].mxu0 }
 0x21c   :  { %v1764_v41 = vmul.f32 0.17677669, %v1581_v45  ;;  %v1583_v44 = vpop.f32.mrb[69].mxu0 }
 0x21e   :  { %v9324_v40 = vadd.f32 %v8992_v6, %v1764_v41 }
 0x220   :  { %v1586_v38 = vpop.f32.mrb[70].mxu0  ;;  %v1968_v53 = vsel %vm1865_vm3, %v9324_v40, -inf }
 0x221   :  { %v1765_v19 = vmul.f32 0.17677669, %v1586_v38  ;;  %1969 = vmax.xlane.f32.xlu1 %v1968_v53  ;;  %v1588_v43 = vpop.f32.mrb[71].mxu0 }
 0x223   :  { %v9329_v27 = vadd.f32 %v8992_v6, %v1765_v19 }
 0x225   :  { %v1971_v58 = vsel %vm1865_vm3, %v9329_v27, -inf }
 0x226   :  { %1972 = vmax.xlane.f32.xlu1 %v1971_v58 }
 0x227   :  { %v1591_v5 = vpop.f32.mrb[72].mxu0 }
 0x228   :  { %v1766_v46 = vmul.f32 0.17677669, %v1591_v5  ;;  %v1593_v49 = vpop.f32.mrb[73].mxu0 }
 0x22a   :  { %v9334_v50 = vadd.f32 %v8992_v6, %v1766_v46  ;;  %v1868_v37 = vpop.xlane.xlu0 %1867 }
 0x22b   :  { %v2058_v35 = vsub.f32 %v9004_v18, %v1868_v37 }
 0x22c   :  { %v1596_v23 = vpop.f32.mrb[74].mxu0  ;;  %v1974_v61 = vsel %vm1865_vm3, %v9334_v50, -inf }
 0x22d   :  { %v1767_v0 = vmul.f32 0.17677669, %v1596_v23  ;;  %1975 = vmax.xlane.f32.xlu1 %v1974_v61  ;;  %v1598_v24 = vpop.f32.mrb[75].mxu0  ;;  %v2122_v21 = vmul.f32 1.442695, %v2058_v35 }
 0x22e   :  { %v1874_v29 = vpop.xlane.xlu0 %1873 }
 0x22f   :  { %v9340_v48 = vadd.f32 %v8992_v6, %v1767_v0  ;;  %v1871_v57 = vpop.xlane.xlu1 %1870  ;;  %7131 = vpow2.f32 %v2122_v21  ;;  %v2060_v31 = vsub.f32 %v9012_v1, %v1874_v29 }
 0x230   :  { %v2059_v47 = vsub.f32 %v9009_v55, %v1871_v57 }
 0x231   :  { %v1977_v18 = vsel %vm1865_vm3, %v9340_v48, -inf  ;;  %v2126_v8 = vmul.f32 1.442695, %v2060_v31 }
 0x232   :  { %v2124_v51 = vmul.f32 1.442695, %v2059_v47  ;;  %1978 = vmax.xlane.f32.xlu1 %v1977_v18  ;;  %v1877_v45 = vpop.xlane.xlu0 %1876 }
 0x233   :  { %v1601_v41 = vpop.f32.mrb[76].mxu0  ;;  %v2061_v44 = vsub.f32 %v9030_v36, %v1877_v45  ;;  %v1880_v38 = vpop.xlane.xlu1 %1879 }
 0x234   :  { %v1768_v53 = vmul.f32 0.17677669, %v1601_v41  ;;  %v1603_v19 = vpop.f32.mrb[77].mxu0  ;;  %7133 = vpow2.f32 %v2124_v51  ;;  %v2062_v43 = vsub.f32 %v9037_v54, %v1880_v38 }
 0x235   :  { %7135 = vpow2.f32 %v2126_v8  ;;  %v2128_v55 = vmul.f32 1.442695, %v2061_v44 }
 0x236   :  { %v9349_v1 = vadd.f32 %v8992_v6, %v1768_v53  ;;  %v1883_v58 = vpop.xlane.xlu0 %1882  ;;  %v2130_v35 = vmul.f32 1.442695, %v2062_v43 }
 0x237   :  { %7137 = vpow2.f32 %v2128_v55  ;;  %v2063_v23 = vsub.f32 %v9052_v32, %v1883_v58  ;;  %v1886_v0 = vpop.xlane.xlu1 %1885 }
 0x238   :  { %v1606_v5 = vpop.f32.mrb[78].mxu0  ;;  %v1980_v46 = vsel %vm1865_vm3, %v9349_v1, -inf  ;;  %7139 = vpow2.f32 %v2130_v35  ;;  %v2064_v57 = vsub.f32 %v9060_v12, %v1886_v0 }
 0x239   :  { %v1769_v49 = vmul.f32 0.17677669, %v1606_v5  ;;  %1981 = vmax.xlane.f32.xlu1 %v1980_v46  ;;  %v1608_v37 = vpop.f32.mrb[79].mxu0  ;;  %v9353_v36 = vpop.eup %7131  ;;  %v2132_v29 = vmul.f32 1.442695, %v2063_v23 }
 0x23a   :  { %v2250_v61 = vsel %vm1865_vm3, %v9353_v36, 0.0  ;;  %v1889_v32 = vpop.xlane.xlu0 %1888  ;;  %v2134_v41 = vmul.f32 1.442695, %v2064_v57 }
 0x23b   :  { %v9357_v54 = vadd.f32 %v8992_v6, %v1769_v49  ;;  %2251 = vadd.xlane.f32.xlu0 %v2250_v61  ;;  %7141 = vpow2.f32 %v2132_v29  ;;  %v2065_v44 = vsub.f32 %v9065_v15, %v1889_v32  ;;  %v1892_v38 = vpop.xlane.xlu1 %1891 }
 0x23c   :  { %7143 = vpow2.f32 %v2134_v41  ;;  %v2066_v46 = vsub.f32 %v9076_v63, %v1892_v38 }
 0x23d   :  { %v1983_v24 = vsel %vm1865_vm3, %v9357_v54, -inf  ;;  %v2136_v5 = vmul.f32 1.442695, %v2065_v44 }
 0x23e   :  { %1984 = vmax.xlane.f32.xlu1 %v1983_v24  ;;  %v9363_v21 = vpop.eup %7133  ;;  %v1895_v49 = vpop.xlane.xlu0 %1894  ;;  %v2138_v61 = vmul.f32 1.442695, %v2066_v46 }
 0x23f   :  { %v1611_v31 = vpop.f32.mrb[80].mxu0  ;;  %v2253_v51 = vsel %vm1865_vm3, %v9363_v21, 0.0  ;;  %v9368_v8 = vpop.eup %7135  ;;  %7145 = vpow2.f32 %v2136_v5  ;;  %v2067_v0 = vsub.f32 %v9086_v33, %v1895_v49  ;;  %v2571_v49 = vld [vmem:[%s12416_s3 + $0x8] sm:$0x1f] }
 0x240   :  { %v1770_v47 = vmul.f32 0.17677669, %v1611_v31  ;;  %v1613_v18 = vpop.f32.mrb[81].mxu0  ;;  %2254 = vadd.xlane.f32.xlu0 %v2253_v51  ;;  %v2256_v12 = vsel %vm1865_vm3, %v9368_v8, 0.0  ;;  %v1898_v63 = vpop.xlane.xlu1 %1897  ;;  %7147 = vpow2.f32 %v2138_v61  ;;  %6360 = vmatprep.subr.msk.mxu1 %vm2764_vm4, %v2571_v49 }
 0x241   :  { %v9378_v43 = vpop.eup %7137  ;;  %v2140_v18 = vmul.f32 1.442695, %v2067_v0  ;;  %v2068_v51 = vsub.f32 %v9091_v59, %v1898_v63  ;;  %v12428_v63 = vmov 0.0  }
 0x242   :  { %v9371_v45 = vadd.f32 %v8992_v6, %v1770_v47  ;;  %v2259_v37 = vsel %vm1865_vm3, %v9378_v43, 0.0  ;;  %v9386_v35 = vpop.eup %7139  ;;  %v1901_v41 = vpop.xlane.xlu0 %1900  ;;  %2835 = vmatprep.mubr.f32.mxu1 %v12428_v63 }
 0x243   :  { %v2262_v31 = vsel %vm1865_vm3, %v9386_v35, 0.0  ;;  %7149 = vpow2.f32 %v2140_v18 }
 0x244   :  { %v1616_v53 = vpop.f32.mrb[82].mxu0  ;;  %v1986_v19 = vsel %vm1865_vm3, %v9371_v45, -inf  ;;  %2257 = vadd.xlane.f32.xlu0 %v2256_v12  ;;  %v1904_v5 = vpop.xlane.xlu1 %1903 }
 0x245   :  { %v1771_v55 = vmul.f32 0.17677669, %v1616_v53  ;;  %1987 = vmax.xlane.f32.xlu1 %v1986_v19  ;;  %v1618_v58 = vpop.f32.mrb[83].mxu0  ;;  %v9393_v32 = vpop.eup %7141  ;;  %v2070_v0 = vsub.f32 %v9114_v25, %v1904_v5 }
 0x246   :  { %v2265_v33 = vsel %vm1865_vm3, %v9393_v32, 0.0  ;;  %v9403_v53 = vpop.eup %7143  ;;  %v2069_v58 = vsub.f32 %v9106_v7, %v1901_v41  ;;  %v2570_v7 = vld [vmem:[%s12416_s3] sm:$0x1f] }
 0x247   :  { %v9382_v15 = vadd.f32 %v8992_v6, %v1771_v55  ;;  %v2142_v55 = vmul.f32 1.442695, %v2068_v51  ;;  %v2268_v46 = vsel %vm1865_vm3, %v9403_v53, 0.0  ;;  %6361 = vmatpush1.msk.msra.mxu1 %vm2764_vm4, %v2570_v7  ;;  %v2146_v25 = vmul.f32 1.442695, %v2070_v0 }
 0x248   :  { %2260 = vadd.xlane.f32.xlu0 %v2259_v37  ;;  %v2144_v61 = vmul.f32 1.442695, %v2069_v58  ;;  %7039 = vmatprep.subr.bf16.mxu1 %v12426_v2 }
 0x249   :  { %v1989_v23 = vsel %vm1865_vm3, %v9382_v15, -inf  ;;  %v9414_v37 = vpop.eup %7145  ;;  %7151 = vpow2.f32 %v2142_v55 }
 0x24a   :  { %1990 = vmax.xlane.f32.xlu1 %v1989_v23  ;;  %v2271_v18 = vsel %vm1865_vm3, %v9414_v37, 0.0  ;;  %v9426_v51 = vpop.eup %7147  ;;  %7153 = vpow2.f32 %v2144_v61 }
 0x24b   :  { %v1621_v24 = vpop.f32.mrb[84].mxu0  ;;  %7155 = vpow2.f32 %v2146_v25 }
 0x24c   :  { %v1772_v29 = vmul.f32 0.17677669, %v1621_v24  ;;  %v1623_v57 = vpop.f32.mrb[85].mxu0  ;;  %2263 = vadd.xlane.f32.xlu0 %v2262_v31 }
 0x24d   :  { %v9436_v55 = vpop.eup %7149 }
 0x24e   :  { %v9396_v47 = vadd.f32 %v8992_v6, %v1772_v29  ;;  %v1907_v29 = vpop.xlane.xlu0 %1906  ;;  %v2277_v7 = vsel %vm1865_vm3, %v9436_v55, 0.0 }
 0x250   :  { %v1626_v44 = vpop.f32.mrb[86].mxu0  ;;  %v1992_v38 = vsel %vm1865_vm3, %v9396_v47, -inf  ;;  %2266 = vadd.xlane.f32.xlu0 %v2265_v33  ;;  %v1910_v33 = vpop.xlane.xlu1 %1909 }
 0x251   :  { %v1773_v12 = vmul.f32 0.17677669, %v1626_v44  ;;  %1993 = vmax.xlane.f32.xlu1 %v1992_v38  ;;  %v1628_v19 = vpop.f32.mrb[87].mxu0  ;;  %v2071_v44 = vsub.f32 %v9119_v13, %v1907_v29  ;;  %v9442_v13 = vld [vmem:[%s12418_s5] ss:$0 sm:$0xff] }
 0x253   :  { %v9407_v59 = vadd.f32 %v8992_v6, %v1773_v12  ;;  %v2274_v12 = vsel %vm1865_vm3, %v9426_v51, 0.0  ;;  %v9449_v61 = vpop.eup %7151 }
 0x254   :  { %2269 = vadd.xlane.f32.xlu0 %v2268_v46  ;;  %v2072_v46 = vsub.f32 %v9128_v62, %v1910_v33  ;;  %v2280_v25 = vsel %vm1865_vm3, %v9449_v61, 0.0 }
 0x255   :  { %v1995_v23 = vsel %vm1865_vm3, %v9407_v59, -inf }
 0x256   :  { %1996 = vmax.xlane.f32.xlu1 %v1995_v23  ;;  %v1913_v23 = vpop.xlane.xlu0 %1912  ;;  %v2150_v62 = vmul.f32 1.442695, %v2072_v46 }
 0x257   :  { %v1631_v24 = vpop.f32.mrb[88].mxu0  ;;  %v2073_v29 = vsub.f32 %v9140_v30, %v1913_v23 }
 0x258   :  { %v1774_v57 = vmul.f32 0.17677669, %v1631_v24  ;;  %v1633_v31 = vpop.f32.mrb[89].mxu0  ;;  %2272 = vadd.xlane.f32.xlu0 %v2271_v18  ;;  %v1916_v24 = vpop.xlane.xlu1 %1915 }
 0x25a   :  { %v9429_v41 = vadd.f32 %v8992_v6, %v1774_v57  ;;  %v2148_v6 = vmul.f32 1.442695, %v2071_v44  ;;  %v9456_v44 = vpop.eup %7153 }
 0x25b   :  { %v2283_v30 = vsel %vm1865_vm3, %v9456_v44, 0.0  ;;  %v9466_v46 = vpop.eup %7155 }
 0x25c   :  { %v1636_v38 = vpop.f32.mrb[90].mxu0  ;;  %v1998_v19 = vsel %vm1865_vm3, %v9429_v41, -inf  ;;  %2275 = vadd.xlane.f32.xlu0 %v2274_v12  ;;  %7157 = vpow2.f32 %v2148_v6  ;;  %v2074_v12 = vsub.f32 %v9145_v52, %v1916_v24 }
 0x25d   :  { %v1775_v58 = vmul.f32 0.17677669, %v1636_v38  ;;  %1999 = vmax.xlane.f32.xlu1 %v1998_v19  ;;  %v1638_v5 = vpop.f32.mrb[91].mxu0  ;;  %7159 = vpow2.f32 %v2150_v62  ;;  %v2152_v38 = vmul.f32 1.442695, %v2073_v29  ;;  %v1919_v19 = vpop.xlane.xlu0 %1918  ;;  %v2286_v29 = vsel %vm1865_vm3, %v9466_v46, 0.0 }
 0x25e   :  { %v2075_v62 = vsub.f32 %v9155_v22, %v1919_v19 }
 0x25f   :  { %v9445_v49 = vadd.f32 %v9442_v13, %v1775_v58  ;;  %v1922_v58 = vpop.xlane.xlu1 %1921  ;;  %7161 = vpow2.f32 %v2152_v38 }
 0x260   :  { %2278 = vadd.xlane.f32.xlu0 %v2277_v7 }
 0x261   :  { %v2001_v0 = vsel %vm1865_vm3, %v9445_v49, -inf  ;;  %v1925_v38 = vpop.xlane.xlu0 %1924 }
 0x262   :  { %2002 = vmax.xlane.f32.xlu1 %v2001_v0  ;;  %v2154_v0 = vmul.f32 1.442695, %v2074_v12 }
 0x263   :  { %v1641_v57 = vpop.f32.mrb[92].mxu0  ;;  %v1928_v24 = vpop.xlane.xlu1 %1927 }
 0x264   :  { %v1776_v31 = vmul.f32 0.17677669, %v1641_v57  ;;  %v1643_v18 = vpop.f32.mrb[93].mxu0  ;;  %2281 = vadd.xlane.f32.xlu0 %v2280_v25  ;;  %7163 = vpow2.f32 %v2154_v0  ;;  %v2076_v25 = vsub.f32 %v9161_v14, %v1922_v58  ;;  %v2077_v0 = vsub.f32 %v9179_v17, %v1925_v38 }
 0x265   :  { %v2156_v18 = vmul.f32 1.442695, %v2075_v62 }
 0x266   :  { %v9459_v33 = vadd.f32 %v9442_v13, %v1776_v31  ;;  %v9474_v57 = vpop.eup %7157 }
 0x267   :  { %v1934_v12 = vpop.xlane.xlu1 %1933  ;;  %7165 = vpow2.f32 %v2156_v18  ;;  %v2078_v18 = vsub.f32 %v9193_v26, %v1928_v24 }
 0x268   :  { %v1646_v5 = vpop.f32.mrb[94].mxu0  ;;  %v2004_v6 = vsel %vm1865_vm3, %v9459_v33, -inf  ;;  %2284 = vadd.xlane.f32.xlu0 %v2283_v30  ;;  %v2289_v30 = vsel %vm1865_vm3, %v9474_v57, 0.0 }
 0x269   :  { %v1777_v23 = vmul.f32 0.17677669, %v1646_v5  ;;  %2005 = vmax.xlane.f32.xlu1 %v2004_v6  ;;  %v1648_v7 = vpop.f32.mrb[95].mxu0  ;;  %v9481_v6 = vpop.eup %7159 }
 0x26a   :  { %v2158_v7 = vmul.f32 1.442695, %v2076_v25  ;;  %v2292_v14 = vsel %vm1865_vm3, %v9481_v6, 0.0  ;;  %v1931_v25 = vpop.xlane.xlu0 %1930 }
 0x26b   :  { %v9470_v52 = vadd.f32 %v9442_v13, %v1777_v23 }
 0x26c   :  { %2287 = vadd.xlane.f32.xlu0 %v2286_v29  ;;  %v9491_v29 = vpop.eup %7161  ;;  %7167 = vpow2.f32 %v2158_v7  ;;  %v2162_v7 = vmul.f32 1.442695, %v2078_v18 }
 0x26d   :  { %v2007_v31 = vsel %vm1865_vm3, %v9470_v52, -inf  ;;  %v2295_v38 = vsel %vm1865_vm3, %v9491_v29, 0.0 }
 0x26e   :  { %2008 = vmax.xlane.f32.xlu1 %v2007_v31 }
 0x26f   :  { %v1651_v22 = vpop.f32.mrb[96].mxu0 }
 0x270   :  { %v1778_v19 = vmul.f32 0.17677669, %v1651_v22  ;;  %v1653_v5 = vpop.f32.mrb[97].mxu0  ;;  %2290 = vadd.xlane.f32.xlu0 %v2289_v30  ;;  %v9499_v30 = vpop.eup %7163 }
 0x271   :  { %v1937_v5 = vpop.xlane.xlu1 %1936 }
 0x272   :  { %v9484_v23 = vadd.f32 %v9442_v13, %v1778_v19  ;;  %v2160_v19 = vmul.f32 1.442695, %v2077_v0  ;;  %v2079_v0 = vsub.f32 %v9204_v16, %v1931_v25 }
 0x274   :  { %v1656_v62 = vpop.f32.mrb[98].mxu0  ;;  %v2010_v58 = vsel %vm1865_vm3, %v9484_v23, -inf  ;;  %2293 = vadd.xlane.f32.xlu0 %v2292_v14  ;;  %7169 = vpow2.f32 %v2160_v19  ;;  %v2164_v2 = vmul.f32 1.442695, %v2079_v0 }
 0x275   :  { %v1779_v31 = vmul.f32 0.17677669, %v1656_v62  ;;  %2011 = vmax.xlane.f32.xlu1 %v2010_v58  ;;  %v1658_v22 = vpop.f32.mrb[99].mxu0  ;;  %v1940_v14 = vpop.xlane.xlu1 %1939  ;;  %7171 = vpow2.f32 %v2162_v7  ;;  %v2081_v7 = vsub.f32 %v9231_v42, %v1937_v5 }
 0x276   :  { %v9506_v22 = vpop.eup %7165  ;;  %7173 = vpow2.f32 %v2164_v2  ;;  %v2082_v2 = vsub.f32 %v9248_v9, %v1940_v14 }
 0x277   :  { %v9495_v17 = vadd.f32 %v9442_v13, %v1779_v31  ;;  %v2298_v31 = vsel %vm1865_vm3, %v9499_v30, 0.0  ;;  %v2301_v16 = vsel %vm1865_vm3, %v9506_v22, 0.0 }
 0x278   :  { %2296 = vadd.xlane.f32.xlu0 %v2295_v38 }
 0x279   :  { %v2013_v62 = vsel %vm1865_vm3, %v9495_v17, -inf  ;;  %v1943_v19 = vpop.xlane.xlu1 %1942 }
 0x27a   :  { %2014 = vmax.xlane.f32.xlu1 %v2013_v62  ;;  %v2080_v62 = vsub.f32 %v9220_v34, %v1934_v12 }
 0x27b   :  { %v1661_v26 = vpop.f32.mrb[100].mxu0 }
 0x27c   :  { %v1780_v24 = vmul.f32 0.17677669, %v1661_v26  ;;  %v1663_v58 = vpop.f32.mrb[101].mxu0  ;;  %2299 = vadd.xlane.f32.xlu0 %v2298_v31  ;;  %v9516_v26 = vpop.eup %7167 }
 0x27d   :  { %12509 = vst [vmem:[#allocation5_spill] sm:$0xff] %v9516_v26  ;;  %v2304_v0 = vsel %vm1865_vm3, %v9516_v26, 0.0  ;;  %v2170_v26 = vmul.f32 1.442695, %v2082_v2 }
 0x27e   :  { %v9509_v38 = vadd.f32 %v9442_v13, %v1780_v24  ;;  %v2166_v24 = vmul.f32 1.442695, %v2080_v62  ;;  %v1946_v12 = vpop.xlane.xlu1 %1945  ;;  %v9524_v63 = vpop.eup %7169 }
 0x280   :  { %v1666_v18 = vpop.f32.mrb[102].mxu0  ;;  %v2016_v25 = vsel %vm1865_vm3, %v9509_v38, -inf  ;;  %2302 = vadd.xlane.f32.xlu0 %v2301_v16  ;;  %7175 = vpow2.f32 %v2166_v24  ;;  %v2168_v16 = vmul.f32 1.442695, %v2081_v7  ;;  %v2083_v24 = vsub.f32 %v9259_v60, %v1943_v19 }
 0x281   :  { %v1781_v58 = vmul.f32 0.17677669, %v1666_v18  ;;  %2017 = vmax.xlane.f32.xlu1 %v2016_v25  ;;  %v1668_v31 = vpop.f32.mrb[103].mxu0  ;;  %v2307_v25 = vsel %vm1865_vm3, %v9524_v63, 0.0 }
 0x282   :  { %7177 = vpow2.f32 %v2168_v16  ;;  %v2084_v16 = vsub.f32 %v9276_v4, %v1946_v12 }
 0x283   :  { %v9520_v34 = vadd.f32 %v9442_v13, %v1781_v58  ;;  %v9531_v58 = vpop.eup %7171  ;;  %v1949_v31 = vpop.xlane.xlu1 %1948  ;;  %7179 = vpow2.f32 %v2170_v26 }
 0x284   :  { %2305 = vadd.xlane.f32.xlu0 %v2304_v0  ;;  %v2310_v9 = vsel %vm1865_vm3, %v9531_v58, 0.0  ;;  %v2085_v26 = vsub.f32 %v9287_v10, %v1949_v31 }
 0x285   :  { %v2019_v18 = vsel %vm1865_vm3, %v9520_v34, -inf }
 0x286   :  { %2020 = vmax.xlane.f32.xlu1 %v2019_v18  ;;  %v9541_v18 = vpop.eup %7173 }
 0x287   :  { %v1671_v62 = vpop.f32.mrb[104].mxu0  ;;  %12510 = vst [vmem:[#allocation6_spill] sm:$0xff] %v9541_v18  ;;  %v2313_v19 = vsel %vm1865_vm3, %v9541_v18, 0.0  ;;  %v2176_v18 = vmul.f32 1.442695, %v2085_v26 }
 0x288   :  { %v1782_v42 = vmul.f32 0.17677669, %v1671_v62  ;;  %v1673_v5 = vpop.f32.mrb[105].mxu0  ;;  %2308 = vadd.xlane.f32.xlu0 %v2307_v25 }
 0x28a   :  { %v9534_v0 = vadd.f32 %v9442_v13, %v1782_v42  ;;  %v1952_v25 = vpop.xlane.xlu1 %1951  ;;  %v2172_v42 = vmul.f32 1.442695, %v2083_v24  ;;  %v9549_v2 = vpop.eup %7175 }
 0x28c   :  { %v1676_v7 = vpop.f32.mrb[106].mxu0  ;;  %v2022_v14 = vsel %vm1865_vm3, %v9534_v0, -inf  ;;  %2311 = vadd.xlane.f32.xlu0 %v2310_v9  ;;  %7181 = vpow2.f32 %v2172_v42  ;;  %v2174_v9 = vmul.f32 1.442695, %v2084_v16  ;;  %v2086_v42 = vsub.f32 %v9294_v39, %v1952_v25 }
 0x28d   :  { %v1783_v62 = vmul.f32 0.17677669, %v1676_v7  ;;  %2023 = vmax.xlane.f32.xlu1 %v2022_v14  ;;  %v1678_v5 = vpop.f32.mrb[107].mxu0 }
 0x28e   :  { %v9556_v5 = vpop.eup %7177  ;;  %7183 = vpow2.f32 %v2174_v9 }
 0x28f   :  { %v9545_v60 = vadd.f32 %v9442_v13, %v1783_v62  ;;  %v1955_v14 = vpop.xlane.xlu1 %1954  ;;  %v2316_v62 = vsel %vm1865_vm3, %v9549_v2, 0.0  ;;  %12511 = vst [vmem:[#allocation7_spill] sm:$0xff] %v9556_v5  ;;  %v2319_v10 = vsel %vm1865_vm3, %v9556_v5, 0.0  ;;  %7185 = vpow2.f32 %v2176_v18 }
 0x290   :  { %2314 = vadd.xlane.f32.xlu0 %v2313_v19  ;;  %v2087_v9 = vsub.f32 %v9299_v28, %v1955_v14 }
 0x291   :  { %v2025_v7 = vsel %vm1865_vm3, %v9545_v60, -inf }
 0x292   :  { %2026 = vmax.xlane.f32.xlu1 %v2025_v7 }
 0x293   :  { %v1681_v24 = vpop.f32.mrb[108].mxu0 }
 0x294   :  { %v1784_v4 = vmul.f32 0.17677669, %v1681_v24  ;;  %v1683_v12 = vpop.f32.mrb[109].mxu0  ;;  %2317 = vadd.xlane.f32.xlu0 %v2316_v62  ;;  %v9566_v24 = vpop.eup %7179 }
 0x295   :  { %12512 = vst [vmem:[#allocation8_spill] sm:$0xff] %v9566_v24  ;;  %v2322_v25 = vsel %vm1865_vm3, %v9566_v24, 0.0 }
 0x296   :  { %v9559_v19 = vadd.f32 %v9442_v13, %v1784_v4  ;;  %v1958_v16 = vpop.xlane.xlu1 %1957  ;;  %v2178_v4 = vmul.f32 1.442695, %v2086_v42  ;;  %v9574_v26 = vpop.eup %7181 }
 0x297   :  { %v2088_v18 = vsub.f32 %v9304_v3, %v1958_v16 }
 0x298   :  { %v1686_v7 = vpop.f32.mrb[110].mxu0  ;;  %v2028_v31 = vsel %vm1865_vm3, %v9559_v19, -inf  ;;  %2320 = vadd.xlane.f32.xlu0 %v2319_v10  ;;  %7187 = vpow2.f32 %v2178_v4  ;;  %v2180_v10 = vmul.f32 1.442695, %v2087_v9 }
 0x299   :  { %v1785_v12 = vmul.f32 0.17677669, %v1686_v7  ;;  %2029 = vmax.xlane.f32.xlu1 %v2028_v31  ;;  %v1688_v62 = vpop.f32.mrb[111].mxu0  ;;  %v2325_v31 = vsel %vm1865_vm3, %v9574_v26, 0.0  ;;  %v2182_v24 = vmul.f32 1.442695, %v2088_v18 }
 0x29a   :  { %7189 = vpow2.f32 %v2180_v10 }
 0x29b   :  { %v9570_v39 = vadd.f32 %v9442_v13, %v1785_v12  ;;  %v1961_v7 = vpop.xlane.xlu1 %1960  ;;  %v9581_v12 = vpop.eup %7183  ;;  %7191 = vpow2.f32 %v2182_v24 }
 0x29c   :  { %2323 = vadd.xlane.f32.xlu0 %v2322_v25  ;;  %v2328_v3 = vsel %vm1865_vm3, %v9581_v12, 0.0  ;;  %v9591_v9 = vpop.eup %7185 }
 0x29d   :  { %v2031_v5 = vsel %vm1865_vm3, %v9570_v39, -inf  ;;  %12513 = vst [vmem:[#allocation9_spill] sm:$0xff] %v9591_v9 }
 0x29e   :  { %2032 = vmax.xlane.f32.xlu1 %v2031_v5  ;;  %v2089_v5 = vsub.f32 %v9309_v11, %v1961_v7  ;;  %v2331_v7 = vsel %vm1865_vm3, %v9591_v9, 0.0 }
 0x29f   :  { %v1691_v42 = vpop.f32.mrb[112].mxu0 }
 0x2a0   :  { %v1786_v28 = vmul.f32 0.17677669, %v1691_v42  ;;  %v1693_v14 = vpop.f32.mrb[113].mxu0  ;;  %2326 = vadd.xlane.f32.xlu0 %v2325_v31 }
 0x2a2   :  { %v9584_v62 = vadd.f32 %v9442_v13, %v1786_v28  ;;  %v1964_v25 = vpop.xlane.xlu1 %1963  ;;  %v2184_v28 = vmul.f32 1.442695, %v2089_v5  ;;  %v9599_v31 = vpop.eup %7187 }
 0x2a3   :  { %v2090_v10 = vsub.f32 %v9314_v20, %v1964_v25  ;;  %v2334_v20 = vsel %vm1865_vm3, %v9599_v31, 0.0 }
 0x2a4   :  { %v1696_v4 = vpop.f32.mrb[114].mxu0  ;;  %v2034_v16 = vsel %vm1865_vm3, %v9584_v62, -inf  ;;  %2329 = vadd.xlane.f32.xlu0 %v2328_v3  ;;  %7193 = vpow2.f32 %v2184_v28  ;;  %v9606_v25 = vpop.eup %7189 }
 0x2a5   :  { %v1787_v42 = vmul.f32 0.17677669, %v1696_v4  ;;  %2035 = vmax.xlane.f32.xlu1 %v2034_v16  ;;  %v1698_v14 = vpop.f32.mrb[115].mxu0  ;;  %v2186_v3 = vmul.f32 1.442695, %v2090_v10  ;;  %v9614_v10 = vpop.eup %7191 }
 0x2a6   :  { %12514 = vst [vmem:[#allocation10_spill] sm:$0xff] %v9614_v10 }
 0x2a7   :  { %v9595_v18 = vadd.f32 %v9442_v13, %v1787_v42  ;;  %v1967_v11 = vpop.xlane.xlu1 %1966  ;;  %7195 = vpow2.f32 %v2186_v3 }
 0x2a8   :  { %2332 = vadd.xlane.f32.xlu0 %v2331_v7  ;;  %v2091_v24 = vsub.f32 %v9319_v56, %v1967_v11  ;;  %v2337_v56 = vsel %vm1865_vm3, %v9606_v25, 0.0 }
 0x2a9   :  { %v2037_v4 = vsel %vm1865_vm3, %v9595_v18, -inf }
 0x2aa   :  { %2038 = vmax.xlane.f32.xlu1 %v2037_v4  ;;  %v2188_v7 = vmul.f32 1.442695, %v2091_v24 }
 0x2ab   :  { %v1701_v5 = vpop.f32.mrb[116].mxu0 }
 0x2ac   :  { %v1788_v16 = vmul.f32 0.17677669, %v1701_v5  ;;  %v1703_v42 = vpop.f32.mrb[117].mxu0  ;;  %2335 = vadd.xlane.f32.xlu0 %v2334_v20  ;;  %7197 = vpow2.f32 %v2188_v7 }
 0x2ad   :  { %v2340_v42 = vsel %vm1865_vm3, %v9614_v10, 0.0 }
 0x2ae   :  { %v1970_v14 = vpop.xlane.xlu1 %1969  ;;  %v9609_v9 = vadd.f32 %v9442_v13, %v1788_v16 }
 0x2af   :  { %v2092_v28 = vsub.f32 %v9324_v40, %v1970_v14  ;;  %v9624_v14 = vpop.eup %7193 }
 0x2b0   :  { %v1706_v11 = vpop.f32.mrb[118].mxu0  ;;  %2338 = vadd.xlane.f32.xlu0 %v2337_v56  ;;  %v2040_v4 = vsel %vm1865_vm3, %v9609_v9, -inf  ;;  %12515 = vst [vmem:[#allocation11_spill] sm:$0xff] %v9624_v14 }
 0x2b1   :  { %v1789_v5 = vmul.f32 0.17677669, %v1706_v11  ;;  %2041 = vmax.xlane.f32.xlu1 %v2040_v4  ;;  %v1708_v20 = vpop.f32.mrb[119].mxu0  ;;  %v2190_v3 = vmul.f32 1.442695, %v2092_v28  ;;  %v2343_v28 = vsel %vm1865_vm3, %v9624_v14, 0.0  ;;  %v9630_v4 = vpop.eup %7195 }
 0x2b2   :  { %12516 = vst [vmem:[#allocation12_spill] sm:$0xff] %v9630_v4 }
 0x2b3   :  { %v1973_v24 = vpop.xlane.xlu1 %1972  ;;  %v9619_v16 = vadd.f32 %v9442_v13, %v1789_v5  ;;  %7199 = vpow2.f32 %v2190_v3  ;;  %v2346_v3 = vsel %vm1865_vm3, %v9630_v4, 0.0 }
 0x2b4   :  { %v2093_v40 = vsub.f32 %v9329_v27, %v1973_v24  ;;  %2341 = vadd.xlane.f32.xlu0 %v2340_v42 }
 0x2b5   :  { %v2043_v56 = vsel %vm1865_vm3, %v9619_v16, -inf }
 0x2b6   :  { %v2192_v11 = vmul.f32 1.442695, %v2093_v40  ;;  %2044 = vmax.xlane.f32.xlu1 %v2043_v56  ;;  %v9638_v40 = vpop.eup %7197 }
 0x2b7   :  { %v1711_v7 = vpop.f32.mrb[120].mxu0  ;;  %12517 = vst [vmem:[#allocation13_spill] sm:$0xff] %v9638_v40 }
 0x2b8   :  { %v1790_v5 = vmul.f32 0.17677669, %v1711_v7  ;;  %v1713_v27 = vpop.f32.mrb[121].mxu0  ;;  %2344 = vadd.xlane.f32.xlu0 %v2343_v28  ;;  %7201 = vpow2.f32 %v2192_v11 }
 0x2ba   :  { %v1976_v20 = vpop.xlane.xlu1 %1975  ;;  %v9633_v24 = vadd.f32 %v9442_v13, %v1790_v5 }
 0x2bb   :  { %v2094_v42 = vsub.f32 %v9334_v50, %v1976_v20  ;;  %v2349_v20 = vsel %vm1865_vm3, %v9638_v40, 0.0 }
 0x2bc   :  { %v1716_v10 = vpop.f32.mrb[122].mxu0  ;;  %2347 = vadd.xlane.f32.xlu0 %v2346_v3  ;;  %v2046_v7 = vsel %vm1865_vm3, %v9633_v24, -inf }
 0x2bd   :  { %v2194_v56 = vmul.f32 1.442695, %v2094_v42  ;;  %v1791_v27 = vmul.f32 0.17677669, %v1716_v10  ;;  %2047 = vmax.xlane.f32.xlu1 %v2046_v7  ;;  %v1718_v28 = vpop.f32.mrb[123].mxu0  ;;  %v9648_v4 = vpop.eup %7199 }
 0x2be   :  { %12518 = vst [vmem:[#allocation14_spill] sm:$0xff] %v9648_v4 }
 0x2bf   :  { %7203 = vpow2.f32 %v2194_v56  ;;  %v1979_v11 = vpop.xlane.xlu1 %1978  ;;  %v9643_v5 = vadd.f32 %v9442_v13, %v1791_v27  ;;  %v2352_v56 = vsel %vm1865_vm3, %v9648_v4, 0.0 }
 0x2c0   :  { %v2095_v50 = vsub.f32 %v9340_v48, %v1979_v11  ;;  %2350 = vadd.xlane.f32.xlu0 %v2349_v20 }
 0x2c1   :  { %v2049_v3 = vsel %vm1865_vm3, %v9643_v5, -inf }
 0x2c2   :  { %v2196_v42 = vmul.f32 1.442695, %v2095_v50  ;;  %2050 = vmax.xlane.f32.xlu1 %v2049_v3  ;;  %v9654_v7 = vpop.eup %7201 }
 0x2c3   :  { %v1721_v10 = vpop.f32.mrb[124].mxu0  ;;  %12519 = vst [vmem:[#allocation15_spill] sm:$0xff] %v9654_v7  ;;  %v2355_v20 = vsel %vm1865_vm3, %v9654_v7, 0.0 }
 0x2c4   :  { %7205 = vpow2.f32 %v2196_v42  ;;  %v1792_v27 = vmul.f32 0.17677669, %v1721_v10  ;;  %v1723_v48 = vpop.f32.mrb[125].mxu0  ;;  %2353 = vadd.xlane.f32.xlu0 %v2352_v56 }
 0x2c6   :  { %v1982_v28 = vpop.xlane.xlu1 %1981  ;;  %v9657_v11 = vadd.f32 %v9442_v13, %v1792_v27 }
 0x2c7   :  { %v2096_v50 = vsub.f32 %v9349_v1, %v1982_v28 }
 0x2c8   :  { %v1726_v40 = vpop.f32.mrb[126].mxu0  ;;  %2356 = vadd.xlane.f32.xlu0 %v2355_v20  ;;  %v2252_v4 = vpop.xlane.xlu0 %2251  ;;  %v2052_v10 = vsel %vm1865_vm3, %v9657_v11, -inf }
 0x2c9   :  { %v9662_v3 = vpop.eup %7203  ;;  %v2198_v42 = vmul.f32 1.442695, %v2096_v50  ;;  %v1793_v48 = vmul.f32 0.17677669, %v1726_v40  ;;  %7207 = vrcp.f32 %v2252_v4  ;;  %2053 = vmax.xlane.f32.xlu1 %v2052_v10  ;;  %v1728_v56 = vpop.f32.mrb[127].mxu0 }
 0x2ca   :  { %v2358_v27 = vsel %vm1865_vm3, %v9662_v3, 0.0 }
 0x2cb   :  { %7209 = vpow2.f32 %v2198_v42  ;;  %v1985_v1 = vpop.xlane.xlu1 %1984  ;;  %v9669_v28 = vadd.f32 %v9442_v13, %v1793_v48  ;;  %v3348_v13 = vld [vmem:[%s12417_s4] sm:$0xff] }
 0x2cc   :  { %v2097_v50 = vsub.f32 %v9357_v54, %v1985_v1  ;;  %2359 = vadd.xlane.f32.xlu0 %v2358_v27  ;;  %v3349_v54 = vld [vmem:[%s12417_s4 + $0x8] sm:$0xff] }
 0x2cd   :  { %v2255_v14 = vpop.xlane.xlu0 %2254  ;;  %v2055_v4 = vsel %vm1865_vm3, %v9669_v28, -inf  ;;  %v7040_v56 = vpack.c.bf16 %v3349_v54, %v3348_v13  ;;  %v12522_v13 = vmov 0.0  }
 0x2ce   :  { %v9672_v20 = vpop.eup %7205  ;;  %v2200_v7 = vmul.f32 1.442695, %v2097_v50  ;;  %7211 = vrcp.f32 %v2255_v14  ;;  %2056 = vmax.xlane.f32.xlu1 %v2055_v4 }
 0x2cf   :  { %12520 = vst [vmem:[#allocation16_spill] sm:$0xff] %v9672_v20  ;;  %v2361_v40 = vsel %vm1865_vm3, %v9672_v20, 0.0 }
 0x2d0   :  { %7213 = vpow2.f32 %v2200_v7  ;;  %2362 = vadd.xlane.f32.xlu0 %v2361_v40  ;;  %v3350_v40 = vld [vmem:[%s12417_s4 + $0x10] sm:$0xff] }
 0x2d1   :  { %v2258_v42 = vpop.xlane.xlu0 %2257 }
 0x2d2   :  { %v1988_v10 = vpop.xlane.xlu1 %1987  ;;  %7215 = vrcp.f32 %v2258_v42  ;;  %v3351_v42 = vld [vmem:[%s12417_s4 + $0x18] sm:$0xff] }
 0x2d3   :  { %v2098_v48 = vsub.f32 %v9371_v45, %v1988_v10  ;;  %v7208_v14 = vpop.eup %7207  ;;  %v12523_v10 = vmov 0.0|0.0  }
 0x2d4   :  { %v2443_v7 = vmul.f32 %v7208_v14, %v9353_v36 }
 0x2d5   :  { %v9685_v27 = vpop.eup %7209  ;;  %v2202_v1 = vmul.f32 1.442695, %v2098_v48  ;;  %v2261_v50 = vpop.xlane.xlu0 %2260  ;;  %v7043_v48 = vpack.c.bf16 %v3351_v42, %v3350_v40 }
 0x2d6   :  { %12521 = vst [vmem:[#allocation17_spill] sm:$0xff] %v9685_v27  ;;  %v2364_v4 = vsel %vm1865_vm3, %v9685_v27, 0.0  ;;  %6362 = vmatmul.mubr.msk.f32.vlgmr.msra.gmra.mrb[0].mxu1 %vm1865_vm3, %v2443_v7  ;;  %v3352_v7 = vld [vmem:[%s12417_s4 + $0x20] sm:$0xff] }
 0x2d7   :  { %7217 = vpow2.f32 %v2202_v1  ;;  %v1991_v45 = vpop.xlane.xlu1 %1990  ;;  %2365 = vadd.xlane.f32.xlu0 %v2364_v4  ;;  %2841 = vmatprep.mubr.f32.mxu1 %v12522_v13 }
 0x2d8   :  { %7219 = vrcp.f32 %v2261_v50  ;;  %v2099_v36 = vsub.f32 %v9382_v15, %v1991_v45  ;;  %7041 = vmatpush1.bf16.msra.mxu1 %v7040_v56  ;;  %v7212_v54 = vpop.eup %7211  ;;  %v3353_v15 = vld [vmem:[%s12417_s4 + $0x28] sm:$0xff]  ;;  %v3355_v45 = vld [vmem:[%s12417_s4 + $0x38] sm:$0xff] }
 0x2d9   :  { %7042 = vmatprep.subr.bf16.mxu1 %v12523_v10  ;;  %v2264_v20 = vpop.xlane.xlu0 %2263  ;;  %v2445_v1 = vmul.f32 %v7212_v54, %v9363_v21  ;;  %v7046_v21 = vpack.c.bf16 %v3353_v15, %v3352_v7 }
 0x2da   :  { %v9700_v14 = vpop.eup %7213  ;;  %v2204_v27 = vmul.f32 1.442695, %v2099_v36  ;;  %7221 = vrcp.f32 %v2264_v20 }
 0x2db   :  { %v2367_v56 = vsel %vm1865_vm3, %v9700_v14, 0.0  ;;  %6363 = vmatmul.mubr.msk.f32.gmra.mrb[2].mxu1 %vm1865_vm3, %v2445_v1 }
 0x2dc   :  { %7223 = vpow2.f32 %v2204_v27  ;;  %2368 = vadd.xlane.f32.xlu0 %v2367_v56  ;;  %v7216_v50 = vpop.eup %7215  ;;  %2847 = vmatprep.mubr.f32.mxu1 %v12522_v13  ;;  %v3354_v27 = vld [vmem:[%s12417_s4 + $0x30] sm:$0xff] }
 0x2dd   :  { %7044 = vmatpush1.bf16.msra.mxu1 %v7043_v48  ;;  %v2267_v4 = vpop.xlane.xlu0 %2266  ;;  %v2447_v42 = vmul.f32 %v7216_v50, %v9368_v8  ;;  %v7049_v1 = vpack.c.bf16 %v3355_v45, %v3354_v27 }
 0x2de   :  { %v1994_v40 = vpop.xlane.xlu1 %1993  ;;  %7045 = vmatprep.subr.bf16.mxu1 %v12523_v10  ;;  %7225 = vrcp.f32 %v2267_v4 }
 0x2df   :  { %v2100_v20 = vsub.f32 %v9396_v47, %v1994_v40  ;;  %6364 = vmatmul.mubr.msk.f32.gmra.mrb[4].mxu1 %vm1865_vm3, %v2447_v42 }
 0x2e0   :  { %2853 = vmatprep.mubr.f32.mxu1 %v12522_v13 }
 0x2e1   :  { %v9723_v36 = vpop.eup %7217  ;;  %v2206_v54 = vmul.f32 1.442695, %v2100_v20  ;;  %7047 = vmatpush1.bf16.msra.mxu1 %v7046_v21  ;;  %v2270_v48 = vpop.xlane.xlu0 %2269 }
 0x2e2   :  { %v7220_v8 = vpop.eup %7219  ;;  %v2370_v47 = vsel %vm1865_vm3, %v9723_v36, 0.0  ;;  %7048 = vmatprep.subr.bf16.mxu1 %v12523_v10 }
 0x2e3   :  { %7227 = vpow2.f32 %v2206_v54  ;;  %v1997_v7 = vpop.xlane.xlu1 %1996  ;;  %2371 = vadd.xlane.f32.xlu0 %v2370_v47  ;;  %v2449_v15 = vmul.f32 %v7220_v8, %v9378_v43 }
 0x2e4   :  { %7229 = vrcp.f32 %v2270_v48  ;;  %v2101_v56 = vsub.f32 %v9407_v59, %v1997_v7  ;;  %v7222_v50 = vpop.eup %7221 }
 0x2e5   :  { %6365 = vmatmul.mubr.msk.f32.gmra.mrb[6].mxu1 %vm1865_vm3, %v2449_v15  ;;  %v2273_v40 = vpop.xlane.xlu0 %2272  ;;  %v2451_v42 = vmul.f32 %v7222_v50, %v9386_v35 }
 0x2e6   :  { %v9732_v21 = vpop.eup %7223  ;;  %v2208_v4 = vmul.f32 1.442695, %v2101_v56  ;;  %2859 = vmatprep.mubr.f32.mxu1 %v12522_v13  ;;  %7050 = vmatpush1.bf16.msra.mxu1 %v7049_v1  ;;  %7231 = vrcp.f32 %v2273_v40 }
 0x2e7   :  { %v2373_v20 = vsel %vm1865_vm3, %v9732_v21, 0.0  ;;  %7051 = vmatprep.subr.bf16.mxu1 %v12523_v10 }
 0x2e8   :  { %7233 = vpow2.f32 %v2208_v4  ;;  %2374 = vadd.xlane.f32.xlu0 %v2373_v20  ;;  %v7226_v43 = vpop.eup %7225 }
 0x2e9   :  { %6366 = vmatmul.mubr.msk.f32.gmra.mrb[8].mxu1 %vm1865_vm3, %v2451_v42  ;;  %v2276_v59 = vpop.xlane.xlu0 %2275  ;;  %v2453_v45 = vmul.f32 %v7226_v43, %v9393_v32  ;;  %v3356_v42 = vld [vmem:[%s12417_s4 + $0x40] sm:$0xff] }
 0x2ea   :  { %v2000_v27 = vpop.xlane.xlu1 %1999  ;;  %2865 = vmatprep.mubr.f32.mxu1 %v12522_v13  ;;  %7235 = vrcp.f32 %v2276_v59 }
 0x2eb   :  { %v2102_v35 = vsub.f32 %v9429_v41, %v2000_v27 }
 0x2ed   :  { %v9743_v54 = vpop.eup %7227  ;;  %v2210_v8 = vmul.f32 1.442695, %v2102_v35  ;;  %6367 = vmatmul.mubr.msk.f32.gmra.mrb[10].mxu1 %vm1865_vm3, %v2453_v45  ;;  %v2279_v47 = vpop.xlane.xlu0 %2278 }
 0x2ee   :  { %v7230_v48 = vpop.eup %7229  ;;  %2871 = vmatprep.mubr.f32.mxu1 %v12522_v13  ;;  %v2376_v1 = vsel %vm1865_vm3, %v9743_v54, 0.0 }
 0x2ef   :  { %7237 = vpow2.f32 %v2210_v8  ;;  %v2003_v7 = vpop.xlane.xlu1 %2002  ;;  %2377 = vadd.xlane.f32.xlu1 %v2376_v1  ;;  %v2455_v32 = vmul.f32 %v7230_v48, %v9403_v53  ;;  %v3357_v53 = vld [vmem:[%s12417_s4 + $0x48] sm:$0xff] }
 0x2f0   :  { %7239 = vrcp.f32 %v2279_v47  ;;  %v2103_v41 = vsub.f32 %v9445_v49, %v2003_v7  ;;  %v7232_v15 = vpop.eup %7231  ;;  %v7052_v20 = vpack.c.bf16 %v3357_v53, %v3356_v42 }
 0x2f1   :  { %6368 = vmatmul.mubr.msk.f32.gmra.mrb[12].mxu1 %vm1865_vm3, %v2455_v32  ;;  %v2282_v4 = vpop.xlane.xlu0 %2281  ;;  %v2457_v40 = vmul.f32 %v7232_v15, %v9414_v37 }
 0x2f2   :  { %v9752_v56 = vpop.eup %7233  ;;  %v2212_v50 = vmul.f32 1.442695, %v2103_v41  ;;  %2877 = vmatprep.mubr.f32.mxu1 %v12522_v13  ;;  %7241 = vrcp.f32 %v2282_v4  ;;  %7053 = vmatpush1.bf16.msra.mxu1 %v7052_v20 }
 0x2f3   :  { %v2379_v49 = vsel %vm1865_vm3, %v9752_v56, 0.0  ;;  %7054 = vmatprep.subr.bf16.mxu1 %v12523_v10 }
 0x2f4   :  { %7243 = vpow2.f32 %v2212_v50  ;;  %2380 = vadd.xlane.f32.xlu0 %v2379_v49  ;;  %v7236_v43 = vpop.eup %7235 }
 0x2f5   :  { %6369 = vmatmul.mubr.msk.f32.gmra.mrb[14].mxu1 %vm1865_vm3, %v2457_v40  ;;  %v2285_v59 = vpop.xlane.xlu0 %2284  ;;  %v2459_v27 = vmul.f32 %v7236_v43, %v9426_v51 }
 0x2f6   :  { %v2006_v37 = vpop.xlane.xlu1 %2005  ;;  %2883 = vmatprep.mubr.f32.mxu1 %v12522_v13  ;;  %7245 = vrcp.f32 %v2285_v59 }
 0x2f7   :  { %v2104_v45 = vsub.f32 %v9459_v33, %v2006_v37 }
 0x2f9   :  { %v9769_v35 = vpop.eup %7237  ;;  %v2214_v8 = vmul.f32 1.442695, %v2104_v45  ;;  %6370 = vmatmul.mubr.msk.f32.gmra.mrb[16].mxu1 %vm1865_vm3, %v2459_v27  ;;  %v2288_v47 = vpop.xlane.xlu0 %2287 }
 0x2fa   :  { %v7240_v48 = vpop.eup %7239  ;;  %2889 = vmatprep.mubr.f32.mxu1 %v12522_v13  ;;  %v2382_v1 = vsel %vm1865_vm3, %v9769_v35, 0.0 }
 0x2fb   :  { %7247 = vpow2.f32 %v2214_v8  ;;  %v2009_v51 = vpop.xlane.xlu1 %2008  ;;  %2383 = vadd.xlane.f32.xlu1 %v2382_v1  ;;  %v2461_v7 = vmul.f32 %v7240_v48, %v9436_v55 }
 0x2fc   :  { %7249 = vrcp.f32 %v2288_v47  ;;  %v2105_v33 = vsub.f32 %v9470_v52, %v2009_v51  ;;  %v7242_v32 = vpop.eup %7241  ;;  %v3358_v51 = vld [vmem:[%s12417_s4 + $0x50] sm:$0xff] }
 0x2fd   :  { %6371 = vmatmul.mubr.msk.f32.gmra.mrb[18].mxu1 %vm1865_vm3, %v2461_v7  ;;  %v2291_v50 = vpop.xlane.xlu0 %2290  ;;  %v2463_v4 = vmul.f32 %v7242_v32, %v9449_v61 }
 0x2fe   :  { %v9778_v41 = vpop.eup %7243  ;;  %v2216_v15 = vmul.f32 1.442695, %v2105_v33  ;;  %2895 = vmatprep.mubr.f32.mxu1 %v12522_v13  ;;  %7251 = vrcp.f32 %v2291_v50 }
 0x2ff   :  { %v2385_v40 = vsel %vm1865_vm3, %v9778_v41, 0.0 }
 0x300   :  { %7253 = vpow2.f32 %v2216_v15  ;;  %2386 = vadd.xlane.f32.xlu0 %v2385_v40  ;;  %v7246_v55 = vpop.eup %7245 }
 0x301   :  { %6372 = vmatmul.mubr.msk.f32.gmra.mrb[20].mxu1 %vm1865_vm3, %v2463_v4  ;;  %v2294_v52 = vpop.xlane.xlu0 %2293  ;;  %v2465_v53 = vmul.f32 %v7246_v55, %v9456_v44 }
 0x302   :  { %v2012_v42 = vpop.xlane.xlu1 %2011  ;;  %2901 = vmatprep.mubr.f32.mxu1 %v12522_v13  ;;  %7255 = vrcp.f32 %v2294_v52 }
 0x303   :  { %v2106_v49 = vsub.f32 %v9484_v23, %v2012_v42 }
 0x305   :  { %v9788_v20 = vpop.eup %7247  ;;  %v2218_v61 = vmul.f32 1.442695, %v2106_v49  ;;  %6373 = vmatmul.mubr.msk.f32.gmra.mrb[22].mxu1 %vm1865_vm3, %v2465_v53  ;;  %v2297_v59 = vpop.xlane.xlu0 %2296 }
 0x306   :  { %v7250_v43 = vpop.eup %7249  ;;  %2907 = vmatprep.mubr.f32.mxu1 %v12522_v13  ;;  %v2388_v37 = vsel %vm1865_vm3, %v9788_v20, 0.0 }
 0x307   :  { %7257 = vpow2.f32 %v2218_v61  ;;  %v2015_v27 = vpop.xlane.xlu1 %2014  ;;  %2389 = vadd.xlane.f32.xlu1 %v2388_v37  ;;  %v2467_v44 = vmul.f32 %v7250_v43, %v9466_v46  ;;  %v3359_v46 = vld [vmem:[%s12417_s4 + $0x58] sm:$0xff] }
 0x308   :  { %7259 = vrcp.f32 %v2297_v59  ;;  %v2107_v23 = vsub.f32 %v9495_v17, %v2015_v27  ;;  %v7252_v45 = vpop.eup %7251  ;;  %v7055_v7 = vpack.c.bf16 %v3359_v46, %v3358_v51 }
 0x309   :  { %6374 = vmatmul.mubr.msk.f32.gmra.mrb[24].mxu1 %vm1865_vm3, %v2467_v44  ;;  %v2300_v47 = vpop.xlane.xlu0 %2299  ;;  %v2469_v1 = vmul.f32 %v7252_v45, %v9474_v57 }
 0x30a   :  { %v9797_v8 = vpop.eup %7253  ;;  %v2220_v48 = vmul.f32 1.442695, %v2107_v23  ;;  %2913 = vmatprep.mubr.f32.mxu1 %v12522_v13  ;;  %7261 = vrcp.f32 %v2300_v47  ;;  %7056 = vmatpush1.bf16.msra.mxu1 %v7055_v7 }
 0x30b   :  { %v2391_v17 = vsel %vm1865_vm3, %v9797_v8, 0.0  ;;  %7057 = vmatprep.subr.bf16.mxu1 %v12523_v10 }
 0x30c   :  { %7263 = vpow2.f32 %v2220_v48  ;;  %2392 = vadd.xlane.f32.xlu0 %v2391_v17  ;;  %v7256_v33 = vpop.eup %7255  ;;  %v12524_v17 = vld [vmem:[#allocation5_spill] sm:$0xff] }
 0x30d   :  { %6375 = vmatmul.mubr.msk.f32.gmra.mrb[26].mxu1 %vm1865_vm3, %v2469_v1  ;;  %v2303_v32 = vpop.xlane.xlu0 %2302  ;;  %v2471_v15 = vmul.f32 %v7256_v33, %v9481_v6 }
 0x30e   :  { %v2018_v57 = vpop.xlane.xlu1 %2017  ;;  %2919 = vmatprep.mubr.f32.mxu1 %v12522_v13  ;;  %7265 = vrcp.f32 %v2303_v32 }
 0x30f   :  { %v2108_v50 = vsub.f32 %v9509_v38, %v2018_v57 }
 0x311   :  { %v9814_v4 = vpop.eup %7257  ;;  %v2222_v40 = vmul.f32 1.442695, %v2108_v50  ;;  %6376 = vmatmul.mubr.msk.f32.gmra.mrb[28].mxu1 %vm1865_vm3, %v2471_v15  ;;  %v2306_v52 = vpop.xlane.xlu0 %2305  ;;  %v3360_v50 = vld [vmem:[%s12417_s4 + $0x60] sm:$0xff] }
 0x312   :  { %v7260_v55 = vpop.eup %7259  ;;  %2925 = vmatprep.mubr.f32.mxu1 %v12522_v13  ;;  %v2394_v42 = vsel %vm1865_vm3, %v9814_v4, 0.0 }
 0x313   :  { %7267 = vpow2.f32 %v2222_v40  ;;  %v2021_v6 = vpop.xlane.xlu1 %2020  ;;  %2395 = vadd.xlane.f32.xlu1 %v2394_v42  ;;  %v2473_v53 = vmul.f32 %v7260_v55, %v9491_v29  ;;  %v3361_v40 = vld [vmem:[%s12417_s4 + $0x68] sm:$0xff] }
 0x314   :  { %7269 = vrcp.f32 %v2306_v52  ;;  %v2109_v38 = vsub.f32 %v9520_v34, %v2021_v6  ;;  %v7262_v49 = vpop.eup %7261  ;;  %v7058_v55 = vpack.c.bf16 %v3361_v40, %v3360_v50  ;;  %v12527_v50 = vld [vmem:[#allocation8_spill] sm:$0xff] }
 0x315   :  { %6377 = vmatmul.mubr.msk.f32.gmra.mrb[30].mxu1 %vm1865_vm3, %v2473_v53  ;;  %v2309_v59 = vpop.xlane.xlu0 %2308  ;;  %v2475_v37 = vmul.f32 %v7262_v49, %v9499_v30 }
 0x316   :  { %v9823_v61 = vpop.eup %7263  ;;  %v2224_v43 = vmul.f32 1.442695, %v2109_v38  ;;  %2931 = vmatprep.mubr.f32.mxu1 %v12522_v13  ;;  %7271 = vrcp.f32 %v2309_v59  ;;  %7059 = vmatpush1.bf16.msra.mxu1 %v7058_v55 }
 0x317   :  { %v2397_v27 = vsel %vm1865_vm3, %v9823_v61, 0.0  ;;  %7060 = vmatprep.subr.bf16.mxu1 %v12523_v10 }
 0x318   :  { %7273 = vpow2.f32 %v2224_v43  ;;  %2398 = vadd.xlane.f32.xlu0 %v2397_v27  ;;  %v7266_v29 = vpop.eup %7265  ;;  %v12525_v27 = vld [vmem:[#allocation6_spill] sm:$0xff] }
 0x319   :  { %6378 = vmatmul.mubr.msk.f32.gmra.mrb[32].mxu1 %vm1865_vm3, %v2475_v37  ;;  %v2312_v34 = vpop.xlane.xlu0 %2311  ;;  %v2477_v23 = vmul.f32 %v7266_v29, %v9506_v22 }
 0x31a   :  { %v2024_v44 = vpop.xlane.xlu1 %2023  ;;  %2937 = vmatprep.mubr.f32.mxu1 %v12522_v13  ;;  %7275 = vrcp.f32 %v2312_v34 }
 0x31b   :  { %v2110_v45 = vsub.f32 %v9534_v0, %v2024_v44 }
 0x31d   :  { %v9833_v48 = vpop.eup %7267  ;;  %v2226_v30 = vmul.f32 1.442695, %v2110_v45  ;;  %6379 = vmatmul.mubr.msk.f32.gmra.mrb[34].mxu1 %vm1865_vm3, %v2477_v23  ;;  %v2315_v1 = vpop.xlane.xlu0 %2314 }
 0x31e   :  { %v7270_v47 = vpop.eup %7269  ;;  %2943 = vmatprep.mubr.f32.mxu1 %v12522_v13  ;;  %v2400_v51 = vsel %vm1865_vm3, %v9833_v48, 0.0 }
 0x31f   :  { %7277 = vpow2.f32 %v2226_v30  ;;  %v2027_v46 = vpop.xlane.xlu1 %2026  ;;  %2401 = vadd.xlane.f32.xlu1 %v2400_v51  ;;  %v2479_v22 = vmul.f32 %v7270_v47, %v12524_v17 }
 0x320   :  { %7279 = vrcp.f32 %v2315_v1  ;;  %v2111_v0 = vsub.f32 %v9545_v60, %v2027_v46  ;;  %v7272_v7 = vpop.eup %7271  ;;  %v12526_v46 = vld [vmem:[#allocation7_spill] sm:$0xff] }
 0x321   :  { %6380 = vmatmul.mubr.msk.f32.gmra.mrb[36].mxu1 %vm1865_vm3, %v2479_v22  ;;  %v2318_v57 = vpop.xlane.xlu0 %2317  ;;  %v2481_v15 = vmul.f32 %v7272_v7, %v9524_v63 }
 0x322   :  { %v9842_v33 = vpop.eup %7273  ;;  %v2228_v32 = vmul.f32 1.442695, %v2111_v0  ;;  %2949 = vmatprep.mubr.f32.mxu1 %v12522_v13  ;;  %7281 = vrcp.f32 %v2318_v57 }
 0x323   :  { %v2403_v60 = vsel %vm1865_vm3, %v9842_v33, 0.0 }
 0x324   :  { %7283 = vpow2.f32 %v2228_v32  ;;  %2404 = vadd.xlane.f32.xlu0 %v2403_v60  ;;  %v7276_v52 = vpop.eup %7275 }
 0x325   :  { %6381 = vmatmul.mubr.msk.f32.gmra.mrb[38].mxu1 %vm1865_vm3, %v2481_v15  ;;  %v2321_v42 = vpop.xlane.xlu0 %2320  ;;  %v2483_v6 = vmul.f32 %v7276_v52, %v9531_v58 }
 0x326   :  { %v2030_v63 = vpop.xlane.xlu1 %2029  ;;  %2955 = vmatprep.mubr.f32.mxu1 %v12522_v13  ;;  %7285 = vrcp.f32 %v2321_v42 }
 0x327   :  { %v2112_v53 = vsub.f32 %v9559_v19, %v2030_v63 }
 0x329   :  { %v9859_v38 = vpop.eup %7277  ;;  %v2230_v49 = vmul.f32 1.442695, %v2112_v53  ;;  %6382 = vmatmul.mubr.msk.f32.gmra.mrb[40].mxu1 %vm1865_vm3, %v2483_v6  ;;  %v2324_v59 = vpop.xlane.xlu0 %2323 }
 0x32a   :  { %v7280_v43 = vpop.eup %7279  ;;  %2961 = vmatprep.mubr.f32.mxu1 %v12522_v13  ;;  %v2406_v37 = vsel %vm1865_vm3, %v9859_v38, 0.0 }
 0x32b   :  { %7287 = vpow2.f32 %v2230_v49  ;;  %v2033_v58 = vpop.xlane.xlu1 %2032  ;;  %2407 = vadd.xlane.f32.xlu1 %v2406_v37  ;;  %v2485_v29 = vmul.f32 %v7280_v43, %v12525_v27 }
 0x32c   :  { %7289 = vrcp.f32 %v2324_v59  ;;  %v2113_v19 = vsub.f32 %v9570_v39, %v2033_v58  ;;  %v7282_v34 = vpop.eup %7281 }
 0x32d   :  { %6383 = vmatmul.mubr.msk.f32.gmra.mrb[42].mxu1 %vm1865_vm3, %v2485_v29  ;;  %v2327_v45 = vpop.xlane.xlu0 %2326  ;;  %v2487_v30 = vmul.f32 %v7282_v34, %v9549_v2 }
 0x32e   :  { %v9868_v44 = vpop.eup %7283  ;;  %v2232_v23 = vmul.f32 1.442695, %v2113_v19  ;;  %2967 = vmatprep.mubr.f32.mxu1 %v12522_v13  ;;  %7291 = vrcp.f32 %v2327_v45  ;;  %v12528_v19 = vld [vmem:[#allocation9_spill] sm:$0xff] }
 0x32f   :  { %v2409_v47 = vsel %vm1865_vm3, %v9868_v44, 0.0 }
 0x330   :  { %7293 = vpow2.f32 %v2232_v23  ;;  %2410 = vadd.xlane.f32.xlu0 %v2409_v47  ;;  %v7286_v1 = vpop.eup %7285 }
 0x331   :  { %6384 = vmatmul.mubr.msk.f32.gmra.mrb[44].mxu1 %vm1865_vm3, %v2487_v30  ;;  %v2330_v39 = vpop.xlane.xlu0 %2329  ;;  %v2489_v17 = vmul.f32 %v7286_v1, %v12526_v46 }
 0x332   :  { %v2036_v51 = vpop.xlane.xlu1 %2035  ;;  %2973 = vmatprep.mubr.f32.mxu1 %v12522_v13  ;;  %7295 = vrcp.f32 %v2330_v39 }
 0x333   :  { %v2114_v22 = vsub.f32 %v9584_v62, %v2036_v51 }
 0x335   :  { %v9878_v0 = vpop.eup %7287  ;;  %v2234_v2 = vmul.f32 1.442695, %v2114_v22  ;;  %6385 = vmatmul.mubr.msk.f32.gmra.mrb[46].mxu1 %vm1865_vm3, %v2489_v17  ;;  %v2333_v32 = vpop.xlane.xlu0 %2332 }
 0x336   :  { %v7290_v7 = vpop.eup %7289  ;;  %2979 = vmatprep.mubr.f32.mxu1 %v12522_v13  ;;  %v2412_v57 = vsel %vm1865_vm3, %v9878_v0, 0.0 }
 0x337   :  { %7297 = vpow2.f32 %v2234_v2  ;;  %v2039_v15 = vpop.xlane.xlu1 %2038  ;;  %2413 = vadd.xlane.f32.xlu1 %v2412_v57  ;;  %v2491_v40 = vmul.f32 %v7290_v7, %v12527_v50 }
 0x338   :  { %7299 = vrcp.f32 %v2333_v32  ;;  %v2115_v62 = vsub.f32 %v9595_v18, %v2039_v15  ;;  %v7292_v60 = vpop.eup %7291 }
 0x339   :  { %6386 = vmatmul.mubr.msk.f32.gmra.mrb[48].mxu1 %vm1865_vm3, %v2491_v40  ;;  %v2336_v42 = vpop.xlane.xlu0 %2335  ;;  %v2493_v63 = vmul.f32 %v7292_v60, %v9574_v26  ;;  %v12529_v40 = vld [vmem:[#allocation10_spill] sm:$0xff] }
 0x33a   :  { %v9887_v55 = vpop.eup %7293  ;;  %v2236_v52 = vmul.f32 1.442695, %v2115_v62  ;;  %2985 = vmatprep.mubr.f32.mxu1 %v12522_v13  ;;  %7301 = vrcp.f32 %v2336_v42 }
 0x33b   :  { %v2415_v6 = vsel %vm1865_vm3, %v9887_v55, 0.0 }
 0x33c   :  { %7303 = vpow2.f32 %v2236_v52  ;;  %2416 = vadd.xlane.f32.xlu0 %v2415_v6  ;;  %v7296_v53 = vpop.eup %7295 }
 0x33d   :  { %6387 = vmatmul.mubr.msk.f32.gmra.mrb[50].mxu1 %vm1865_vm3, %v2493_v63  ;;  %v2339_v18 = vpop.xlane.xlu0 %2338  ;;  %v2495_v49 = vmul.f32 %v7296_v53, %v9581_v12  ;;  %v3362_v12 = vld [vmem:[%s12417_s4 + $0x70] sm:$0xff] }
 0x33e   :  { %2991 = vmatprep.mubr.f32.mxu1 %v12522_v13  ;;  %7305 = vrcp.f32 %v2339_v18  ;;  %v2042_v43 = vpop.xlane.xlu1 %2041  ;;  %v12530_v63 = vld [vmem:[#allocation11_spill] sm:$0xff] }
 0x33f   :  { %v2116_v59 = vsub.f32 %v9609_v9, %v2042_v43  ;;  %v3363_v9 = vld [vmem:[%s12417_s4 + $0x78] sm:$0xff] }
 0x340   :  { %v7061_v23 = vpack.c.bf16 %v3363_v9, %v3362_v12 }
 0x341   :  { %v9897_v37 = vpop.eup %7297  ;;  %6388 = vmatmul.mubr.msk.f32.gmra.mrb[52].mxu1 %vm1865_vm3, %v2495_v49  ;;  %v2238_v58 = vmul.f32 1.442695, %v2116_v59  ;;  %v2342_v27 = vpop.xlane.xlu0 %2341  ;;  %v12531_v59 = vld [vmem:[#allocation12_spill] sm:$0xff] }
 0x342   :  { %v7300_v26 = vpop.eup %7299  ;;  %2997 = vmatprep.mubr.f32.mxu1 %v12522_v13  ;;  %v2418_v29 = vsel %vm1865_vm3, %v9897_v37, 0.0  ;;  %7307 = vrcp.f32 %v2342_v27  ;;  %7062 = vmatpush1.bf16.msra.mxu1 %v7061_v23 }
 0x343   :  { %2419 = vadd.xlane.f32.xlu1 %v2418_v29  ;;  %v2497_v34 = vmul.f32 %v7300_v26, %v12528_v19  ;;  %7309 = vpow2.f32 %v2238_v58  ;;  %v2045_v45 = vpop.xlane.xlu1 %2044  ;;  %7063 = vmatprep.subr.bf16.mxu1 %v12523_v10 }
 0x344   :  { %v7302_v30 = vpop.eup %7301  ;;  %v2117_v47 = vsub.f32 %v9619_v16, %v2045_v45  ;;  %v3364_v45 = vld [vmem:[%s12417_s4 + $0x80] sm:$0xff] }
 0x345   :  { %6389 = vmatmul.mubr.msk.f32.gmra.mrb[54].mxu1 %vm1865_vm3, %v2497_v34  ;;  %v2345_v39 = vpop.xlane.xlu0 %2344  ;;  %v2499_v51 = vmul.f32 %v7302_v30, %v9599_v31  ;;  %v12532_v34 = vld [vmem:[#allocation13_spill] sm:$0xff] }
 0x346   :  { %v9912_v1 = vpop.eup %7303  ;;  %3003 = vmatprep.mubr.f32.mxu1 %v12522_v13  ;;  %v2240_v46 = vmul.f32 1.442695, %v2117_v47  ;;  %7311 = vrcp.f32 %v2345_v39  ;;  %v3365_v30 = vld [vmem:[%s12417_s4 + $0x88] sm:$0xff] }
 0x347   :  { %v2421_v17 = vsel %vm1865_vm3, %v9912_v1, 0.0  ;;  %v7064_v47 = vpack.c.bf16 %v3365_v30, %v3364_v45 }
 0x348   :  { %2422 = vadd.xlane.f32.xlu0 %v2421_v17  ;;  %v7306_v22 = vpop.eup %7305  ;;  %7313 = vpow2.f32 %v2240_v46 }
 0x349   :  { %6390 = vmatmul.mubr.msk.f32.gmra.mrb[56].mxu1 %vm1865_vm3, %v2499_v51  ;;  %v2348_v16 = vpop.xlane.xlu0 %2347  ;;  %v2501_v2 = vmul.f32 %v7306_v22, %v9606_v25  ;;  %v12533_v22 = vld [vmem:[#allocation14_spill] sm:$0xff] }
 0x34a   :  { %3009 = vmatprep.mubr.f32.mxu1 %v12522_v13  ;;  %7315 = vrcp.f32 %v2348_v16  ;;  %v2048_v31 = vpop.xlane.xlu1 %2047  ;;  %7065 = vmatpush1.bf16.msra.mxu1 %v7064_v47 }
 0x34b   :  { %v2118_v7 = vsub.f32 %v9633_v24, %v2048_v31  ;;  %7066 = vmatprep.subr.bf16.mxu1 %v12523_v10 }
 0x34c   :  { %v7308_v32 = vpop.eup %7307 }
 0x34d   :  { %6391 = vmatmul.mubr.msk.f32.gmra.mrb[58].mxu1 %vm1865_vm3, %v2501_v2  ;;  %v9924_v57 = vpop.eup %7309  ;;  %v2242_v15 = vmul.f32 1.442695, %v2118_v7  ;;  %v2351_v50 = vpop.xlane.xlu0 %2350  ;;  %v2503_v62 = vmul.f32 %v7308_v32, %v12529_v40 }
 0x34e   :  { %3015 = vmatprep.mubr.f32.mxu1 %v12522_v13  ;;  %7317 = vrcp.f32 %v2351_v50  ;;  %v2424_v60 = vsel %vm1865_vm3, %v9924_v57, 0.0 }
 0x34f   :  { %7319 = vpow2.f32 %v2242_v15  ;;  %v2051_v25 = vpop.xlane.xlu1 %2050  ;;  %2425 = vadd.xlane.f32.xlu1 %v2424_v60 }
 0x350   :  { %v7312_v52 = vpop.eup %7311  ;;  %v2119_v24 = vsub.f32 %v9643_v5, %v2051_v25 }
 0x351   :  { %6392 = vmatmul.mubr.msk.f32.gmra.mrb[60].mxu1 %vm1865_vm3, %v2503_v62  ;;  %v2354_v42 = vpop.xlane.xlu0 %2353  ;;  %v2505_v6 = vmul.f32 %v7312_v52, %v12530_v63 }
 0x352   :  { %3021 = vmatprep.mubr.f32.mxu1 %v12522_v13  ;;  %v9934_v53 = vpop.eup %7313  ;;  %v2244_v18 = vmul.f32 1.442695, %v2119_v24  ;;  %7321 = vrcp.f32 %v2354_v42  ;;  %v12535_v24 = vld [vmem:[#allocation16_spill] sm:$0xff] }
 0x353   :  { %v2427_v49 = vsel %vm1865_vm3, %v9934_v53, 0.0 }
 0x354   :  { %v7316_v43 = vpop.eup %7315  ;;  %7323 = vpow2.f32 %v2244_v18  ;;  %2428 = vadd.xlane.f32.xlu0 %v2427_v49  ;;  %v12536_v49 = vld [vmem:[#allocation17_spill] sm:$0xff] }
 0x355   :  { %6393 = vmatmul.mubr.msk.f32.gmra.mrb[62].mxu1 %vm1865_vm3, %v2505_v6  ;;  %v2357_v5 = vpop.xlane.xlu0 %2356  ;;  %v2507_v26 = vmul.f32 %v7316_v43, %v12531_v59 }
 0x356   :  { %3027 = vmatprep.mubr.f32.mxu1 %v12522_v13  ;;  %7325 = vrcp.f32 %v2357_v5  ;;  %v2054_v58 = vpop.xlane.xlu1 %2053 }
 0x357   :  { %v2120_v27 = vsub.f32 %v9657_v11, %v2054_v58  ;;  %v3366_v58 = vld [vmem:[%s12417_s4 + $0x90] sm:$0xff] }
 0x358   :  { %v7318_v29 = vpop.eup %7317 }
 0x359   :  { %6394 = vmatmul.mubr.msk.f32.gmra.mrb[64].mxu1 %vm1865_vm3, %v2507_v26  ;;  %v9943_v12 = vpop.eup %7319  ;;  %v2246_v9 = vmul.f32 1.442695, %v2120_v27  ;;  %v2360_v19 = vpop.xlane.xlu0 %2359  ;;  %v2509_v23 = vmul.f32 %v7318_v29, %v12532_v34  ;;  %v3367_v27 = vld [vmem:[%s12417_s4 + $0x98] sm:$0xff] }
 0x35a   :  { %3033 = vmatprep.mubr.f32.mxu1 %v12522_v13  ;;  %7327 = vrcp.f32 %v2360_v19  ;;  %v2430_v11 = vsel %vm1865_vm3, %v9943_v12, 0.0  ;;  %v7067_v29 = vpack.c.bf16 %v3367_v27, %v3366_v58 }
 0x35b   :  { %7329 = vpow2.f32 %v2246_v9  ;;  %2431 = vadd.xlane.f32.xlu1 %v2430_v11  ;;  %v2057_v39 = vpop.xlane.xlu1 %2056 }
 0x35c   :  { %v7322_v51 = vpop.eup %7321  ;;  %v2121_v46 = vsub.f32 %v9669_v28, %v2057_v39  ;;  %v12534_v28 = vld [vmem:[#allocation15_spill] sm:$0xff]  ;;  %7068 = vmatpush1.bf16.msra.mxu1 %v7067_v29 }
 0x35d   :  { %6395 = vmatmul.mubr.msk.f32.gmra.mrb[66].mxu1 %vm1865_vm3, %v2509_v23  ;;  %v2363_v17 = vpop.xlane.xlu0 %2362  ;;  %v2511_v16 = vmul.f32 %v7322_v51, %v12533_v22 }
 0x35e   :  { %3039 = vmatprep.mubr.f32.mxu1 %v12522_v13  ;;  %v9959_v2 = vpop.eup %7323  ;;  %v2248_v31 = vmul.f32 1.442695, %v2121_v46  ;;  %7331 = vrcp.f32 %v2363_v17 }
 0x35f   :  { %v2433_v7 = vsel %vm1865_vm3, %v9959_v2, 0.0 }
 0x360   :  { %v7326_v32 = vpop.eup %7325  ;;  %7333 = vpow2.f32 %v2248_v31  ;;  %2434 = vadd.xlane.f32.xlu0 %v2433_v7 }
 0x361   :  { %6396 = vmatmul.mubr.msk.f32.gmra.mrb[68].mxu1 %vm1865_vm3, %v2511_v16  ;;  %v2513_v15 = vmul.f32 %v7326_v32, %v12534_v28 }
 0x362   :  { %3045 = vmatprep.mubr.f32.mxu1 %v12522_v13 }
 0x364   :  { %v2366_v50 = vpop.xlane.xlu0 %2365  ;;  %v7328_v40 = vpop.eup %7327 }
 0x365   :  { %6397 = vmatmul.mubr.msk.f32.gmra.mrb[70].mxu1 %vm1865_vm3, %v2513_v15  ;;  %7335 = vrcp.f32 %v2366_v50  ;;  %v9968_v62 = vpop.eup %7329  ;;  %v2515_v10 = vmul.f32 %v7328_v40, %v9662_v3 }
 0x366   :  { %3051 = vmatprep.mubr.f32.mxu1 %v12522_v13  ;;  %v2436_v60 = vsel %vm1865_vm3, %v9968_v62, 0.0 }
 0x367   :  { %2437 = vadd.xlane.f32.xlu1 %v2436_v60 }
 0x368   :  { %v7332_v25 = vpop.eup %7331 }
 0x369   :  { %6398 = vmatmul.mubr.msk.f32.gmra.mrb[72].mxu1 %vm1865_vm3, %v2515_v10  ;;  %v2369_v52 = vpop.xlane.xlu0 %2368  ;;  %v2517_v42 = vmul.f32 %v7332_v25, %v12535_v24 }
 0x36a   :  { %7337 = vrcp.f32 %v2369_v52  ;;  %3057 = vmatprep.mubr.f32.mxu1 %v12522_v13  ;;  %v9977_v63 = vpop.eup %7333 }
 0x36b   :  { %v2439_v6 = vsel %vm1865_vm3, %v9977_v63, 0.0 }
 0x36c   :  { %2440 = vadd.xlane.f32.xlu0 %v2439_v6 }
 0x36d   :  { %6399 = vmatmul.mubr.msk.f32.gmra.mrb[74].mxu1 %vm1865_vm3, %v2517_v42 }
 0x36e   :  { %3063 = vmatprep.mubr.f32.mxu1 %v12522_v13 }
 0x36f   :  { %v7336_v3 = vpop.eup %7335 }
 0x370   :  { %v2372_v18 = vpop.xlane.xlu0 %2371  ;;  %v2519_v43 = vmul.f32 %v7336_v3, %v12536_v49 }
 0x371   :  { %7339 = vrcp.f32 %v2372_v18 }
 0x372   :  { %6400 = vmatmul.mubr.msk.f32.gmra.mrb[76].mxu1 %vm1865_vm3, %v2519_v43 }
 0x373   :  { %3069 = vmatprep.mubr.f32.mxu1 %v12522_v13 }
 0x374   :  { %v7338_v5 = vpop.eup %7337 }
 0x375   :  { %v2375_v59 = vpop.xlane.xlu0 %2374  ;;  %v2521_v26 = vmul.f32 %v7338_v5, %v9700_v14 }
 0x376   :  { %7341 = vrcp.f32 %v2375_v59 }
 0x377   :  { %6401 = vmatmul.mubr.msk.f32.gmra.mrb[78].mxu1 %vm1865_vm3, %v2521_v26 }
 0x378   :  { %3075 = vmatprep.mubr.f32.mxu1 %v12522_v13 }
 0x37b   :  { %v7340_v9 = vpop.eup %7339 }
 0x37c   :  { %v2378_v19 = vpop.xlane.xlu1 %2377  ;;  %v2523_v34 = vmul.f32 %v7340_v9, %v9723_v36 }
 0x37d   :  { %7343 = vrcp.f32 %v2378_v19 }
 0x37e   :  { %6402 = vmatmul.mubr.msk.f32.gmra.mrb[80].mxu1 %vm1865_vm3, %v2523_v34 }
 0x37f   :  { %3081 = vmatprep.mubr.f32.mxu1 %v12522_v13 }
 0x380   :  { %v7342_v14 = vpop.eup %7341 }
 0x381   :  { %v2381_v23 = vpop.xlane.xlu0 %2380  ;;  %v2525_v45 = vmul.f32 %v7342_v14, %v9732_v21 }
 0x382   :  { %7345 = vrcp.f32 %v2381_v23 }
 0x383   :  { %6403 = vmatmul.mubr.msk.f32.gmra.mrb[82].mxu1 %vm1865_vm3, %v2525_v45 }
 0x384   :  { %3087 = vmatprep.mubr.f32.mxu1 %v12522_v13 }
 0x387   :  { %v7344_v30 = vpop.eup %7343 }
 0x388   :  { %v2384_v11 = vpop.xlane.xlu1 %2383  ;;  %v2527_v47 = vmul.f32 %v7344_v30, %v9743_v54 }
 0x389   :  { %7347 = vrcp.f32 %v2384_v11 }
 0x38a   :  { %6404 = vmatmul.mubr.msk.f32.gmra.mrb[84].mxu1 %vm1865_vm3, %v2527_v47 }
 0x38b   :  { %3093 = vmatprep.mubr.f32.mxu1 %v12522_v13 }
 0x38c   :  { %v7346_v36 = vpop.eup %7345 }
 0x38d   :  { %v2387_v39 = vpop.xlane.xlu0 %2386  ;;  %v2529_v51 = vmul.f32 %v7346_v36, %v9752_v56 }
 0x38e   :  { %7349 = vrcp.f32 %v2387_v39 }
 0x38f   :  { %6405 = vmatmul.mubr.msk.f32.gmra.mrb[86].mxu1 %vm1865_vm3, %v2529_v51 }
 0x390   :  { %3099 = vmatprep.mubr.f32.mxu1 %v12522_v13 }
 0x393   :  { %v7348_v21 = vpop.eup %7347 }
 0x394   :  { %v2390_v46 = vpop.xlane.xlu1 %2389  ;;  %v2531_v17 = vmul.f32 %v7348_v21, %v9769_v35 }
 0x395   :  { %7351 = vrcp.f32 %v2390_v46 }
 0x396   :  { %6406 = vmatmul.mubr.msk.f32.gmra.mrb[88].mxu1 %vm1865_vm3, %v2531_v17 }
 0x397   :  { %3105 = vmatprep.mubr.f32.mxu1 %v12522_v13 }
 0x398   :  { %v7350_v54 = vpop.eup %7349 }
 0x399   :  { %v2393_v22 = vpop.xlane.xlu0 %2392  ;;  %v2533_v16 = vmul.f32 %v7350_v54, %v9778_v41 }
 0x39a   :  { %7353 = vrcp.f32 %v2393_v22 }
 0x39b   :  { %6407 = vmatmul.mubr.msk.f32.gmra.mrb[90].mxu1 %vm1865_vm3, %v2533_v16 }
 0x39c   :  { %3111 = vmatprep.mubr.f32.mxu1 %v12522_v13 }
 0x39f   :  { %v7352_v56 = vpop.eup %7351 }
 0x3a0   :  { %v2396_v31 = vpop.xlane.xlu1 %2395  ;;  %v2535_v7 = vmul.f32 %v7352_v56, %v9788_v20 }
 0x3a1   :  { %7355 = vrcp.f32 %v2396_v31 }
 0x3a2   :  { %6408 = vmatmul.mubr.msk.f32.gmra.mrb[92].mxu1 %vm1865_vm3, %v2535_v7 }
 0x3a3   :  { %3117 = vmatprep.mubr.f32.mxu1 %v12522_v13 }
 0x3a4   :  { %v7354_v35 = vpop.eup %7353 }
 0x3a5   :  { %v2399_v32 = vpop.xlane.xlu0 %2398  ;;  %v2537_v28 = vmul.f32 %v7354_v35, %v9797_v8 }
 0x3a6   :  { %7357 = vrcp.f32 %v2399_v32 }
 0x3a7   :  { %6409 = vmatmul.mubr.msk.f32.gmra.mrb[94].mxu1 %vm1865_vm3, %v2537_v28 }
 0x3a8   :  { %3123 = vmatprep.mubr.f32.mxu1 %v12522_v13 }
 0x3a9   :  { %v10019_v41 = vpop.f32.mrb[0].mxu1 }
 0x3aa   :  { %v10021_v50 = vpop.f32.mrb[1].mxu1 }
 0x3ab   :  { %v7356_v15 = vpop.eup %7355 }
 0x3ac   :  { %v2402_v20 = vpop.xlane.xlu1 %2401  ;;  %v2539_v40 = vmul.f32 %v7356_v15, %v9814_v4 }
 0x3ad   :  { %7359 = vrcp.f32 %v2402_v20 }
 0x3ae   :  { %6410 = vmatmul.mubr.msk.f32.gmra.mrb[96].mxu1 %vm1865_vm3, %v2539_v40  ;;  %v10025_v10 = vpop.f32.mrb[2].mxu1 }
 0x3af   :  { %3129 = vmatprep.mubr.f32.mxu1 %v12522_v13  ;;  %v10028_v60 = vpop.f32.mrb[3].mxu1 }
 0x3b0   :  { %v7358_v8 = vpop.eup %7357 }
 0x3b1   :  { %v2405_v25 = vpop.xlane.xlu0 %2404  ;;  %v2541_v52 = vmul.f32 %v7358_v8, %v9823_v61 }
 0x3b2   :  { %7361 = vrcp.f32 %v2405_v25  ;;  %v10031_v24 = vpop.f32.mrb[4].mxu1 }
 0x3b3   :  { %6411 = vmatmul.mubr.msk.f32.gmra.mrb[98].mxu1 %vm1865_vm3, %v2541_v52  ;;  %v10034_v42 = vpop.f32.mrb[5].mxu1 }
 0x3b4   :  { %3135 = vmatprep.mubr.f32.mxu1 %v12522_v13 }
 0x3b7   :  { %v7360_v4 = vpop.eup %7359 }
 0x3b8   :  { %v10037_v6 = vpop.f32.mrb[6].mxu1  ;;  %v2408_v3 = vpop.xlane.xlu1 %2407  ;;  %v2543_v18 = vmul.f32 %v7360_v4, %v9833_v48 }
 0x3b9   :  { %v10040_v49 = vpop.f32.mrb[7].mxu1  ;;  %7363 = vrcp.f32 %v2408_v3 }
 0x3ba   :  { %6412 = vmatmul.mubr.msk.f32.gmra.mrb[100].mxu1 %vm1865_vm3, %v2543_v18 }
 0x3bb   :  { %3141 = vmatprep.mubr.f32.mxu1 %v12522_v13 }
 0x3bc   :  { %v7362_v61 = vpop.eup %7361  ;;  %v10044_v43 = vpop.f32.mrb[8].mxu1 }
 0x3bd   :  { %v10046_v5 = vpop.f32.mrb[9].mxu1  ;;  %v2411_v59 = vpop.xlane.xlu0 %2410  ;;  %v2545_v26 = vmul.f32 %v7362_v61, %v9842_v33 }
 0x3be   :  { %7365 = vrcp.f32 %v2411_v59 }
 0x3bf   :  { %6413 = vmatmul.mubr.msk.f32.gmra.mrb[102].mxu1 %vm1865_vm3, %v2545_v26 }
 0x3c0   :  { %v10050_v58 = vpop.f32.mrb[10].mxu1  ;;  %3147 = vmatprep.mubr.f32.mxu1 %v12522_v13 }
 0x3c1   :  { %v10053_v48 = vpop.f32.mrb[11].mxu1 }
 0x3c3   :  { %v7364_v27 = vpop.eup %7363 }
 0x3c4   :  { %v10055_v29 = vpop.f32.mrb[12].mxu1  ;;  %v2414_v9 = vpop.xlane.xlu1 %2413  ;;  %v2547_v19 = vmul.f32 %v7364_v27, %v9859_v38 }
 0x3c5   :  { %v10058_v34 = vpop.f32.mrb[13].mxu1  ;;  %7367 = vrcp.f32 %v2414_v9 }
 0x3c6   :  { %6414 = vmatmul.mubr.msk.f32.gmra.mrb[104].mxu1 %vm1865_vm3, %v2547_v19 }
 0x3c7   :  { %3153 = vmatprep.mubr.f32.mxu1 %v12522_v13 }
 0x3c8   :  { %v7366_v33 = vpop.eup %7365  ;;  %v10062_v14 = vpop.f32.mrb[14].mxu1 }
 0x3c9   :  { %v10064_v23 = vpop.f32.mrb[15].mxu1  ;;  %v2417_v45 = vpop.xlane.xlu0 %2416  ;;  %v2549_v30 = vmul.f32 %v7366_v33, %v9868_v44 }
 0x3ca   :  { %7369 = vrcp.f32 %v2417_v45 }
 0x3cb   :  { %6415 = vmatmul.mubr.msk.f32.gmra.mrb[106].mxu1 %vm1865_vm3, %v2549_v30 }
 0x3cc   :  { %v10068_v11 = vpop.f32.mrb[16].mxu1  ;;  %3159 = vmatprep.mubr.f32.mxu1 %v12522_v13 }
 0x3cd   :  { %v10071_v38 = vpop.f32.mrb[17].mxu1 }
 0x3cf   :  { %v7368_v47 = vpop.eup %7367 }
 0x3d0   :  { %v10073_v36 = vpop.f32.mrb[18].mxu1  ;;  %v2420_v39 = vpop.xlane.xlu1 %2419  ;;  %v2551_v51 = vmul.f32 %v7368_v47, %v9878_v0 }
 0x3d1   :  { %v10076_v21 = vpop.f32.mrb[19].mxu1  ;;  %7371 = vrcp.f32 %v2420_v39 }
 0x3d2   :  { %6416 = vmatmul.mubr.msk.f32.gmra.mrb[108].mxu1 %vm1865_vm3, %v2551_v51 }
 0x3d3   :  { %3165 = vmatprep.mubr.f32.mxu1 %v12522_v13 }
 0x3d4   :  { %v7370_v44 = vpop.eup %7369  ;;  %v10080_v46 = vpop.f32.mrb[20].mxu1 }
 0x3d5   :  { %v10082_v17 = vpop.f32.mrb[21].mxu1  ;;  %v2423_v54 = vpop.xlane.xlu0 %2422  ;;  %v2553_v22 = vmul.f32 %v7370_v44, %v9887_v55 }
 0x3d6   :  { %7373 = vrcp.f32 %v2423_v54 }
 0x3d7   :  { %6417 = vmatmul.mubr.msk.f32.gmra.mrb[110].mxu1 %vm1865_vm3, %v2553_v22 }
 0x3d8   :  { %v10086_v16 = vpop.f32.mrb[22].mxu1  ;;  %3171 = vmatprep.mubr.f32.mxu1 %v12522_v13 }
 0x3d9   :  { %v10089_v0 = vpop.f32.mrb[23].mxu1 }
 0x3db   :  { %v7372_v56 = vpop.eup %7371 }
 0x3dc   :  { %v10091_v31 = vpop.f32.mrb[24].mxu1  ;;  %v2555_v7 = vmul.f32 %v7372_v56, %v9897_v37  ;;  %v2426_v32 = vpop.xlane.xlu1 %2425 }
 0x3dd   :  { %v10094_v35 = vpop.f32.mrb[25].mxu1  ;;  %7375 = vrcp.f32 %v2426_v32 }
 0x3de   :  { %6418 = vmatmul.mubr.msk.f32.gmra.mrb[112].mxu1 %vm1865_vm3, %v2555_v7 }
 0x3df   :  { %3177 = vmatprep.mubr.f32.mxu1 %v12522_v13 }
 0x3e0   :  { %v7374_v55 = vpop.eup %7373  ;;  %v10098_v28 = vpop.f32.mrb[26].mxu1 }
 0x3e1   :  { %v10100_v15 = vpop.f32.mrb[27].mxu1  ;;  %v2557_v20 = vmul.f32 %v7374_v55, %v9912_v1  ;;  %v2429_v40 = vpop.xlane.xlu0 %2428 }
 0x3e2   :  { %7377 = vrcp.f32 %v2429_v40 }
 0x3e3   :  { %6419 = vmatmul.mubr.msk.f32.gmra.mrb[114].mxu1 %vm1865_vm3, %v2557_v20 }
 0x3e4   :  { %v10104_v37 = vpop.f32.mrb[28].mxu1  ;;  %3183 = vmatprep.mubr.f32.mxu1 %v12522_v13 }
 0x3e5   :  { %v10107_v8 = vpop.f32.mrb[29].mxu1 }
 0x3e7   :  { %v7376_v25 = vpop.eup %7375 }
 0x3e8   :  { %v10109_v52 = vpop.f32.mrb[30].mxu1  ;;  %v2432_v3 = vpop.xlane.xlu1 %2431  ;;  %v2559_v18 = vmul.f32 %v7376_v25, %v9924_v57 }
 0x3e9   :  { %v10111_v4 = vpop.f32.mrb[31].mxu1  ;;  %7379 = vrcp.f32 %v2432_v3  ;;  %v10160_v3 = vld [vmem:[%s12413_s0 + $0x8] sm:$0xff] }
 0x3ea   :  { %6420 = vmatmul.mubr.msk.f32.gmra.mrb[116].mxu1 %vm1865_vm3, %v2559_v18  ;;  %v3221_v18 = vmul.f32 %v10160_v3, %v10021_v50  ;;  %v10180_v50 = vld [vmem:[%s12413_s0 + $0x18] sm:$0xff] }
 0x3eb   :  { %3189 = vmatprep.mubr.f32.mxu1 %v12522_v13 }
 0x3ec   :  { %v10115_v1 = vpop.f32.mrb[32].mxu1  ;;  %v7378_v61 = vpop.eup %7377 }
 0x3ed   :  { %v10118_v59 = vpop.f32.mrb[33].mxu1  ;;  %v2435_v26 = vpop.xlane.xlu0 %2434  ;;  %v2561_v27 = vmul.f32 %v7378_v61, %v9934_v53 }
 0x3ee   :  { %7381 = vrcp.f32 %v2435_v26  ;;  %v3223_v26 = vmul.f32 %v10180_v50, %v10028_v60 }
 0x3ef   :  { %6421 = vmatmul.mubr.msk.f32.gmra.mrb[118].mxu1 %vm1865_vm3, %v2561_v27 }
 0x3f0   :  { %v10121_v9 = vpop.f32.mrb[34].mxu1  ;;  %3195 = vmatprep.mubr.f32.mxu1 %v12522_v13 }
 0x3f1   :  { %v10124_v19 = vpop.f32.mrb[35].mxu1 }
 0x3f3   :  { %v7380_v57 = vpop.eup %7379 }
 0x3f4   :  { %v10127_v33 = vpop.f32.mrb[36].mxu1  ;;  %v2438_v30 = vpop.xlane.xlu1 %2437  ;;  %v2563_v47 = vmul.f32 %v7380_v57, %v9943_v12 }
 0x3f5   :  { %v10129_v45 = vpop.f32.mrb[37].mxu1  ;;  %7383 = vrcp.f32 %v2438_v30  ;;  %v10192_v30 = vld [vmem:[%s12413_s0 + $0x10] sm:$0xff] }
 0x3f6   :  { %6422 = vmatmul.mubr.msk.f32.gmra.mrb[120].mxu1 %vm1865_vm3, %v2563_v47  ;;  %v10199_v47 = vld [vmem:[%s12413_s0 + $0x28] sm:$0xff] }
 0x3f7   :  { %3201 = vmatprep.mubr.f32.mxu1 %v12522_v13  ;;  %v3225_v60 = vmul.f32 %v10199_v47, %v10034_v42 }
 0x3f8   :  { %v10133_v53 = vpop.f32.mrb[38].mxu1  ;;  %v7382_v39 = vpop.eup %7381 }
 0x3f9   :  { %v10136_v51 = vpop.f32.mrb[39].mxu1  ;;  %v2441_v44 = vpop.xlane.xlu0 %2440  ;;  %v2565_v54 = vmul.f32 %v7382_v39, %v9959_v2 }
 0x3fa   :  { %7385 = vrcp.f32 %v2441_v44 }
 0x3fb   :  { %6423 = vmatmul.mubr.msk.f32.gmra.mrb[122].mxu1 %vm1865_vm3, %v2565_v54  ;;  %v10211_v54 = vld [vmem:[%s12413_s0 + $0x20] sm:$0xff] }
 0x3fc   :  { %v10139_v22 = vpop.f32.mrb[40].mxu1  ;;  %3207 = vmatprep.mubr.f32.mxu1 %v12522_v13 }
 0x3fd   :  { %v10142_v56 = vpop.f32.mrb[41].mxu1 }
 0x3ff   :  { %v7384_v12 = vpop.eup %7383 }
 0x400   :  { %v10145_v7 = vpop.f32.mrb[42].mxu1  ;;  %v2567_v55 = vmul.f32 %v7384_v12, %v9968_v62  ;;  %v10218_v12 = vld [vmem:[%s12413_s0 + $0x38] sm:$0xff] }
 0x401   :  { %v10147_v32 = vpop.f32.mrb[43].mxu1  ;;  %v3227_v42 = vmul.f32 %v10218_v12, %v10040_v49 }
 0x402   :  { %6424 = vmatmul.mubr.msk.f32.gmra.mrb[124].mxu1 %vm1865_vm3, %v2567_v55 }
 0x403   :  { %3213 = vmatprep.mubr.f32.mxu1 %v12522_v13  ;;  %v10173_v13 = vld [vmem:[%s12413_s0] sm:$0xff] }
 0x404   :  { %v10151_v20 = vpop.f32.mrb[44].mxu1  ;;  %v7386_v2 = vpop.eup %7385 }
 0x405   :  { %v10154_v40 = vpop.f32.mrb[45].mxu1  ;;  %v2569_v25 = vmul.f32 %v7386_v2, %v9977_v63  ;;  %v3220_v63 = vmul.f32 %v10173_v13, %v10019_v41  ;;  %v3222_v41 = vmul.f32 %v10192_v30, %v10025_v10  ;;  %v3224_v10 = vmul.f32 %v10211_v54, %v10031_v24 }
 0x407   :  { %6425 = vmatmul.mubr.msk.f32.gmra.mrb[126].mxu1 %vm1865_vm3, %v2569_v25  ;;  %v10230_v25 = vld [vmem:[%s12413_s0 + $0x30] sm:$0xff] }
 0x408   :  { %v10164_v62 = vpop.f32.mrb[46].mxu1  ;;  %6426 = vmatprep.mubr.msk.f32.mxu1 %vm810_vm0, %v3221_v18  ;;  %v3226_v24 = vmul.f32 %v10230_v25, %v10037_v6  ;;  %v10237_v18 = vld [vmem:[%s12413_s0 + $0x48] sm:$0xff] }
 0x409   :  { %v10167_v61 = vpop.f32.mrb[47].mxu1  ;;  %12537 = vst [vmem:[#allocation5_spill] sm:$0xff] %v10237_v18  ;;  %v3229_v49 = vmul.f32 %v10237_v18, %v10046_v5  ;;  %v10414_v18 = vld [vmem:[%s12413_s0 + $0xd8] sm:$0xff] }
 0x40a   :  { %12553 = vst [vmem:[#allocation21_spill] sm:$0xff] %v10414_v18 }
 0x40b   :  { %3625 = vmatmul.mubr.f32.vlgmr.msra.gmra.mrb[128].mxu1 %v3220_v63 }
 0x40c   :  { %v10184_v27 = vpop.f32.mrb[48].mxu1  ;;  %6427 = vmatprep.mubr.msk.f32.mxu1 %vm810_vm0, %v3223_v26 }
 0x40d   :  { %v10186_v57 = vpop.f32.mrb[49].mxu1 }
 0x40f   :  { %3630 = vmatmul.mubr.f32.gmra.mrb[130].mxu1 %v3222_v41  ;;  %v10249_v41 = vld [vmem:[%s12413_s0 + $0x40] sm:$0xff] }
 0x410   :  { %v10203_v39 = vpop.f32.mrb[50].mxu1  ;;  %6428 = vmatprep.mubr.msk.f32.mxu1 %vm810_vm0, %v3225_v60  ;;  %v3228_v6 = vmul.f32 %v10249_v41, %v10044_v43  ;;  %v10256_v60 = vld [vmem:[%s12413_s0 + $0x58] sm:$0xff] }
 0x411   :  { %v10205_v44 = vpop.f32.mrb[51].mxu1  ;;  %12538 = vst [vmem:[#allocation6_spill] sm:$0xff] %v10256_v60  ;;  %v3231_v5 = vmul.f32 %v10256_v60, %v10053_v48  ;;  %v10287_v60 = vld [vmem:[%s12413_s0 + $0x60] sm:$0xff] }
 0x412   :  { %12541 = vst [vmem:[#allocation9_spill] sm:$0xff] %v10287_v60 }
 0x413   :  { %3635 = vmatmul.mubr.f32.gmra.mrb[132].mxu1 %v3224_v10 }
 0x414   :  { %v10222_v55 = vpop.f32.mrb[52].mxu1  ;;  %6429 = vmatprep.mubr.msk.f32.mxu1 %vm810_vm0, %v3227_v42 }
 0x415   :  { %v10224_v2 = vpop.f32.mrb[53].mxu1 }
 0x417   :  { %3640 = vmatmul.mubr.f32.gmra.mrb[134].mxu1 %v3226_v24  ;;  %v10268_v24 = vld [vmem:[%s12413_s0 + $0x50] sm:$0xff] }
 0x418   :  { %v10241_v63 = vpop.f32.mrb[54].mxu1  ;;  %6430 = vmatprep.mubr.msk.f32.mxu1 %vm810_vm0, %v3229_v49  ;;  %12539 = vst [vmem:[#allocation7_spill] sm:$0xff] %v10268_v24  ;;  %v3230_v43 = vmul.f32 %v10268_v24, %v10050_v58  ;;  %v10275_v49 = vld [vmem:[%s12413_s0 + $0x68] sm:$0xff]  ;;  %v3232_v58 = vmul.f32 %v10287_v60, %v10055_v29  ;;  %v10294_v24 = vld [vmem:[%s12413_s0 + $0x78] sm:$0xff] }
 0x419   :  { %v10243_v26 = vpop.f32.mrb[55].mxu1  ;;  %12540 = vst [vmem:[#allocation8_spill] sm:$0xff] %v10275_v49  ;;  %v3233_v48 = vmul.f32 %v10275_v49, %v10058_v34  ;;  %12542 = vst [vmem:[#allocation10_spill] sm:$0xff] %v10294_v24  ;;  %v3235_v34 = vmul.f32 %v10294_v24, %v10064_v23  ;;  %v10306_v49 = vld [vmem:[%s12413_s0 + $0x70] sm:$0xff]  ;;  %v10313_v60 = vld [vmem:[%s12413_s0 + $0x88] sm:$0xff] }
 0x41a   :  { %12543 = vst [vmem:[#allocation11_spill] sm:$0xff] %v10306_v49  ;;  %v3234_v29 = vmul.f32 %v10306_v49, %v10062_v14  ;;  %12544 = vst [vmem:[#allocation12_spill] sm:$0xff] %v10313_v60  ;;  %v3237_v23 = vmul.f32 %v10313_v60, %v10071_v38  ;;  %v10325_v24 = vld [vmem:[%s12413_s0 + $0x80] sm:$0xff]  ;;  %v10332_v49 = vld [vmem:[%s12413_s0 + $0x98] sm:$0xff] }
 0x41b   :  { %3645 = vmatmul.mubr.f32.gmra.mrb[136].mxu1 %v3228_v6  ;;  %12545 = vst [vmem:[#allocation13_spill] sm:$0xff] %v10325_v24  ;;  %v3236_v14 = vmul.f32 %v10325_v24, %v10068_v11  ;;  %12546 = vst [vmem:[#allocation14_spill] sm:$0xff] %v10332_v49  ;;  %v3239_v38 = vmul.f32 %v10332_v49, %v10076_v21  ;;  %v10344_v60 = vld [vmem:[%s12413_s0 + $0x90] sm:$0xff]  ;;  %v10351_v24 = vld [vmem:[%s12413_s0 + $0xa8] sm:$0xff] }
 0x41c   :  { %v10260_v10 = vpop.f32.mrb[56].mxu1  ;;  %6431 = vmatprep.mubr.msk.f32.mxu1 %vm810_vm0, %v3231_v5  ;;  %12547 = vst [vmem:[#allocation15_spill] sm:$0xff] %v10344_v60  ;;  %v3238_v11 = vmul.f32 %v10344_v60, %v10073_v36  ;;  %12548 = vst [vmem:[#allocation16_spill] sm:$0xff] %v10351_v24  ;;  %v3241_v21 = vmul.f32 %v10351_v24, %v10082_v17  ;;  %v10363_v49 = vld [vmem:[%s12413_s0 + $0xa0] sm:$0xff]  ;;  %v10370_v60 = vld [vmem:[%s12413_s0 + $0xb8] sm:$0xff] }
 0x41d   :  { %v10262_v42 = vpop.f32.mrb[57].mxu1  ;;  %12549 = vst [vmem:[#allocation17_spill] sm:$0xff] %v10363_v49  ;;  %v3240_v36 = vmul.f32 %v10363_v49, %v10080_v46  ;;  %12550 = vst [vmem:[#allocation18_spill] sm:$0xff] %v10370_v60  ;;  %v3243_v17 = vmul.f32 %v10370_v60, %v10089_v0  ;;  %v10382_v24 = vld [vmem:[%s12413_s0 + $0xb0] sm:$0xff]  ;;  %v10389_v49 = vld [vmem:[%s12413_s0 + $0xc8] sm:$0xff] }
 0x41e   :  { %12551 = vst [vmem:[#allocation19_spill] sm:$0xff] %v10382_v24  ;;  %v3242_v46 = vmul.f32 %v10382_v24, %v10086_v16  ;;  %12552 = vst [vmem:[#allocation20_spill] sm:$0xff] %v10389_v49  ;;  %v3245_v0 = vmul.f32 %v10389_v49, %v10094_v35  ;;  %v10407_v35 = vld [vmem:[%s12413_s0 + $0xc0] sm:$0xff] }
 0x41f   :  { %3650 = vmatmul.mubr.f32.gmra.mrb[138].mxu1 %v3230_v43  ;;  %v3244_v49 = vmul.f32 %v10407_v35, %v10091_v31  ;;  %v10426_v31 = vld [vmem:[%s12413_s0 + $0xd0] sm:$0xff] }
 0x420   :  { %v10279_v6 = vpop.f32.mrb[58].mxu1  ;;  %6432 = vmatprep.mubr.msk.f32.mxu1 %vm810_vm0, %v3233_v48  ;;  %12554 = vst [vmem:[#allocation22_spill] sm:$0xff] %v10426_v31 }
 0x421   :  { %v10281_v5 = vpop.f32.mrb[59].mxu1 }
 0x423   :  { %3655 = vmatmul.mubr.f32.gmra.mrb[140].mxu1 %v3232_v58 }
 0x424   :  { %v10298_v43 = vpop.f32.mrb[60].mxu1  ;;  %6433 = vmatprep.mubr.msk.f32.mxu1 %vm810_vm0, %v3235_v34 }
 0x425   :  { %v10300_v48 = vpop.f32.mrb[61].mxu1 }
 0x427   :  { %3660 = vmatmul.mubr.f32.gmra.mrb[142].mxu1 %v3234_v29 }
 0x428   :  { %v10317_v58 = vpop.f32.mrb[62].mxu1  ;;  %6434 = vmatprep.mubr.msk.f32.mxu1 %vm810_vm0, %v3237_v23 }
 0x429   :  { %v10319_v34 = vpop.f32.mrb[63].mxu1 }
 0x42b   :  { %3665 = vmatmul.mubr.f32.gmra.mrb[144].mxu1 %v3236_v14 }
 0x42c   :  { %v10336_v29 = vpop.f32.mrb[64].mxu1  ;;  %6435 = vmatprep.mubr.msk.f32.mxu1 %vm810_vm0, %v3239_v38 }
 0x42d   :  { %v10338_v23 = vpop.f32.mrb[65].mxu1 }
 0x42f   :  { %3670 = vmatmul.mubr.f32.gmra.mrb[146].mxu1 %v3238_v11 }
 0x430   :  { %v10355_v14 = vpop.f32.mrb[66].mxu1  ;;  %6436 = vmatprep.mubr.msk.f32.mxu1 %vm810_vm0, %v3241_v21 }
 0x431   :  { %v10357_v38 = vpop.f32.mrb[67].mxu1 }
 0x433   :  { %3675 = vmatmul.mubr.f32.gmra.mrb[148].mxu1 %v3240_v36  ;;  %v4329_v36 = vld [vmem:[%s12421_s8] sm:$0xff] }
 0x434   :  { %v10374_v11 = vpop.f32.mrb[68].mxu1  ;;  %6437 = vmatprep.mubr.msk.f32.mxu1 %vm810_vm0, %v3243_v17  ;;  %v4330_v17 = vld [vmem:[%s12421_s8 + $0x8] sm:$0xff] }
 0x435   :  { %v10376_v21 = vpop.f32.mrb[69].mxu1  ;;  %v7069_v16 = vpack.c.bf16 %v4330_v17, %v4329_v36  ;;  %v3246_v17 = vmul.f32 %v10426_v31, %v10098_v28  ;;  %v10452_v31 = vld [vmem:[%s12413_s0 + $0xf8] sm:$0xff] }
 0x436   :  { %12557 = vst [vmem:[#allocation25_spill] sm:$0xff] %v10452_v31 }
 0x437   :  { %3680 = vmatmul.mubr.f32.gmra.mrb[150].mxu1 %v3242_v46  ;;  %7070 = vmatprep.subr.bf16.mxu0 %v7069_v16  ;;  %v3247_v46 = vmul.f32 %v10414_v18, %v10100_v15  ;;  %v10433_v15 = vld [vmem:[%s12413_s0 + $0xe8] sm:$0xff]  ;;  %v10445_v18 = vld [vmem:[%s12413_s0 + $0xe0] sm:$0xff] }
 0x438   :  { %v10399_v60 = vpop.f32.mrb[70].mxu1  ;;  %6438 = vmatprep.mubr.msk.f32.mxu1 %vm810_vm0, %v3245_v0  ;;  %7109 = vmatprep.subr.bf16.mxu1 %v7069_v16  ;;  %12555 = vst [vmem:[#allocation23_spill] sm:$0xff] %v10433_v15  ;;  %12556 = vst [vmem:[#allocation24_spill] sm:$0xff] %v10445_v18  ;;  %v3248_v28 = vmul.f32 %v10445_v18, %v10104_v37  ;;  %v10471_v18 = vld [vmem:[%s12413_s0 + $0x108] sm:$0xff] }
 0x439   :  { %v10401_v24 = vpop.f32.mrb[71].mxu1  ;;  %7072 = vmatpush3.bf16.msra.mxu0 %v7069_v16  ;;  %7115 = vmatpush3.bf16.msra.mxu1 %v7069_v16  ;;  %12558 = vst [vmem:[#allocation26_spill] sm:$0xff] %v10471_v18 }
 0x43b   :  { %3685 = vmatmul.mubr.f32.gmra.mrb[152].mxu1 %v3244_v49  ;;  %v3249_v49 = vmul.f32 %v10433_v15, %v10107_v8  ;;  %v3251_v8 = vmul.f32 %v10452_v31, %v10111_v4  ;;  %v3253_v4 = vmul.f32 %v10471_v18, %v10118_v59  ;;  %v10488_v31 = vld [vmem:[%s12413_s0 + $0x118] sm:$0xff]  ;;  %v10505_v18 = vld [vmem:[%s12413_s0 + $0x128] sm:$0xff] }
 0x43c   :  { %v10418_v0 = vpop.f32.mrb[72].mxu1  ;;  %6439 = vmatprep.mubr.msk.f32.mxu1 %vm810_vm0, %v3247_v46  ;;  %12559 = vst [vmem:[#allocation27_spill] sm:$0xff] %v10488_v31  ;;  %v3255_v59 = vmul.f32 %v10488_v31, %v10124_v19  ;;  %12561 = vst [vmem:[#allocation29_spill] sm:$0xff] %v10505_v18  ;;  %v3257_v19 = vmul.f32 %v10505_v18, %v10129_v45  ;;  %v10541_v18 = vld [vmem:[%s12413_s0 + $0x148] sm:$0xff] }
 0x43d   :  { %v10420_v36 = vpop.f32.mrb[73].mxu1  ;;  %12563 = vst [vmem:[#allocation31_spill] sm:$0xff] %v10541_v18 }
 0x43f   :  { %3690 = vmatmul.mubr.f32.gmra.mrb[154].mxu1 %v3246_v17 }
 0x440   :  { %v10437_v16 = vpop.f32.mrb[74].mxu1  ;;  %6440 = vmatprep.mubr.msk.f32.mxu1 %vm810_vm0, %v3249_v49  ;;  %v10462_v49 = vld [vmem:[%s12413_s0 + $0xf0] sm:$0xff] }
 0x441   :  { %v10439_v46 = vpop.f32.mrb[75].mxu1  ;;  %v3250_v37 = vmul.f32 %v10462_v49, %v10109_v52 }
 0x443   :  { %3695 = vmatmul.mubr.f32.gmra.mrb[156].mxu1 %v3248_v28  ;;  %v10479_v28 = vld [vmem:[%s12413_s0 + $0x100] sm:$0xff] }
 0x444   :  { %6441 = vmatprep.mubr.msk.f32.mxu1 %vm810_vm0, %v3251_v8  ;;  %v3252_v52 = vmul.f32 %v10479_v28, %v10115_v1 }
 0x445   :  { %v10457_v17 = vpop.f32.mrb[76].mxu1 }
 0x446   :  { %v10466_v15 = vpop.f32.mrb[77].mxu1 }
 0x447   :  { %3700 = vmatmul.mubr.f32.gmra.mrb[158].mxu1 %v3250_v37 }
 0x448   :  { %6442 = vmatprep.mubr.msk.f32.mxu1 %vm810_vm0, %v3253_v4  ;;  %v10498_v4 = vld [vmem:[%s12413_s0 + $0x110] sm:$0xff] }
 0x449   :  { %12560 = vst [vmem:[#allocation28_spill] sm:$0xff] %v10498_v4  ;;  %v3254_v1 = vmul.f32 %v10498_v4, %v10121_v9  ;;  %v10524_v4 = vld [vmem:[%s12413_s0 + $0x138] sm:$0xff] }
 0x44a   :  { %v10483_v8 = vpop.f32.mrb[78].mxu1  ;;  %12562 = vst [vmem:[#allocation30_spill] sm:$0xff] %v10524_v4  ;;  %v3259_v45 = vmul.f32 %v10524_v4, %v10136_v51  ;;  %v3261_v51 = vmul.f32 %v10541_v18, %v10142_v56  ;;  %v10558_v4 = vld [vmem:[%s12413_s0 + $0x158] sm:$0xff] }
 0x44b   :  { %v10492_v37 = vpop.f32.mrb[79].mxu1  ;;  %3705 = vmatmul.mubr.f32.gmra.mrb[160].mxu1 %v3252_v52  ;;  %12565 = vst [vmem:[#allocation33_spill] sm:$0xff] %v10558_v4  ;;  %v3263_v56 = vmul.f32 %v10558_v4, %v10147_v32 }
 0x44c   :  { %6443 = vmatprep.mubr.msk.f32.mxu1 %vm810_vm0, %v3255_v59  ;;  %v10515_v59 = vld [vmem:[%s12413_s0 + $0x120] sm:$0xff] }
 0x44d   :  { %v3256_v9 = vmul.f32 %v10515_v59, %v10127_v33 }
 0x44f   :  { %3710 = vmatmul.mubr.f32.gmra.mrb[162].mxu1 %v3254_v1  ;;  %v10532_v1 = vld [vmem:[%s12413_s0 + $0x130] sm:$0xff] }
 0x450   :  { %6444 = vmatprep.mubr.msk.f32.mxu1 %vm810_vm0, %v3257_v19  ;;  %v3258_v33 = vmul.f32 %v10532_v1, %v10133_v53 }
 0x451   :  { %v10510_v52 = vpop.f32.mrb[80].mxu1 }
 0x452   :  { %v10519_v31 = vpop.f32.mrb[81].mxu1 }
 0x453   :  { %3715 = vmatmul.mubr.f32.gmra.mrb[164].mxu1 %v3256_v9 }
 0x454   :  { %6445 = vmatprep.mubr.msk.f32.mxu1 %vm810_vm0, %v3259_v45  ;;  %v10551_v45 = vld [vmem:[%s12413_s0 + $0x140] sm:$0xff] }
 0x455   :  { %12564 = vst [vmem:[#allocation32_spill] sm:$0xff] %v10551_v45  ;;  %v3260_v53 = vmul.f32 %v10551_v45, %v10139_v22  ;;  %v10577_v45 = vld [vmem:[%s12413_s0 + $0x168] sm:$0xff] }
 0x456   :  { %v10536_v19 = vpop.f32.mrb[82].mxu1  ;;  %12567 = vst [vmem:[#allocation35_spill] sm:$0xff] %v10577_v45  ;;  %v3265_v32 = vmul.f32 %v10577_v45, %v10154_v40 }
 0x457   :  { %v10545_v9 = vpop.f32.mrb[83].mxu1  ;;  %3720 = vmatmul.mubr.f32.gmra.mrb[166].mxu1 %v3258_v33 }
 0x458   :  { %6446 = vmatprep.mubr.msk.f32.mxu1 %vm810_vm0, %v3261_v51  ;;  %v10568_v51 = vld [vmem:[%s12413_s0 + $0x150] sm:$0xff] }
 0x459   :  { %12566 = vst [vmem:[#allocation34_spill] sm:$0xff] %v10568_v51  ;;  %v3262_v22 = vmul.f32 %v10568_v51, %v10145_v7  ;;  %v4332_v7 = vld [vmem:[%s12421_s8 + $0x18] sm:$0xff] }
 0x45b   :  { %3725 = vmatmul.mubr.f32.gmra.mrb[168].mxu1 %v3260_v53  ;;  %v4331_v53 = vld [vmem:[%s12421_s8 + $0x10] sm:$0xff] }
 0x45c   :  { %6447 = vmatprep.mubr.msk.f32.mxu1 %vm810_vm0, %v3263_v56  ;;  %v10591_v56 = vld [vmem:[%s12413_s0 + $0x160] sm:$0xff] }
 0x45d   :  { %v10563_v33 = vpop.f32.mrb[84].mxu1  ;;  %v3264_v4 = vmul.f32 %v10591_v56, %v10151_v20  ;;  %v10610_v20 = vld [vmem:[%s12413_s0 + $0x170] sm:$0xff] }
 0x45e   :  { %v10572_v18 = vpop.f32.mrb[85].mxu1 }
 0x45f   :  { %3730 = vmatmul.mubr.f32.gmra.mrb[170].mxu1 %v3262_v22  ;;  %v7073_v22 = vpack.c.bf16 %v4332_v7, %v4331_v53  ;;  %v3266_v53 = vmul.f32 %v10610_v20, %v10164_v62  ;;  %v10627_v7 = vld [vmem:[%s12413_s0 + $0x180] sm:$0xff] }
 0x460   :  { %6448 = vmatprep.mubr.msk.f32.mxu1 %vm810_vm0, %v3265_v32  ;;  %v10600_v32 = vld [vmem:[%s12413_s0 + $0x178] sm:$0xff]  ;;  %v3268_v62 = vmul.f32 %v10627_v7, %v10184_v27 }
 0x461   :  { %12568 = vst [vmem:[#allocation36_spill] sm:$0xff] %v10600_v32  ;;  %v3267_v45 = vmul.f32 %v10600_v32, %v10167_v61  ;;  %7074 = vmatprep.subr.bf16.mxu0 %v7073_v22  ;;  %7110 = vmatprep.subr.bf16.mxu1 %v7073_v22  ;;  %v10617_v61 = vld [vmem:[%s12413_s0 + $0x188] sm:$0xff] }
 0x462   :  { %v10595_v40 = vpop.f32.mrb[86].mxu1  ;;  %7076 = vmatpush3.bf16.msra.mxu0 %v7073_v22  ;;  %12569 = vst [vmem:[#allocation37_spill] sm:$0xff] %v10617_v61  ;;  %7116 = vmatpush3.bf16.msra.mxu1 %v7073_v22 }
 0x463   :  { %v10604_v51 = vpop.f32.mrb[87].mxu1  ;;  %3735 = vmatmul.mubr.f32.gmra.mrb[172].mxu1 %v3264_v4  ;;  %v3269_v4 = vmul.f32 %v10617_v61, %v10186_v57  ;;  %v10636_v57 = vld [vmem:[%s12413_s0 + $0x198] sm:$0xff]  ;;  %v10653_v61 = vld [vmem:[%s12413_s0 + $0x1a8] sm:$0xff] }
 0x464   :  { %6449 = vmatprep.mubr.msk.f32.mxu1 %vm810_vm0, %v3267_v45  ;;  %12570 = vst [vmem:[#allocation38_spill] sm:$0xff] %v10636_v57  ;;  %v3271_v22 = vmul.f32 %v10636_v57, %v10205_v44  ;;  %12571 = vst [vmem:[#allocation39_spill] sm:$0xff] %v10653_v61  ;;  %v3273_v44 = vmul.f32 %v10653_v61, %v10224_v2  ;;  %v10670_v57 = vld [vmem:[%s12413_s0 + $0x1b8] sm:$0xff] }
 0x465   :  { %12573 = vst [vmem:[#allocation41_spill] sm:$0xff] %v10670_v57  ;;  %v3275_v2 = vmul.f32 %v10670_v57, %v10243_v26  ;;  %v7574_v57 = vld [vmem:[%s12413_s0 + $0x1d8] sm:$0xff] }
 0x467   :  { %3740 = vmatmul.mubr.f32.gmra.mrb[174].mxu1 %v3266_v53  ;;  %v10644_v53 = vld [vmem:[%s12413_s0 + $0x190] sm:$0xff] }
 0x468   :  { %6450 = vmatprep.mubr.msk.f32.mxu1 %vm810_vm0, %v3269_v4  ;;  %v3270_v27 = vmul.f32 %v10644_v53, %v10203_v39 }
 0x469   :  { %v10622_v45 = vpop.f32.mrb[88].mxu1 }
 0x46a   :  { %v10631_v32 = vpop.f32.mrb[89].mxu1 }
 0x46b   :  { %3745 = vmatmul.mubr.f32.gmra.mrb[176].mxu1 %v3268_v62 }
 0x46c   :  { %6451 = vmatprep.mubr.msk.f32.mxu1 %vm810_vm0, %v3271_v22  ;;  %v10663_v22 = vld [vmem:[%s12413_s0 + $0x1a0] sm:$0xff] }
 0x46d   :  { %12572 = vst [vmem:[#allocation40_spill] sm:$0xff] %v10663_v22  ;;  %v3272_v39 = vmul.f32 %v10663_v22, %v10222_v55  ;;  %v10689_v22 = vld [vmem:[%s12413_s0 + $0x1c8] sm:$0xff] }
 0x46e   :  { %v10648_v4 = vpop.f32.mrb[90].mxu1  ;;  %12575 = vst [vmem:[#allocation43_spill] sm:$0xff] %v10689_v22  ;;  %v3277_v26 = vmul.f32 %v10689_v22, %v10262_v42 }
 0x46f   :  { %v10657_v62 = vpop.f32.mrb[91].mxu1  ;;  %3750 = vmatmul.mubr.f32.gmra.mrb[178].mxu1 %v3270_v27 }
 0x470   :  { %6452 = vmatprep.mubr.msk.f32.mxu1 %vm810_vm0, %v3273_v44  ;;  %v10680_v44 = vld [vmem:[%s12413_s0 + $0x1b0] sm:$0xff] }
 0x471   :  { %12574 = vst [vmem:[#allocation42_spill] sm:$0xff] %v10680_v44  ;;  %v3274_v55 = vmul.f32 %v10680_v44, %v10241_v63  ;;  %v3279_v44 = vmul.f32 %v7574_v57, %v10281_v5  ;;  %v10727_v57 = vld [vmem:[%s12413_s0 + $0x1e0] sm:$0xff] }
 0x472   :  { %12577 = vst [vmem:[#allocation45_spill] sm:$0xff] %v10727_v57 }
 0x473   :  { %3755 = vmatmul.mubr.f32.gmra.mrb[180].mxu1 %v3272_v39  ;;  %v10697_v39 = vld [vmem:[%s12413_s0 + $0x1c0] sm:$0xff] }
 0x474   :  { %6453 = vmatprep.mubr.msk.f32.mxu1 %vm810_vm0, %v3275_v2  ;;  %v3276_v63 = vmul.f32 %v10697_v39, %v10260_v10 }
 0x475   :  { %v10675_v27 = vpop.f32.mrb[92].mxu1 }
 0x476   :  { %v10684_v61 = vpop.f32.mrb[93].mxu1 }
 0x477   :  { %3760 = vmatmul.mubr.f32.gmra.mrb[182].mxu1 %v3274_v55  ;;  %v10713_v55 = vld [vmem:[%s12413_s0 + $0x1d0] sm:$0xff] }
 0x478   :  { %6454 = vmatprep.mubr.msk.f32.mxu1 %vm810_vm0, %v3277_v26  ;;  %12576 = vst [vmem:[#allocation44_spill] sm:$0xff] %v10713_v55  ;;  %v3278_v10 = vmul.f32 %v10713_v55, %v10279_v6  ;;  %v7576_v26 = vld [vmem:[%s12413_s0 + $0x1e8] sm:$0xff] }
 0x479   :  { %v3281_v22 = vmul.f32 %v7576_v26, %v10300_v48 }
 0x47a   :  { %v10701_v2 = vpop.f32.mrb[94].mxu1 }
 0x47b   :  { %v10707_v42 = vpop.f32.mrb[95].mxu1  ;;  %3765 = vmatmul.mubr.f32.gmra.mrb[184].mxu1 %v3276_v63  ;;  %v7578_v63 = vld [vmem:[%s12413_s0 + $0x1f8] sm:$0xff] }
 0x47c   :  { %6455 = vmatprep.mubr.msk.f32.mxu1 %vm810_vm0, %v3279_v44  ;;  %v3280_v44 = vmul.f32 %v10727_v57, %v10298_v43  ;;  %v3283_v48 = vmul.f32 %v7578_v63, %v10319_v34  ;;  %v7580_v43 = vld [vmem:[%s12413_s0 + $0x208] sm:$0xff]  ;;  %v7581_v34 = vld [vmem:[%s12413_s0 + $0x200] sm:$0xff] }
 0x47d   :  { %v3285_v57 = vmul.f32 %v7580_v43, %v10338_v23  ;;  %v4333_v23 = vld [vmem:[%s12421_s8 + $0x20] sm:$0xff]  ;;  %v7584_v43 = vld [vmem:[%s12413_s0 + $0x228] sm:$0xff] }
 0x47f   :  { %3770 = vmatmul.mubr.f32.gmra.mrb[186].mxu1 %v3278_v10 }
 0x480   :  { %6456 = vmatprep.mubr.msk.f32.mxu1 %vm810_vm0, %v3281_v22  ;;  %v7579_v22 = vld [vmem:[%s12413_s0 + $0x1f0] sm:$0xff] }
 0x481   :  { %v10722_v5 = vpop.f32.mrb[96].mxu1  ;;  %v3282_v10 = vmul.f32 %v7579_v22, %v10317_v58  ;;  %v7582_v58 = vld [vmem:[%s12413_s0 + $0x218] sm:$0xff]  ;;  %v7583_v22 = vld [vmem:[%s12413_s0 + $0x210] sm:$0xff] }
 0x482   :  { %v10731_v6 = vpop.f32.mrb[97].mxu1  ;;  %v3287_v63 = vmul.f32 %v7582_v58, %v10357_v38  ;;  %v3286_v38 = vmul.f32 %v7583_v22, %v10355_v14 }
 0x483   :  { %3775 = vmatmul.mubr.f32.gmra.mrb[188].mxu1 %v3280_v44  ;;  %v3284_v44 = vmul.f32 %v7581_v34, %v10336_v29  ;;  %v3289_v34 = vmul.f32 %v7584_v43, %v10376_v21  ;;  %v7586_v21 = vld [vmem:[%s12413_s0 + $0x238] sm:$0xff] }
 0x484   :  { %6457 = vmatprep.mubr.msk.f32.mxu1 %vm810_vm0, %v3283_v48 }
 0x486   :  { %v10742_v26 = vpop.f32.mrb[98].mxu1 }
 0x487   :  { %v10748_v55 = vpop.f32.mrb[99].mxu1  ;;  %3780 = vmatmul.mubr.f32.gmra.mrb[190].mxu1 %v3282_v10 }
 0x488   :  { %6458 = vmatprep.mubr.msk.f32.mxu1 %vm810_vm0, %v3285_v57  ;;  %v4334_v57 = vld [vmem:[%s12421_s8 + $0x28] sm:$0xff] }
 0x489   :  { %v7077_v29 = vpack.c.bf16 %v4334_v57, %v4333_v23  ;;  %v10798_v57 = vld [vmem:[%s12413_s0 + $0x230] sm:$0xff] }
 0x48b   :  { %3785 = vmatmul.mubr.f32.gmra.mrb[192].mxu1 %v3284_v44  ;;  %7078 = vmatprep.subr.bf16.mxu0 %v7077_v29  ;;  %v10782_v44 = vld [vmem:[%s12413_s0 + $0x220] sm:$0xff] }
 0x48c   :  { %6459 = vmatprep.mubr.msk.f32.mxu1 %vm810_vm0, %v3287_v63  ;;  %7111 = vmatprep.subr.bf16.mxu1 %v7077_v29  ;;  %v3288_v14 = vmul.f32 %v10782_v44, %v10374_v11  ;;  %v3291_v63 = vmul.f32 %v7586_v21, %v10401_v24  ;;  %v3290_v11 = vmul.f32 %v10798_v57, %v10399_v60 }
 0x48d   :  { %v10766_v48 = vpop.f32.mrb[100].mxu1  ;;  %7080 = vmatpush3.bf16.msra.mxu0 %v7077_v29  ;;  %7117 = vmatpush3.bf16.msra.mxu1 %v7077_v29  ;;  %v7588_v29 = vld [vmem:[%s12413_s0 + $0x248] sm:$0xff] }
 0x48e   :  { %v10772_v10 = vpop.f32.mrb[101].mxu1  ;;  %v3293_v22 = vmul.f32 %v7588_v29, %v10420_v36  ;;  %v10845_v29 = vld [vmem:[%s12413_s0 + $0x260] sm:$0xff] }
 0x48f   :  { %3790 = vmatmul.mubr.f32.gmra.mrb[194].mxu1 %v3286_v38  ;;  %v10812_v38 = vld [vmem:[%s12413_s0 + $0x240] sm:$0xff] }
 0x490   :  { %6460 = vmatprep.mubr.msk.f32.mxu1 %vm810_vm0, %v3289_v34  ;;  %v3292_v43 = vmul.f32 %v10812_v38, %v10418_v0  ;;  %v7590_v34 = vld [vmem:[%s12413_s0 + $0x258] sm:$0xff] }
 0x491   :  { %v3295_v36 = vmul.f32 %v7590_v34, %v10439_v46  ;;  %v10862_v34 = vld [vmem:[%s12413_s0 + $0x270] sm:$0xff] }
 0x492   :  { %v10786_v58 = vpop.f32.mrb[102].mxu1 }
 0x493   :  { %v10792_v23 = vpop.f32.mrb[103].mxu1  ;;  %3795 = vmatmul.mubr.f32.gmra.mrb[196].mxu1 %v3288_v14  ;;  %v10826_v14 = vld [vmem:[%s12413_s0 + $0x250] sm:$0xff] }
 0x494   :  { %6461 = vmatprep.mubr.msk.f32.mxu1 %vm810_vm0, %v3291_v63  ;;  %v3294_v21 = vmul.f32 %v10826_v14, %v10437_v16  ;;  %v10835_v63 = vld [vmem:[%s12413_s0 + $0x268] sm:$0xff]  ;;  %v3296_v16 = vmul.f32 %v10845_v29, %v10457_v17  ;;  %v3298_v17 = vmul.f32 %v10862_v34, %v10483_v8 }
 0x495   :  { %v3297_v46 = vmul.f32 %v10835_v63, %v10466_v15 }
 0x497   :  { %3800 = vmatmul.mubr.f32.gmra.mrb[198].mxu1 %v3290_v11 }
 0x498   :  { %6462 = vmatprep.mubr.msk.f32.mxu1 %vm810_vm0, %v3293_v22  ;;  %v10852_v22 = vld [vmem:[%s12413_s0 + $0x278] sm:$0xff] }
 0x499   :  { %v10807_v24 = vpop.f32.mrb[104].mxu1  ;;  %v3299_v15 = vmul.f32 %v10852_v22, %v10492_v37 }
 0x49a   :  { %v10816_v60 = vpop.f32.mrb[105].mxu1 }
 0x49b   :  { %3805 = vmatmul.mubr.f32.gmra.mrb[200].mxu1 %v3292_v43 }
 0x49c   :  { %6463 = vmatprep.mubr.msk.f32.mxu1 %vm810_vm0, %v3295_v36 }
 0x49e   :  { %v10830_v0 = vpop.f32.mrb[106].mxu1 }
 0x49f   :  { %v10839_v11 = vpop.f32.mrb[107].mxu1  ;;  %3810 = vmatmul.mubr.f32.gmra.mrb[202].mxu1 %v3294_v21  ;;  %v10871_v21 = vld [vmem:[%s12413_s0 + $0x288] sm:$0xff] }
 0x4a0   :  { %6464 = vmatprep.mubr.msk.f32.mxu1 %vm810_vm0, %v3297_v46  ;;  %12578 = vst [vmem:[#allocation46_spill] sm:$0xff] %v10871_v21  ;;  %v3301_v37 = vmul.f32 %v10871_v21, %v10519_v31  ;;  %v10879_v46 = vld [vmem:[%s12413_s0 + $0x280] sm:$0xff]  ;;  %v10905_v21 = vld [vmem:[%s12413_s0 + $0x2a8] sm:$0xff] }
 0x4a1   :  { %v3300_v8 = vmul.f32 %v10879_v46, %v10510_v52  ;;  %12581 = vst [vmem:[#allocation49_spill] sm:$0xff] %v10905_v21 }
 0x4a3   :  { %3815 = vmatmul.mubr.f32.gmra.mrb[204].mxu1 %v3296_v16 }
 0x4a4   :  { %6465 = vmatprep.mubr.msk.f32.mxu1 %vm810_vm0, %v3299_v15  ;;  %v10888_v15 = vld [vmem:[%s12413_s0 + $0x298] sm:$0xff] }
 0x4a5   :  { %v10857_v43 = vpop.f32.mrb[108].mxu1  ;;  %12579 = vst [vmem:[#allocation47_spill] sm:$0xff] %v10888_v15  ;;  %v3303_v31 = vmul.f32 %v10888_v15, %v10545_v9  ;;  %v3305_v9 = vmul.f32 %v10905_v21, %v10572_v18  ;;  %v10941_v21 = vld [vmem:[%s12413_s0 + $0x2c8] sm:$0xff] }
 0x4a6   :  { %v10866_v36 = vpop.f32.mrb[109].mxu1  ;;  %12584 = vst [vmem:[#allocation52_spill] sm:$0xff] %v10941_v21 }
 0x4a7   :  { %3820 = vmatmul.mubr.f32.gmra.mrb[206].mxu1 %v3298_v17 }
 0x4a8   :  { %6466 = vmatprep.mubr.msk.f32.mxu1 %vm810_vm0, %v3301_v37  ;;  %v10898_v37 = vld [vmem:[%s12413_s0 + $0x290] sm:$0xff] }
 0x4a9   :  { %12580 = vst [vmem:[#allocation48_spill] sm:$0xff] %v10898_v37  ;;  %v3302_v52 = vmul.f32 %v10898_v37, %v10536_v19  ;;  %v10924_v37 = vld [vmem:[%s12413_s0 + $0x2b8] sm:$0xff] }
 0x4aa   :  { %v10883_v16 = vpop.f32.mrb[110].mxu1  ;;  %12582 = vst [vmem:[#allocation50_spill] sm:$0xff] %v10924_v37  ;;  %v3307_v18 = vmul.f32 %v10924_v37, %v10604_v51  ;;  %v3309_v51 = vmul.f32 %v10941_v21, %v10631_v32  ;;  %v10964_v21 = vld [vmem:[%s12413_s0 + $0x2d8] sm:$0xff] }
 0x4ab   :  { %v10892_v17 = vpop.f32.mrb[111].mxu1  ;;  %3825 = vmatmul.mubr.f32.gmra.mrb[208].mxu1 %v3300_v8 }
 0x4ac   :  { %6467 = vmatprep.mubr.msk.f32.mxu1 %vm810_vm0, %v3303_v31  ;;  %v10915_v31 = vld [vmem:[%s12413_s0 + $0x2a0] sm:$0xff] }
 0x4ad   :  { %v3304_v19 = vmul.f32 %v10915_v31, %v10563_v33 }
 0x4af   :  { %3830 = vmatmul.mubr.f32.gmra.mrb[210].mxu1 %v3302_v52  ;;  %v10932_v52 = vld [vmem:[%s12413_s0 + $0x2b0] sm:$0xff] }
 0x4b0   :  { %6468 = vmatprep.mubr.msk.f32.mxu1 %vm810_vm0, %v3305_v9  ;;  %12583 = vst [vmem:[#allocation51_spill] sm:$0xff] %v10932_v52  ;;  %v3306_v33 = vmul.f32 %v10932_v52, %v10595_v40  ;;  %v4336_v40 = vld [vmem:[%s12421_s8 + $0x38] sm:$0xff]  ;;  %v10957_v52 = vld [vmem:[%s12413_s0 + $0x2c0] sm:$0xff] }
 0x4b1   :  { %v10910_v8 = vpop.f32.mrb[112].mxu1  ;;  %v3308_v32 = vmul.f32 %v10957_v52, %v10622_v45 }
 0x4b2   :  { %v10919_v15 = vpop.f32.mrb[113].mxu1 }
 0x4b3   :  { %3835 = vmatmul.mubr.f32.gmra.mrb[212].mxu1 %v3304_v19 }
 0x4b4   :  { %6469 = vmatprep.mubr.msk.f32.mxu1 %vm810_vm0, %v3307_v18  ;;  %v4335_v18 = vld [vmem:[%s12421_s8 + $0x30] sm:$0xff] }
 0x4b5   :  { %v7081_v37 = vpack.c.bf16 %v4336_v40, %v4335_v18  ;;  %v10981_v40 = vld [vmem:[%s12413_s0 + $0x2e8] sm:$0xff] }
 0x4b6   :  { %v10936_v9 = vpop.f32.mrb[114].mxu1  ;;  %12585 = vst [vmem:[#allocation53_spill] sm:$0xff] %v10981_v40 }
 0x4b7   :  { %v10945_v19 = vpop.f32.mrb[115].mxu1  ;;  %3840 = vmatmul.mubr.f32.gmra.mrb[214].mxu1 %v3306_v33  ;;  %7082 = vmatprep.subr.bf16.mxu0 %v7081_v37  ;;  %v3311_v33 = vmul.f32 %v10964_v21, %v10657_v62  ;;  %v3313_v62 = vmul.f32 %v10981_v40, %v10684_v61 }
 0x4b8   :  { %6470 = vmatprep.mubr.msk.f32.mxu1 %vm810_vm0, %v3309_v51  ;;  %7112 = vmatprep.subr.bf16.mxu1 %v7081_v37  ;;  %v10972_v51 = vld [vmem:[%s12413_s0 + $0x2d0] sm:$0xff] }
 0x4b9   :  { %7084 = vmatpush3.bf16.msra.mxu0 %v7081_v37  ;;  %7118 = vmatpush3.bf16.msra.mxu1 %v7081_v37  ;;  %v3310_v45 = vmul.f32 %v10972_v51, %v10648_v4 }
 0x4bb   :  { %3845 = vmatmul.mubr.f32.gmra.mrb[216].mxu1 %v3308_v32  ;;  %v10991_v32 = vld [vmem:[%s12413_s0 + $0x2e0] sm:$0xff] }
 0x4bc   :  { %6471 = vmatprep.mubr.msk.f32.mxu1 %vm810_vm0, %v3311_v33  ;;  %12586 = vst [vmem:[#allocation54_spill] sm:$0xff] %v10991_v32  ;;  %v3312_v4 = vmul.f32 %v10991_v32, %v10675_v27  ;;  %v10998_v33 = vld [vmem:[%s12413_s0 + $0x2f8] sm:$0xff]  ;;  %v11017_v32 = vld [vmem:[%s12413_s0 + $0x308] sm:$0xff] }
 0x4bd   :  { %v10976_v18 = vpop.f32.mrb[116].mxu1  ;;  %12587 = vst [vmem:[#allocation55_spill] sm:$0xff] %v10998_v33  ;;  %v3315_v61 = vmul.f32 %v10998_v33, %v10707_v42  ;;  %12589 = vst [vmem:[#allocation57_spill] sm:$0xff] %v11017_v32  ;;  %v3317_v42 = vmul.f32 %v11017_v32, %v10731_v6  ;;  %v11034_v33 = vld [vmem:[%s12413_s0 + $0x318] sm:$0xff]  ;;  %v4337_v32 = vld [vmem:[%s12421_s8 + $0x40] sm:$0xff] }
 0x4be   :  { %v10985_v37 = vpop.f32.mrb[117].mxu1  ;;  %12591 = vst [vmem:[#allocation59_spill] sm:$0xff] %v11034_v33  ;;  %v3319_v6 = vmul.f32 %v11034_v33, %v10748_v55  ;;  %v4338_v55 = vld [vmem:[%s12421_s8 + $0x48] sm:$0xff] }
 0x4bf   :  { %3850 = vmatmul.mubr.f32.gmra.mrb[218].mxu1 %v3310_v45 }
 0x4c0   :  { %6472 = vmatprep.mubr.msk.f32.mxu1 %vm810_vm0, %v3313_v62  ;;  %v11010_v62 = vld [vmem:[%s12413_s0 + $0x2f0] sm:$0xff] }
 0x4c1   :  { %12588 = vst [vmem:[#allocation56_spill] sm:$0xff] %v11010_v62  ;;  %v3314_v27 = vmul.f32 %v11010_v62, %v10701_v2 }
 0x4c2   :  { %v11002_v40 = vpop.f32.mrb[118].mxu1 }
 0x4c3   :  { %v11004_v45 = vpop.f32.mrb[119].mxu1  ;;  %3855 = vmatmul.mubr.f32.gmra.mrb[220].mxu1 %v3312_v4  ;;  %v11025_v4 = vld [vmem:[%s12413_s0 + $0x300] sm:$0xff] }
 0x4c4   :  { %6473 = vmatprep.mubr.msk.f32.mxu1 %vm810_vm0, %v3315_v61  ;;  %12590 = vst [vmem:[#allocation58_spill] sm:$0xff] %v11025_v4  ;;  %v3316_v61 = vmul.f32 %v11025_v4, %v10722_v5  ;;  %v7085_v4 = vpack.c.bf16 %v4338_v55, %v4337_v32  ;;  %v4340_v32 = vld [vmem:[%s12421_s8 + $0x58] sm:$0xff] }
 0x4c6   :  { %7086 = vmatprep.subr.bf16.mxu0 %v7085_v4  ;;  %7113 = vmatprep.subr.bf16.mxu1 %v7085_v4 }
 0x4c7   :  { %3860 = vmatmul.mubr.f32.gmra.mrb[222].mxu1 %v3314_v27  ;;  %7088 = vmatpush3.bf16.msra.mxu0 %v7085_v4 }
 0x4c8   :  { %6474 = vmatprep.mubr.msk.f32.mxu1 %vm810_vm0, %v3317_v42  ;;  %v11044_v42 = vld [vmem:[%s12413_s0 + $0x310] sm:$0xff]  ;;  %7119 = vmatpush3.bf16.msra.mxu1 %v7085_v4 }
 0x4c9   :  { %v11029_v2 = vpop.f32.mrb[120].mxu1  ;;  %12592 = vst [vmem:[#allocation60_spill] sm:$0xff] %v11044_v42  ;;  %v3318_v5 = vmul.f32 %v11044_v42, %v10742_v26  ;;  %v11069_v42 = vld [vmem:[%s12413_s0 + $0x320] sm:$0xff] }
 0x4ca   :  { %v11038_v27 = vpop.f32.mrb[121].mxu1  ;;  %12594 = vst [vmem:[#allocation62_spill] sm:$0xff] %v11069_v42  ;;  %v3320_v62 = vmul.f32 %v11069_v42, %v10766_v48  ;;  %v11090_v48 = vld [vmem:[%s12413_s0 + $0x330] sm:$0xff] }
 0x4cb   :  { %3865 = vmatmul.mubr.f32.gmra.mrb[224].mxu1 %v3316_v61  ;;  %v11057_v61 = vld [vmem:[%s12413_s0 + $0x328] sm:$0xff] }
 0x4cc   :  { %6475 = vmatprep.mubr.msk.f32.mxu1 %vm810_vm0, %v3319_v6  ;;  %12593 = vst [vmem:[#allocation61_spill] sm:$0xff] %v11057_v61  ;;  %v3321_v6 = vmul.f32 %v11057_v61, %v10772_v10  ;;  %v4339_v10 = vld [vmem:[%s12421_s8 + $0x50] sm:$0xff]  ;;  %v3322_v61 = vmul.f32 %v11090_v48, %v10786_v58  ;;  %v11109_v58 = vld [vmem:[%s12413_s0 + $0x340] sm:$0xff] }
 0x4ce   :  { %v11061_v33 = vpop.f32.mrb[122].mxu1 }
 0x4cf   :  { %v11063_v26 = vpop.f32.mrb[123].mxu1  ;;  %3870 = vmatmul.mubr.f32.gmra.mrb[226].mxu1 %v3318_v5  ;;  %v11082_v5 = vld [vmem:[%s12413_s0 + $0x338] sm:$0xff] }
 0x4d0   :  { %6476 = vmatprep.mubr.msk.f32.mxu1 %vm810_vm0, %v3321_v6  ;;  %v3323_v55 = vmul.f32 %v11082_v5, %v10792_v23  ;;  %v7089_v6 = vpack.c.bf16 %v4340_v32, %v4339_v10  ;;  %v11099_v23 = vld [vmem:[%s12413_s0 + $0x348] sm:$0xff]  ;;  %v3324_v10 = vmul.f32 %v11109_v58, %v10807_v24  ;;  %v11116_v32 = vld [vmem:[%s12413_s0 + $0x358] sm:$0xff] }
 0x4d1   :  { %12595 = vst [vmem:[#allocation63_spill] sm:$0xff] %v11116_v32 }
 0x4d2   :  { %7090 = vmatprep.subr.bf16.mxu0 %v7089_v6  ;;  %7114 = vmatprep.subr.bf16.mxu1 %v7089_v6 }
 0x4d3   :  { %3875 = vmatmul.mubr.f32.gmra.mrb[228].mxu1 %v3320_v62  ;;  %7092 = vmatpush3.bf16.msra.mxu0 %v7089_v6  ;;  %v3325_v62 = vmul.f32 %v11099_v23, %v10816_v60  ;;  %v3327_v60 = vmul.f32 %v11116_v32, %v10839_v11 }
 0x4d4   :  { %6477 = vmatprep.mubr.msk.f32.mxu1 %vm810_vm0, %v3323_v55  ;;  %7120 = vmatpush3.bf16.msra.mxu1 %v7089_v6  ;;  %v11128_v6 = vld [vmem:[%s12413_s0 + $0x350] sm:$0xff] }
 0x4d5   :  { %v11094_v42 = vpop.f32.mrb[124].mxu1  ;;  %12596 = vst [vmem:[#allocation64_spill] sm:$0xff] %v11128_v6  ;;  %v3326_v24 = vmul.f32 %v11128_v6, %v10830_v0  ;;  %v11151_v6 = vld [vmem:[%s12413_s0 + $0x378] sm:$0xff] }
 0x4d6   :  { %v11103_v4 = vpop.f32.mrb[125].mxu1 }
 0x4d7   :  { %3880 = vmatmul.mubr.f32.gmra.mrb[230].mxu1 %v3322_v61 }
 0x4d8   :  { %6478 = vmatprep.mubr.msk.f32.mxu1 %vm810_vm0, %v3325_v62  ;;  %v11135_v62 = vld [vmem:[%s12413_s0 + $0x368] sm:$0xff] }
 0x4d9   :  { %v3329_v11 = vmul.f32 %v11135_v62, %v10866_v36  ;;  %v3331_v36 = vmul.f32 %v11151_v6, %v10892_v17 }
 0x4da   :  { %v11120_v55 = vpop.f32.mrb[126].mxu1 }
 0x4db   :  { %v11122_v61 = vpop.f32.mrb[127].mxu1  ;;  %3885 = vmatmul.mubr.f32.gmra.mrb[232].mxu1 %v3324_v10 }
 0x4dc   :  { %6479 = vmatprep.mubr.msk.f32.mxu1 %vm810_vm0, %v3327_v60  ;;  %v11144_v60 = vld [vmem:[%s12413_s0 + $0x360] sm:$0xff] }
 0x4dd   :  { %v3328_v0 = vmul.f32 %v11144_v60, %v10857_v43 }
 0x4de   :  { %v3626_v32 = vpop.f32.mrb[128].mxu1 }
 0x4df   :  { %3890 = vmatmul.mubr.f32.gmra.mrb[234].mxu1 %v3326_v24  ;;  %4009 = vrot.lane.b32.xlu1 %v3626_v32, %s7680_s23  ;;  %v3628_v10 = vpop.f32.mrb[129].mxu1 }
 0x4e0   :  { %6480 = vmatprep.mubr.msk.f32.mxu1 %vm810_vm0, %v3329_v11  ;;  %v11160_v11 = vld [vmem:[%s12413_s0 + $0x370] sm:$0xff]  ;;  %v11167_v10 = vld [vmem:[%s12413_s0 + $0x388] sm:$0xff] }
 0x4e1   :  { %v3330_v43 = vmul.f32 %v11160_v11, %v10883_v16  ;;  %v3333_v17 = vmul.f32 %v11167_v10, %v10919_v15 }
 0x4e2   :  { %v3631_v32 = vpop.f32.mrb[130].mxu1 }
 0x4e3   :  { %3895 = vmatmul.mubr.f32.gmra.mrb[236].mxu1 %v3328_v0  ;;  %4011 = vrot.lane.b32.xlu0 %v3631_v32, %s7680_s23  ;;  %v3633_v24 = vpop.f32.mrb[131].mxu1  ;;  %v11176_v32 = vld [vmem:[%s12413_s0 + $0x380] sm:$0xff] }
 0x4e4   :  { %6481 = vmatprep.mubr.msk.f32.mxu1 %vm810_vm0, %v3331_v36  ;;  %v3332_v16 = vmul.f32 %v11176_v32, %v10910_v8  ;;  %v11183_v24 = vld [vmem:[%s12413_s0 + $0x398] sm:$0xff] }
 0x4e5   :  { %v3335_v15 = vmul.f32 %v11183_v24, %v10945_v19 }
 0x4e6   :  { %v3636_v0 = vpop.f32.mrb[132].mxu1 }
 0x4e7   :  { %3900 = vmatmul.mubr.f32.gmra.mrb[238].mxu1 %v3330_v43  ;;  %4013 = vrot.lane.b32.xlu1 %v3636_v0, %s7680_s23  ;;  %v3638_v36 = vpop.f32.mrb[133].mxu1  ;;  %v11192_v0 = vld [vmem:[%s12413_s0 + $0x390] sm:$0xff] }
 0x4e8   :  { %6482 = vmatprep.mubr.msk.f32.mxu1 %vm810_vm0, %v3333_v17  ;;  %v3334_v8 = vmul.f32 %v11192_v0, %v10936_v9  ;;  %v11199_v36 = vld [vmem:[%s12413_s0 + $0x3a8] sm:$0xff] }
 0x4e9   :  { %v3337_v19 = vmul.f32 %v11199_v36, %v10985_v37 }
 0x4ea   :  { %v3641_v43 = vpop.f32.mrb[134].mxu1 }
 0x4eb   :  { %3905 = vmatmul.mubr.f32.gmra.mrb[240].mxu1 %v3332_v16  ;;  %4015 = vrot.lane.b32.xlu1 %v3641_v43, %s7680_s23  ;;  %v3643_v17 = vpop.f32.mrb[135].mxu1  ;;  %v11208_v43 = vld [vmem:[%s12413_s0 + $0x3a0] sm:$0xff] }
 0x4ec   :  { %6483 = vmatprep.mubr.msk.f32.mxu1 %vm810_vm0, %v3335_v15  ;;  %v3336_v9 = vmul.f32 %v11208_v43, %v10976_v18  ;;  %v11215_v17 = vld [vmem:[%s12413_s0 + $0x3b8] sm:$0xff] }
 0x4ed   :  { %v3339_v37 = vmul.f32 %v11215_v17, %v11004_v45 }
 0x4ee   :  { %v3646_v16 = vpop.f32.mrb[136].mxu1 }
 0x4ef   :  { %3910 = vmatmul.mubr.f32.gmra.mrb[242].mxu1 %v3334_v8  ;;  %4017 = vrot.lane.b32.xlu0 %v3646_v16, %s7680_s23  ;;  %v3648_v15 = vpop.f32.mrb[137].mxu1  ;;  %v11224_v16 = vld [vmem:[%s12413_s0 + $0x3b0] sm:$0xff] }
 0x4f0   :  { %6484 = vmatprep.mubr.msk.f32.mxu1 %vm810_vm0, %v3337_v19  ;;  %v3338_v18 = vmul.f32 %v11224_v16, %v11002_v40  ;;  %v11231_v15 = vld [vmem:[%s12413_s0 + $0x3c8] sm:$0xff] }
 0x4f1   :  { %v3341_v45 = vmul.f32 %v11231_v15, %v11038_v27 }
 0x4f2   :  { %v3651_v8 = vpop.f32.mrb[138].mxu1 }
 0x4f3   :  { %3915 = vmatmul.mubr.f32.gmra.mrb[244].mxu1 %v3336_v9  ;;  %4019 = vrot.lane.b32.xlu1 %v3651_v8, %s7680_s23  ;;  %v3653_v19 = vpop.f32.mrb[139].mxu1  ;;  %v11240_v8 = vld [vmem:[%s12413_s0 + $0x3c0] sm:$0xff] }
 0x4f4   :  { %6485 = vmatprep.mubr.msk.f32.mxu1 %vm810_vm0, %v3339_v37  ;;  %v3340_v40 = vmul.f32 %v11240_v8, %v11029_v2  ;;  %v11247_v19 = vld [vmem:[%s12413_s0 + $0x3d8] sm:$0xff] }
 0x4f5   :  { %v3343_v27 = vmul.f32 %v11247_v19, %v11063_v26 }
 0x4f6   :  { %v3656_v9 = vpop.f32.mrb[140].mxu1 }
 0x4f7   :  { %3920 = vmatmul.mubr.f32.gmra.mrb[246].mxu1 %v3338_v18  ;;  %4021 = vrot.lane.b32.xlu0 %v3656_v9, %s7680_s23  ;;  %v3658_v37 = vpop.f32.mrb[141].mxu1  ;;  %v11256_v9 = vld [vmem:[%s12413_s0 + $0x3d0] sm:$0xff] }
 0x4f8   :  { %6486 = vmatprep.mubr.msk.f32.mxu1 %vm810_vm0, %v3341_v45  ;;  %v3342_v2 = vmul.f32 %v11256_v9, %v11061_v33  ;;  %v11263_v37 = vld [vmem:[%s12413_s0 + $0x3e8] sm:$0xff] }
 0x4f9   :  { %12597 = vst [vmem:[#allocation65_spill] sm:$0xff] %v11263_v37  ;;  %v3345_v26 = vmul.f32 %v11263_v37, %v11103_v4 }
 0x4fa   :  { %v3661_v18 = vpop.f32.mrb[142].mxu1 }
 0x4fb   :  { %3925 = vmatmul.mubr.f32.gmra.mrb[248].mxu1 %v3340_v40  ;;  %4023 = vrot.lane.b32.xlu1 %v3661_v18, %s7680_s23  ;;  %v3663_v45 = vpop.f32.mrb[143].mxu1  ;;  %v11272_v18 = vld [vmem:[%s12413_s0 + $0x3e0] sm:$0xff] }
 0x4fc   :  { %6487 = vmatprep.mubr.msk.f32.mxu1 %vm810_vm0, %v3343_v27  ;;  %12598 = vst [vmem:[#allocation66_spill] sm:$0xff] %v11272_v18  ;;  %v3344_v33 = vmul.f32 %v11272_v18, %v11094_v42  ;;  %v11279_v45 = vld [vmem:[%s12413_s0 + $0x3f8] sm:$0xff] }
 0x4fd   :  { %12599 = vst [vmem:[#allocation67_spill] sm:$0xff] %v11279_v45  ;;  %v3347_v4 = vmul.f32 %v11279_v45, %v11122_v61 }
 0x4fe   :  { %v3666_v40 = vpop.f32.mrb[144].mxu1 }
 0x4ff   :  { %3930 = vmatmul.mubr.f32.gmra.mrb[250].mxu1 %v3342_v2  ;;  %4025 = vrot.lane.b32.xlu0 %v3666_v40, %s7680_s23  ;;  %v3668_v27 = vpop.f32.mrb[145].mxu1  ;;  %v11288_v40 = vld [vmem:[%s12413_s0 + $0x3f0] sm:$0xff] }
 0x500   :  { %6488 = vmatprep.mubr.msk.f32.mxu1 %vm810_vm0, %v3345_v26  ;;  %12600 = vst [vmem:[#allocation68_spill] sm:$0xff] %v11288_v40  ;;  %v3346_v42 = vmul.f32 %v11288_v40, %v11120_v55 }
 0x502   :  { %v3671_v2 = vpop.f32.mrb[146].mxu1 }
 0x503   :  { %3935 = vmatmul.mubr.f32.gmra.mrb[252].mxu1 %v3344_v33  ;;  %4027 = vrot.lane.b32.xlu1 %v3671_v2, %s7680_s23  ;;  %v3673_v26 = vpop.f32.mrb[147].mxu1 }
 0x504   :  { %6489 = vmatprep.mubr.msk.f32.mxu1 %vm810_vm0, %v3347_v4 }
 0x506   :  { %v3676_v27 = vpop.f32.mrb[148].mxu1 }
 0x507   :  { %4029 = vrot.lane.b32.xlu0 %v3676_v27, %s7680_s23  ;;  %v3678_v37 = vpop.f32.mrb[149].mxu1  ;;  %3940 = vmatmul.mubr.f32.gmra.mrb[254].mxu1 %v3346_v42 }
 0x50a   :  { %v3681_v61 = vpop.f32.mrb[150].mxu1 }
 0x50b   :  { %4031 = vrot.lane.b32.xlu1 %v3681_v61, %s7680_s23  ;;  %v3683_v33 = vpop.f32.mrb[151].mxu1 }
 0x50e   :  { %v3686_v2 = vpop.f32.mrb[152].mxu1 }
 0x50f   :  { %4033 = vrot.lane.b32.xlu0 %v3686_v2, %s7680_s23  ;;  %v3688_v4 = vpop.f32.mrb[153].mxu1 }
 0x512   :  { %v3691_v26 = vpop.f32.mrb[154].mxu1 }
 0x513   :  { %4035 = vrot.lane.b32.xlu1 %v3691_v26, %s7680_s23  ;;  %v3693_v45 = vpop.f32.mrb[155].mxu1 }
 0x516   :  { %v3696_v18 = vpop.f32.mrb[156].mxu1 }
 0x517   :  { %4037 = vrot.lane.b32.xlu0 %v3696_v18, %s7680_s23  ;;  %v3698_v55 = vpop.f32.mrb[157].mxu1 }
 0x51a   :  { %v3701_v40 = vpop.f32.mrb[158].mxu1 }
 0x51b   :  { %4039 = vrot.lane.b32.xlu1 %v3701_v40, %s7680_s23  ;;  %v3703_v37 = vpop.f32.mrb[159].mxu1 }
 0x51e   :  { %v3706_v42 = vpop.f32.mrb[160].mxu1 }
 0x51f   :  { %4041 = vrot.lane.b32.xlu0 %v3706_v42, %s7680_s23  ;;  %v3708_v27 = vpop.f32.mrb[161].mxu1 }
 0x522   :  { %v3711_v61 = vpop.f32.mrb[162].mxu1 }
 0x523   :  { %4043 = vrot.lane.b32.xlu1 %v3711_v61, %s7680_s23  ;;  %v3713_v33 = vpop.f32.mrb[163].mxu1 }
 0x526   :  { %v3716_v2 = vpop.f32.mrb[164].mxu1 }
 0x527   :  { %4045 = vrot.lane.b32.xlu0 %v3716_v2, %s7680_s23  ;;  %v3718_v45 = vpop.f32.mrb[165].mxu1 }
 0x52a   :  { %v3721_v4 = vpop.f32.mrb[166].mxu1 }
 0x52b   :  { %4047 = vrot.lane.b32.xlu1 %v3721_v4, %s7680_s23  ;;  %v3723_v18 = vpop.f32.mrb[167].mxu1 }
 0x52e   :  { %v3726_v26 = vpop.f32.mrb[168].mxu1 }
 0x52f   :  { %4049 = vrot.lane.b32.xlu0 %v3726_v26, %s7680_s23  ;;  %v3728_v40 = vpop.f32.mrb[169].mxu1 }
 0x532   :  { %v3731_v55 = vpop.f32.mrb[170].mxu1 }
 0x533   :  { %4051 = vrot.lane.b32.xlu1 %v3731_v55, %s7680_s23  ;;  %v3733_v37 = vpop.f32.mrb[171].mxu1 }
 0x536   :  { %v3736_v42 = vpop.f32.mrb[172].mxu1 }
 0x537   :  { %4053 = vrot.lane.b32.xlu0 %v3736_v42, %s7680_s23  ;;  %v3738_v27 = vpop.f32.mrb[173].mxu1 }
 0x53a   :  { %v3741_v61 = vpop.f32.mrb[174].mxu1 }
 0x53b   :  { %4055 = vrot.lane.b32.xlu1 %v3741_v61, %s7680_s23  ;;  %v3743_v33 = vpop.f32.mrb[175].mxu1  ;;  %v4201_v61 = vsel %vm810_vm0, %v10160_v3, %v10173_v13  ;;  %v4203_v13 = vsel %vm810_vm0, %v10199_v47, %v10211_v54  ;;  %v12601_v54 = vld [vmem:[#allocation5_spill] sm:$0xff] }
 0x53e   :  { %v3746_v2 = vpop.f32.mrb[176].mxu1 }
 0x53f   :  { %4057 = vrot.lane.b32.xlu0 %v3746_v2, %s7680_s23  ;;  %v3748_v45 = vpop.f32.mrb[177].mxu1 }
 0x542   :  { %v3751_v4 = vpop.f32.mrb[178].mxu1 }
 0x543   :  { %4059 = vrot.lane.b32.xlu1 %v3751_v4, %s7680_s23  ;;  %v3753_v18 = vpop.f32.mrb[179].mxu1 }
 0x544   :  { %v4202_v18 = vsel %vm810_vm0, %v10180_v50, %v10192_v30  ;;  %v4204_v30 = vsel %vm810_vm0, %v10218_v12, %v10230_v25  ;;  %v12602_v25 = vld [vmem:[#allocation7_spill] sm:$0xff] }
 0x546   :  { %v3756_v26 = vpop.f32.mrb[180].mxu1 }
 0x547   :  { %4061 = vrot.lane.b32.xlu0 %v3756_v26, %s7680_s23  ;;  %v3758_v40 = vpop.f32.mrb[181].mxu1 }
 0x54a   :  { %v3761_v55 = vpop.f32.mrb[182].mxu1 }
 0x54b   :  { %4063 = vrot.lane.b32.xlu1 %v3761_v55, %s7680_s23  ;;  %v3763_v37 = vpop.f32.mrb[183].mxu1 }
 0x54e   :  { %v3766_v42 = vpop.f32.mrb[184].mxu1 }
 0x54f   :  { %4065 = vrot.lane.b32.xlu0 %v3766_v42, %s7680_s23  ;;  %v3768_v27 = vpop.f32.mrb[185].mxu1 }
 0x551   :  { %v4010_v33 = vpop.permute.xlu1 %4009 }
 0x552   :  { %v4265_v2 = vsel %vm875_vm1, %v4201_v61, %v4010_v33  ;;  %v3771_v45 = vpop.f32.mrb[186].mxu1 }
 0x553   :  { %4067 = vrot.lane.b32.xlu1 %v3771_v45, %s7680_s23  ;;  %v3773_v4 = vpop.f32.mrb[187].mxu1  ;;  %6801 = vmatprep.mubr.msk.f32.mxu0 %vm940_vm2, %v4265_v2  ;;  %v4205_v45 = vsel %vm810_vm0, %v12601_v54, %v10249_v41  ;;  %v12607_v54 = vld [vmem:[#allocation10_spill] sm:$0xff] }
 0x555   :  { %v4012_v26 = vpop.permute.xlu0 %4011 }
 0x556   :  { %v4266_v40 = vsel %vm875_vm1, %v4202_v18, %v4012_v26  ;;  %v3776_v55 = vpop.f32.mrb[188].mxu1 }
 0x557   :  { %4069 = vrot.lane.b32.xlu0 %v3776_v55, %s7680_s23  ;;  %v3778_v3 = vpop.f32.mrb[189].mxu1  ;;  %6802 = vmatmul.mubr.msk.f32.vlgmr.msra.gmra.mrb[128].mxu0 %vm940_vm2, %v4266_v40  ;;  %v12603_v40 = vld [vmem:[#allocation6_spill] sm:$0xff] }
 0x558   :  { %v4206_v55 = vsel %vm810_vm0, %v12603_v40, %v12602_v25  ;;  %v12608_v25 = vld [vmem:[#allocation13_spill] sm:$0xff]  ;;  %v12609_v40 = vld [vmem:[#allocation12_spill] sm:$0xff] }
 0x559   :  { %v4014_v37 = vpop.permute.xlu1 %4013 }
 0x55a   :  { %v4267_v42 = vsel %vm875_vm1, %v4203_v13, %v4014_v37  ;;  %v3781_v27 = vpop.f32.mrb[190].mxu1 }
 0x55b   :  { %4071 = vrot.lane.b32.xlu1 %v3781_v27, %s7680_s23  ;;  %v3783_v50 = vpop.f32.mrb[191].mxu1  ;;  %6804 = vmatprep.mubr.msk.f32.mxu0 %vm940_vm2, %v4267_v42  ;;  %v12604_v42 = vld [vmem:[#allocation9_spill] sm:$0xff]  ;;  %v12605_v27 = vld [vmem:[#allocation8_spill] sm:$0xff] }
 0x55c   :  { %v4207_v50 = vsel %vm810_vm0, %v12605_v27, %v12604_v42  ;;  %v12610_v42 = vld [vmem:[#allocation15_spill] sm:$0xff]  ;;  %v12611_v27 = vld [vmem:[#allocation14_spill] sm:$0xff] }
 0x55d   :  { %v4016_v61 = vpop.permute.xlu1 %4015 }
 0x55e   :  { %v4268_v33 = vsel %vm875_vm1, %v4204_v30, %v4016_v61  ;;  %v3786_v2 = vpop.f32.mrb[192].mxu1 }
 0x55f   :  { %4073 = vrot.lane.b32.xlu0 %v3786_v2, %s7680_s23  ;;  %v3788_v47 = vpop.f32.mrb[193].mxu1  ;;  %6805 = vmatmul.mubr.msk.f32.gmra.mrb[130].mxu0 %vm940_vm2, %v4268_v33 }
 0x560   :  { %v12606_v47 = vld [vmem:[#allocation11_spill] sm:$0xff] }
 0x561   :  { %v4018_v4 = vpop.permute.xlu0 %4017 }
 0x562   :  { %v4269_v18 = vsel %vm875_vm1, %v4205_v45, %v4018_v4  ;;  %v3791_v26 = vpop.f32.mrb[194].mxu1  ;;  %v4208_v45 = vsel %vm810_vm0, %v12607_v54, %v12606_v47  ;;  %v12612_v47 = vld [vmem:[#allocation17_spill] sm:$0xff]  ;;  %v12613_v54 = vld [vmem:[#allocation16_spill] sm:$0xff] }
 0x563   :  { %4075 = vrot.lane.b32.xlu1 %v3791_v26, %s7680_s23  ;;  %v3793_v12 = vpop.f32.mrb[195].mxu1  ;;  %6807 = vmatprep.mubr.msk.f32.mxu0 %vm940_vm2, %v4269_v18 }
 0x565   :  { %v4020_v3 = vpop.permute.xlu1 %4019 }
 0x566   :  { %v4270_v13 = vsel %vm875_vm1, %v4206_v55, %v4020_v3  ;;  %v3796_v37 = vpop.f32.mrb[196].mxu1  ;;  %v4209_v55 = vsel %vm810_vm0, %v12609_v40, %v12608_v25  ;;  %v12614_v25 = vld [vmem:[#allocation19_spill] sm:$0xff]  ;;  %v12615_v40 = vld [vmem:[#allocation18_spill] sm:$0xff] }
 0x567   :  { %4077 = vrot.lane.b32.xlu0 %v3796_v37, %s7680_s23  ;;  %v3798_v41 = vpop.f32.mrb[197].mxu1  ;;  %6808 = vmatmul.mubr.msk.f32.gmra.mrb[132].mxu0 %vm940_vm2, %v4270_v13 }
 0x569   :  { %v4022_v30 = vpop.permute.xlu0 %4021 }
 0x56a   :  { %v4271_v61 = vsel %vm875_vm1, %v4207_v50, %v4022_v30  ;;  %v3801_v33 = vpop.f32.mrb[198].mxu1  ;;  %v4210_v50 = vsel %vm810_vm0, %v12611_v27, %v12610_v42  ;;  %v12616_v42 = vld [vmem:[#allocation20_spill] sm:$0xff] }
 0x56b   :  { %4079 = vrot.lane.b32.xlu1 %v3801_v33, %s7680_s23  ;;  %v3803_v2 = vpop.f32.mrb[199].mxu1  ;;  %6810 = vmatprep.mubr.msk.f32.mxu0 %vm940_vm2, %v4271_v61  ;;  %v4213_v27 = vsel %vm810_vm0, %v12616_v42, %v10407_v35 }
 0x56d   :  { %v4024_v4 = vpop.permute.xlu1 %4023 }
 0x56e   :  { %v4272_v18 = vsel %vm875_vm1, %v4208_v45, %v4024_v4  ;;  %v3806_v26 = vpop.f32.mrb[200].mxu1  ;;  %v4211_v45 = vsel %vm810_vm0, %v12613_v54, %v12612_v47  ;;  %v12618_v47 = vld [vmem:[#allocation21_spill] sm:$0xff] }
 0x56f   :  { %4081 = vrot.lane.b32.xlu0 %v3806_v26, %s7680_s23  ;;  %v3808_v12 = vpop.f32.mrb[201].mxu1  ;;  %6811 = vmatmul.mubr.msk.f32.gmra.mrb[134].mxu0 %vm940_vm2, %v4272_v18 }
 0x571   :  { %v4026_v3 = vpop.permute.xlu0 %4025 }
 0x572   :  { %v4273_v13 = vsel %vm875_vm1, %v4209_v55, %v4026_v3  ;;  %v3811_v37 = vpop.f32.mrb[202].mxu1  ;;  %v4212_v55 = vsel %vm810_vm0, %v12615_v40, %v12614_v25 }
 0x573   :  { %4083 = vrot.lane.b32.xlu1 %v3811_v37, %s7680_s23  ;;  %v3813_v41 = vpop.f32.mrb[203].mxu1  ;;  %6813 = vmatprep.mubr.msk.f32.mxu0 %vm940_vm2, %v4273_v13 }
 0x575   :  { %v4028_v30 = vpop.permute.xlu1 %4027 }
 0x576   :  { %v4274_v61 = vsel %vm875_vm1, %v4210_v50, %v4028_v30  ;;  %v3816_v33 = vpop.f32.mrb[204].mxu1 }
 0x577   :  { %4085 = vrot.lane.b32.xlu0 %v3816_v33, %s7680_s23  ;;  %v3818_v2 = vpop.f32.mrb[205].mxu1  ;;  %6814 = vmatmul.mubr.msk.f32.gmra.mrb[136].mxu0 %vm940_vm2, %v4274_v61 }
 0x578   :  { %v12617_v2 = vld [vmem:[#allocation22_spill] sm:$0xff] }
 0x579   :  { %v4030_v4 = vpop.permute.xlu0 %4029  ;;  %v4214_v54 = vsel %vm810_vm0, %v12618_v47, %v12617_v2 }
 0x57a   :  { %v4275_v18 = vsel %vm875_vm1, %v4211_v45, %v4030_v4  ;;  %v3821_v26 = vpop.f32.mrb[206].mxu1 }
 0x57b   :  { %4087 = vrot.lane.b32.xlu1 %v3821_v26, %s7680_s23  ;;  %v3823_v12 = vpop.f32.mrb[207].mxu1  ;;  %6816 = vmatprep.mubr.msk.f32.mxu0 %vm940_vm2, %v4275_v18  ;;  %v12619_v26 = vld [vmem:[#allocation24_spill] sm:$0xff] }
 0x57c   :  { %v12620_v12 = vld [vmem:[#allocation23_spill] sm:$0xff] }
 0x57d   :  { %v4032_v3 = vpop.permute.xlu1 %4031  ;;  %v4215_v25 = vsel %vm810_vm0, %v12620_v12, %v12619_v26 }
 0x57e   :  { %v4276_v13 = vsel %vm875_vm1, %v4212_v55, %v4032_v3  ;;  %v3826_v37 = vpop.f32.mrb[208].mxu1 }
 0x57f   :  { %4089 = vrot.lane.b32.xlu0 %v3826_v37, %s7680_s23  ;;  %v3828_v41 = vpop.f32.mrb[209].mxu1  ;;  %6817 = vmatmul.mubr.msk.f32.gmra.mrb[138].mxu0 %vm940_vm2, %v4276_v13  ;;  %v12621_v37 = vld [vmem:[#allocation25_spill] sm:$0xff] }
 0x580   :  { %v4216_v41 = vsel %vm810_vm0, %v12621_v37, %v10462_v49 }
 0x581   :  { %v4034_v50 = vpop.permute.xlu0 %4033 }
 0x582   :  { %v4277_v30 = vsel %vm875_vm1, %v4213_v27, %v4034_v50  ;;  %v3831_v61 = vpop.f32.mrb[210].mxu1 }
 0x583   :  { %4091 = vrot.lane.b32.xlu1 %v3831_v61, %s7680_s23  ;;  %v3833_v33 = vpop.f32.mrb[211].mxu1  ;;  %6819 = vmatprep.mubr.msk.f32.mxu0 %vm940_vm2, %v4277_v30  ;;  %v12622_v61 = vld [vmem:[#allocation26_spill] sm:$0xff] }
 0x584   :  { %v4217_v33 = vsel %vm810_vm0, %v12622_v61, %v10479_v28  ;;  %v12627_v61 = vld [vmem:[#allocation32_spill] sm:$0xff] }
 0x585   :  { %v4036_v45 = vpop.permute.xlu1 %4035 }
 0x586   :  { %v4278_v4 = vsel %vm875_vm1, %v4214_v54, %v4036_v45  ;;  %v3836_v18 = vpop.f32.mrb[212].mxu1  ;;  %v12623_v45 = vld [vmem:[#allocation28_spill] sm:$0xff] }
 0x587   :  { %4093 = vrot.lane.b32.xlu0 %v3836_v18, %s7680_s23  ;;  %v3838_v35 = vpop.f32.mrb[213].mxu1  ;;  %6820 = vmatmul.mubr.msk.f32.gmra.mrb[140].mxu0 %vm940_vm2, %v4278_v4  ;;  %v12624_v4 = vld [vmem:[#allocation27_spill] sm:$0xff] }
 0x588   :  { %v4218_v18 = vsel %vm810_vm0, %v12624_v4, %v12623_v45 }
 0x589   :  { %v4038_v40 = vpop.permute.xlu0 %4037 }
 0x58a   :  { %v4279_v55 = vsel %vm875_vm1, %v4215_v25, %v4038_v40  ;;  %v3841_v3 = vpop.f32.mrb[214].mxu1  ;;  %v12625_v25 = vld [vmem:[#allocation29_spill] sm:$0xff] }
 0x58b   :  { %4095 = vrot.lane.b32.xlu1 %v3841_v3, %s7680_s23  ;;  %v3843_v13 = vpop.f32.mrb[215].mxu1  ;;  %6822 = vmatprep.mubr.msk.f32.mxu0 %vm940_vm2, %v4279_v55  ;;  %v4219_v40 = vsel %vm810_vm0, %v12625_v25, %v10515_v59  ;;  %v4991_v25 = vld [vmem:[%s12423_s10 + $0x10] sm:$0xff] }
 0x58d   :  { %v4040_v42 = vpop.permute.xlu1 %4039 }
 0x58e   :  { %v4280_v27 = vsel %vm875_vm1, %v4216_v41, %v4040_v42  ;;  %v3846_v50 = vpop.f32.mrb[216].mxu1  ;;  %v12626_v41 = vld [vmem:[#allocation30_spill] sm:$0xff] }
 0x58f   :  { %4097 = vrot.lane.b32.xlu0 %v3846_v50, %s7680_s23  ;;  %v3848_v30 = vpop.f32.mrb[217].mxu1  ;;  %6823 = vmatmul.mubr.msk.f32.gmra.mrb[142].mxu0 %vm940_vm2, %v4280_v27  ;;  %v4220_v42 = vsel %vm810_vm0, %v12626_v41, %v10532_v1  ;;  %v4990_v1 = vld [vmem:[%s12423_s10 + $0x8] sm:$0xff]  ;;  %v12631_v41 = vld [vmem:[#allocation35_spill] sm:$0xff] }
 0x591   :  { %v4042_v2 = vpop.permute.xlu0 %4041 }
 0x592   :  { %v4281_v47 = vsel %vm875_vm1, %v4217_v33, %v4042_v2  ;;  %v3851_v54 = vpop.f32.mrb[218].mxu1  ;;  %v12628_v33 = vld [vmem:[#allocation31_spill] sm:$0xff] }
 0x593   :  { %4099 = vrot.lane.b32.xlu1 %v3851_v54, %s7680_s23  ;;  %v3853_v49 = vpop.f32.mrb[219].mxu1  ;;  %6825 = vmatprep.mubr.msk.f32.mxu0 %vm940_vm2, %v4281_v47  ;;  %v4221_v2 = vsel %vm810_vm0, %v12628_v33, %v12627_v61  ;;  %v4989_v47 = vld [vmem:[%s12423_s10] sm:$0xff] }
 0x594   :  { %v7093_v54 = vpack.c.bf16 %v4990_v1, %v4989_v47 }
 0x595   :  { %v4044_v35 = vpop.permute.xlu1 %4043 }
 0x596   :  { %v4282_v26 = vsel %vm875_vm1, %v4218_v18, %v4044_v35  ;;  %v3856_v12 = vpop.f32.mrb[220].mxu1  ;;  %7094 = vmatprep.subr.bf16.mxu0 %v7093_v54  ;;  %v12629_v35 = vld [vmem:[#allocation34_spill] sm:$0xff] }
 0x597   :  { %4101 = vrot.lane.b32.xlu0 %v3856_v12, %s7680_s23  ;;  %v3858_v28 = vpop.f32.mrb[221].mxu1  ;;  %6826 = vmatmul.mubr.msk.f32.gmra.mrb[144].mxu0 %vm940_vm2, %v4282_v26  ;;  %v12630_v26 = vld [vmem:[#allocation33_spill] sm:$0xff] }
 0x598   :  { %v4222_v12 = vsel %vm810_vm0, %v12630_v26, %v12629_v35  ;;  %7096 = vmatpush3.bf16.msra.mxu0 %v7093_v54  ;;  %v4995_v54 = vld [vmem:[%s12423_s10 + $0x30] sm:$0xff] }
 0x599   :  { %v4046_v55 = vpop.permute.xlu0 %4045 }
 0x59a   :  { %v4283_v3 = vsel %vm875_vm1, %v4219_v40, %v4046_v55  ;;  %v3861_v13 = vpop.f32.mrb[222].mxu1  ;;  %v4992_v40 = vld [vmem:[%s12423_s10 + $0x18] sm:$0xff] }
 0x59b   :  { %4103 = vrot.lane.b32.xlu1 %v3861_v13, %s7680_s23  ;;  %v3863_v37 = vpop.f32.mrb[223].mxu1  ;;  %6828 = vmatprep.mubr.msk.f32.mxu0 %vm940_vm2, %v4283_v3  ;;  %v7097_v13 = vpack.c.bf16 %v4992_v40, %v4991_v25 }
 0x59d   :  { %v4048_v27 = vpop.permute.xlu1 %4047  ;;  %7098 = vmatprep.subr.bf16.mxu0 %v7097_v13 }
 0x59e   :  { %v4284_v50 = vsel %vm875_vm1, %v4220_v42, %v4048_v27  ;;  %v3866_v30 = vpop.f32.mrb[224].mxu1  ;;  %v4223_v42 = vsel %vm810_vm0, %v12631_v41, %v10591_v56  ;;  %7100 = vmatpush3.bf16.msra.mxu0 %v7097_v13  ;;  %v12632_v56 = vld [vmem:[#allocation36_spill] sm:$0xff] }
 0x59f   :  { %4105 = vrot.lane.b32.xlu0 %v3866_v30, %s7680_s23  ;;  %v3868_v59 = vpop.f32.mrb[225].mxu1  ;;  %6829 = vmatmul.mubr.msk.f32.gmra.mrb[146].mxu0 %vm940_vm2, %v4284_v50  ;;  %v4993_v50 = vld [vmem:[%s12423_s10 + $0x20] sm:$0xff]  ;;  %v4994_v30 = vld [vmem:[%s12423_s10 + $0x28] sm:$0xff]  ;;  %v4224_v47 = vsel %vm810_vm0, %v12632_v56, %v10610_v20 }
 0x5a0   :  { %v7101_v33 = vpack.c.bf16 %v4994_v30, %v4993_v50  ;;  %v12633_v20 = vld [vmem:[#allocation37_spill] sm:$0xff] }
 0x5a1   :  { %v4050_v49 = vpop.permute.xlu0 %4049  ;;  %v4225_v26 = vsel %vm810_vm0, %v12633_v20, %v10627_v7 }
 0x5a2   :  { %v4285_v45 = vsel %vm875_vm1, %v4221_v2, %v4050_v49  ;;  %v3871_v4 = vpop.f32.mrb[226].mxu1  ;;  %7102 = vmatprep.subr.bf16.mxu0 %v7101_v33  ;;  %v4996_v49 = vld [vmem:[%s12423_s10 + $0x38] sm:$0xff] }
 0x5a3   :  { %4107 = vrot.lane.b32.xlu1 %v3871_v4, %s7680_s23  ;;  %v3873_v18 = vpop.f32.mrb[227].mxu1  ;;  %6831 = vmatprep.mubr.msk.f32.mxu0 %vm940_vm2, %v4285_v45 }
 0x5a4   :  { %7104 = vmatpush3.bf16.msra.mxu0 %v7101_v33  ;;  %v7105_v18 = vpack.c.bf16 %v4996_v49, %v4995_v54  ;;  %v12637_v33 = vld [vmem:[#allocation42_spill] sm:$0xff] }
 0x5a5   :  { %v4052_v28 = vpop.permute.xlu1 %4051 }
 0x5a6   :  { %v4286_v55 = vsel %vm875_vm1, %v4222_v12, %v4052_v28  ;;  %v3876_v3 = vpop.f32.mrb[228].mxu1  ;;  %7106 = vmatprep.subr.bf16.mxu0 %v7105_v18 }
 0x5a7   :  { %4109 = vrot.lane.b32.xlu0 %v3876_v3, %s7680_s23  ;;  %v3878_v37 = vpop.f32.mrb[229].mxu1  ;;  %6832 = vmatmul.mubr.msk.f32.gmra.mrb[148].mxu0 %vm940_vm2, %v4286_v55  ;;  %v12634_v55 = vld [vmem:[#allocation38_spill] sm:$0xff] }
 0x5a8   :  { %7108 = vmatpush3.bf16.msra.mxu0 %v7105_v18  ;;  %v4226_v3 = vsel %vm810_vm0, %v12634_v55, %v10644_v53 }
 0x5a9   :  { %v4054_v27 = vpop.permute.xlu0 %4053 }
 0x5aa   :  { %v4287_v59 = vsel %vm875_vm1, %v4223_v42, %v4054_v27  ;;  %v3881_v61 = vpop.f32.mrb[230].mxu1  ;;  %v12635_v42 = vld [vmem:[#allocation40_spill] sm:$0xff]  ;;  %v12636_v27 = vld [vmem:[#allocation39_spill] sm:$0xff] }
 0x5ab   :  { %4111 = vrot.lane.b32.xlu1 %v3881_v61, %s7680_s23  ;;  %v3883_v2 = vpop.f32.mrb[231].mxu1  ;;  %6834 = vmatprep.mubr.msk.f32.mxu0 %vm940_vm2, %v4287_v59  ;;  %v4227_v50 = vsel %vm810_vm0, %v12636_v27, %v12635_v42 }
 0x5ac   :  { %v12638_v2 = vld [vmem:[#allocation41_spill] sm:$0xff] }
 0x5ad   :  { %v4056_v1 = vpop.permute.xlu1 %4055  ;;  %v4228_v56 = vsel %vm810_vm0, %v12638_v2, %v12637_v33 }
 0x5ae   :  { %v4288_v45 = vsel %vm875_vm1, %v4224_v47, %v4056_v1  ;;  %v3886_v4 = vpop.f32.mrb[232].mxu1 }
 0x5af   :  { %4113 = vrot.lane.b32.xlu0 %v3886_v4, %s7680_s23  ;;  %v3888_v35 = vpop.f32.mrb[233].mxu1  ;;  %6835 = vmatmul.mubr.msk.f32.gmra.mrb[150].mxu0 %vm940_vm2, %v4288_v45  ;;  %v12639_v45 = vld [vmem:[#allocation43_spill] sm:$0xff] }
 0x5b0   :  { %v4229_v4 = vsel %vm810_vm0, %v12639_v45, %v10697_v39 }
 0x5b1   :  { %v4058_v12 = vpop.permute.xlu0 %4057 }
 0x5b2   :  { %v4289_v28 = vsel %vm875_vm1, %v4225_v26, %v4058_v12  ;;  %v3891_v25 = vpop.f32.mrb[234].mxu1  ;;  %v7644_v12 = vld [vmem:[%s12413_s0 + $0x1d8] sm:$0xff] }
 0x5b3   :  { %4115 = vrot.lane.b32.xlu1 %v3891_v25, %s7680_s23  ;;  %v3893_v40 = vpop.f32.mrb[235].mxu1  ;;  %6837 = vmatprep.mubr.msk.f32.mxu0 %vm940_vm2, %v4289_v28  ;;  %v12640_v28 = vld [vmem:[#allocation44_spill] sm:$0xff] }
 0x5b4   :  { %v4230_v25 = vsel %vm810_vm0, %v7644_v12, %v12640_v28 }
 0x5b5   :  { %v4060_v13 = vpop.permute.xlu1 %4059 }
 0x5b6   :  { %v4290_v37 = vsel %vm875_vm1, %v4226_v3, %v4060_v13  ;;  %v3896_v41 = vpop.f32.mrb[236].mxu1  ;;  %v7645_v13 = vld [vmem:[%s12413_s0 + $0x1e8] sm:$0xff] }
 0x5b7   :  { %4117 = vrot.lane.b32.xlu0 %v3896_v41, %s7680_s23  ;;  %v3898_v7 = vpop.f32.mrb[237].mxu1  ;;  %6838 = vmatmul.mubr.msk.f32.gmra.mrb[152].mxu0 %vm940_vm2, %v4290_v37  ;;  %v12641_v37 = vld [vmem:[#allocation45_spill] sm:$0xff] }
 0x5b8   :  { %v4231_v41 = vsel %vm810_vm0, %v7645_v13, %v12641_v37 }
 0x5b9   :  { %v4062_v30 = vpop.permute.xlu0 %4061 }
 0x5ba   :  { %v4291_v59 = vsel %vm875_vm1, %v4227_v50, %v4062_v30  ;;  %v3901_v61 = vpop.f32.mrb[238].mxu1  ;;  %v7646_v30 = vld [vmem:[%s12413_s0 + $0x1f0] sm:$0xff] }
 0x5bb   :  { %4119 = vrot.lane.b32.xlu1 %v3901_v61, %s7680_s23  ;;  %v3903_v53 = vpop.f32.mrb[239].mxu1  ;;  %6840 = vmatprep.mubr.msk.f32.mxu0 %vm940_vm2, %v4291_v59  ;;  %v7647_v59 = vld [vmem:[%s12413_s0 + $0x1f8] sm:$0xff] }
 0x5bc   :  { %v4232_v61 = vsel %vm810_vm0, %v7647_v59, %v7646_v30 }
 0x5bd   :  { %v4064_v47 = vpop.permute.xlu1 %4063 }
 0x5be   :  { %v4292_v1 = vsel %vm875_vm1, %v4228_v56, %v4064_v47  ;;  %v3906_v54 = vpop.f32.mrb[240].mxu1  ;;  %v7648_v47 = vld [vmem:[%s12413_s0 + $0x200] sm:$0xff] }
 0x5bf   :  { %4121 = vrot.lane.b32.xlu0 %v3906_v54, %s7680_s23  ;;  %v3908_v49 = vpop.f32.mrb[241].mxu1  ;;  %6841 = vmatmul.mubr.msk.f32.gmra.mrb[154].mxu0 %vm940_vm2, %v4292_v1  ;;  %v7649_v1 = vld [vmem:[%s12413_s0 + $0x208] sm:$0xff] }
 0x5c0   :  { %v4233_v54 = vsel %vm810_vm0, %v7649_v1, %v7648_v47  ;;  %v4240_v1 = vsel %vm810_vm0, %v10852_v22, %v10862_v34  ;;  %v12645_v34 = vld [vmem:[#allocation49_spill] sm:$0xff] }
 0x5c1   :  { %v4066_v18 = vpop.permute.xlu0 %4065 }
 0x5c2   :  { %v4293_v35 = vsel %vm875_vm1, %v4229_v4, %v4066_v18  ;;  %v3911_v20 = vpop.f32.mrb[242].mxu1 }
 0x5c3   :  { %4123 = vrot.lane.b32.xlu1 %v3911_v20, %s7680_s23  ;;  %v3913_v26 = vpop.f32.mrb[243].mxu1  ;;  %6843 = vmatprep.mubr.msk.f32.mxu0 %vm940_vm2, %v4293_v35  ;;  %v7650_v35 = vld [vmem:[%s12413_s0 + $0x210] sm:$0xff]  ;;  %v7651_v20 = vld [vmem:[%s12413_s0 + $0x218] sm:$0xff] }
 0x5c4   :  { %v4234_v26 = vsel %vm810_vm0, %v7651_v20, %v7650_v35 }
 0x5c5   :  { %v4068_v40 = vpop.permute.xlu1 %4067 }
 0x5c6   :  { %v4294_v55 = vsel %vm875_vm1, %v4230_v25, %v4068_v40  ;;  %v3916_v39 = vpop.f32.mrb[244].mxu1 }
 0x5c7   :  { %4125 = vrot.lane.b32.xlu0 %v3916_v39, %s7680_s23  ;;  %v3918_v3 = vpop.f32.mrb[245].mxu1  ;;  %6844 = vmatmul.mubr.msk.f32.gmra.mrb[156].mxu0 %vm940_vm2, %v4294_v55  ;;  %v7652_v55 = vld [vmem:[%s12413_s0 + $0x228] sm:$0xff] }
 0x5c8   :  { %v4235_v39 = vsel %vm810_vm0, %v7652_v55, %v10782_v44  ;;  %v7654_v44 = vld [vmem:[%s12413_s0 + $0x248] sm:$0xff] }
 0x5c9   :  { %v4070_v7 = vpop.permute.xlu0 %4069  ;;  %v4237_v30 = vsel %vm810_vm0, %v7654_v44, %v10812_v38  ;;  %v4239_v38 = vsel %vm810_vm0, %v10835_v63, %v10845_v29  ;;  %v12643_v29 = vld [vmem:[#allocation48_spill] sm:$0xff] }
 0x5ca   :  { %v4295_v42 = vsel %vm875_vm1, %v4231_v41, %v4070_v7  ;;  %v3921_v27 = vpop.f32.mrb[246].mxu1  ;;  %v7653_v7 = vld [vmem:[%s12413_s0 + $0x238] sm:$0xff] }
 0x5cb   :  { %4127 = vrot.lane.b32.xlu1 %v3921_v27, %s7680_s23  ;;  %v3923_v50 = vpop.f32.mrb[247].mxu1  ;;  %6846 = vmatprep.mubr.msk.f32.mxu0 %vm940_vm2, %v4295_v42  ;;  %v4236_v42 = vsel %vm810_vm0, %v7653_v7, %v10798_v57  ;;  %v7655_v57 = vld [vmem:[%s12413_s0 + $0x258] sm:$0xff] }
 0x5cd   :  { %v4072_v53 = vpop.permute.xlu1 %4071 }
 0x5ce   :  { %v4296_v33 = vsel %vm875_vm1, %v4232_v61, %v4072_v53  ;;  %v3926_v2 = vpop.f32.mrb[248].mxu1  ;;  %v4238_v53 = vsel %vm810_vm0, %v7655_v57, %v10826_v14 }
 0x5cf   :  { %4129 = vrot.lane.b32.xlu0 %v3926_v2, %s7680_s23  ;;  %v3928_v56 = vpop.f32.mrb[249].mxu1  ;;  %6847 = vmatmul.mubr.msk.f32.gmra.mrb[158].mxu0 %vm940_vm2, %v4296_v33 }
 0x5d1   :  { %v4074_v49 = vpop.permute.xlu0 %4073 }
 0x5d2   :  { %v4297_v45 = vsel %vm875_vm1, %v4233_v54, %v4074_v49  ;;  %v3931_v4 = vpop.f32.mrb[250].mxu1  ;;  %v12642_v49 = vld [vmem:[#allocation46_spill] sm:$0xff] }
 0x5d3   :  { %4131 = vrot.lane.b32.xlu1 %v3931_v4, %s7680_s23  ;;  %v3933_v18 = vpop.f32.mrb[251].mxu1  ;;  %6849 = vmatprep.mubr.msk.f32.mxu0 %vm940_vm2, %v4297_v45  ;;  %v4241_v45 = vsel %vm810_vm0, %v12642_v49, %v10879_v46 }
 0x5d4   :  { %v12644_v18 = vld [vmem:[#allocation47_spill] sm:$0xff] }
 0x5d5   :  { %v4076_v12 = vpop.permute.xlu1 %4075  ;;  %v4242_v35 = vsel %vm810_vm0, %v12644_v18, %v12643_v29 }
 0x5d6   :  { %v4298_v28 = vsel %vm875_vm1, %v4234_v26, %v4076_v12  ;;  %v3936_v25 = vpop.f32.mrb[252].mxu1  ;;  %v4243_v26 = vsel %vm810_vm0, %v12645_v34, %v10915_v31  ;;  %v4253_v34 = vsel %vm810_vm0, %v11099_v23, %v11109_v58  ;;  %v11670_v23 = vld [vmem:[%s12422_s9] ss:$0 sm:$0xff] }
 0x5d7   :  { %4133 = vrot.lane.b32.xlu0 %v3936_v25, %s7680_s23  ;;  %v3938_v40 = vpop.f32.mrb[253].mxu1  ;;  %6850 = vmatmul.mubr.msk.f32.gmra.mrb[160].mxu0 %vm940_vm2, %v4298_v28  ;;  %v12646_v28 = vld [vmem:[#allocation51_spill] sm:$0xff]  ;;  %v12647_v25 = vld [vmem:[#allocation50_spill] sm:$0xff] }
 0x5d8   :  { %v4244_v40 = vsel %vm810_vm0, %v12647_v25, %v12646_v28  ;;  %v12660_v28 = vld [vmem:[#allocation63_spill] sm:$0xff] }
 0x5d9   :  { %v4078_v3 = vpop.permute.xlu0 %4077 }
 0x5da   :  { %v4299_v13 = vsel %vm875_vm1, %v4235_v39, %v4078_v3  ;;  %v3941_v37 = vpop.f32.mrb[254].mxu1  ;;  %v12648_v3 = vld [vmem:[#allocation52_spill] sm:$0xff] }
 0x5db   :  { %4135 = vrot.lane.b32.xlu1 %v3941_v37, %s7680_s23  ;;  %v3943_v41 = vpop.f32.mrb[255].mxu1  ;;  %6852 = vmatprep.mubr.msk.f32.mxu0 %vm940_vm2, %v4299_v13  ;;  %v4245_v13 = vsel %vm810_vm0, %v12648_v3, %v10957_v52 }
 0x5dc   :  { %v4246_v41 = vsel %vm810_vm0, %v10964_v21, %v10972_v51  ;;  %v12653_v51 = vld [vmem:[#allocation58_spill] sm:$0xff] }
 0x5dd   :  { %v4080_v27 = vpop.permute.xlu1 %4079 }
 0x5de   :  { %v4300_v50 = vsel %vm875_vm1, %v4236_v42, %v4080_v27  ;;  %v12649_v27 = vld [vmem:[#allocation54_spill] sm:$0xff] }
 0x5df   :  { %6853 = vmatmul.mubr.msk.f32.gmra.mrb[162].mxu0 %vm940_vm2, %v4300_v50  ;;  %v12650_v50 = vld [vmem:[#allocation53_spill] sm:$0xff] }
 0x5e0   :  { %v4247_v44 = vsel %vm810_vm0, %v12650_v50, %v12649_v27 }
 0x5e1   :  { %v4082_v59 = vpop.permute.xlu0 %4081 }
 0x5e2   :  { %v4301_v61 = vsel %vm875_vm1, %v4237_v30, %v4082_v59  ;;  %v12651_v59 = vld [vmem:[#allocation56_spill] sm:$0xff] }
 0x5e3   :  { %6855 = vmatprep.mubr.msk.f32.mxu0 %vm940_vm2, %v4301_v61  ;;  %v12652_v61 = vld [vmem:[#allocation55_spill] sm:$0xff] }
 0x5e4   :  { %v4248_v57 = vsel %vm810_vm0, %v12652_v61, %v12651_v59 }
 0x5e5   :  { %v4084_v33 = vpop.permute.xlu1 %4083 }
 0x5e6   :  { %v4302_v2 = vsel %vm875_vm1, %v4238_v53, %v4084_v33  ;;  %v12654_v33 = vld [vmem:[#allocation57_spill] sm:$0xff] }
 0x5e7   :  { %6856 = vmatmul.mubr.msk.f32.gmra.mrb[164].mxu0 %vm940_vm2, %v4302_v2  ;;  %v4249_v2 = vsel %vm810_vm0, %v12654_v33, %v12653_v51  ;;  %v4260_v33 = vsel %vm810_vm0, %v11215_v17, %v11224_v16 }
 0x5e9   :  { %v4086_v56 = vpop.permute.xlu0 %4085 }
 0x5ea   :  { %v4303_v47 = vsel %vm875_vm1, %v4239_v38, %v4086_v56 }
 0x5eb   :  { %6858 = vmatprep.mubr.msk.f32.mxu0 %vm940_vm2, %v4303_v47  ;;  %v12655_v47 = vld [vmem:[#allocation60_spill] sm:$0xff] }
 0x5ed   :  { %v4088_v54 = vpop.permute.xlu1 %4087 }
 0x5ee   :  { %v4304_v14 = vsel %vm875_vm1, %v4240_v1, %v4088_v54  ;;  %v12656_v1 = vld [vmem:[#allocation59_spill] sm:$0xff] }
 0x5ef   :  { %6859 = vmatmul.mubr.msk.f32.gmra.mrb[166].mxu0 %vm940_vm2, %v4304_v14  ;;  %v4250_v54 = vsel %vm810_vm0, %v12656_v1, %v12655_v47  ;;  %v4261_v47 = vsel %vm810_vm0, %v11231_v15, %v11240_v8 }
 0x5f1   :  { %v4090_v4 = vpop.permute.xlu0 %4089 }
 0x5f2   :  { %v4305_v63 = vsel %vm875_vm1, %v4241_v45, %v4090_v4  ;;  %v12657_v45 = vld [vmem:[#allocation62_spill] sm:$0xff]  ;;  %v12658_v4 = vld [vmem:[#allocation61_spill] sm:$0xff] }
 0x5f3   :  { %6861 = vmatprep.mubr.msk.f32.mxu0 %vm940_vm2, %v4305_v63  ;;  %v4251_v63 = vsel %vm810_vm0, %v12658_v4, %v12657_v45 }
 0x5f5   :  { %v4092_v20 = vpop.permute.xlu1 %4091 }
 0x5f6   :  { %v4306_v22 = vsel %vm875_vm1, %v4242_v35, %v4092_v20  ;;  %v4252_v35 = vsel %vm810_vm0, %v11082_v5, %v11090_v48  ;;  %v4255_v48 = vsel %vm810_vm0, %v11135_v62, %v11144_v60 }
 0x5f7   :  { %6862 = vmatmul.mubr.msk.f32.gmra.mrb[168].mxu0 %vm940_vm2, %v4306_v22 }
 0x5f9   :  { %v4094_v12 = vpop.permute.xlu0 %4093 }
 0x5fa   :  { %v4307_v46 = vsel %vm875_vm1, %v4243_v26, %v4094_v12 }
 0x5fb   :  { %6864 = vmatprep.mubr.msk.f32.mxu0 %vm940_vm2, %v4307_v46  ;;  %v12659_v46 = vld [vmem:[#allocation64_spill] sm:$0xff] }
 0x5fc   :  { %v4254_v25 = vsel %vm810_vm0, %v12660_v28, %v12659_v46 }
 0x5fd   :  { %v4096_v55 = vpop.permute.xlu1 %4095 }
 0x5fe   :  { %v4308_v39 = vsel %vm875_vm1, %v4244_v40, %v4096_v55 }
 0x5ff   :  { %6865 = vmatmul.mubr.msk.f32.gmra.mrb[170].mxu0 %vm940_vm2, %v4308_v39 }
 0x601   :  { %v4098_v37 = vpop.permute.xlu0 %4097 }
 0x602   :  { %v4309_v31 = vsel %vm875_vm1, %v4245_v13, %v4098_v37  ;;  %v4256_v13 = vsel %vm810_vm0, %v11151_v6, %v11160_v11 }
 0x603   :  { %6867 = vmatprep.mubr.msk.f32.mxu0 %vm940_vm2, %v4309_v31 }
 0x605   :  { %v4100_v7 = vpop.permute.xlu1 %4099 }
 0x606   :  { %v4310_v42 = vsel %vm875_vm1, %v4246_v41, %v4100_v7  ;;  %v4257_v7 = vsel %vm810_vm0, %v11167_v10, %v11176_v32 }
 0x607   :  { %6868 = vmatmul.mubr.msk.f32.gmra.mrb[172].mxu0 %vm940_vm2, %v4310_v42 }
 0x609   :  { %v4102_v30 = vpop.permute.xlu0 %4101 }
 0x60a   :  { %v4311_v52 = vsel %vm875_vm1, %v4247_v44, %v4102_v30  ;;  %v4258_v30 = vsel %vm810_vm0, %v11183_v24, %v11192_v0 }
 0x60b   :  { %6870 = vmatprep.mubr.msk.f32.mxu0 %vm940_vm2, %v4311_v52 }
 0x60d   :  { %v4104_v53 = vpop.permute.xlu1 %4103 }
 0x60e   :  { %v4312_v21 = vsel %vm875_vm1, %v4248_v57, %v4104_v53  ;;  %v4259_v57 = vsel %vm810_vm0, %v11199_v36, %v11208_v43 }
 0x60f   :  { %6871 = vmatmul.mubr.msk.f32.gmra.mrb[174].mxu0 %vm940_vm2, %v4312_v21 }
 0x611   :  { %v4106_v38 = vpop.permute.xlu0 %4105 }
 0x612   :  { %v4313_v56 = vsel %vm875_vm1, %v4249_v2, %v4106_v38 }
 0x613   :  { %6873 = vmatprep.mubr.msk.f32.mxu0 %vm940_vm2, %v4313_v56 }
 0x615   :  { %v4108_v14 = vpop.permute.xlu1 %4107 }
 0x616   :  { %v4314_v49 = vsel %vm875_vm1, %v4250_v54, %v4108_v14 }
 0x617   :  { %6874 = vmatmul.mubr.msk.f32.gmra.mrb[176].mxu0 %vm940_vm2, %v4314_v49  ;;  %v4262_v49 = vsel %vm810_vm0, %v11247_v19, %v11256_v9 }
 0x619   :  { %v4110_v29 = vpop.permute.xlu0 %4109 }
 0x61a   :  { %v4315_v18 = vsel %vm875_vm1, %v4251_v63, %v4110_v29  ;;  %v12661_v29 = vld [vmem:[#allocation66_spill] sm:$0xff] }
 0x61b   :  { %6876 = vmatprep.mubr.msk.f32.mxu0 %vm940_vm2, %v4315_v18  ;;  %v12662_v18 = vld [vmem:[#allocation65_spill] sm:$0xff] }
 0x61d   :  { %v4112_v20 = vpop.permute.xlu1 %4111 }
 0x61e   :  { %v4316_v22 = vsel %vm875_vm1, %v4252_v35, %v4112_v20  ;;  %v4263_v35 = vsel %vm810_vm0, %v12662_v18, %v12661_v29 }
 0x61f   :  { %6877 = vmatmul.mubr.msk.f32.gmra.mrb[178].mxu0 %vm940_vm2, %v4316_v22 }
 0x621   :  { %v4114_v26 = vpop.permute.xlu0 %4113 }
 0x622   :  { %v4317_v12 = vsel %vm875_vm1, %v4253_v34, %v4114_v26  ;;  %v12663_v26 = vld [vmem:[#allocation68_spill] sm:$0xff] }
 0x623   :  { %6879 = vmatprep.mubr.msk.f32.mxu0 %vm940_vm2, %v4317_v12  ;;  %v12664_v12 = vld [vmem:[#allocation67_spill] sm:$0xff] }
 0x624   :  { %v4264_v46 = vsel %vm810_vm0, %v12664_v12, %v12663_v26 }
 0x625   :  { %v4116_v40 = vpop.permute.xlu1 %4115 }
 0x626   :  { %v4318_v5 = vsel %vm875_vm1, %v4254_v25, %v4116_v40 }
 0x627   :  { %6880 = vmatmul.mubr.msk.f32.gmra.mrb[180].mxu0 %vm940_vm2, %v4318_v5 }
 0x629   :  { %v4118_v55 = vpop.permute.xlu0 %4117 }
 0x62a   :  { %v4319_v58 = vsel %vm875_vm1, %v4255_v48, %v4118_v55  ;;  %v6803_v39 = vpop.f32.mrb[128].mxu0 }
 0x62b   :  { %v4606_v3 = vpop.f32.mrb[129].mxu0  ;;  %6882 = vmatprep.mubr.msk.f32.mxu0 %vm940_vm2, %v4319_v58  ;;  %v4612_v62 = vadd.f32 %v6803_v39, %v11670_v23 }
 0x62c   :  { %v4607_v37 = vadd.f32 %v11670_v23, %v4606_v3 }
 0x62d   :  { %v4120_v60 = vpop.permute.xlu1 %4119  ;;  %v4926_v42 = vmax.f32 %v4612_v62, 0.0 }
 0x62e   :  { %v4925_v31 = vmax.f32 %v4607_v37, 0.0  ;;  %v4320_v41 = vsel %vm875_vm1, %v4256_v13, %v4120_v60 }
 0x62f   :  { %6883 = vmatmul.mubr.msk.f32.gmra.mrb[182].mxu0 %vm940_vm2, %v4320_v41 }
 0x630   :  { %6913 = vmatprep.mubr.msk.f32.mxu0 %vm875_vm1, %v4925_v31 }
 0x631   :  { %v4122_v27 = vpop.permute.xlu0 %4121 }
 0x632   :  { %v4321_v6 = vsel %vm875_vm1, %v4257_v7, %v4122_v27  ;;  %v6806_v11 = vpop.f32.mrb[130].mxu0 }
 0x633   :  { %v4622_v50 = vadd.f32 %v6806_v11, %v11670_v23  ;;  %v4616_v44 = vpop.f32.mrb[131].mxu0  ;;  %6885 = vmatprep.mubr.msk.f32.mxu1 %vm940_vm2, %v4321_v6  ;;  %6914 = vmatmul.mubr.msk.f32.vlgmr.msra.gmra.mrb[184].mxu0 %vm875_vm1, %v4926_v42 }
 0x634   :  { %v4617_v10 = vadd.f32 %v11670_v23, %v4616_v44 }
 0x635   :  { %v4124_v32 = vpop.permute.xlu1 %4123  ;;  %v4928_v61 = vmax.f32 %v4622_v50, 0.0 }
 0x636   :  { %v4927_v52 = vmax.f32 %v4617_v10, 0.0  ;;  %v4322_v59 = vsel %vm875_vm1, %v4258_v30, %v4124_v32 }
 0x637   :  { %6886 = vmatmul.mubr.msk.f32.vlgmr.msra.gmra.mrb[0].mxu1 %vm940_vm2, %v4322_v59 }
 0x638   :  { %6916 = vmatprep.mubr.msk.f32.mxu0 %vm875_vm1, %v4927_v52 }
 0x639   :  { %v4126_v53 = vpop.permute.xlu0 %4125  ;;  %6917 = vmatmul.mubr.msk.f32.gmra.mrb[186].mxu0 %vm875_vm1, %v4928_v61 }
 0x63a   :  { %v4323_v24 = vsel %vm875_vm1, %v4259_v57, %v4126_v53  ;;  %v6809_v0 = vpop.f32.mrb[132].mxu0 }
 0x63b   :  { %v4632_v21 = vadd.f32 %v6809_v0, %v11670_v23  ;;  %v4626_v51 = vpop.f32.mrb[133].mxu0  ;;  %6888 = vmatprep.mubr.msk.f32.mxu1 %vm940_vm2, %v4323_v24 }
 0x63c   :  { %v4627_v2 = vadd.f32 %v11670_v23, %v4626_v51 }
 0x63d   :  { %v4128_v36 = vpop.permute.xlu1 %4127  ;;  %v4930_v56 = vmax.f32 %v4632_v21, 0.0 }
 0x63e   :  { %v4929_v43 = vmax.f32 %v4627_v2, 0.0  ;;  %v4324_v38 = vsel %vm875_vm1, %v4260_v33, %v4128_v36 }
 0x63f   :  { %6889 = vmatmul.mubr.msk.f32.gmra.mrb[2].mxu1 %vm940_vm2, %v4324_v38 }
 0x640   :  { %6919 = vmatprep.mubr.msk.f32.mxu0 %vm875_vm1, %v4929_v43 }
 0x641   :  { %v4130_v1 = vpop.permute.xlu0 %4129  ;;  %6920 = vmatmul.mubr.msk.f32.gmra.mrb[188].mxu0 %vm875_vm1, %v4930_v56 }
 0x642   :  { %v4325_v17 = vsel %vm875_vm1, %v4261_v47, %v4130_v1  ;;  %v6812_v16 = vpop.f32.mrb[134].mxu0 }
 0x643   :  { %v4642_v54 = vadd.f32 %v6812_v16, %v11670_v23  ;;  %v4636_v14 = vpop.f32.mrb[135].mxu0  ;;  %6891 = vmatprep.mubr.msk.f32.mxu1 %vm940_vm2, %v4325_v17 }
 0x644   :  { %v4637_v45 = vadd.f32 %v11670_v23, %v4636_v14 }
 0x645   :  { %v4132_v15 = vpop.permute.xlu1 %4131  ;;  %v4932_v63 = vmax.f32 %v4642_v54, 0.0 }
 0x646   :  { %v4931_v8 = vmax.f32 %v4637_v45, 0.0  ;;  %v4326_v4 = vsel %vm875_vm1, %v4262_v49, %v4132_v15 }
 0x647   :  { %6892 = vmatmul.mubr.msk.f32.gmra.mrb[4].mxu1 %vm940_vm2, %v4326_v4 }
 0x648   :  { %6922 = vmatprep.mubr.msk.f32.mxu0 %vm875_vm1, %v4931_v8 }
 0x649   :  { %v4134_v20 = vpop.permute.xlu0 %4133  ;;  %6923 = vmatmul.mubr.msk.f32.gmra.mrb[190].mxu0 %vm875_vm1, %v4932_v63 }
 0x64a   :  { %v4327_v19 = vsel %vm875_vm1, %v4263_v35, %v4134_v20  ;;  %v6815_v9 = vpop.f32.mrb[136].mxu0 }
 0x64b   :  { %v4652_v22 = vadd.f32 %v6815_v9, %v11670_v23  ;;  %v4646_v34 = vpop.f32.mrb[137].mxu0  ;;  %6894 = vmatprep.mubr.msk.f32.mxu1 %vm940_vm2, %v4327_v19 }
 0x64c   :  { %v4647_v28 = vadd.f32 %v11670_v23, %v4646_v34 }
 0x64d   :  { %v4136_v25 = vpop.permute.xlu1 %4135  ;;  %v4934_v48 = vmax.f32 %v4652_v22, 0.0 }
 0x64e   :  { %v4933_v40 = vmax.f32 %v4647_v28, 0.0  ;;  %v4328_v5 = vsel %vm875_vm1, %v4264_v46, %v4136_v25 }
 0x64f   :  { %6895 = vmatmul.mubr.msk.f32.gmra.mrb[6].mxu1 %vm940_vm2, %v4328_v5 }
 0x650   :  { %6925 = vmatprep.mubr.msk.f32.mxu0 %vm875_vm1, %v4933_v40 }
 0x651   :  { %6926 = vmatmul.mubr.msk.f32.gmra.mrb[192].mxu0 %vm875_vm1, %v4934_v48 }
 0x652   :  { %v6818_v55 = vpop.f32.mrb[138].mxu0 }
 0x653   :  { %v4662_v58 = vadd.f32 %v6818_v55, %v11670_v23  ;;  %v4656_v39 = vpop.f32.mrb[139].mxu0 }
 0x654   :  { %v4657_v3 = vadd.f32 %v11670_v23, %v4656_v39 }
 0x655   :  { %v4936_v37 = vmax.f32 %v4662_v58, 0.0 }
 0x656   :  { %v4935_v13 = vmax.f32 %v4657_v3, 0.0 }
 0x658   :  { %6928 = vmatprep.mubr.msk.f32.mxu0 %vm875_vm1, %v4935_v13 }
 0x659   :  { %6929 = vmatmul.mubr.msk.f32.gmra.mrb[194].mxu0 %vm875_vm1, %v4936_v37 }
 0x65a   :  { %v6821_v62 = vpop.f32.mrb[140].mxu0 }
 0x65b   :  { %v4672_v60 = vadd.f32 %v6821_v62, %v11670_v23  ;;  %v4666_v31 = vpop.f32.mrb[141].mxu0 }
 0x65c   :  { %v4667_v41 = vadd.f32 %v11670_v23, %v4666_v31 }
 0x65d   :  { %v4938_v42 = vmax.f32 %v4672_v60, 0.0 }
 0x65e   :  { %v4937_v7 = vmax.f32 %v4667_v41, 0.0 }
 0x660   :  { %6931 = vmatprep.mubr.msk.f32.mxu0 %vm875_vm1, %v4937_v7 }
 0x661   :  { %6932 = vmatmul.mubr.msk.f32.gmra.mrb[196].mxu0 %vm875_vm1, %v4938_v42 }
 0x662   :  { %v6824_v27 = vpop.f32.mrb[142].mxu0 }
 0x663   :  { %v4682_v6 = vadd.f32 %v6824_v27, %v11670_v23  ;;  %v4676_v11 = vpop.f32.mrb[143].mxu0 }
 0x664   :  { %v4677_v50 = vadd.f32 %v11670_v23, %v4676_v11 }
 0x665   :  { %v4940_v30 = vmax.f32 %v4682_v6, 0.0 }
 0x666   :  { %v4939_v44 = vmax.f32 %v4677_v50, 0.0 }
 0x668   :  { %6934 = vmatprep.mubr.msk.f32.mxu0 %vm875_vm1, %v4939_v44 }
 0x669   :  { %6935 = vmatmul.mubr.msk.f32.gmra.mrb[198].mxu0 %vm875_vm1, %v4940_v30 }
 0x66a   :  { %v6827_v10 = vpop.f32.mrb[144].mxu0 }
 0x66b   :  { %v4692_v32 = vadd.f32 %v6827_v10, %v11670_v23  ;;  %v4686_v52 = vpop.f32.mrb[145].mxu0 }
 0x66c   :  { %v4687_v59 = vadd.f32 %v11670_v23, %v4686_v52 }
 0x66d   :  { %v4942_v57 = vmax.f32 %v4692_v32, 0.0 }
 0x66e   :  { %v4941_v61 = vmax.f32 %v4687_v59, 0.0 }
 0x670   :  { %6937 = vmatprep.mubr.msk.f32.mxu0 %vm875_vm1, %v4941_v61 }
 0x671   :  { %6938 = vmatmul.mubr.msk.f32.gmra.mrb[200].mxu0 %vm875_vm1, %v4942_v57 }
 0x672   :  { %v6830_v53 = vpop.f32.mrb[146].mxu0 }
 0x673   :  { %v4702_v24 = vadd.f32 %v6830_v53, %v11670_v23  ;;  %v4696_v0 = vpop.f32.mrb[147].mxu0 }
 0x674   :  { %v4697_v21 = vadd.f32 %v11670_v23, %v4696_v0 }
 0x675   :  { %v4944_v33 = vmax.f32 %v4702_v24, 0.0 }
 0x676   :  { %v4943_v51 = vmax.f32 %v4697_v21, 0.0 }
 0x678   :  { %6940 = vmatprep.mubr.msk.f32.mxu0 %vm875_vm1, %v4943_v51 }
 0x679   :  { %6941 = vmatmul.mubr.msk.f32.gmra.mrb[202].mxu0 %vm875_vm1, %v4944_v33 }
 0x67a   :  { %v6833_v2 = vpop.f32.mrb[148].mxu0 }
 0x67b   :  { %v4712_v36 = vadd.f32 %v6833_v2, %v11670_v23  ;;  %v4706_v43 = vpop.f32.mrb[149].mxu0 }
 0x67c   :  { %v4707_v38 = vadd.f32 %v11670_v23, %v4706_v43 }
 0x67d   :  { %v4946_v47 = vmax.f32 %v4712_v36, 0.0 }
 0x67e   :  { %v4945_v56 = vmax.f32 %v4707_v38, 0.0 }
 0x680   :  { %6943 = vmatprep.mubr.msk.f32.mxu0 %vm875_vm1, %v4945_v56 }
 0x681   :  { %6944 = vmatmul.mubr.msk.f32.gmra.mrb[204].mxu0 %vm875_vm1, %v4946_v47 }
 0x682   :  { %v6836_v1 = vpop.f32.mrb[150].mxu0 }
 0x683   :  { %v4722_v17 = vadd.f32 %v6836_v1, %v11670_v23  ;;  %v4716_v16 = vpop.f32.mrb[151].mxu0 }
 0x684   :  { %v4717_v54 = vadd.f32 %v11670_v23, %v4716_v16 }
 0x685   :  { %v4948_v49 = vmax.f32 %v4722_v17, 0.0 }
 0x686   :  { %v4947_v14 = vmax.f32 %v4717_v54, 0.0 }
 0x688   :  { %6946 = vmatprep.mubr.msk.f32.mxu0 %vm875_vm1, %v4947_v14 }
 0x689   :  { %6947 = vmatmul.mubr.msk.f32.gmra.mrb[206].mxu0 %vm875_vm1, %v4948_v49 }
 0x68a   :  { %v6839_v45 = vpop.f32.mrb[152].mxu0 }
 0x68b   :  { %v4732_v15 = vadd.f32 %v6839_v45, %v11670_v23  ;;  %v4726_v8 = vpop.f32.mrb[153].mxu0 }
 0x68c   :  { %v4727_v4 = vadd.f32 %v11670_v23, %v4726_v8 }
 0x68d   :  { %v4950_v29 = vmax.f32 %v4732_v15, 0.0 }
 0x68e   :  { %v4949_v63 = vmax.f32 %v4727_v4, 0.0 }
 0x690   :  { %6949 = vmatprep.mubr.msk.f32.mxu0 %vm875_vm1, %v4949_v63 }
 0x691   :  { %6950 = vmatmul.mubr.msk.f32.gmra.mrb[208].mxu0 %vm875_vm1, %v4950_v29 }
 0x692   :  { %v6842_v18 = vpop.f32.mrb[154].mxu0 }
 0x693   :  { %v4742_v35 = vadd.f32 %v6842_v18, %v11670_v23  ;;  %v4736_v20 = vpop.f32.mrb[155].mxu0 }
 0x694   :  { %v4737_v19 = vadd.f32 %v11670_v23, %v4736_v20 }
 0x695   :  { %v4952_v22 = vmax.f32 %v4742_v35, 0.0 }
 0x696   :  { %v4951_v9 = vmax.f32 %v4737_v19, 0.0 }
 0x698   :  { %6952 = vmatprep.mubr.msk.f32.mxu0 %vm875_vm1, %v4951_v9 }
 0x699   :  { %6953 = vmatmul.mubr.msk.f32.gmra.mrb[210].mxu0 %vm875_vm1, %v4952_v22 }
 0x69a   :  { %v6845_v34 = vpop.f32.mrb[156].mxu0 }
 0x69b   :  { %v4752_v26 = vadd.f32 %v6845_v34, %v11670_v23  ;;  %v4746_v12 = vpop.f32.mrb[157].mxu0 }
 0x69c   :  { %v4747_v46 = vadd.f32 %v11670_v23, %v4746_v12 }
 0x69d   :  { %v4954_v25 = vmax.f32 %v4752_v26, 0.0 }
 0x69e   :  { %v4953_v28 = vmax.f32 %v4747_v46, 0.0 }
 0x6a0   :  { %6955 = vmatprep.mubr.msk.f32.mxu0 %vm875_vm1, %v4953_v28 }
 0x6a1   :  { %6956 = vmatmul.mubr.msk.f32.gmra.mrb[212].mxu0 %vm875_vm1, %v4954_v25 }
 0x6a2   :  { %v6848_v40 = vpop.f32.mrb[158].mxu0 }
 0x6a3   :  { %v4762_v5 = vadd.f32 %v6848_v40, %v11670_v23  ;;  %v4756_v48 = vpop.f32.mrb[159].mxu0 }
 0x6a4   :  { %v4757_v55 = vadd.f32 %v11670_v23, %v4756_v48 }
 0x6a5   :  { %v4956_v39 = vmax.f32 %v4762_v5, 0.0 }
 0x6a6   :  { %v4955_v58 = vmax.f32 %v4757_v55, 0.0 }
 0x6a8   :  { %6958 = vmatprep.mubr.msk.f32.mxu0 %vm875_vm1, %v4955_v58 }
 0x6a9   :  { %6959 = vmatmul.mubr.msk.f32.gmra.mrb[214].mxu0 %vm875_vm1, %v4956_v39 }
 0x6aa   :  { %v6851_v3 = vpop.f32.mrb[160].mxu0 }
 0x6ab   :  { %v4772_v13 = vadd.f32 %v6851_v3, %v11670_v23  ;;  %v4766_v37 = vpop.f32.mrb[161].mxu0 }
 0x6ac   :  { %v4767_v62 = vadd.f32 %v11670_v23, %v4766_v37 }
 0x6ad   :  { %v4958_v31 = vmax.f32 %v4772_v13, 0.0 }
 0x6ae   :  { %v4957_v60 = vmax.f32 %v4767_v62, 0.0 }
 0x6b0   :  { %6961 = vmatprep.mubr.msk.f32.mxu0 %vm875_vm1, %v4957_v60 }
 0x6b1   :  { %6962 = vmatmul.mubr.msk.f32.gmra.mrb[216].mxu0 %vm875_vm1, %v4958_v31 }
 0x6b2   :  { %v6854_v41 = vpop.f32.mrb[162].mxu0 }
 0x6b3   :  { %v4782_v7 = vadd.f32 %v6854_v41, %v11670_v23  ;;  %v4776_v42 = vpop.f32.mrb[163].mxu0 }
 0x6b4   :  { %v4777_v27 = vadd.f32 %v11670_v23, %v4776_v42 }
 0x6b5   :  { %v4960_v11 = vmax.f32 %v4782_v7, 0.0  ;;  %v11832_v7 = vld [vmem:[%s12424_s11] ss:$0 sm:$0xff] }
 0x6b6   :  { %v4959_v6 = vmax.f32 %v4777_v27, 0.0 }
 0x6b8   :  { %6964 = vmatprep.mubr.msk.f32.mxu0 %vm875_vm1, %v4959_v6 }
 0x6b9   :  { %6965 = vmatmul.mubr.msk.f32.gmra.mrb[218].mxu0 %vm875_vm1, %v4960_v11 }
 0x6ba   :  { %v6857_v50 = vpop.f32.mrb[164].mxu0 }
 0x6bb   :  { %v4792_v44 = vadd.f32 %v6857_v50, %v11670_v23  ;;  %v4786_v30 = vpop.f32.mrb[165].mxu0 }
 0x6bc   :  { %v4787_v10 = vadd.f32 %v11670_v23, %v4786_v30 }
 0x6bd   :  { %v4962_v52 = vmax.f32 %v4792_v44, 0.0 }
 0x6be   :  { %v4961_v32 = vmax.f32 %v4787_v10, 0.0 }
 0x6c0   :  { %6967 = vmatprep.mubr.msk.f32.mxu0 %vm875_vm1, %v4961_v32 }
 0x6c1   :  { %6968 = vmatmul.mubr.msk.f32.gmra.mrb[220].mxu0 %vm875_vm1, %v4962_v52 }
 0x6c2   :  { %v6860_v59 = vpop.f32.mrb[166].mxu0 }
 0x6c3   :  { %v4802_v61 = vadd.f32 %v6860_v59, %v11670_v23  ;;  %v4796_v57 = vpop.f32.mrb[167].mxu0 }
 0x6c4   :  { %v4797_v53 = vadd.f32 %v11670_v23, %v4796_v57 }
 0x6c5   :  { %v4964_v0 = vmax.f32 %v4802_v61, 0.0 }
 0x6c6   :  { %v4963_v24 = vmax.f32 %v4797_v53, 0.0 }
 0x6c8   :  { %6970 = vmatprep.mubr.msk.f32.mxu0 %vm875_vm1, %v4963_v24 }
 0x6c9   :  { %6971 = vmatmul.mubr.msk.f32.gmra.mrb[222].mxu0 %vm875_vm1, %v4964_v0 }
 0x6ca   :  { %v6863_v21 = vpop.f32.mrb[168].mxu0 }
 0x6cb   :  { %v4812_v51 = vadd.f32 %v6863_v21, %v11670_v23  ;;  %v4806_v33 = vpop.f32.mrb[169].mxu0 }
 0x6cc   :  { %v4807_v2 = vadd.f32 %v11670_v23, %v4806_v33 }
 0x6cd   :  { %v4966_v43 = vmax.f32 %v4812_v51, 0.0 }
 0x6ce   :  { %v4965_v36 = vmax.f32 %v4807_v2, 0.0 }
 0x6d0   :  { %6973 = vmatprep.mubr.msk.f32.mxu0 %vm875_vm1, %v4965_v36 }
 0x6d1   :  { %6974 = vmatmul.mubr.msk.f32.gmra.mrb[224].mxu0 %vm875_vm1, %v4966_v43 }
 0x6d2   :  { %v6866_v38 = vpop.f32.mrb[170].mxu0 }
 0x6d3   :  { %v4822_v56 = vadd.f32 %v6866_v38, %v11670_v23  ;;  %v4816_v47 = vpop.f32.mrb[171].mxu0 }
 0x6d4   :  { %v4817_v1 = vadd.f32 %v11670_v23, %v4816_v47 }
 0x6d5   :  { %v4968_v16 = vmax.f32 %v4822_v56, 0.0 }
 0x6d6   :  { %v4967_v17 = vmax.f32 %v4817_v1, 0.0 }
 0x6d8   :  { %6976 = vmatprep.mubr.msk.f32.mxu0 %vm875_vm1, %v4967_v17 }
 0x6d9   :  { %6977 = vmatmul.mubr.msk.f32.gmra.mrb[226].mxu0 %vm875_vm1, %v4968_v16 }
 0x6da   :  { %v6869_v54 = vpop.f32.mrb[172].mxu0 }
 0x6db   :  { %v4832_v14 = vadd.f32 %v6869_v54, %v11670_v23  ;;  %v4826_v49 = vpop.f32.mrb[173].mxu0 }
 0x6dc   :  { %v4827_v45 = vadd.f32 %v11670_v23, %v4826_v49 }
 0x6dd   :  { %v4970_v8 = vmax.f32 %v4832_v14, 0.0 }
 0x6de   :  { %v4969_v15 = vmax.f32 %v4827_v45, 0.0 }
 0x6e0   :  { %6979 = vmatprep.mubr.msk.f32.mxu0 %vm875_vm1, %v4969_v15 }
 0x6e1   :  { %6980 = vmatmul.mubr.msk.f32.gmra.mrb[228].mxu0 %vm875_vm1, %v4970_v8 }
 0x6e2   :  { %v6872_v4 = vpop.f32.mrb[174].mxu0 }
 0x6e3   :  { %v4842_v63 = vadd.f32 %v6872_v4, %v11670_v23  ;;  %v4836_v29 = vpop.f32.mrb[175].mxu0 }
 0x6e4   :  { %v4837_v18 = vadd.f32 %v11670_v23, %v4836_v29 }
 0x6e5   :  { %v4972_v20 = vmax.f32 %v4842_v63, 0.0 }
 0x6e6   :  { %v4971_v35 = vmax.f32 %v4837_v18, 0.0 }
 0x6e8   :  { %6982 = vmatprep.mubr.msk.f32.mxu0 %vm875_vm1, %v4971_v35 }
 0x6e9   :  { %6983 = vmatmul.mubr.msk.f32.gmra.mrb[230].mxu0 %vm875_vm1, %v4972_v20 }
 0x6ea   :  { %v6875_v19 = vpop.f32.mrb[176].mxu0 }
 0x6eb   :  { %v4852_v9 = vadd.f32 %v6875_v19, %v11670_v23  ;;  %v4846_v22 = vpop.f32.mrb[177].mxu0 }
 0x6ec   :  { %v4847_v34 = vadd.f32 %v11670_v23, %v4846_v22 }
 0x6ed   :  { %v4974_v12 = vmax.f32 %v4852_v9, 0.0 }
 0x6ee   :  { %v4973_v26 = vmax.f32 %v4847_v34, 0.0 }
 0x6f0   :  { %6985 = vmatprep.mubr.msk.f32.mxu0 %vm875_vm1, %v4973_v26 }
 0x6f1   :  { %6986 = vmatmul.mubr.msk.f32.gmra.mrb[232].mxu0 %vm875_vm1, %v4974_v12 }
 0x6f2   :  { %v6878_v46 = vpop.f32.mrb[178].mxu0 }
 0x6f3   :  { %v4862_v28 = vadd.f32 %v6878_v46, %v11670_v23  ;;  %v4856_v25 = vpop.f32.mrb[179].mxu0 }
 0x6f4   :  { %v4857_v40 = vadd.f32 %v11670_v23, %v4856_v25 }
 0x6f5   :  { %v4976_v48 = vmax.f32 %v4862_v28, 0.0 }
 0x6f6   :  { %v4975_v5 = vmax.f32 %v4857_v40, 0.0 }
 0x6f8   :  { %6988 = vmatprep.mubr.msk.f32.mxu0 %vm875_vm1, %v4975_v5 }
 0x6f9   :  { %6989 = vmatmul.mubr.msk.f32.gmra.mrb[234].mxu0 %vm875_vm1, %v4976_v48 }
 0x6fa   :  { %v6881_v55 = vpop.f32.mrb[180].mxu0 }
 0x6fb   :  { %v4872_v58 = vadd.f32 %v6881_v55, %v11670_v23  ;;  %v4866_v39 = vpop.f32.mrb[181].mxu0 }
 0x6fc   :  { %v4867_v3 = vadd.f32 %v11670_v23, %v4866_v39 }
 0x6fd   :  { %v4978_v37 = vmax.f32 %v4872_v58, 0.0 }
 0x6fe   :  { %v4977_v13 = vmax.f32 %v4867_v3, 0.0 }
 0x700   :  { %6991 = vmatprep.mubr.msk.f32.mxu0 %vm875_vm1, %v4977_v13 }
 0x701   :  { %6992 = vmatmul.mubr.msk.f32.gmra.mrb[236].mxu0 %vm875_vm1, %v4978_v37 }
 0x702   :  { %v6884_v62 = vpop.f32.mrb[182].mxu0 }
 0x703   :  { %v4882_v60 = vadd.f32 %v6884_v62, %v11670_v23  ;;  %v4876_v31 = vpop.f32.mrb[183].mxu0 }
 0x704   :  { %v4877_v41 = vadd.f32 %v11670_v23, %v4876_v31 }
 0x705   :  { %v4980_v6 = vmax.f32 %v4882_v60, 0.0 }
 0x706   :  { %v4979_v42 = vmax.f32 %v4877_v41, 0.0  ;;  %v6915_v27 = vpop.f32.mrb[184].mxu0 }
 0x707   :  { %v5262_v11 = vpop.f32.mrb[185].mxu0  ;;  %v5268_v32 = vadd.f32 %v6915_v27, %v11832_v7 }
 0x708   :  { %v5263_v50 = vadd.f32 %v11832_v7, %v5262_v11  ;;  %6994 = vmatprep.mubr.msk.f32.mxu0 %vm875_vm1, %v4979_v42 }
 0x709   :  { %6995 = vmatmul.mubr.msk.f32.gmra.mrb[238].mxu0 %vm875_vm1, %v4980_v6 }
 0x70a   :  { %v6887_v44 = vpop.f32.mrb[0].mxu1  ;;  %5581 = vxpose.xlu0.b32.start [1/16] (narrow) %v5263_v50, 48 }
 0x70b   :  { %v4892_v30 = vadd.f32 %v6887_v44, %v11670_v23  ;;  %v4886_v10 = vpop.f32.mrb[1].mxu1 }
 0x70c   :  { %v4887_v52 = vadd.f32 %v11670_v23, %v4886_v10  ;;  %v6918_v59 = vpop.f32.mrb[186].mxu0 }
 0x70d   :  { %v5272_v61 = vpop.f32.mrb[187].mxu0  ;;  %v4982_v53 = vmax.f32 %v4892_v30, 0.0  ;;  %v5278_v33 = vadd.f32 %v6918_v59, %v11832_v7 }
 0x70e   :  { %v4981_v57 = vmax.f32 %v4887_v52, 0.0  ;;  %5582 = vxpose.xlu0.b32.cont [2/16] (narrow) %v5268_v32, 48  ;;  %v5273_v24 = vadd.f32 %v11832_v7, %v5272_v61 }
 0x710   :  { %6997 = vmatprep.mubr.msk.f32.mxu0 %vm875_vm1, %v4981_v57 }
 0x711   :  { %6998 = vmatmul.mubr.msk.f32.gmra.mrb[240].mxu0 %vm875_vm1, %v4982_v53 }
 0x712   :  { %v6890_v0 = vpop.f32.mrb[2].mxu1  ;;  %5583 = vxpose.xlu0.b32.cont [3/16] (narrow) %v5273_v24, 48 }
 0x713   :  { %v4902_v21 = vadd.f32 %v6890_v0, %v11670_v23  ;;  %v4896_v51 = vpop.f32.mrb[3].mxu1 }
 0x714   :  { %v4897_v2 = vadd.f32 %v11670_v23, %v4896_v51  ;;  %v6921_v36 = vpop.f32.mrb[188].mxu0 }
 0x715   :  { %v5282_v43 = vpop.f32.mrb[189].mxu0  ;;  %v4984_v56 = vmax.f32 %v4902_v21, 0.0  ;;  %v5288_v54 = vadd.f32 %v6921_v36, %v11832_v7 }
 0x716   :  { %v4983_v38 = vmax.f32 %v4897_v2, 0.0  ;;  %5584 = vxpose.xlu0.b32.cont [4/16] (narrow) %v5278_v33, 48  ;;  %v5283_v47 = vadd.f32 %v11832_v7, %v5282_v43 }
 0x718   :  { %7000 = vmatprep.mubr.msk.f32.mxu0 %vm875_vm1, %v4983_v38 }
 0x719   :  { %7001 = vmatmul.mubr.msk.f32.gmra.mrb[242].mxu0 %vm875_vm1, %v4984_v56 }
 0x71a   :  { %v6893_v1 = vpop.f32.mrb[4].mxu1  ;;  %5585 = vxpose.xlu0.b32.cont [5/16] (narrow) %v5283_v47, 48 }
 0x71b   :  { %v4912_v17 = vadd.f32 %v6893_v1, %v11670_v23  ;;  %v4906_v16 = vpop.f32.mrb[5].mxu1 }
 0x71c   :  { %v4907_v14 = vadd.f32 %v11670_v23, %v4906_v16  ;;  %v6924_v49 = vpop.f32.mrb[190].mxu0 }
 0x71d   :  { %v5292_v45 = vpop.f32.mrb[191].mxu0  ;;  %v4986_v8 = vmax.f32 %v4912_v17, 0.0  ;;  %v5298_v35 = vadd.f32 %v6924_v49, %v11832_v7 }
 0x71e   :  { %v4985_v15 = vmax.f32 %v4907_v14, 0.0  ;;  %5586 = vxpose.xlu0.b32.cont [6/16] (narrow) %v5288_v54, 48  ;;  %v5293_v4 = vadd.f32 %v11832_v7, %v5292_v45 }
 0x720   :  { %7003 = vmatprep.mubr.msk.f32.mxu0 %vm875_vm1, %v4985_v15 }
 0x721   :  { %7004 = vmatmul.mubr.msk.f32.gmra.mrb[244].mxu0 %vm875_vm1, %v4986_v8 }
 0x722   :  { %v6896_v63 = vpop.f32.mrb[6].mxu1  ;;  %5587 = vxpose.xlu0.b32.cont [7/16] (narrow) %v5293_v4, 48 }
 0x723   :  { %v4922_v29 = vadd.f32 %v6896_v63, %v11670_v23  ;;  %v4916_v18 = vpop.f32.mrb[7].mxu1 }
 0x724   :  { %v4917_v20 = vadd.f32 %v11670_v23, %v4916_v18  ;;  %v6927_v19 = vpop.f32.mrb[192].mxu0 }
 0x725   :  { %v5302_v9 = vpop.f32.mrb[193].mxu0  ;;  %v4988_v34 = vmax.f32 %v4922_v29, 0.0  ;;  %v5308_v12 = vadd.f32 %v6927_v19, %v11832_v7 }
 0x726   :  { %v4987_v22 = vmax.f32 %v4917_v20, 0.0  ;;  %5588 = vxpose.xlu0.b32.cont [8/16] (narrow) %v5298_v35, 48  ;;  %v5303_v26 = vadd.f32 %v11832_v7, %v5302_v9 }
 0x728   :  { %7006 = vmatprep.mubr.msk.f32.mxu0 %vm875_vm1, %v4987_v22 }
 0x729   :  { %7007 = vmatmul.mubr.msk.f32.gmra.mrb[246].mxu0 %vm875_vm1, %v4988_v34 }
 0x72a   :  { %5589 = vxpose.xlu0.b32.cont [9/16] (narrow) %v5303_v26, 48 }
 0x72c   :  { %v6930_v46 = vpop.f32.mrb[194].mxu0 }
 0x72d   :  { %v5312_v28 = vpop.f32.mrb[195].mxu0  ;;  %v5318_v23 = vadd.f32 %v6930_v46, %v11832_v7 }
 0x72e   :  { %5590 = vxpose.xlu0.b32.cont [10/16] (narrow) %v5308_v12, 48  ;;  %v5313_v25 = vadd.f32 %v11832_v7, %v5312_v28 }
 0x732   :  { %5591 = vxpose.xlu0.b32.cont [11/16] (narrow) %v5313_v25, 48 }
 0x734   :  { %v6933_v40 = vpop.f32.mrb[196].mxu0 }
 0x735   :  { %v5322_v5 = vpop.f32.mrb[197].mxu0  ;;  %v5328_v55 = vadd.f32 %v6933_v40, %v11832_v7 }
 0x736   :  { %5592 = vxpose.xlu0.b32.cont [12/16] (narrow) %v5318_v23, 48  ;;  %v5323_v48 = vadd.f32 %v11832_v7, %v5322_v5 }
 0x73a   :  { %5593 = vxpose.xlu0.b32.cont [13/16] (narrow) %v5323_v48, 48 }
 0x73c   :  { %v6936_v58 = vpop.f32.mrb[198].mxu0 }
 0x73d   :  { %v5332_v39 = vpop.f32.mrb[199].mxu0  ;;  %v5338_v13 = vadd.f32 %v6936_v58, %v11832_v7 }
 0x73e   :  { %5594 = vxpose.xlu0.b32.cont [14/16] (narrow) %v5328_v55, 48  ;;  %v5333_v3 = vadd.f32 %v11832_v7, %v5332_v39 }
 0x742   :  { %5595 = vxpose.xlu0.b32.cont [15/16] (narrow) %v5333_v3, 48 }
 0x744   :  { %v6939_v37 = vpop.f32.mrb[200].mxu0 }
 0x745   :  { %v5342_v62 = vpop.f32.mrb[201].mxu0  ;;  %v5348_v31 = vadd.f32 %v6939_v37, %v11832_v7 }
 0x746   :  { %v5343_v60 = vadd.f32 %v11832_v7, %v5342_v62  ;;  %5596 = vxpose.xlu0.b32.end [16/16] (narrow) %v5338_v13, 48 }
 0x748   :  { %5613 = vxpose.xlu1.b32.start [1/16] (narrow) %v5343_v60, 48 }
 0x74c   :  { %v6942_v41 = vpop.f32.mrb[202].mxu0  ;;  %5614 = vxpose.xlu1.b32.cont [2/16] (narrow) %v5348_v31, 48 }
 0x74d   :  { %v5352_v42 = vpop.f32.mrb[203].mxu0  ;;  %v5358_v6 = vadd.f32 %v6942_v41, %v11832_v7 }
 0x74e   :  { %v5353_v27 = vadd.f32 %v11832_v7, %v5352_v42 }
 0x750   :  { %5615 = vxpose.xlu1.b32.cont [3/16] (narrow) %v5353_v27, 48 }
 0x754   :  { %v6945_v11 = vpop.f32.mrb[204].mxu0  ;;  %5616 = vxpose.xlu1.b32.cont [4/16] (narrow) %v5358_v6, 48 }
 0x755   :  { %v5362_v50 = vpop.f32.mrb[205].mxu0  ;;  %v5368_v30 = vadd.f32 %v6945_v11, %v11832_v7 }
 0x756   :  { %v5363_v44 = vadd.f32 %v11832_v7, %v5362_v50 }
 0x758   :  { %5617 = vxpose.xlu1.b32.cont [5/16] (narrow) %v5363_v44, 48 }
 0x75c   :  { %v6948_v10 = vpop.f32.mrb[206].mxu0  ;;  %5618 = vxpose.xlu1.b32.cont [6/16] (narrow) %v5368_v30, 48 }
 0x75d   :  { %v5372_v32 = vpop.f32.mrb[207].mxu0  ;;  %v5378_v59 = vadd.f32 %v6948_v10, %v11832_v7 }
 0x75e   :  { %v5373_v52 = vadd.f32 %v11832_v7, %v5372_v32 }
 0x760   :  { %5619 = vxpose.xlu1.b32.cont [7/16] (narrow) %v5373_v52, 48 }
 0x764   :  { %v6951_v61 = vpop.f32.mrb[208].mxu0  ;;  %5620 = vxpose.xlu1.b32.cont [8/16] (narrow) %v5378_v59, 48 }
 0x765   :  { %v5382_v57 = vpop.f32.mrb[209].mxu0  ;;  %v5388_v24 = vadd.f32 %v6951_v61, %v11832_v7 }
 0x766   :  { %v5383_v53 = vadd.f32 %v11832_v7, %v5382_v57 }
 0x768   :  { %5621 = vxpose.xlu1.b32.cont [9/16] (narrow) %v5383_v53, 48 }
 0x76c   :  { %v6954_v0 = vpop.f32.mrb[210].mxu0  ;;  %5622 = vxpose.xlu1.b32.cont [10/16] (narrow) %v5388_v24, 48 }
 0x76d   :  { %v5392_v21 = vpop.f32.mrb[211].mxu0  ;;  %v5398_v33 = vadd.f32 %v6954_v0, %v11832_v7 }
 0x76e   :  { %v5393_v51 = vadd.f32 %v11832_v7, %v5392_v21  ;;  %v5898_v21 = vld [vmem:[%s12419_s6] sm:$0xff] }
 0x770   :  { %5623 = vxpose.xlu1.b32.cont [11/16] (narrow) %v5393_v51, 48 }
 0x774   :  { %v6957_v2 = vpop.f32.mrb[212].mxu0  ;;  %5624 = vxpose.xlu1.b32.cont [12/16] (narrow) %v5398_v33, 48 }
 0x775   :  { %v5402_v36 = vpop.f32.mrb[213].mxu0  ;;  %v5408_v38 = vadd.f32 %v6957_v2, %v11832_v7  ;;  %v7685_v2 = vmov 0  }
 0x776   :  { %v5403_v43 = vadd.f32 %v11832_v7, %v5402_v36 }
 0x778   :  { %5625 = vxpose.xlu1.b32.cont [13/16] (narrow) %v5403_v43, 48 }
 0x77c   :  { %v6960_v56 = vpop.f32.mrb[214].mxu0  ;;  %5626 = vxpose.xlu1.b32.cont [14/16] (narrow) %v5408_v38, 48  ;;  %v5900_v38 = vld [vmem:[%s12420_s7] sm:$0xff] }
 0x77d   :  { %v5412_v47 = vpop.f32.mrb[215].mxu0  ;;  %v5418_v17 = vadd.f32 %v6960_v56, %v11832_v7 }
 0x77e   :  { %v5413_v1 = vadd.f32 %v11832_v7, %v5412_v47 }
 0x780   :  { %5627 = vxpose.xlu1.b32.cont [15/16] (narrow) %v5413_v1, 48 }
 0x784   :  { %v6963_v16 = vpop.f32.mrb[216].mxu0  ;;  %5628 = vxpose.xlu1.b32.end [16/16] (narrow) %v5418_v17, 48 }
 0x785   :  { %v5422_v54 = vpop.f32.mrb[217].mxu0  ;;  %v5428_v49 = vadd.f32 %v6963_v16, %v11832_v7 }
 0x786   :  { %v5423_v14 = vadd.f32 %v11832_v7, %v5422_v54 }
 0x788   :  { %5645 = vxpose.xlu0.b32.start [1/16] (narrow) %v5423_v14, 48 }
 0x78a   :  { %v11914_v43 = vpop.trf.xlu0 }
 0x78c   :  { %v6966_v45 = vpop.f32.mrb[218].mxu0  ;;  %5646 = vxpose.xlu0.b32.cont [2/16] (narrow) %v5428_v49, 48 }
 0x78d   :  { %v5432_v15 = vpop.f32.mrb[219].mxu0  ;;  %v5438_v4 = vadd.f32 %v6966_v45, %v11832_v7 }
 0x78e   :  { %v5433_v8 = vadd.f32 %v11832_v7, %v5432_v15  ;;  %v11920_v1 = vpop.trf.xlu0 }
 0x790   :  { %5647 = vxpose.xlu0.b32.cont [3/16] (narrow) %v5433_v8, 48 }
 0x792   :  { %v11924_v14 = vpop.trf.xlu0 }
 0x794   :  { %v6969_v63 = vpop.f32.mrb[220].mxu0  ;;  %5648 = vxpose.xlu0.b32.cont [4/16] (narrow) %v5438_v4, 48 }
 0x795   :  { %v5442_v29 = vpop.f32.mrb[221].mxu0  ;;  %v5448_v35 = vadd.f32 %v6969_v63, %v11832_v7 }
 0x796   :  { %v5443_v18 = vadd.f32 %v11832_v7, %v5442_v29  ;;  %v11927_v8 = vpop.trf.xlu0 }
 0x798   :  { %5649 = vxpose.xlu0.b32.cont [5/16] (narrow) %v5443_v18, 48 }
 0x79a   :  { %v11930_v63 = vpop.trf.xlu0 }
 0x79c   :  { %v6972_v20 = vpop.f32.mrb[222].mxu0  ;;  %5650 = vxpose.xlu0.b32.cont [6/16] (narrow) %v5448_v35, 48 }
 0x79d   :  { %v5452_v19 = vpop.f32.mrb[223].mxu0  ;;  %v5458_v22 = vadd.f32 %v6972_v20, %v11832_v7 }
 0x79e   :  { %v5453_v9 = vadd.f32 %v11832_v7, %v5452_v19  ;;  %v11932_v29 = vpop.trf.xlu0  ;;  %v5709_v19 = vmax.f32 %v11914_v43, %v11920_v1 }
 0x7a0   :  { %5651 = vxpose.xlu0.b32.cont [7/16] (narrow) %v5453_v9, 48 }
 0x7a4   :  { %v6975_v34 = vpop.f32.mrb[224].mxu0  ;;  %5652 = vxpose.xlu0.b32.cont [8/16] (narrow) %v5458_v22, 48 }
 0x7a5   :  { %v5462_v26 = vpop.f32.mrb[225].mxu0  ;;  %v5468_v46 = vadd.f32 %v6975_v34, %v11832_v7 }
 0x7a6   :  { %v5463_v12 = vadd.f32 %v11832_v7, %v5462_v26 }
 0x7a8   :  { %5653 = vxpose.xlu0.b32.cont [9/16] (narrow) %v5463_v12, 48 }
 0x7ac   :  { %v6978_v28 = vpop.f32.mrb[226].mxu0  ;;  %5654 = vxpose.xlu0.b32.cont [10/16] (narrow) %v5468_v46, 48 }
 0x7ad   :  { %v5472_v25 = vpop.f32.mrb[227].mxu0  ;;  %v5478_v40 = vadd.f32 %v6978_v28, %v11832_v7  ;;  %v5899_v28 = vld [vmem:[%s12419_s6 + $0x8] sm:$0xff] }
 0x7ae   :  { %v5473_v23 = vadd.f32 %v11832_v7, %v5472_v25 }
 0x7b0   :  { %5655 = vxpose.xlu0.b32.cont [11/16] (narrow) %v5473_v23, 48 }
 0x7b4   :  { %v6981_v5 = vpop.f32.mrb[228].mxu0  ;;  %5656 = vxpose.xlu0.b32.cont [12/16] (narrow) %v5478_v40, 48 }
 0x7b5   :  { %v5482_v48 = vpop.f32.mrb[229].mxu0  ;;  %v5488_v58 = vadd.f32 %v6981_v5, %v11832_v7  ;;  %v5901_v5 = vld [vmem:[%s12420_s7 + $0x8] sm:$0xff] }
 0x7b6   :  { %v5483_v55 = vadd.f32 %v11832_v7, %v5482_v48 }
 0x7b8   :  { %5657 = vxpose.xlu0.b32.cont [13/16] (narrow) %v5483_v55, 48 }
 0x7bc   :  { %v6984_v39 = vpop.f32.mrb[230].mxu0  ;;  %5658 = vxpose.xlu0.b32.cont [14/16] (narrow) %v5488_v58, 48 }
 0x7bd   :  { %v5492_v3 = vpop.f32.mrb[231].mxu0  ;;  %v5498_v37 = vadd.f32 %v6984_v39, %v11832_v7 }
 0x7be   :  { %v5493_v13 = vadd.f32 %v11832_v7, %v5492_v3 }
 0x7c0   :  { %5659 = vxpose.xlu0.b32.cont [15/16] (narrow) %v5493_v13, 48 }
 0x7c4   :  { %v6987_v62 = vpop.f32.mrb[232].mxu0  ;;  %5660 = vxpose.xlu0.b32.end [16/16] (narrow) %v5498_v37, 48 }
 0x7c5   :  { %v5502_v60 = vpop.f32.mrb[233].mxu0  ;;  %v5508_v41 = vadd.f32 %v6987_v62, %v11832_v7 }
 0x7c6   :  { %v5503_v31 = vadd.f32 %v11832_v7, %v5502_v60 }
 0x7c8   :  { %5677 = vxpose.xlu1.b32.start [1/16] (narrow) %v5503_v31, 48  ;;  %v11934_v18 = vpop.trf.xlu1 }
 0x7cc   :  { %v6990_v42 = vpop.f32.mrb[234].mxu0  ;;  %5678 = vxpose.xlu1.b32.cont [2/16] (narrow) %v5508_v41, 48  ;;  %v11938_v20 = vpop.trf.xlu1 }
 0x7cd   :  { %v5512_v27 = vpop.f32.mrb[235].mxu0  ;;  %v5518_v11 = vadd.f32 %v6990_v42, %v11832_v7  ;;  %v5720_v26 = vmax.f32 %v11934_v18, %v11938_v20 }
 0x7ce   :  { %v5513_v6 = vadd.f32 %v11832_v7, %v5512_v27 }
 0x7d0   :  { %5679 = vxpose.xlu1.b32.cont [3/16] (narrow) %v5513_v6, 48  ;;  %v11944_v22 = vpop.trf.xlu1 }
 0x7d1   :  { %v5721_v23 = vmax.f32 %v5720_v26, %v11944_v22 }
 0x7d4   :  { %v6993_v50 = vpop.f32.mrb[236].mxu0  ;;  %5680 = vxpose.xlu1.b32.cont [4/16] (narrow) %v5518_v11, 48  ;;  %v11952_v46 = vpop.trf.xlu1 }
 0x7d5   :  { %v5522_v44 = vpop.f32.mrb[237].mxu0  ;;  %v5528_v10 = vadd.f32 %v6993_v50, %v11832_v7  ;;  %v5722_v39 = vmax.f32 %v5721_v23, %v11952_v46 }
 0x7d6   :  { %v5523_v30 = vadd.f32 %v11832_v7, %v5522_v44 }
 0x7d8   :  { %5681 = vxpose.xlu1.b32.cont [5/16] (narrow) %v5523_v30, 48  ;;  %v11966_v55 = vpop.trf.xlu1 }
 0x7d9   :  { %v5723_v37 = vmax.f32 %v5722_v39, %v11966_v55 }
 0x7dc   :  { %v6996_v32 = vpop.f32.mrb[238].mxu0  ;;  %5682 = vxpose.xlu1.b32.cont [6/16] (narrow) %v5528_v10, 48  ;;  %v11974_v60 = vpop.trf.xlu1 }
 0x7dd   :  { %v5532_v52 = vpop.f32.mrb[239].mxu0  ;;  %v5538_v61 = vadd.f32 %v6996_v32, %v11832_v7  ;;  %v5724_v42 = vmax.f32 %v5723_v37, %v11974_v60 }
 0x7de   :  { %v5533_v59 = vadd.f32 %v11832_v7, %v5532_v52 }
 0x7df   :  { %v5725_v50 = vrot.slane %v5724_v42, 4 }
 0x7e0   :  { %5683 = vxpose.xlu1.b32.cont [7/16] (narrow) %v5533_v59, 48 }
 0x7e1   :  { %v5726_v10 = vmax.f32 %v5724_v42, %v5725_v50 }
 0x7e3   :  { %v5727_v59 = vrot.slane %v5726_v10, 2 }
 0x7e4   :  { %v6999_v57 = vpop.f32.mrb[240].mxu0  ;;  %5684 = vxpose.xlu1.b32.cont [8/16] (narrow) %v5538_v61, 48 }
 0x7e5   :  { %v5542_v53 = vpop.f32.mrb[241].mxu0  ;;  %v5548_v0 = vadd.f32 %v6999_v57, %v11832_v7 }
 0x7e6   :  { %v5543_v24 = vadd.f32 %v11832_v7, %v5542_v53  ;;  %v5728_v53 = vmax.f32 %v5726_v10, %v5727_v59 }
 0x7e8   :  { %5685 = vxpose.xlu1.b32.cont [9/16] (narrow) %v5543_v24, 48 }
 0x7ec   :  { %v7002_v51 = vpop.f32.mrb[242].mxu0  ;;  %5686 = vxpose.xlu1.b32.cont [10/16] (narrow) %v5548_v0, 48 }
 0x7ed   :  { %v5552_v33 = vpop.f32.mrb[243].mxu0  ;;  %7129 = vset.pattern.permute.xlu0 %v7685_v2  ;;  %v5558_v56 = vadd.f32 %v7002_v51, %v11832_v7 }
 0x7ee   :  { %v5553_v36 = vadd.f32 %v11832_v7, %v5552_v33  ;;  %5930 = vperm.xlu0 %7129, %v5898_v21   ;;  %v5729_v21 = vrot.slane %v5728_v53, 1 }
 0x7f0   :  { %5687 = vxpose.xlu1.b32.cont [11/16] (narrow) %v5553_v36, 48  ;;  %v11984_v36 = vmax.f32 %v5728_v53, %v5729_v21 }
 0x7f2   :  { %6187 = vperm.xlu0 %7129, %v5900_v38  }
 0x7f4   :  { %v7005_v47 = vpop.f32.mrb[244].mxu0  ;;  %5688 = vxpose.xlu1.b32.cont [12/16] (narrow) %v5558_v56, 48 }
 0x7f5   :  { %v5562_v17 = vpop.f32.mrb[245].mxu0  ;;  %v5568_v54 = vadd.f32 %v7005_v47, %v11832_v7 }
 0x7f6   :  { %v5563_v16 = vadd.f32 %v11832_v7, %v5562_v17 }
 0x7f8   :  { %5689 = vxpose.xlu1.b32.cont [13/16] (narrow) %v5563_v16, 48 }
 0x7fc   :  { %v7008_v49 = vpop.f32.mrb[246].mxu0  ;;  %5690 = vxpose.xlu1.b32.cont [14/16] (narrow) %v5568_v54, 48  ;;  %v5754_v54 = vsub.f32 %v11934_v18, %v11984_v36  ;;  %v5762_v18 = vsub.f32 %v11944_v22, %v11984_v36 }
 0x7fd   :  { %v5572_v45 = vpop.f32.mrb[247].mxu0  ;;  %v5578_v4 = vadd.f32 %v7008_v49, %v11832_v7 }
 0x7fe   :  { %v5573_v15 = vadd.f32 %v11832_v7, %v5572_v45  ;;  %v5710_v7 = vmax.f32 %v5709_v19, %v11924_v14  ;;  %v5779_v19 = vmul.f32 1.442695, %v5754_v54  ;;  %v5795_v22 = vmul.f32 1.442695, %v5762_v18 }
 0x800   :  { %5691 = vxpose.xlu1.b32.cont [15/16] (narrow) %v5573_v15, 48  ;;  %v5711_v34 = vmax.f32 %v5710_v7, %v11927_v8 }
 0x802   :  { %v5712_v25 = vmax.f32 %v5711_v34, %v11930_v63 }
 0x804   :  { %5692 = vxpose.xlu1.b32.end [16/16] (narrow) %v5578_v4, 48  ;;  %v5713_v58 = vmax.f32 %v5712_v25, %v11932_v29 }
 0x806   :  { %v5714_v13 = vrot.slane %v5713_v58, 4 }
 0x808   :  { %v11936_v35 = vpop.trf.xlu0  ;;  %v5715_v41 = vmax.f32 %v5713_v58, %v5714_v13 }
 0x80a   :  { %v5716_v11 = vrot.slane %v5715_v41, 2 }
 0x80c   :  { %v11942_v9 = vpop.trf.xlu0  ;;  %v5717_v30 = vmax.f32 %v5715_v41, %v5716_v11  ;;  %v5770_v41 = vsub.f32 %v11966_v55, %v11984_v36  ;;  %v5774_v55 = vsub.f32 %v11974_v60, %v11984_v36 }
 0x80d   :  { %v5731_v40 = vmax.f32 %v11936_v35, %v11942_v9 }
 0x80e   :  { %v5718_v52 = vrot.slane %v5717_v30, 1  ;;  %v5819_v60 = vmul.f32 1.442695, %v5774_v55 }
 0x810   :  { %v11950_v12 = vpop.trf.xlu0  ;;  %v5719_v57 = vmax.f32 %v5717_v30, %v5718_v52 }
 0x811   :  { %v5732_v3 = vmax.f32 %v5731_v40, %v11950_v12 }
 0x812   :  { %v5753_v0 = vsub.f32 %v11914_v43, %v5719_v57  ;;  %v5757_v51 = vsub.f32 %v11920_v1, %v5719_v57  ;;  %v5761_v38 = vsub.f32 %v11924_v14, %v5719_v57  ;;  %v5765_v16 = vsub.f32 %v11927_v8, %v5719_v57  ;;  %v11999_v14 = vld [vmem:[%s12414_s1] sm:$0xf]  ;;  %s7687_s1 = smov [#allocation2]  }
 0x813   :  { %v5758_v1 = vsub.f32 %v11938_v20, %v11984_v36  ;;  %v5769_v15 = vsub.f32 %v11930_v63, %v5719_v57  ;;  %v12009_v20 = vsub.f32 0.0, %v11999_v14  ;;  %v5773_v23 = vsub.f32 %v11932_v29, %v5719_v57  ;;  %s6287_s21 = sshll.u32 %s7687_s1, 4  ;;  %s6288_s21 = int_to_ptr.vmem [resolvable:$true] %s6287_s21 }
 0x814   :  { %v11964_v48 = vpop.trf.xlu0  ;;  %v5785_v56 = vmul.f32 1.442695, %v5757_v51  ;;  %v5793_v43 = vmul.f32 1.442695, %v5761_v38  ;;  %v5801_v8 = vmul.f32 1.442695, %v5765_v16  ;;  %p7661_p1 = scmp.lt.s32.totalorder %s6288_s21, %s6288_s21 }
 0x815   :  { %v5733_v31 = vmax.f32 %v5732_v3, %v11964_v48  ;;  %v5787_v7 = vmul.f32 1.442695, %v5758_v1  ;;  %v5912_v40 = vand.u32 2147483647, %v12009_v20  ;;  %v5817_v37 = vmul.f32 1.442695, %v5773_v23 }
 0x816   :  { %v6620_v23 = vmul.f32 -1.442695, %v11999_v14  ;;  %vm5910_vm6 = vcmp.ne.f32.partialorder %v12009_v20, %v12009_v20  ;;  %s7656_s22 = scalar_lea.vmem %s6288_s21, 64 }
 0x817   :  { %p7657_p0 = scmp.ne.s32.totalorder %s6288_s21, %s7656_s22  ;;  %p7662_p2 = scmp.lt.s32.totalorder %s7656_s22, %s7656_s22 }
 0x818   :  { %v11972_v62 = vpop.trf.xlu0 }
 0x819   :  { %v5734_v27 = vmax.f32 %v5733_v31, %v11972_v62  ;;  %v5913_v31 = vsub.f32 0.0, %v5912_v40  ;;  %p7663_p3 = por %p7662_p2, %p7661_p1 }
 0x81b   :  { %v5914_v30 = vmul.f32 1.442695, %v5913_v31  ;;  %p7664_p4 = pnand %p7663_p3, %p7657_p0 }
 0x81c   :  { %v11979_v6 = vpop.trf.xlu0 }
 0x81d   :  { %v5735_v44 = vmax.f32 %v5734_v27, %v11979_v6 }
 0x81f   :  { %v5736_v32 = vrot.slane %v5735_v44, 4 }
 0x821   :  { %v5737_v61 = vmax.f32 %v5735_v44, %v5736_v32  ;;  %v5811_v32 = vmul.f32 1.442695, %v5770_v41 }
 0x822   :  { %7130 = vset.pattern.permute.xlu1 %v7685_v2  ;;  %v5777_v2 = vmul.f32 1.442695, %v5753_v0 }
 0x823   :  { %5935 = vperm.xlu1 %7130, %v5899_v28   ;;  %v5738_v24 = vrot.slane %v5737_v61, 2  ;;  %v5809_v28 = vmul.f32 1.442695, %v5769_v15 }
 0x824   :  { %7387 = vpow2.f32 %v5777_v2 }
 0x825   :  { %v5739_v33 = vmax.f32 %v5737_v61, %v5738_v24  ;;  %7389 = vpow2.f32 %v5785_v56 }
 0x826   :  { %7391 = vpow2.f32 %v5793_v43 }
 0x827   :  { %6192 = vperm.xlu1 %7130, %v5901_v5   ;;  %v5740_v47 = vrot.slane %v5739_v33, 1  ;;  %7393 = vpow2.f32 %v5801_v8 }
 0x828   :  { %7395 = vpow2.f32 %v5779_v19 }
 0x829   :  { %v11994_v49 = vmax.f32 %v5739_v33, %v5740_v47  ;;  %7397 = vpow2.f32 %v5787_v7 }
 0x82a   :  { %7399 = vpow2.f32 %v5809_v28 }
 0x82b   :  { %v5755_v34 = vsub.f32 %v11936_v35, %v11994_v49  ;;  %v5759_v26 = vsub.f32 %v11942_v9, %v11994_v49  ;;  %v5766_v35 = vsub.f32 %v11952_v46, %v11984_v36  ;;  %v5763_v39 = vsub.f32 %v11950_v12, %v11994_v49 }
 0x82c   :  { %7401 = vpow2.f32 %v5795_v22  ;;  %v5767_v12 = vsub.f32 %v11964_v48, %v11994_v49  ;;  %v5771_v48 = vsub.f32 %v11972_v62, %v11994_v49  ;;  %v5775_v2 = vsub.f32 %v11979_v6, %v11994_v49 }
 0x82d   :  { %v5781_v58 = vmul.f32 1.442695, %v5755_v34  ;;  %v5789_v3 = vmul.f32 1.442695, %v5759_v26  ;;  %v5803_v46 = vmul.f32 1.442695, %v5766_v35 }
 0x82e   :  { %v12020_v5 = vpop.eup %7387  ;;  %v5797_v11 = vmul.f32 1.442695, %v5763_v39  ;;  %v5805_v61 = vmul.f32 1.442695, %v5767_v12  ;;  %v5813_v36 = vmul.f32 1.442695, %v5771_v48 }
 0x82f   :  { %v12024_v9 = vpop.eup %7389  ;;  %7403 = vpow2.f32 %v5781_v58  ;;  %v5821_v15 = vmul.f32 1.442695, %v5775_v2 }
 0x830   :  { %v5825_v42 = vadd.f32 %v12024_v9, %v12020_v5  ;;  %v12035_v27 = vpop.eup %7391  ;;  %7405 = vpow2.f32 %v5789_v3 }
 0x831   :  { %7407 = vpow2.f32 %v5817_v37  ;;  %v12042_v10 = vpop.eup %7393 }
 0x832   :  { %7409 = vpow2.f32 %v5803_v46  ;;  %v5826_v52 = vadd.f32 %v12035_v27, %v5825_v42  ;;  %v12047_v59 = vpop.eup %7395 }
 0x833   :  { %7411 = vpow2.f32 %v5797_v11  ;;  %v12053_v53 = vpop.eup %7397 }
 0x834   :  { %7413 = vpow2.f32 %v5914_v30  ;;  %v12056_v0 = vpop.eup %7399  ;;  %v5827_v21 = vadd.f32 %v12042_v10, %v5826_v52  ;;  %v5836_v62 = vadd.f32 %v12053_v53, %v12047_v59 }
 0x835   :  { %7415 = vpow2.f32 %v5811_v32 }
 0x836   :  { %v12059_v33 = vpop.eup %7401  ;;  %7417 = vpow2.f32 %v5805_v61  ;;  %v5828_v1 = vadd.f32 %v12056_v0, %v5827_v21 }
 0x837   :  { %7419 = vpow2.f32 %v5819_v60  ;;  %v5837_v43 = vadd.f32 %v12059_v33, %v5836_v62 }
 0x838   :  { %7421 = vpow2.f32 %v5813_v36 }
 0x839   :  { %v12065_v38 = vpop.eup %7403  ;;  %7423 = vpow2.f32 %v5821_v15 }
 0x83a   :  { %v12067_v47 = vpop.eup %7405  ;;  %7425 = vpow2.f32 %v6620_v23 }
 0x83b   :  { %v12069_v54 = vpop.eup %7407  ;;  %v5847_v6 = vadd.f32 %v12067_v47, %v12065_v38 }
 0x83c   :  { %v12073_v8 = vpop.eup %7409  ;;  %v5829_v34 = vadd.f32 %v12069_v54, %v5828_v1 }
 0x83d   :  { %v5838_v7 = vadd.f32 %v12073_v8, %v5837_v43 }
 0x83e   :  { %v5830_v3 = vrot.slane %v5829_v34, 4 }
 0x840   :  { %v5831_v12 = vadd.f32 %v5830_v3, %v5829_v34 }
 0x848   :  { %v11987_v17 = vpop.trf.xlu1 }
 0x84c   :  { %v12001_v45 = vpop.trf.xlu1 }
 0x84d   :  { %v5742_v4 = vmax.f32 %v11987_v17, %v12001_v45 }
 0x850   :  { %v12015_v63 = vpop.trf.xlu1 }
 0x851   :  { %v5743_v25 = vmax.f32 %v5742_v4, %v12015_v63  ;;  %v12077_v4 = vpop.eup %7411 }
 0x852   :  { %v7414_v19 = vpop.eup %7413  ;;  %v5848_v28 = vadd.f32 %v12077_v4, %v5847_v6 }
 0x853   :  { %v12081_v26 = vpop.eup %7415  ;;  %v5916_v58 = vadd.f32 1.0, %v7414_v19  ;;  %v5919_v32 = vmul.f32 -0.5, %v7414_v19 }
 0x854   :  { %v12028_v13 = vpop.trf.xlu1  ;;  %v12084_v22 = vpop.eup %7417  ;;  %v5839_v39 = vadd.f32 %v12081_v26, %v5838_v7 }
 0x855   :  { %v5744_v29 = vmax.f32 %v5743_v25, %v12028_v13  ;;  %v5849_v37 = vadd.f32 %v12084_v22, %v5848_v28  ;;  %7427 = vlog2.f32 %v5916_v58 }
 0x858   :  { %v12039_v50 = vpop.trf.xlu1 }
 0x859   :  { %v5745_v44 = vmax.f32 %v5744_v29, %v12039_v50  ;;  %v12090_v29 = vpop.eup %7419 }
 0x85a   :  { %v12094_v42 = vpop.eup %7421 }
 0x85b   :  { %v12099_v30 = vpop.eup %7423 }
 0x85c   :  { %v12051_v57 = vpop.trf.xlu1 }
 0x85d   :  { %v5746_v24 = vmax.f32 %v5745_v44, %v12051_v57 }
 0x85f   :  { %v5747_v51 = vrot.slane %v5746_v24, 4 }
 0x861   :  { %v5748_v56 = vmax.f32 %v5746_v24, %v5747_v51  ;;  %v7426_v24 = vpop.eup %7425  ;;  %v5920_v51 = vadd.f32 1.0, %v5919_v32 }
 0x862   :  { %v7428_v62 = vpop.eup %7427 }
 0x863   :  { %v5749_v16 = vrot.slane %v5748_v56, 2  ;;  %v5918_v6 = vmul.f32 0.6931472, %v7428_v62  ;;  %v5921_v7 = vmul.f32 %v7414_v19, %v5920_v51 }
 0x865   :  { %v5750_v49 = vmax.f32 %v5748_v56, %v5749_v16  ;;  %v5922_v16 = vand.u32 2147483647, %v7414_v19 }
 0x867   :  { %v5751_v18 = vrot.slane %v5750_v49, 1  ;;  %vm5923_vm5 = vcmp.lt.f32.partialorder %v5922_v16, 0.0004427343 }
 0x868   :  { %v5924_v58 = vsel %vm5923_vm5, %v5921_v7, %v5918_v6 }
 0x869   :  { %v5752_v25 = vmax.f32 %v5750_v49, %v5751_v18 }
 0x86b   :  { %v5756_v40 = vsub.f32 %v11987_v17, %v5752_v25  ;;  %v5760_v35 = vsub.f32 %v12001_v45, %v5752_v25  ;;  %v5764_v31 = vsub.f32 %v12015_v63, %v5752_v25  ;;  %v5840_v17 = vadd.f32 %v12090_v29, %v5839_v39 }
 0x86c   :  { %v5850_v45 = vadd.f32 %v12094_v42, %v5849_v37  ;;  %v5768_v11 = vsub.f32 %v12028_v13, %v5752_v25  ;;  %v5832_v63 = vrot.slane %v5831_v12, 2  ;;  %v5772_v48 = vsub.f32 %v12039_v50, %v5752_v25 }
 0x86d   :  { %v5783_v41 = vmul.f32 1.442695, %v5756_v40  ;;  %v5791_v46 = vmul.f32 1.442695, %v5760_v35  ;;  %v5799_v44 = vmul.f32 1.442695, %v5764_v31  ;;  %v5776_v13 = vsub.f32 %v12051_v57, %v5752_v25 }
 0x86e   :  { %v5841_v55 = vrot.slane %v5840_v17, 4  ;;  %v5851_v52 = vadd.f32 %v12099_v30, %v5850_v45  ;;  %v5807_v61 = vmul.f32 1.442695, %v5768_v11  ;;  %v5833_v21 = vadd.f32 %v5832_v63, %v5831_v12 }
 0x86f   :  { %7429 = vpow2.f32 %v5783_v41  ;;  %v5815_v36 = vmul.f32 1.442695, %v5772_v48  ;;  %v5905_v50 = vadd.f32 1.0, %v7426_v24  ;;  %v5823_v18 = vmul.f32 1.442695, %v5776_v13  ;;  %v5931_v24 = vpop.permute.xlu0 %5930 }
 0x870   :  { %7431 = vpow2.f32 %v5791_v46  ;;  %v5842_v60 = vadd.f32 %v5841_v55, %v5840_v17  ;;  %v5852_v2 = vrot.slane %v5851_v52, 4  ;;  %v5834_v15 = vrot.slane %v5833_v21, 1 }
 0x871   :  { %7433 = vpow2.f32 %v5799_v44  ;;  %v12507_v57 = vlaneseq  ;;  %v5909_v40 = vmax.f32 %v12009_v20, 0.0 }
 0x872   :  { %7435 = vpow2.f32 %v5807_v61  ;;  %v5843_v1 = vrot.slane %v5842_v60, 2  ;;  %v5853_v49 = vadd.f32 %v5852_v2, %v5851_v52  ;;  %v5835_v23 = vadd.f32 %v5834_v15, %v5833_v21 }
 0x873   :  { %7437 = vpow2.f32 %v5815_v36  ;;  %v12115_v3 = vshrl.u32 %v12507_v57, 7  ;;  %v5925_v31 = vadd.f32 %v5924_v58, %v5909_v40 }
 0x874   :  { %v5844_v25 = vadd.f32 %v5843_v1, %v5842_v60  ;;  %7439 = vrcp.f32 %v5905_v50  ;;  %v5854_v35 = vrot.slane %v5853_v49, 2 }
 0x875   :  { %7441 = vpow2.f32 %v5823_v18  ;;  %12665 = vst [vmem:[#allocation5_spill] sm:$0xff] %v12115_v3  ;;  %v5941_v17 = vsub.s32 0, %v12115_v3  ;;  %v5945_v45 = vsub.s32 1, %v12115_v3  ;;  %v5926_v44 = vsel %vm5910_vm6, %v12009_v20, %v5925_v31 }
 0x876   :  { %v5845_v37 = vrot.slane %v5844_v25, 1  ;;  %7443 = vrcp.f32 %v5835_v23  ;;  %v5855_v41 = vadd.f32 %v5854_v35, %v5853_v49  ;;  %v5949_v55 = vsub.s32 2, %v12115_v3 }
 0x877   :  { %v12130_v48 = vrot.slane %v11999_v14, %v5941_v17  ;;  %v5927_v60 = vsub.f32 0.0, %v5926_v44  ;;  %v12135_v21 = vrot.slane %v11999_v14, %v5945_v45  ;;  %v5953_v49 = vsub.s32 3, %v12115_v3 }
 0x878   :  { %v5846_v11 = vadd.f32 %v5845_v37, %v5844_v25  ;;  %v5856_v63 = vrot.slane %v5855_v41, 1  ;;  %v12138_v51 = vrot.slane %v11999_v14, %v5949_v55 }
 0x879   :  { %v12104_v56 = vpop.eup %7429  ;;  %v6012_v13 = vmul.f32 %v12130_v48, %v5931_v24  ;;  %v12144_v16 = vrot.slane %v5927_v60, %v5941_v17  ;;  %v6013_v1 = vmul.f32 %v12135_v21, %v5931_v24  ;;  %v12147_v15 = vrot.slane %v5927_v60, %v5945_v45 }
 0x87a   :  { %v12106_v43 = vpop.eup %7431  ;;  %7445 = vrcp.f32 %v5846_v11  ;;  %v5857_v20 = vadd.f32 %v5856_v63, %v5855_v41  ;;  %v6014_v50 = vmul.f32 %v12138_v51, %v5931_v24 }
 0x87b   :  { %v5858_v34 = vadd.f32 %v12106_v43, %v12104_v56  ;;  %v12110_v28 = vpop.eup %7433  ;;  %v6621_v25 = vmul.f32 -1.442695, %v6012_v13  ;;  %v5959_v35 = vmul.f32 %v12144_v16, %v5931_v24  ;;  %v6622_v58 = vmul.f32 -1.442695, %v6013_v1 }
 0x87c   :  { %v12117_v19 = vpop.eup %7435  ;;  %7447 = vrcp.f32 %v5857_v20  ;;  %v6623_v37 = vmul.f32 -1.442695, %v6014_v50 }
 0x87d   :  { %v5859_v39 = vadd.f32 %v12110_v28, %v5858_v34  ;;  %v12123_v12 = vpop.eup %7437  ;;  %v12156_v34 = vrot.slane %v5927_v60, %v5949_v55  ;;  %7449 = vpow2.f32 %v6621_v25 }
 0x87e   :  { %v7440_v32 = vpop.eup %7439  ;;  %7451 = vpow2.f32 %v6622_v58 }
 0x87f   :  { %v5860_v46 = vadd.f32 %v12117_v19, %v5859_v39  ;;  %v12132_v61 = vpop.eup %7441  ;;  %v12142_v36 = vrot.slane %v7440_v32, %v5941_v17  ;;  %v12154_v18 = vrot.slane %v7440_v32, %v5945_v45  ;;  %v12165_v39 = vrot.slane %v7440_v32, %v5949_v55 }
 0x880   :  { %v7444_v62 = vpop.eup %7443  ;;  %v12168_v31 = vrot.slane %v7440_v32, %v5953_v49  ;;  %v12176_v17 = vrot.slane %v5927_v60, %v5953_v49  ;;  %v5961_v55 = vmul.f32 %v12156_v34, %v5931_v24  ;;  %7453 = vpow2.f32 %v6623_v37 }
 0x881   :  { %v5861_v52 = vadd.f32 %v12123_v12, %v5860_v46  ;;  %v12151_v6 = vmul.f32 %v7444_v62, %v12020_v5  ;;  %v12159_v23 = vmul.f32 %v12142_v36, %v5931_v24  ;;  %v12162_v40 = vmul.f32 %v7444_v62, %v12035_v27 }
 0x882   :  { %v5960_v5 = vmul.f32 %v12147_v15, %v5931_v24  ;;  %v12171_v41 = vmul.f32 %v7444_v62, %v12024_v9  ;;  %v12174_v46 = vmul.f32 %v7444_v62, %v12056_v0  ;;  %v12179_v27 = vrot.slane %v11999_v14, %v5953_v49 }
 0x883   :  { %v5862_v2 = vadd.f32 %v12132_v61, %v5861_v52  ;;  %v12182_v45 = vmul.f32 %v12154_v18, %v5931_v24  ;;  %v6113_v63 = vadd.f32 1.0, %v12159_v23  ;;  %v5967_v9 = vmul.f32 1.442695, %v5959_v35 }
 0x884   :  { %v7446_v11 = vpop.eup %7445  ;;  %v12187_v0 = vmul.f32 %v12165_v39, %v5931_v24  ;;  %v12190_v32 = vmul.f32 %v7444_v62, %v12042_v10  ;;  %v5969_v14 = vmul.f32 1.442695, %v5960_v5  ;;  %v12193_v52 = vmul.f32 %v12168_v31, %v5931_v24 }
 0x885   :  { %v5863_v7 = vrot.slane %v5862_v2, 4  ;;  %v12196_v60 = vmul.f32 %v7444_v62, %v12069_v54  ;;  %v12199_v20 = vmul.f32 %v7446_v11, %v12047_v59  ;;  %v5962_v13 = vmul.f32 %v12176_v17, %v5931_v24 }
 0x886   :  { %v6122_v1 = vadd.f32 1.0, %v12182_v45  ;;  %v5971_v50 = vmul.f32 1.442695, %v5961_v55  ;;  %v6015_v49 = vmul.f32 %v12179_v27, %v5931_v24  ;;  %7455 = vlog2.f32 %v6113_v63 }
 0x887   :  { %v5864_v44 = vadd.f32 %v5863_v7, %v5862_v2  ;;  %12666 = vst [vmem:[#allocation7_spill] sm:$0xff] %v12196_v60  ;;  %v12202_v2 = vmul.f32 %v7446_v11, %v12059_v33  ;;  %v12207_v7 = vpop.eup %7447  ;;  %v12210_v54 = vmul.f32 %v7446_v11, %v12081_v26  ;;  %7457 = vpow2.f32 %v5967_v9 }
 0x888   :  { %v6116_v59 = vmul.f32 -0.5, %v12159_v23  ;;  %v6131_v33 = vadd.f32 1.0, %v12187_v0  ;;  %7459 = vpow2.f32 %v5969_v14  ;;  %v6140_v62 = vadd.f32 1.0, %v12193_v52  ;;  %v7450_v9 = vpop.eup %7449 }
 0x889   :  { %v5865_v10 = vrot.slane %v5864_v44, 2  ;;  %v12216_v25 = vmul.f32 %v7446_v11, %v12053_v53  ;;  %v12219_v35 = vmul.f32 %v7446_v11, %v12073_v8  ;;  %v5973_v24 = vmul.f32 1.442695, %v5962_v13 }
 0x88a   :  { %7461 = vlog2.f32 %v6122_v1  ;;  %v6125_v58 = vmul.f32 -0.5, %v12182_v45  ;;  %v12223_v26 = vmul.f32 %v7446_v11, %v12090_v29  ;;  %v12227_v37 = vmul.f32 %v12207_v7, %v12065_v38  ;;  %v7452_v11 = vpop.eup %7451 }
 0x88b   :  { %v5866_v5 = vadd.f32 %v5865_v10, %v5864_v44  ;;  %7463 = vpow2.f32 %v5971_v50  ;;  %v6624_v55 = vmul.f32 -1.442695, %v6015_v49  ;;  %v6117_v63 = vadd.f32 1.0, %v6116_v59 }
 0x88c   :  { %12667 = vst [vmem:[#allocation6_spill] sm:$0xff] %v12223_v26  ;;  %v6119_v53 = vand.u32 2147483647, %v12159_v23  ;;  %v6128_v8 = vand.u32 2147483647, %v12182_v45  ;;  %7465 = vlog2.f32 %v6131_v33  ;;  %v12233_v14 = vmul.f32 %v12207_v7, %v12077_v4  ;;  %v7454_v4 = vpop.eup %7453 }
 0x88d   :  { %v12237_v29 = vmul.f32 %v12207_v7, %v12094_v42  ;;  %v6134_v38 = vmul.f32 -0.5, %v12187_v0  ;;  %7467 = vlog2.f32 %v6140_v62  ;;  %v6126_v44 = vadd.f32 1.0, %v6125_v58 }
 0x88e   :  { %7469 = vpow2.f32 %v5973_v24  ;;  %v12242_v13 = vmul.f32 %v12207_v7, %v12067_v47  ;;  %v12246_v1 = vmul.f32 %v12207_v7, %v12084_v22  ;;  %v5867_v10 = vrot.slane %v5866_v5, 1 }
 0x88f   :  { %7471 = vpow2.f32 %v6624_v55  ;;  %v6137_v42 = vand.u32 2147483647, %v12187_v0  ;;  %v6143_v50 = vmul.f32 -0.5, %v12193_v52  ;;  %v6044_v59 = vadd.f32 1.0, %v7450_v9 }
 0x890   :  { %12668 = vst [vmem:[#allocation9_spill] sm:$0xff] %v12246_v1  ;;  %v12251_v33 = vmul.f32 %v6117_v63, %v12159_v23  ;;  %vm12253_vm7 = vcmp.lt.f32.partialorder %v6119_v53, 0.0004427343  ;;  %vm12257_vm8 = vcmp.lt.f32.partialorder %v6128_v8, 0.0004427343  ;;  %v7456_v22 = vpop.eup %7455  ;;  %v6045_v24 = vadd.f32 1.0, %v7452_v11 }
 0x891   :  { %v6135_v58 = vadd.f32 1.0, %v6134_v38  ;;  %v12263_v3 = vpop.eup %7457  ;;  %v6046_v9 = vadd.f32 1.0, %v7454_v4  ;;  %v6127_v23 = vmul.f32 %v6126_v44, %v12182_v45  ;;  %v6146_v63 = vand.u32 2147483647, %v12193_v52 }
 0x892   :  { %v7460_v8 = vpop.eup %7459  ;;  %v5868_v26 = vadd.f32 %v5867_v10, %v5866_v5  ;;  %vm12268_vm9 = vcmp.lt.f32.partialorder %v6137_v42, 0.0004427343  ;;  %v6144_v38 = vadd.f32 1.0, %v6143_v50  ;;  %7473 = vrcp.f32 %v6044_v59 }
 0x893   :  { %7475 = vrcp.f32 %v6045_v24  ;;  %vm12280_vm10 = vcmp.lt.f32.partialorder %v6146_v63, 0.0004427343  ;;  %v6188_v63 = vpop.permute.xlu0 %6187 }
 0x894   :  { %v7462_v11 = vpop.eup %7461  ;;  %7477 = vrcp.f32 %v6046_v9  ;;  %v6145_v24 = vmul.f32 %v6144_v38, %v12193_v52 }
 0x895   :  { %v7464_v45 = vpop.eup %7463  ;;  %7479 = vrcp.f32 %v5868_v26  ;;  %v6124_v59 = vmul.f32 0.6931472, %v7462_v11 }
 0x896   :  { %v7466_v10 = vpop.eup %7465 }
 0x897   :  { %v6130_v52 = vsel %vm12257_vm8, %v6127_v23, %v6124_v59 }
 0x898   :  { %v6196_v23 = vmul.f32 %v6188_v63, %v6130_v52 }
 0x8a2   :  { %v5936_v49 = vpop.permute.xlu1 %5935 }
 0x8a3   :  { %v6016_v55 = vmul.f32 %v12130_v48, %v5936_v49  ;;  %v6017_v57 = vmul.f32 %v12135_v21, %v5936_v49  ;;  %v6018_v53 = vmul.f32 %v12138_v51, %v5936_v49  ;;  %v6019_v48 = vmul.f32 %v12179_v27, %v5936_v49 }
 0x8a4   :  { %v6115_v21 = vmul.f32 0.6931472, %v7456_v22  ;;  %v12274_v4 = vmul.f32 %v12142_v36, %v5936_v49  ;;  %v6136_v51 = vmul.f32 %v6135_v58, %v12187_v0  ;;  %v12278_v5 = vmul.f32 %v12154_v18, %v5936_v49  ;;  %v7468_v36 = vpop.eup %7467 }
 0x8a5   :  { %v6625_v1 = vmul.f32 -1.442695, %v6016_v55  ;;  %v6626_v44 = vmul.f32 -1.442695, %v6017_v57  ;;  %v6627_v27 = vmul.f32 -1.442695, %v6018_v53  ;;  %v12285_v50 = vmul.f32 %v12165_v39, %v5936_v49  ;;  %v12290_v57 = vpop.eup %7469 }
 0x8a6   :  { %v6628_v22 = vmul.f32 -1.442695, %v6019_v48  ;;  %v12288_v0 = vmul.f32 %v12168_v31, %v5936_v49  ;;  %v6121_v18 = vsel %vm12253_vm7, %v12251_v33, %v6115_v21  ;;  %v6149_v58 = vadd.f32 1.0, %v12274_v4  ;;  %v7472_v39 = vpop.eup %7471 }
 0x8a7   :  { %7481 = vpow2.f32 %v6625_v1  ;;  %v6133_v55 = vmul.f32 0.6931472, %v7466_v10  ;;  %v5963_v26 = vmul.f32 %v12144_v16, %v5936_v49  ;;  %v6158_v9 = vadd.f32 1.0, %v12278_v5  ;;  %v7474_v47 = vpop.eup %7473 }
 0x8a8   :  { %7483 = vpow2.f32 %v6626_v44  ;;  %v6142_v31 = vmul.f32 0.6931472, %v7468_v36  ;;  %v5964_v53 = vmul.f32 %v12147_v15, %v5936_v49  ;;  %v6167_v62 = vadd.f32 1.0, %v12285_v50  ;;  %v7476_v10 = vpop.eup %7475 }
 0x8a9   :  { %7485 = vpow2.f32 %v6627_v27  ;;  %v5965_v1 = vmul.f32 %v12156_v34, %v5936_v49  ;;  %v6176_v33 = vadd.f32 1.0, %v12288_v0  ;;  %v6047_v38 = vadd.f32 1.0, %v7472_v39  ;;  %v7478_v60 = vpop.eup %7477 }
 0x8aa   :  { %7487 = vpow2.f32 %v6628_v22  ;;  %v5966_v16 = vmul.f32 %v12176_v17, %v5936_v49  ;;  %v12308_v48 = vmul.f32 %v12207_v7, %v12099_v30  ;;  %v6139_v15 = vsel %vm12268_vm9, %v6136_v51, %v6133_v55  ;;  %v12322_v27 = vpop.eup %7479 }
 0x8ab   :  { %7489 = vlog2.f32 %v6149_v58  ;;  %v6195_v11 = vmul.f32 %v6188_v63, %v6121_v18  ;;  %v5975_v21 = vmul.f32 1.442695, %v5963_v26  ;;  %v6148_v34 = vsel %vm12280_vm10, %v6145_v24, %v6142_v31 }
 0x8ac   :  { %7491 = vlog2.f32 %v6158_v9  ;;  %v5977_v44 = vmul.f32 1.442695, %v5964_v53  ;;  %v5983_v17 = vmul.f32 %v12263_v3, %v12151_v6  ;;  %v12317_v30 = vmul.f32 %v7460_v8, %v12199_v20 }
 0x8ad   :  { %7493 = vlog2.f32 %v6167_v62  ;;  %v5979_v7 = vmul.f32 1.442695, %v5965_v1  ;;  %v12320_v49 = vmul.f32 %v7464_v45, %v12227_v37  ;;  %v6197_v51 = vmul.f32 %v6188_v63, %v6139_v15 }
 0x8ae   :  { %7495 = vlog2.f32 %v6176_v33  ;;  %v5981_v42 = vmul.f32 1.442695, %v5966_v16  ;;  %v12324_v36 = vmul.f32 %v6188_v63, %v6148_v34  ;;  %v12327_v59 = vmul.f32 %v6195_v11, %v12174_v46 }
 0x8af   :  { %7497 = vrcp.f32 %v6047_v38  ;;  %v6152_v3 = vmul.f32 -0.5, %v12274_v4  ;;  %v6068_v20 = vmul.f32 %v7474_v47, %v12162_v40  ;;  %v12332_v8 = vmul.f32 %v6196_v23, %v12210_v54 }
 0x8b0   :  { %7499 = vpow2.f32 %v5975_v21  ;;  %v6161_v37 = vmul.f32 -0.5, %v12278_v5  ;;  %v6069_v22 = vmul.f32 %v7476_v10, %v12202_v2  ;;  %v6170_v46 = vmul.f32 -0.5, %v12285_v50 }
 0x8b1   :  { %v7482_v6 = vpop.eup %7481  ;;  %7501 = vpow2.f32 %v5977_v44  ;;  %v6070_v58 = vmul.f32 %v7478_v60, %v12233_v14  ;;  %v6179_v40 = vmul.f32 -0.5, %v12288_v0  ;;  %v5876_v54 = vmul.f32 %v12322_v27, %v12104_v56 }
 0x8b2   :  { %v7484_v45 = vpop.eup %7483  ;;  %7503 = vpow2.f32 %v5979_v7  ;;  %v6048_v18 = vadd.f32 1.0, %v7482_v6  ;;  %v6153_v9 = vadd.f32 1.0, %v6152_v3  ;;  %v6155_v63 = vand.u32 2147483647, %v12274_v4 }
 0x8b3   :  { %v7486_v24 = vpop.eup %7485  ;;  %7505 = vpow2.f32 %v5981_v42  ;;  %v6049_v39 = vadd.f32 1.0, %v7484_v45  ;;  %v6162_v53 = vadd.f32 1.0, %v6161_v37  ;;  %v6164_v52 = vand.u32 2147483647, %v12278_v5 }
 0x8b4   :  { %v7488_v55 = vpop.eup %7487  ;;  %v6050_v26 = vadd.f32 1.0, %v7486_v24  ;;  %7507 = vrcp.f32 %v6048_v18  ;;  %v6171_v1 = vadd.f32 1.0, %v6170_v46  ;;  %v6173_v56 = vand.u32 2147483647, %v12285_v50 }
 0x8b5   :  { %v7490_v31 = vpop.eup %7489  ;;  %v6051_v2 = vadd.f32 1.0, %v7488_v55  ;;  %7509 = vrcp.f32 %v6049_v39  ;;  %v6180_v16 = vadd.f32 1.0, %v6179_v40  ;;  %v5884_v11 = vmul.f32 %v12322_v27, %v12110_v28 }
 0x8b6   :  { %v7492_v62 = vpop.eup %7491  ;;  %7511 = vrcp.f32 %v6050_v26  ;;  %v6151_v14 = vmul.f32 0.6931472, %v7490_v31  ;;  %v6154_v21 = vmul.f32 %v6153_v9, %v12274_v4  ;;  %v6182_v34 = vand.u32 2147483647, %v12288_v0 }
 0x8b7   :  { %v7494_v33 = vpop.eup %7493  ;;  %7513 = vrcp.f32 %v6051_v2  ;;  %v6160_v38 = vmul.f32 0.6931472, %v7492_v62  ;;  %v6076_v44 = vadd.f32 %v6068_v20, %v5983_v17  ;;  %vm12348_vm11 = vcmp.lt.f32.partialorder %v6155_v63, 0.0004427343 }
 0x8b8   :  { %v7496_v15 = vpop.eup %7495  ;;  %v6169_v47 = vmul.f32 0.6931472, %v7494_v33  ;;  %v6163_v7 = vmul.f32 %v6162_v53, %v12278_v5  ;;  %v6205_v3 = vmul.f32 %v6197_v51, %v12237_v29  ;;  %v6157_v28 = vsel %vm12348_vm11, %v6154_v21, %v6151_v14 }
 0x8b9   :  { %v7498_v23 = vpop.eup %7497  ;;  %v6178_v60 = vmul.f32 0.6931472, %v7496_v15  ;;  %vm12356_vm12 = vcmp.lt.f32.partialorder %v6164_v52, 0.0004427343  ;;  %v6172_v6 = vmul.f32 %v6171_v1, %v12285_v50  ;;  %v6077_v20 = vadd.f32 %v6069_v22, %v12317_v30  ;;  %v6193_v30 = vpop.permute.xlu1 %6192  ;;  %v12685_v52 = vld [vmem:[#allocation9_spill] sm:$0xff] }
 0x8ba   :  { %v7500_v42 = vpop.eup %7499  ;;  %v6166_v37 = vsel %vm12356_vm12, %v6163_v7, %v6160_v38  ;;  %vm12364_vm13 = vcmp.lt.f32.partialorder %v6173_v56, 0.0004427343  ;;  %v6181_v29 = vmul.f32 %v6180_v16, %v12288_v0  ;;  %v5986_v45 = vmul.f32 %v12290_v57, %v5876_v54  ;;  %v12686_v38 = vld [vmem:[#allocation7_spill] sm:$0xff] }
 0x8bb   :  { %v7502_v17 = vpop.eup %7501  ;;  %v6071_v18 = vmul.f32 %v7498_v23, %v5884_v11  ;;  %v6175_v46 = vsel %vm12364_vm13, %v6172_v6, %v6169_v47  ;;  %vm12372_vm14 = vcmp.lt.f32.partialorder %v6182_v34, 0.0004427343  ;;  %v6078_v24 = vadd.f32 %v6070_v58, %v12320_v49 }
 0x8bc   :  { %v7504_v51 = vpop.eup %7503  ;;  %v6211_v39 = vadd.f32 %v12327_v59, %v6076_v44  ;;  %v6184_v0 = vsel %vm12372_vm14, %v6181_v29, %v6178_v60  ;;  %v6199_v40 = vmul.f32 %v6193_v30, %v6157_v28  ;;  %v5892_v57 = vmul.f32 %v12322_v27, %v12123_v12 }
 0x8bd   :  { %v7506_v22 = vpop.eup %7505  ;;  %v5880_v54 = vmul.f32 %v12322_v27, %v12106_v43  ;;  %v5888_v26 = vmul.f32 %v12322_v27, %v12117_v19  ;;  %v6200_v9 = vmul.f32 %v6193_v30, %v6166_v37  ;;  %v5896_v49 = vmul.f32 %v12322_v27, %v12132_v61 }
 0x8be   :  { %v7508_v55 = vpop.eup %7507  ;;  %v5987_v59 = vmul.f32 %v7500_v42, %v12171_v41  ;;  %v6201_v2 = vmul.f32 %v6193_v30, %v6175_v46  ;;  %v6079_v53 = vadd.f32 %v6071_v18, %v5986_v45  ;;  %v5988_v12 = vmul.f32 %v7502_v17, %v12216_v25 }
 0x8bf   :  { %v7510_v31 = vpop.eup %7509  ;;  %v6072_v58 = vmul.f32 %v7508_v55, %v12190_v32  ;;  %v6202_v43 = vmul.f32 %v6193_v30, %v6184_v0  ;;  %v5989_v19 = vmul.f32 %v7504_v51, %v12242_v13  ;;  %v6207_v61 = vmul.f32 %v6199_v40, %v12686_v38  ;;  %v12687_v32 = vld [vmem:[#allocation6_spill] sm:$0xff] }
 0x8c0   :  { %v7512_v63 = vpop.eup %7511  ;;  %v6073_v62 = vmul.f32 %v7510_v31, %v12219_v35  ;;  %v5990_v27 = vmul.f32 %v7506_v22, %v5880_v54  ;;  %v6208_v16 = vmul.f32 %v6200_v9, %v12687_v32  ;;  %v6212_v15 = vadd.f32 %v12332_v8, %v6077_v20  ;;  %v12688_v9 = vld [vmem:[#allocation5_spill] sm:$0xff] }
 0x8c1   :  { %v7514_v14 = vpop.eup %7513  ;;  %v6074_v1 = vmul.f32 %v7512_v63, %v12685_v52  ;;  %v6080_v33 = vadd.f32 %v6072_v58, %v5987_v59  ;;  %v6209_v25 = vmul.f32 %v6201_v2, %v12308_v48  ;;  %v6206_v21 = vmul.f32 %v12324_v36, %v5892_v57 }
 0x8c2   :  { %v6075_v41 = vmul.f32 %v7514_v14, %v5888_v26  ;;  %v6081_v56 = vadd.f32 %v6073_v62, %v5988_v12  ;;  %v6210_v13 = vmul.f32 %v6202_v43, %v5896_v49  ;;  %v6213_v23 = vadd.f32 %v6205_v3, %v6078_v24 }
 0x8c3   :  { %v6082_v11 = vadd.f32 %v6074_v1, %v5989_v19  ;;  %v6215_v35 = vadd.f32 %v6207_v61, %v6080_v33  ;;  %v6214_v7 = vadd.f32 %v6206_v21, %v6079_v53  ;;  %v7686_v5 = vmov 1966171168  }
 0x8c4   :  { %v6083_v47 = vadd.f32 %v6075_v41, %v5990_v27  ;;  %v6216_v34 = vadd.f32 %v6208_v16, %v6081_v56  ;;  %v6254_v29 = vunpack.c.l.s4 %v7686_v5  ;;  %v12689_v62 = vlaneseq }
 0x8c5   :  { %v6217_v44 = vadd.f32 %v6209_v25, %v6082_v11  ;;  %v6219_v10 = vadd.f32 %v6215_v35, %v6211_v39 }
 0x8c6   :  { %v6218_v60 = vadd.f32 %v6210_v13, %v6083_v47  ;;  %v6226_v42 = vadd.f32 %v6216_v34, %v6212_v15  ;;  %v6255_v22 = vunpack.c.0.s8 %v6254_v29  ;;  %vm6278_vm15 = vcmp.lt.s32.totalorder %v12689_v62, 512 }
 0x8c7   :  { %v6220_v28 = vrot.slane %v6219_v10, 4  ;;  %v6233_v4 = vadd.f32 %v6217_v44, %v6213_v23 }
 0x8c8   :  { %v6227_v6 = vrot.slane %v6226_v42, 4  ;;  %v6240_v17 = vadd.f32 %v6218_v60, %v6214_v7  ;;  %v6258_v31 = vsub.s32 %v6255_v22, %v12688_v9 }
 0x8c9   :  { %v6221_v8 = vadd.f32 %v6220_v28, %v6219_v10  ;;  %v6234_v20 = vrot.slane %v6233_v4, 4 }
 0x8ca   :  { %v6228_v37 = vadd.f32 %v6227_v6, %v6226_v42  ;;  %v6241_v48 = vrot.slane %v6240_v17, 4 }
 0x8cb   :  { %v6222_v36 = vrot.slane %v6221_v8, 2  ;;  %v6235_v51 = vadd.f32 %v6234_v20, %v6233_v4 }
 0x8cc   :  { %v6229_v45 = vrot.slane %v6228_v37, 2  ;;  %v6242_v18 = vadd.f32 %v6241_v48, %v6240_v17 }
 0x8cd   :  { %v6223_v3 = vadd.f32 %v6222_v36, %v6221_v8  ;;  %v6236_v46 = vrot.slane %v6235_v51, 2 }
 0x8ce   :  { %v6230_v50 = vadd.f32 %v6229_v45, %v6228_v37  ;;  %v6243_v30 = vrot.slane %v6242_v18, 2 }
 0x8cf   :  { %v6237_v24 = vadd.f32 %v6236_v46, %v6235_v51  ;;  %v6224_v39 = vrot.slane %v6223_v3, 1 }
 0x8d0   :  { %v6244_v0 = vadd.f32 %v6243_v30, %v6242_v18  ;;  %v6231_v40 = vrot.slane %v6230_v50, 1 }
 0x8d1   :  { %v6225_v55 = vadd.f32 %v6224_v39, %v6223_v3  ;;  %v6238_v57 = vrot.slane %v6237_v24, 1 }
 0x8d2   :  { %v6232_v54 = vadd.f32 %v6231_v40, %v6230_v50  ;;  %v6245_v26 = vrot.slane %v6244_v0, 1 }
 0x8d3   :  { %v6239_v49 = vadd.f32 %v6238_v57, %v6237_v24 }
 0x8d4   :  { %v6246_v59 = vadd.f32 %v6245_v26, %v6244_v0  ;;  %v6251_v58 = vcombine.low %v6225_v55, %v6232_v54 }
 0x8d6   :  { %v6252_v2 = vcombine.low %v6239_v49, %v6246_v59  ;;  %v6259_v63 = vrot.slane %v6251_v58, %v6258_v31 }
 0x8d8   :  { %v6266_v53 = vrot.slane %v6252_v2, %v6258_v31 }
 0x8da   :  { %v6267_v12 = vcombine.low %v6259_v63, %v6266_v53 }
 0x8dc   :  { %v6274_v43 = vrot.slane %v6267_v12, %v6258_v31 }
 0x8de   :  { %6280 = vst.msk [vmem:[#allocation2] sm:$0xf] %vm6278_vm15, %v6274_v43 }
 0x8df   :  { %7667 = shalt.err (!%p7664_p4)
}
 0x8e0   :  { %s7668_s28 = scalar_lea.hbm %s12425_s12, 64 }
 0x8e1   :  { %p7669_p5 = scmp.ne.s32.totalorder %s12425_s12, %s7668_s28  ;;  %p7672_p6 = scmp.lt.u32.totalorder %s7668_s28, %s12425_s12 }
 0x8e3   :  { %p7674_p7 = pnand %p7672_p6, %p7669_p5 }
 0x8e5   :  { %7677 = shalt.err (!%p7674_p7)
}
 0x8e6   :  { %6290 = dma.vmem_to_hbm [thread:$0]  %s6288_s21, 64, %s12425_s12, [#allocation3]  }
 0x8e7   :  { %7678 = dma.done.wait [#allocation3], 64  }
 0x8e8   :  { %7679 = vsyncadd [#allocation3], 4294967232 }
 0x8e9   :  { %6294 = vsyncpa [#allocation3], 1 }

</bundles_post_ra>
